<compile_context>
chip_gen: v6e
topology: v6e:2x2x1
jax: 0.10.0
libtpu: 0.0.40
codegen_flags: <defaults>
</compile_context>

<pallas_src>
import functools

import jax
import jax.numpy as jnp
from jax import lax
from jax.experimental import pallas as pl
from jax.experimental.pallas import tpu as pltpu

EPS = 1e-5


# ----------------------------------------------------------------------------- helpers
def _layernorm_fast(x, w, b):
    """One-pass LayerNorm: var = E[x^2] - E[x]^2 (shorter serial XLU chain)."""
    mu = jnp.mean(x, axis=-1, keepdims=True)
    ms = jnp.mean(x * x, axis=-1, keepdims=True)
    var = ms - mu * mu
    return (x - mu) * lax.rsqrt(var + EPS) * w + b


def _layernorm_ref(x, w, b):
    mu = jnp.mean(x, axis=-1, keepdims=True)
    var = jnp.mean(jnp.square(x - mu), axis=-1, keepdims=True)
    return (x - mu) * lax.rsqrt(var + EPS) * w + b


# ----------------------------------------------------------------------------- fused kernel
def fused_encoder_kernel(patches_ref, embed_w_ref, pe_ref,
                         wqkv_ref, wo_ref, w12_ref, w3_ref,
                         lvec_ref, hvec_ref, out_w_ref, out_ref,
                         *, num_layers, num_heads, batch, seq, embed, mid, out_dim):
    """Everything resident in VMEM; the whole forward runs in one invocation."""
    D, M = embed, mid
    bn = batch * seq
    hd = D // num_heads

    # ---- patch embed + (PE + embed bias) pre-folded host-side ----
    x = jnp.dot(patches_ref[...], embed_w_ref[...],
                preferred_element_type=jnp.float32)
    x = x + pe_ref[...]                                         # [B*N, D]

    # ---- transformer layers (static Python loop; weights stay resident) ----
    for l in range(num_layers):
        ln1w = lvec_ref[l, 0:1, :D]
        ln1b = lvec_ref[l, 1:2, :D]
        bqkv = lvec_ref[l, 2:3, :3 * D]
        bo = lvec_ref[l, 3:4, :D]
        ln2w = lvec_ref[l, 4:5, :D]
        ln2b = lvec_ref[l, 5:6, :D]
        b12 = lvec_ref[l, 6:7, :2 * M]
        b3 = lvec_ref[l, 7:8, :D]

        # --- token mixer: x = x + Wo( softmax(q k^T / sqrt(hd)) v ) + bo ---
        xn = _layernorm_fast(x, ln1w, ln1b)
        # fused QKV projection: one [D, 3D] matmul (scale folded into Q columns)
        qkv = jnp.dot(xn, wqkv_ref[l], preferred_element_type=jnp.float32) + bqkv

        head_outs = []
        for h in range(num_heads):                              # static; tiny in-vreg slices
            qh = qkv[:, h * hd:(h + 1) * hd].reshape(batch, seq, hd)
            kh = qkv[:, D + h * hd:D + (h + 1) * hd].reshape(batch, seq, hd)
            vh = qkv[:, 2 * D + h * hd:2 * D + (h + 1) * hd].reshape(batch, seq, hd)
            s = jnp.einsum("bqd,bkd->bqk", qh, kh,
                           preferred_element_type=jnp.float32)
            s = s - jnp.max(s, axis=-1, keepdims=True)
            p = jnp.exp(s)
            p = p * pl.reciprocal(jnp.sum(p, axis=-1, keepdims=True), approx=True)
            oh = jnp.einsum("bqk,bkd->bqd", p, vh,
                            preferred_element_type=jnp.float32)
            head_outs.append(oh.reshape(bn, hd))
        attn = jnp.concatenate(head_outs, axis=-1)              # lane concat -> [B*N, D]
        x = x + jnp.dot(attn, wo_ref[l], preferred_element_type=jnp.float32) + bo

        # --- channel mixer: x = x + w3( silu(w1 xn) * (w2 xn) ) + b3 ---
        xn = _layernorm_fast(x, ln2w, ln2b)
        ug = jnp.dot(xn, w12_ref[l], preferred_element_type=jnp.float32) + b12  # [B*N, 2M]
        gated = jax.nn.silu(ug[:, :M]) * ug[:, M:]
        x = x + jnp.dot(gated, w3_ref[l], preferred_element_type=jnp.float32) + b3

    # ---- head: final_norm + out_proj ----
    fw = hvec_ref[0:1, :D]
    fb = hvec_ref[1:2, :D]
    ob = hvec_ref[2:3, :out_dim]
    xn = _layernorm_fast(x, fw, fb)
    y = jnp.dot(xn, out_w_ref[...], preferred_element_type=jnp.float32) + ob
    out_ref[...] = y.astype(out_ref.dtype)                      # [B*N, out_dim]


# ----------------------------------------------------------------------------- wrapper
def freq_transformer_encoder(x_nchw, params, cfg):
    """Full forward.  x_nchw: [B, C, H, W] float32 -> [B, N, out_dim]."""
    B, C, H, W = x_nchw.shape
    ps = cfg["patch_size"]
    h, w = H // ps, W // ps
    D, nh = cfg["embed_dim"], cfg["num_heads"]
    hd = D // nh
    M, O, L = cfg["mid_dim"], cfg["out_dim"], cfg["num_layers"]
    N = h * w
    BN = B * N
    P = C * ps * ps
    scale = 1.0 / (hd ** 0.5)

    # glue: NCHW -> [B*N, C*ps*ps] patch tokens (Conv2d(k=s=ps) element order)
    patches = x_nchw.reshape(B, C, h, ps, w, ps)
    patches = patches.transpose(0, 2, 4, 1, 3, 5).reshape(BN, P)

    # ---- host-side packing of weights (fewer, lane-dense operands) ----
    Vmax = max(3 * D, 2 * M, D)
    Hw = max(D, O)

    def pad_lane(v, width):
        return jnp.pad(v, ((0, 0), (0, width - v.shape[1])))

    wqkv_l, wo_l, w12_l, w3_l, lvec_l = [], [], [], [], []
    for (l1w, l1b, wq, bq, wk, bk, wv, bv, wo, bo,
         l2w, l2b, w1, b1, w2, b2, w3, b3) in params["layers"]:
        wqkv_l.append(jnp.concatenate([wq * scale, wk, wv], axis=1))     # [D, 3D]
        bqkv = jnp.concatenate([bq * scale, bk, bv], axis=1)             # [1, 3D]
        wo_l.append(wo)                                                   # [D, D]
        w12_l.append(jnp.concatenate([w1, w2], axis=1))                   # [D, 2M]
        b12 = jnp.concatenate([b1, b2], axis=1)                           # [1, 2M]
        w3_l.append(w3)                                                    # [M, D]
        lvec_l.append(jnp.concatenate(
            [pad_lane(l1w, Vmax), pad_lane(l1b, Vmax), pad_lane(bqkv, Vmax),
             pad_lane(bo, Vmax), pad_lane(l2w, Vmax), pad_lane(l2b, Vmax),
             pad_lane(b12, Vmax), pad_lane(b3, Vmax)], axis=0))            # [8, Vmax]

    wqkv = jnp.stack(wqkv_l)                                               # [L, D, 3D]
    wo_s = jnp.stack(wo_l)                                                 # [L, D, D]
    w12 = jnp.stack(w12_l)                                                 # [L, D, 2M]
    w3_s = jnp.stack(w3_l)                                                 # [L, M, D]
    lvec = jnp.stack(lvec_l)                                               # [L, 8, Vmax]
    hvec = jnp.concatenate([pad_lane(params["final_ln_w"], Hw),
                            pad_lane(params["final_ln_b"], Hw),
                            pad_lane(params["out_b"], Hw)], axis=0)        # [3, Hw]
    pe_plus_b = jnp.tile(params["pe"] + params["embed_b"], (B, 1))         # [B*N, D]

    operands = [patches, params["embed_w"], pe_plus_b,
                wqkv, wo_s, w12, w3_s, lvec, hvec, params["out_w"]]

    flops = (2 * BN * P * D + 2 * BN * D * O
             + L * (2 * BN * D * 3 * D            # fused qkv
                    + 4 * B * nh * N * N * hd     # scores + attn*v
                    + 2 * BN * D * D              # wo
                    + 2 * BN * D * 2 * M          # fused w1|w2
                    + 2 * BN * M * D))            # w3
    transcendentals = (L * (B * nh * N * (N + 1) + BN * M) + (2 * L + 1) * BN)
    bytes_accessed = 4 * (sum(int(op.size) for op in operands) + BN * O)

    kernel = functools.partial(fused_encoder_kernel, num_layers=L, num_heads=nh,
                               batch=B, seq=N, embed=D, mid=M, out_dim=O)
    vspec = pl.BlockSpec(memory_space=pltpu.MemorySpace.VMEM)
    # NOTE: grid=() single invocation on purpose (single-TC v5e/v6e); on v7x a size-2
    # "parallel" batch grid could engage the 2nd TensorCore, but at ~8 MFLOP the
    # per-step overhead would dominate -- measure before adding it.
    out = pl.pallas_call(
        kernel,
        out_shape=jax.ShapeDtypeStruct((BN, O), jnp.float32),
        in_specs=[vspec] * len(operands),
        out_specs=vspec,
        cost_estimate=pl.CostEstimate(flops=flops,
                                      transcendentals=transcendentals,
                                      bytes_accessed=bytes_accessed),
    )(*operands)
    return out.reshape(B, N, O)


# ----------------------------------------------------------------------------- params / reference
def sincos_pe_2d(h, w, d, base):
    m = 2
    d_per = d // (2 * m)
    theta = base ** (-jnp.arange(d_per, dtype=jnp.float32) / d_per)

    def axis_pe(n):
        pos = jnp.arange(n, dtype=jnp.float32)[:, None] * theta[None, :]
        return jnp.concatenate([jnp.sin(pos), jnp.cos(pos)], axis=-1)

    pe_h = axis_pe(h)
    pe_w = axis_pe(w)
    pe = jnp.concatenate([
        jnp.broadcast_to(pe_h[:, None, :], (h, w, 2 * d_per)),
        jnp.broadcast_to(pe_w[None, :, :], (h, w, 2 * d_per)),
    ], axis=-1)
    return pe.reshape(h * w, d)


def make_params(key, cfg):
    C, ps, D, M, O = (cfg["in_channels"], cfg["patch_size"], cfg["embed_dim"],
                      cfg["mid_dim"], cfg["out_dim"])
    P = C * ps * ps
    h = cfg["image_size"] // ps
    std = 0.02

    def nrm(k, shape):
        return std * jax.random.normal(k, shape, jnp.float32)

    keys = iter(jax.random.split(key, 64))
    params = {
        "embed_w": nrm(next(keys), (P, D)),
        "embed_b": jnp.zeros((1, D), jnp.float32),
        "pe": sincos_pe_2d(h, h, D, cfg["theta_base"]),
        "final_ln_w": jnp.ones((1, D), jnp.float32),
        "final_ln_b": jnp.zeros((1, D), jnp.float32),
        "out_w": nrm(next(keys), (D, O)),
        "out_b": jnp.zeros((1, O), jnp.float32),
        "layers": [],
    }
    for _ in range(cfg["num_layers"]):
        lp = [
            jnp.ones((1, D), jnp.float32), jnp.zeros((1, D), jnp.float32),   # token_norm
            nrm(next(keys), (D, D)), jnp.zeros((1, D), jnp.float32),         # Wq, bq
            nrm(next(keys), (D, D)), jnp.zeros((1, D), jnp.float32),         # Wk, bk
            nrm(next(keys), (D, D)), jnp.zeros((1, D), jnp.float32),         # Wv, bv
            nrm(next(keys), (D, D)), jnp.zeros((1, D), jnp.float32),         # Wo, bo
            jnp.ones((1, D), jnp.float32), jnp.zeros((1, D), jnp.float32),   # channel_norm
            nrm(next(keys), (D, M)), jnp.zeros((1, M), jnp.float32),         # w1
            nrm(next(keys), (D, M)), jnp.zeros((1, M), jnp.float32),         # w2
            nrm(next(keys), (M, D)), jnp.zeros((1, D), jnp.float32),         # w3
        ]
        params["layers"].append(lp)
    return params


def reference_forward(x_nchw, params, cfg):
    """Pure-jnp reference mirroring the PyTorch forward semantics."""
    B, C, H, W = x_nchw.shape
    ps, D, nh = cfg["patch_size"], cfg["embed_dim"], cfg["num_heads"]
    h, w = H // ps, W // ps
    hd = D // nh

    patches = x_nchw.reshape(B, C, h, ps, w, ps)
    patches = patches.transpose(0, 2, 4, 1, 3, 5).reshape(B, h * w, C * ps * ps)
    x = patches @ params["embed_w"] + params["embed_b"] + params["pe"]

    for (l1w, l1b, wq, bq, wk, bk, wv, bv, wo, bo,
         l2w, l2b, w1, b1, w2, b2, w3, b3) in params["layers"]:
        xn = _layernorm_ref(x, l1w, l1b)
        q = (xn @ wq + bq).reshape(B, -1, nh, hd).transpose(0, 2, 1, 3)
        k = (xn @ wk + bk).reshape(B, -1, nh, hd).transpose(0, 2, 1, 3)
        v = (xn @ wv + bv).reshape(B, -1, nh, hd).transpose(0, 2, 1, 3)
        s = jnp.einsum("bhqd,bhkd->bhqk", q, k) / (hd ** 0.5)
        p = jax.nn.softmax(s, axis=-1)
        a = jnp.einsum("bhqk,bhkd->bhqd", p, v).transpose(0, 2, 1, 3).reshape(B, -1, D)
        x = x + (a @ wo + bo)
        xn = _layernorm_ref(x, l2w, l2b)
        x = x + (jax.nn.silu(xn @ w1 + b1) * (xn @ w2 + b2)) @ w3 + b3
    x = _layernorm_ref(x, params["final_ln_w"], params["final_ln_b"])
    return x @ params["out_w"] + params["out_b"]


# ----------------------------------------------------------------------------- main
if __name__ == "__main__":
    cfg = dict(
        image_size=16, patch_size=2, in_channels=4,
        embed_dim=32, num_heads=2, mid_dim=64, out_dim=16,
        num_layers=2, theta_base=10000.0,
    )
    # TODO(synk): DCT/zigzag "freq" patch-embed variants not reproduced; vanilla conv
    # patch embed (use_zigzag=False, use_freq_patch=False) is implemented instead.

    key = jax.random.PRNGKey(0)
    kx, kp = jax.random.split(key)
    x = jax.random.normal(kx, (2, cfg["in_channels"], cfg["image_size"], cfg["image_size"]),
                          jnp.float32)
    params = make_params(kp, cfg)

    fwd = jax.jit(functools.partial(freq_transformer_encoder, cfg=cfg))
    out = jax.block_until_ready(fwd(x, params))

    ref = reference_forward(x, params, cfg)
    assert out.shape == (2, (cfg["image_size"] // cfg["patch_size"]) ** 2, cfg["out_dim"])
    assert jnp.allclose(out, ref, rtol=2e-3, atol=2e-3), float(jnp.max(jnp.abs(out - ref)))

    print("KERNEL_OK")
</pallas_src>

<mosaic_0001>
module attributes {stable_mosaic.version = 11 : i64} {
  func.func @fused_encoder_kernel(%arg0: memref<128x16xf32, #tpu.memory_space<vmem>>, %arg1: memref<16x32xf32, #tpu.memory_space<vmem>>, %arg2: memref<128x32xf32, #tpu.memory_space<vmem>>, %arg3: memref<2x32x96xf32, #tpu.memory_space<vmem>>, %arg4: memref<2x32x32xf32, #tpu.memory_space<vmem>>, %arg5: memref<2x32x128xf32, #tpu.memory_space<vmem>>, %arg6: memref<2x64x32xf32, #tpu.memory_space<vmem>>, %arg7: memref<2x8x128xf32, #tpu.memory_space<vmem>>, %arg8: memref<3x32xf32, #tpu.memory_space<vmem>>, %arg9: memref<32x16xf32, #tpu.memory_space<vmem>>, %arg10: memref<128x16xf32, #tpu.memory_space<vmem>>) attributes {dimension_semantics = [], scalar_prefetch = 0 : i64, scratch_operands = 0 : i64, tpu.core_type = #tpu.core_type<tc>} {
    %c0 = arith.constant 0 : index
    %c0_0 = arith.constant 0 : index
    %0 = vector.load %arg0[%c0, %c0_0] : memref<128x16xf32, #tpu.memory_space<vmem>>, vector<128x16xf32>
    %c0_1 = arith.constant 0 : index
    %c0_2 = arith.constant 0 : index
    %1 = vector.load %arg1[%c0_1, %c0_2] : memref<16x32xf32, #tpu.memory_space<vmem>>, vector<16x32xf32>
    %cst = arith.constant dense<0.000000e+00> : vector<128x32xf32>
    %2 = tpu.matmul %0, %1, %cst {dimension_numbers = #tpu.dot_dimension_numbers<[1], [0], [0], [1], [0, 0, 1, 1], [], []>} : vector<128x16xf32>, vector<16x32xf32>, vector<128x32xf32> -> vector<128x32xf32>
    %c0_3 = arith.constant 0 : index
    %c0_4 = arith.constant 0 : index
    %3 = vector.load %arg2[%c0_3, %c0_4] : memref<128x32xf32, #tpu.memory_space<vmem>>, vector<128x32xf32>
    %4 = arith.addf %2, %3 : vector<128x32xf32>
    %c0_5 = arith.constant 0 : index
    %c0_6 = arith.constant 0 : index
    %c0_7 = arith.constant 0 : index
    %5 = vector.load %arg7[%c0_5, %c0_6, %c0_7] : memref<2x8x128xf32, #tpu.memory_space<vmem>>, vector<1x1x32xf32>
    %6 = vector.shape_cast %5 : vector<1x1x32xf32> to vector<1x32xf32>
    %c0_8 = arith.constant 0 : index
    %c1 = arith.constant 1 : index
    %c0_9 = arith.constant 0 : index
    %7 = vector.load %arg7[%c0_8, %c1, %c0_9] : memref<2x8x128xf32, #tpu.memory_space<vmem>>, vector<1x1x32xf32>
    %8 = vector.shape_cast %7 : vector<1x1x32xf32> to vector<1x32xf32>
    %c0_10 = arith.constant 0 : index
    %c2 = arith.constant 2 : index
    %c0_11 = arith.constant 0 : index
    %9 = vector.load %arg7[%c0_10, %c2, %c0_11] : memref<2x8x128xf32, #tpu.memory_space<vmem>>, vector<1x1x96xf32>
    %10 = vector.shape_cast %9 : vector<1x1x96xf32> to vector<1x96xf32>
    %c0_12 = arith.constant 0 : index
    %c3 = arith.constant 3 : index
    %c0_13 = arith.constant 0 : index
    %11 = vector.load %arg7[%c0_12, %c3, %c0_13] : memref<2x8x128xf32, #tpu.memory_space<vmem>>, vector<1x1x32xf32>
    %12 = vector.shape_cast %11 : vector<1x1x32xf32> to vector<1x32xf32>
    %c0_14 = arith.constant 0 : index
    %c4 = arith.constant 4 : index
    %c0_15 = arith.constant 0 : index
    %13 = vector.load %arg7[%c0_14, %c4, %c0_15] : memref<2x8x128xf32, #tpu.memory_space<vmem>>, vector<1x1x32xf32>
    %14 = vector.shape_cast %13 : vector<1x1x32xf32> to vector<1x32xf32>
    %c0_16 = arith.constant 0 : index
    %c5 = arith.constant 5 : index
    %c0_17 = arith.constant 0 : index
    %15 = vector.load %arg7[%c0_16, %c5, %c0_17] : memref<2x8x128xf32, #tpu.memory_space<vmem>>, vector<1x1x32xf32>
    %16 = vector.shape_cast %15 : vector<1x1x32xf32> to vector<1x32xf32>
    %c0_18 = arith.constant 0 : index
    %c6 = arith.constant 6 : index
    %c0_19 = arith.constant 0 : index
    %17 = vector.load %arg7[%c0_18, %c6, %c0_19] : memref<2x8x128xf32, #tpu.memory_space<vmem>>, vector<1x1x128xf32>
    %18 = vector.shape_cast %17 : vector<1x1x128xf32> to vector<1x128xf32>
    %c0_20 = arith.constant 0 : index
    %c7 = arith.constant 7 : index
    %c0_21 = arith.constant 0 : index
    %19 = vector.load %arg7[%c0_20, %c7, %c0_21] : memref<2x8x128xf32, #tpu.memory_space<vmem>>, vector<1x1x32xf32>
    %20 = vector.shape_cast %19 : vector<1x1x32xf32> to vector<1x32xf32>
    %cst_22 = arith.constant dense<0.000000e+00> : vector<128xf32>
    %21 = vector.multi_reduction <add>, %4, %cst_22 [1] : vector<128x32xf32> to vector<128xf32>
    %22 = vector.shape_cast %21 : vector<128xf32> to vector<128x1xf32>
    %cst_23 = arith.constant 3.200000e+01 : f32
    %23 = vector.broadcast %cst_23 : f32 to vector<128x1xf32>
    %24 = arith.divf %22, %23 : vector<128x1xf32>
    %25 = arith.mulf %4, %4 : vector<128x32xf32>
    %cst_24 = arith.constant dense<0.000000e+00> : vector<128xf32>
    %26 = vector.multi_reduction <add>, %25, %cst_24 [1] : vector<128x32xf32> to vector<128xf32>
    %27 = vector.shape_cast %26 : vector<128xf32> to vector<128x1xf32>
    %cst_25 = arith.constant 3.200000e+01 : f32
    %28 = vector.broadcast %cst_25 : f32 to vector<128x1xf32>
    %29 = arith.divf %27, %28 : vector<128x1xf32>
    %30 = arith.mulf %24, %24 : vector<128x1xf32>
    %31 = arith.subf %29, %30 : vector<128x1xf32>
    %32 = vector.broadcast %24 : vector<128x1xf32> to vector<128x32xf32>
    %33 = arith.subf %4, %32 : vector<128x32xf32>
    %cst_26 = arith.constant 9.99999974E-6 : f32
    %34 = vector.broadcast %cst_26 : f32 to vector<128x1xf32>
    %35 = arith.addf %31, %34 : vector<128x1xf32>
    %36 = math.rsqrt %35 : vector<128x1xf32>
    %37 = vector.broadcast %36 : vector<128x1xf32> to vector<128x32xf32>
    %38 = arith.mulf %33, %37 : vector<128x32xf32>
    %39 = vector.broadcast %6 : vector<1x32xf32> to vector<128x32xf32>
    %40 = arith.mulf %38, %39 : vector<128x32xf32>
    %41 = vector.broadcast %8 : vector<1x32xf32> to vector<128x32xf32>
    %42 = arith.addf %40, %41 : vector<128x32xf32>
    %c0_27 = arith.constant 0 : index
    %c0_28 = arith.constant 0 : index
    %c0_29 = arith.constant 0 : index
    %43 = vector.load %arg3[%c0_27, %c0_28, %c0_29] : memref<2x32x96xf32, #tpu.memory_space<vmem>>, vector<1x32x96xf32>
    %44 = vector.shape_cast %43 : vector<1x32x96xf32> to vector<32x96xf32>
    %cst_30 = arith.constant dense<0.000000e+00> : vector<128x96xf32>
    %45 = tpu.matmul %42, %44, %cst_30 {dimension_numbers = #tpu.dot_dimension_numbers<[1], [0], [0], [1], [0, 0, 1, 1], [], []>} : vector<128x32xf32>, vector<32x96xf32>, vector<128x96xf32> -> vector<128x96xf32>
    %46 = vector.broadcast %10 : vector<1x96xf32> to vector<128x96xf32>
    %47 = arith.addf %45, %46 : vector<128x96xf32>
    %48 = vector.extract_strided_slice %47 {offsets = [0, 0], sizes = [128, 16], strides = [1, 1]} : vector<128x96xf32> to vector<128x16xf32>
    %49 = vector.shape_cast %48 : vector<128x16xf32> to vector<2x64x16xf32>
    %50 = vector.extract_strided_slice %47 {offsets = [0, 32], sizes = [128, 16], strides = [1, 1]} : vector<128x96xf32> to vector<128x16xf32>
    %51 = vector.shape_cast %50 : vector<128x16xf32> to vector<2x64x16xf32>
    %52 = vector.extract_strided_slice %47 {offsets = [0, 64], sizes = [128, 16], strides = [1, 1]} : vector<128x96xf32> to vector<128x16xf32>
    %53 = vector.shape_cast %52 : vector<128x16xf32> to vector<2x64x16xf32>
    "tpu.trace_start"() <{level = 10 : i32, message = "bqd,bkd->bqk"}> : () -> ()
    %cst_31 = arith.constant dense<0.000000e+00> : vector<2x64x64xf32>
    %54 = tpu.matmul %49, %51, %cst_31 {dimension_numbers = #tpu.dot_dimension_numbers<[2], [2], [1], [1], [0, 0, 0, 1, 1, 1], [0], [0]>} : vector<2x64x16xf32>, vector<2x64x16xf32>, vector<2x64x64xf32> -> vector<2x64x64xf32>
    "tpu.trace_stop"() : () -> ()
    %cst_32 = arith.constant dense<0xFF800000> : vector<2x64xf32>
    %55 = vector.multi_reduction <maximumf>, %54, %cst_32 [2] : vector<2x64x64xf32> to vector<2x64xf32>
    %56 = vector.shape_cast %55 : vector<2x64xf32> to vector<2x64x1xf32>
    %57 = vector.broadcast %56 : vector<2x64x1xf32> to vector<2x64x64xf32>
    %58 = arith.subf %54, %57 : vector<2x64x64xf32>
    %59 = math.exp %58 : vector<2x64x64xf32>
    %cst_33 = arith.constant dense<0.000000e+00> : vector<2x64xf32>
    %60 = vector.multi_reduction <add>, %59, %cst_33 [2] : vector<2x64x64xf32> to vector<2x64xf32>
    %61 = vector.shape_cast %60 : vector<2x64xf32> to vector<2x64x1xf32>
    %62 = tpu.reciprocal %61 {approx = true} : vector<2x64x1xf32> -> vector<2x64x1xf32>
    %63 = vector.broadcast %62 : vector<2x64x1xf32> to vector<2x64x64xf32>
    %64 = arith.mulf %59, %63 : vector<2x64x64xf32>
    "tpu.trace_start"() <{level = 10 : i32, message = "bqk,bkd->bqd"}> : () -> ()
    %cst_34 = arith.constant dense<0.000000e+00> : vector<2x64x16xf32>
    %65 = tpu.matmul %64, %53, %cst_34 {dimension_numbers = #tpu.dot_dimension_numbers<[2], [1], [1], [2], [0, 0, 0, 1, 1, 2], [0], [0]>} : vector<2x64x64xf32>, vector<2x64x16xf32>, vector<2x64x16xf32> -> vector<2x64x16xf32>
    "tpu.trace_stop"() : () -> ()
    %66 = vector.shape_cast %65 : vector<2x64x16xf32> to vector<128x16xf32>
    %67 = vector.extract_strided_slice %47 {offsets = [0, 16], sizes = [128, 16], strides = [1, 1]} : vector<128x96xf32> to vector<128x16xf32>
    %68 = vector.shape_cast %67 : vector<128x16xf32> to vector<2x64x16xf32>
    %69 = vector.extract_strided_slice %47 {offsets = [0, 48], sizes = [128, 16], strides = [1, 1]} : vector<128x96xf32> to vector<128x16xf32>
    %70 = vector.shape_cast %69 : vector<128x16xf32> to vector<2x64x16xf32>
    %71 = vector.extract_strided_slice %47 {offsets = [0, 80], sizes = [128, 16], strides = [1, 1]} : vector<128x96xf32> to vector<128x16xf32>
    %72 = vector.shape_cast %71 : vector<128x16xf32> to vector<2x64x16xf32>
    "tpu.trace_start"() <{level = 10 : i32, message = "bqd,bkd->bqk"}> : () -> ()
    %cst_35 = arith.constant dense<0.000000e+00> : vector<2x64x64xf32>
    %73 = tpu.matmul %68, %70, %cst_35 {dimension_numbers = #tpu.dot_dimension_numbers<[2], [2], [1], [1], [0, 0, 0, 1, 1, 1], [0], [0]>} : vector<2x64x16xf32>, vector<2x64x16xf32>, vector<2x64x64xf32> -> vector<2x64x64xf32>
    "tpu.trace_stop"() : () -> ()
    %cst_36 = arith.constant dense<0xFF800000> : vector<2x64xf32>
    %74 = vector.multi_reduction <maximumf>, %73, %cst_36 [2] : vector<2x64x64xf32> to vector<2x64xf32>
    %75 = vector.shape_cast %74 : vector<2x64xf32> to vector<2x64x1xf32>
    %76 = vector.broadcast %75 : vector<2x64x1xf32> to vector<2x64x64xf32>
    %77 = arith.subf %73, %76 : vector<2x64x64xf32>
    %78 = math.exp %77 : vector<2x64x64xf32>
    %cst_37 = arith.constant dense<0.000000e+00> : vector<2x64xf32>
    %79 = vector.multi_reduction <add>, %78, %cst_37 [2] : vector<2x64x64xf32> to vector<2x64xf32>
    %80 = vector.shape_cast %79 : vector<2x64xf32> to vector<2x64x1xf32>
    %81 = tpu.reciprocal %80 {approx = true} : vector<2x64x1xf32> -> vector<2x64x1xf32>
    %82 = vector.broadcast %81 : vector<2x64x1xf32> to vector<2x64x64xf32>
    %83 = arith.mulf %78, %82 : vector<2x64x64xf32>
    "tpu.trace_start"() <{level = 10 : i32, message = "bqk,bkd->bqd"}> : () -> ()
    %cst_38 = arith.constant dense<0.000000e+00> : vector<2x64x16xf32>
    %84 = tpu.matmul %83, %72, %cst_38 {dimension_numbers = #tpu.dot_dimension_numbers<[2], [1], [1], [2], [0, 0, 0, 1, 1, 2], [0], [0]>} : vector<2x64x64xf32>, vector<2x64x16xf32>, vector<2x64x16xf32> -> vector<2x64x16xf32>
    "tpu.trace_stop"() : () -> ()
    %85 = vector.shape_cast %84 : vector<2x64x16xf32> to vector<128x16xf32>
    %86 = tpu.concatenate %66, %85 in 1 : vector<128x16xf32>, vector<128x16xf32> -> vector<128x32xf32>
    %c0_39 = arith.constant 0 : index
    %c0_40 = arith.constant 0 : index
    %c0_41 = arith.constant 0 : index
    %87 = vector.load %arg4[%c0_39, %c0_40, %c0_41] : memref<2x32x32xf32, #tpu.memory_space<vmem>>, vector<1x32x32xf32>
    %88 = vector.shape_cast %87 : vector<1x32x32xf32> to vector<32x32xf32>
    %cst_42 = arith.constant dense<0.000000e+00> : vector<128x32xf32>
    %89 = tpu.matmul %86, %88, %cst_42 {dimension_numbers = #tpu.dot_dimension_numbers<[1], [0], [0], [1], [0, 0, 1, 1], [], []>} : vector<128x32xf32>, vector<32x32xf32>, vector<128x32xf32> -> vector<128x32xf32>
    %90 = arith.addf %4, %89 : vector<128x32xf32>
    %91 = vector.broadcast %12 : vector<1x32xf32> to vector<128x32xf32>
    %92 = arith.addf %90, %91 : vector<128x32xf32>
    %cst_43 = arith.constant dense<0.000000e+00> : vector<128xf32>
    %93 = vector.multi_reduction <add>, %92, %cst_43 [1] : vector<128x32xf32> to vector<128xf32>
    %94 = vector.shape_cast %93 : vector<128xf32> to vector<128x1xf32>
    %cst_44 = arith.constant 3.200000e+01 : f32
    %95 = vector.broadcast %cst_44 : f32 to vector<128x1xf32>
    %96 = arith.divf %94, %95 : vector<128x1xf32>
    %97 = arith.mulf %92, %92 : vector<128x32xf32>
    %cst_45 = arith.constant dense<0.000000e+00> : vector<128xf32>
    %98 = vector.multi_reduction <add>, %97, %cst_45 [1] : vector<128x32xf32> to vector<128xf32>
    %99 = vector.shape_cast %98 : vector<128xf32> to vector<128x1xf32>
    %cst_46 = arith.constant 3.200000e+01 : f32
    %100 = vector.broadcast %cst_46 : f32 to vector<128x1xf32>
    %101 = arith.divf %99, %100 : vector<128x1xf32>
    %102 = arith.mulf %96, %96 : vector<128x1xf32>
    %103 = arith.subf %101, %102 : vector<128x1xf32>
    %104 = vector.broadcast %96 : vector<128x1xf32> to vector<128x32xf32>
    %105 = arith.subf %92, %104 : vector<128x32xf32>
    %cst_47 = arith.constant 9.99999974E-6 : f32
    %106 = vector.broadcast %cst_47 : f32 to vector<128x1xf32>
    %107 = arith.addf %103, %106 : vector<128x1xf32>
    %108 = math.rsqrt %107 : vector<128x1xf32>
    %109 = vector.broadcast %108 : vector<128x1xf32> to vector<128x32xf32>
    %110 = arith.mulf %105, %109 : vector<128x32xf32>
    %111 = vector.broadcast %14 : vector<1x32xf32> to vector<128x32xf32>
    %112 = arith.mulf %110, %111 : vector<128x32xf32>
    %113 = vector.broadcast %16 : vector<1x32xf32> to vector<128x32xf32>
    %114 = arith.addf %112, %113 : vector<128x32xf32>
    %c0_48 = arith.constant 0 : index
    %c0_49 = arith.constant 0 : index
    %c0_50 = arith.constant 0 : index
    %115 = vector.load %arg5[%c0_48, %c0_49, %c0_50] : memref<2x32x128xf32, #tpu.memory_space<vmem>>, vector<1x32x128xf32>
    %116 = vector.shape_cast %115 : vector<1x32x128xf32> to vector<32x128xf32>
    %cst_51 = arith.constant dense<0.000000e+00> : vector<128x128xf32>
    %117 = tpu.matmul %114, %116, %cst_51 {dimension_numbers = #tpu.dot_dimension_numbers<[1], [0], [0], [1], [0, 0, 1, 1], [], []>} : vector<128x32xf32>, vector<32x128xf32>, vector<128x128xf32> -> vector<128x128xf32>
    %118 = vector.broadcast %18 : vector<1x128xf32> to vector<128x128xf32>
    %119 = arith.addf %117, %118 : vector<128x128xf32>
    %120 = vector.extract_strided_slice %119 {offsets = [0, 0], sizes = [128, 64], strides = [1, 1]} : vector<128x128xf32> to vector<128x64xf32>
    %121 = arith.negf %120 : vector<128x64xf32>
    %122 = math.exp %121 : vector<128x64xf32>
    %cst_52 = arith.constant 1.000000e+00 : f32
    %123 = vector.broadcast %cst_52 : f32 to vector<128x64xf32>
    %124 = arith.addf %123, %122 : vector<128x64xf32>
    %125 = arith.divf %123, %124 : vector<128x64xf32>
    %126 = arith.mulf %120, %125 : vector<128x64xf32>
    %127 = vector.extract_strided_slice %119 {offsets = [0, 64], sizes = [128, 64], strides = [1, 1]} : vector<128x128xf32> to vector<128x64xf32>
    %128 = arith.mulf %126, %127 : vector<128x64xf32>
    %c0_53 = arith.constant 0 : index
    %c0_54 = arith.constant 0 : index
    %c0_55 = arith.constant 0 : index
    %129 = vector.load %arg6[%c0_53, %c0_54, %c0_55] : memref<2x64x32xf32, #tpu.memory_space<vmem>>, vector<1x64x32xf32>
    %130 = vector.shape_cast %129 : vector<1x64x32xf32> to vector<64x32xf32>
    %cst_56 = arith.constant dense<0.000000e+00> : vector<128x32xf32>
    %131 = tpu.matmul %128, %130, %cst_56 {dimension_numbers = #tpu.dot_dimension_numbers<[1], [0], [0], [1], [0, 0, 1, 1], [], []>} : vector<128x64xf32>, vector<64x32xf32>, vector<128x32xf32> -> vector<128x32xf32>
    %132 = arith.addf %92, %131 : vector<128x32xf32>
    %133 = vector.broadcast %20 : vector<1x32xf32> to vector<128x32xf32>
    %134 = arith.addf %132, %133 : vector<128x32xf32>
    %c1_57 = arith.constant 1 : index
    %c0_58 = arith.constant 0 : index
    %c0_59 = arith.constant 0 : index
    %135 = vector.load %arg7[%c1_57, %c0_58, %c0_59] : memref<2x8x128xf32, #tpu.memory_space<vmem>>, vector<1x1x32xf32>
    %136 = vector.shape_cast %135 : vector<1x1x32xf32> to vector<1x32xf32>
    %c1_60 = arith.constant 1 : index
    %c1_61 = arith.constant 1 : index
    %c0_62 = arith.constant 0 : index
    %137 = vector.load %arg7[%c1_60, %c1_61, %c0_62] : memref<2x8x128xf32, #tpu.memory_space<vmem>>, vector<1x1x32xf32>
    %138 = vector.shape_cast %137 : vector<1x1x32xf32> to vector<1x32xf32>
    %c1_63 = arith.constant 1 : index
    %c2_64 = arith.constant 2 : index
    %c0_65 = arith.constant 0 : index
    %139 = vector.load %arg7[%c1_63, %c2_64, %c0_65] : memref<2x8x128xf32, #tpu.memory_space<vmem>>, vector<1x1x96xf32>
    %140 = vector.shape_cast %139 : vector<1x1x96xf32> to vector<1x96xf32>
    %c1_66 = arith.constant 1 : index
    %c3_67 = arith.constant 3 : index
    %c0_68 = arith.constant 0 : index
    %141 = vector.load %arg7[%c1_66, %c3_67, %c0_68] : memref<2x8x128xf32, #tpu.memory_space<vmem>>, vector<1x1x32xf32>
    %142 = vector.shape_cast %141 : vector<1x1x32xf32> to vector<1x32xf32>
    %c1_69 = arith.constant 1 : index
    %c4_70 = arith.constant 4 : index
    %c0_71 = arith.constant 0 : index
    %143 = vector.load %arg7[%c1_69, %c4_70, %c0_71] : memref<2x8x128xf32, #tpu.memory_space<vmem>>, vector<1x1x32xf32>
    %144 = vector.shape_cast %143 : vector<1x1x32xf32> to vector<1x32xf32>
    %c1_72 = arith.constant 1 : index
    %c5_73 = arith.constant 5 : index
    %c0_74 = arith.constant 0 : index
    %145 = vector.load %arg7[%c1_72, %c5_73, %c0_74] : memref<2x8x128xf32, #tpu.memory_space<vmem>>, vector<1x1x32xf32>
    %146 = vector.shape_cast %145 : vector<1x1x32xf32> to vector<1x32xf32>
    %c1_75 = arith.constant 1 : index
    %c6_76 = arith.constant 6 : index
    %c0_77 = arith.constant 0 : index
    %147 = vector.load %arg7[%c1_75, %c6_76, %c0_77] : memref<2x8x128xf32, #tpu.memory_space<vmem>>, vector<1x1x128xf32>
    %148 = vector.shape_cast %147 : vector<1x1x128xf32> to vector<1x128xf32>
    %c1_78 = arith.constant 1 : index
    %c7_79 = arith.constant 7 : index
    %c0_80 = arith.constant 0 : index
    %149 = vector.load %arg7[%c1_78, %c7_79, %c0_80] : memref<2x8x128xf32, #tpu.memory_space<vmem>>, vector<1x1x32xf32>
    %150 = vector.shape_cast %149 : vector<1x1x32xf32> to vector<1x32xf32>
    %cst_81 = arith.constant dense<0.000000e+00> : vector<128xf32>
    %151 = vector.multi_reduction <add>, %134, %cst_81 [1] : vector<128x32xf32> to vector<128xf32>
    %152 = vector.shape_cast %151 : vector<128xf32> to vector<128x1xf32>
    %cst_82 = arith.constant 3.200000e+01 : f32
    %153 = vector.broadcast %cst_82 : f32 to vector<128x1xf32>
    %154 = arith.divf %152, %153 : vector<128x1xf32>
    %155 = arith.mulf %134, %134 : vector<128x32xf32>
    %cst_83 = arith.constant dense<0.000000e+00> : vector<128xf32>
    %156 = vector.multi_reduction <add>, %155, %cst_83 [1] : vector<128x32xf32> to vector<128xf32>
    %157 = vector.shape_cast %156 : vector<128xf32> to vector<128x1xf32>
    %cst_84 = arith.constant 3.200000e+01 : f32
    %158 = vector.broadcast %cst_84 : f32 to vector<128x1xf32>
    %159 = arith.divf %157, %158 : vector<128x1xf32>
    %160 = arith.mulf %154, %154 : vector<128x1xf32>
    %161 = arith.subf %159, %160 : vector<128x1xf32>
    %162 = vector.broadcast %154 : vector<128x1xf32> to vector<128x32xf32>
    %163 = arith.subf %134, %162 : vector<128x32xf32>
    %cst_85 = arith.constant 9.99999974E-6 : f32
    %164 = vector.broadcast %cst_85 : f32 to vector<128x1xf32>
    %165 = arith.addf %161, %164 : vector<128x1xf32>
    %166 = math.rsqrt %165 : vector<128x1xf32>
    %167 = vector.broadcast %166 : vector<128x1xf32> to vector<128x32xf32>
    %168 = arith.mulf %163, %167 : vector<128x32xf32>
    %169 = vector.broadcast %136 : vector<1x32xf32> to vector<128x32xf32>
    %170 = arith.mulf %168, %169 : vector<128x32xf32>
    %171 = vector.broadcast %138 : vector<1x32xf32> to vector<128x32xf32>
    %172 = arith.addf %170, %171 : vector<128x32xf32>
    %c1_86 = arith.constant 1 : index
    %c0_87 = arith.constant 0 : index
    %c0_88 = arith.constant 0 : index
    %173 = vector.load %arg3[%c1_86, %c0_87, %c0_88] : memref<2x32x96xf32, #tpu.memory_space<vmem>>, vector<1x32x96xf32>
    %174 = vector.shape_cast %173 : vector<1x32x96xf32> to vector<32x96xf32>
    %cst_89 = arith.constant dense<0.000000e+00> : vector<128x96xf32>
    %175 = tpu.matmul %172, %174, %cst_89 {dimension_numbers = #tpu.dot_dimension_numbers<[1], [0], [0], [1], [0, 0, 1, 1], [], []>} : vector<128x32xf32>, vector<32x96xf32>, vector<128x96xf32> -> vector<128x96xf32>
    %176 = vector.broadcast %140 : vector<1x96xf32> to vector<128x96xf32>
    %177 = arith.addf %175, %176 : vector<128x96xf32>
    %178 = vector.extract_strided_slice %177 {offsets = [0, 0], sizes = [128, 16], strides = [1, 1]} : vector<128x96xf32> to vector<128x16xf32>
    %179 = vector.shape_cast %178 : vector<128x16xf32> to vector<2x64x16xf32>
    %180 = vector.extract_strided_slice %177 {offsets = [0, 32], sizes = [128, 16], strides = [1, 1]} : vector<128x96xf32> to vector<128x16xf32>
    %181 = vector.shape_cast %180 : vector<128x16xf32> to vector<2x64x16xf32>
    %182 = vector.extract_strided_slice %177 {offsets = [0, 64], sizes = [128, 16], strides = [1, 1]} : vector<128x96xf32> to vector<128x16xf32>
    %183 = vector.shape_cast %182 : vector<128x16xf32> to vector<2x64x16xf32>
    "tpu.trace_start"() <{level = 10 : i32, message = "bqd,bkd->bqk"}> : () -> ()
    %cst_90 = arith.constant dense<0.000000e+00> : vector<2x64x64xf32>
    %184 = tpu.matmul %179, %181, %cst_90 {dimension_numbers = #tpu.dot_dimension_numbers<[2], [2], [1], [1], [0, 0, 0, 1, 1, 1], [0], [0]>} : vector<2x64x16xf32>, vector<2x64x16xf32>, vector<2x64x64xf32> -> vector<2x64x64xf32>
    "tpu.trace_stop"() : () -> ()
    %cst_91 = arith.constant dense<0xFF800000> : vector<2x64xf32>
    %185 = vector.multi_reduction <maximumf>, %184, %cst_91 [2] : vector<2x64x64xf32> to vector<2x64xf32>
    %186 = vector.shape_cast %185 : vector<2x64xf32> to vector<2x64x1xf32>
    %187 = vector.broadcast %186 : vector<2x64x1xf32> to vector<2x64x64xf32>
    %188 = arith.subf %184, %187 : vector<2x64x64xf32>
    %189 = math.exp %188 : vector<2x64x64xf32>
    %cst_92 = arith.constant dense<0.000000e+00> : vector<2x64xf32>
    %190 = vector.multi_reduction <add>, %189, %cst_92 [2] : vector<2x64x64xf32> to vector<2x64xf32>
    %191 = vector.shape_cast %190 : vector<2x64xf32> to vector<2x64x1xf32>
    %192 = tpu.reciprocal %191 {approx = true} : vector<2x64x1xf32> -> vector<2x64x1xf32>
    %193 = vector.broadcast %192 : vector<2x64x1xf32> to vector<2x64x64xf32>
    %194 = arith.mulf %189, %193 : vector<2x64x64xf32>
    "tpu.trace_start"() <{level = 10 : i32, message = "bqk,bkd->bqd"}> : () -> ()
    %cst_93 = arith.constant dense<0.000000e+00> : vector<2x64x16xf32>
    %195 = tpu.matmul %194, %183, %cst_93 {dimension_numbers = #tpu.dot_dimension_numbers<[2], [1], [1], [2], [0, 0, 0, 1, 1, 2], [0], [0]>} : vector<2x64x64xf32>, vector<2x64x16xf32>, vector<2x64x16xf32> -> vector<2x64x16xf32>
    "tpu.trace_stop"() : () -> ()
    %196 = vector.shape_cast %195 : vector<2x64x16xf32> to vector<128x16xf32>
    %197 = vector.extract_strided_slice %177 {offsets = [0, 16], sizes = [128, 16], strides = [1, 1]} : vector<128x96xf32> to vector<128x16xf32>
    %198 = vector.shape_cast %197 : vector<128x16xf32> to vector<2x64x16xf32>
    %199 = vector.extract_strided_slice %177 {offsets = [0, 48], sizes = [128, 16], strides = [1, 1]} : vector<128x96xf32> to vector<128x16xf32>
    %200 = vector.shape_cast %199 : vector<128x16xf32> to vector<2x64x16xf32>
    %201 = vector.extract_strided_slice %177 {offsets = [0, 80], sizes = [128, 16], strides = [1, 1]} : vector<128x96xf32> to vector<128x16xf32>
    %202 = vector.shape_cast %201 : vector<128x16xf32> to vector<2x64x16xf32>
    "tpu.trace_start"() <{level = 10 : i32, message = "bqd,bkd->bqk"}> : () -> ()
    %cst_94 = arith.constant dense<0.000000e+00> : vector<2x64x64xf32>
    %203 = tpu.matmul %198, %200, %cst_94 {dimension_numbers = #tpu.dot_dimension_numbers<[2], [2], [1], [1], [0, 0, 0, 1, 1, 1], [0], [0]>} : vector<2x64x16xf32>, vector<2x64x16xf32>, vector<2x64x64xf32> -> vector<2x64x64xf32>
    "tpu.trace_stop"() : () -> ()
    %cst_95 = arith.constant dense<0xFF800000> : vector<2x64xf32>
    %204 = vector.multi_reduction <maximumf>, %203, %cst_95 [2] : vector<2x64x64xf32> to vector<2x64xf32>
    %205 = vector.shape_cast %204 : vector<2x64xf32> to vector<2x64x1xf32>
    %206 = vector.broadcast %205 : vector<2x64x1xf32> to vector<2x64x64xf32>
    %207 = arith.subf %203, %206 : vector<2x64x64xf32>
    %208 = math.exp %207 : vector<2x64x64xf32>
    %cst_96 = arith.constant dense<0.000000e+00> : vector<2x64xf32>
    %209 = vector.multi_reduction <add>, %208, %cst_96 [2] : vector<2x64x64xf32> to vector<2x64xf32>
    %210 = vector.shape_cast %209 : vector<2x64xf32> to vector<2x64x1xf32>
    %211 = tpu.reciprocal %210 {approx = true} : vector<2x64x1xf32> -> vector<2x64x1xf32>
    %212 = vector.broadcast %211 : vector<2x64x1xf32> to vector<2x64x64xf32>
    %213 = arith.mulf %208, %212 : vector<2x64x64xf32>
    "tpu.trace_start"() <{level = 10 : i32, message = "bqk,bkd->bqd"}> : () -> ()
    %cst_97 = arith.constant dense<0.000000e+00> : vector<2x64x16xf32>
    %214 = tpu.matmul %213, %202, %cst_97 {dimension_numbers = #tpu.dot_dimension_numbers<[2], [1], [1], [2], [0, 0, 0, 1, 1, 2], [0], [0]>} : vector<2x64x64xf32>, vector<2x64x16xf32>, vector<2x64x16xf32> -> vector<2x64x16xf32>
    "tpu.trace_stop"() : () -> ()
    %215 = vector.shape_cast %214 : vector<2x64x16xf32> to vector<128x16xf32>
    %216 = tpu.concatenate %196, %215 in 1 : vector<128x16xf32>, vector<128x16xf32> -> vector<128x32xf32>
    %c1_98 = arith.constant 1 : index
    %c0_99 = arith.constant 0 : index
    %c0_100 = arith.constant 0 : index
    %217 = vector.load %arg4[%c1_98, %c0_99, %c0_100] : memref<2x32x32xf32, #tpu.memory_space<vmem>>, vector<1x32x32xf32>
    %218 = vector.shape_cast %217 : vector<1x32x32xf32> to vector<32x32xf32>
    %cst_101 = arith.constant dense<0.000000e+00> : vector<128x32xf32>
    %219 = tpu.matmul %216, %218, %cst_101 {dimension_numbers = #tpu.dot_dimension_numbers<[1], [0], [0], [1], [0, 0, 1, 1], [], []>} : vector<128x32xf32>, vector<32x32xf32>, vector<128x32xf32> -> vector<128x32xf32>
    %220 = arith.addf %134, %219 : vector<128x32xf32>
    %221 = vector.broadcast %142 : vector<1x32xf32> to vector<128x32xf32>
    %222 = arith.addf %220, %221 : vector<128x32xf32>
    %cst_102 = arith.constant dense<0.000000e+00> : vector<128xf32>
    %223 = vector.multi_reduction <add>, %222, %cst_102 [1] : vector<128x32xf32> to vector<128xf32>
    %224 = vector.shape_cast %223 : vector<128xf32> to vector<128x1xf32>
    %cst_103 = arith.constant 3.200000e+01 : f32
    %225 = vector.broadcast %cst_103 : f32 to vector<128x1xf32>
    %226 = arith.divf %224, %225 : vector<128x1xf32>
    %227 = arith.mulf %222, %222 : vector<128x32xf32>
    %cst_104 = arith.constant dense<0.000000e+00> : vector<128xf32>
    %228 = vector.multi_reduction <add>, %227, %cst_104 [1] : vector<128x32xf32> to vector<128xf32>
    %229 = vector.shape_cast %228 : vector<128xf32> to vector<128x1xf32>
    %cst_105 = arith.constant 3.200000e+01 : f32
    %230 = vector.broadcast %cst_105 : f32 to vector<128x1xf32>
    %231 = arith.divf %229, %230 : vector<128x1xf32>
    %232 = arith.mulf %226, %226 : vector<128x1xf32>
    %233 = arith.subf %231, %232 : vector<128x1xf32>
    %234 = vector.broadcast %226 : vector<128x1xf32> to vector<128x32xf32>
    %235 = arith.subf %222, %234 : vector<128x32xf32>
    %cst_106 = arith.constant 9.99999974E-6 : f32
    %236 = vector.broadcast %cst_106 : f32 to vector<128x1xf32>
    %237 = arith.addf %233, %236 : vector<128x1xf32>
    %238 = math.rsqrt %237 : vector<128x1xf32>
    %239 = vector.broadcast %238 : vector<128x1xf32> to vector<128x32xf32>
    %240 = arith.mulf %235, %239 : vector<128x32xf32>
    %241 = vector.broadcast %144 : vector<1x32xf32> to vector<128x32xf32>
    %242 = arith.mulf %240, %241 : vector<128x32xf32>
    %243 = vector.broadcast %146 : vector<1x32xf32> to vector<128x32xf32>
    %244 = arith.addf %242, %243 : vector<128x32xf32>
    %c1_107 = arith.constant 1 : index
    %c0_108 = arith.constant 0 : index
    %c0_109 = arith.constant 0 : index
    %245 = vector.load %arg5[%c1_107, %c0_108, %c0_109] : memref<2x32x128xf32, #tpu.memory_space<vmem>>, vector<1x32x128xf32>
    %246 = vector.shape_cast %245 : vector<1x32x128xf32> to vector<32x128xf32>
    %cst_110 = arith.constant dense<0.000000e+00> : vector<128x128xf32>
    %247 = tpu.matmul %244, %246, %cst_110 {dimension_numbers = #tpu.dot_dimension_numbers<[1], [0], [0], [1], [0, 0, 1, 1], [], []>} : vector<128x32xf32>, vector<32x128xf32>, vector<128x128xf32> -> vector<128x128xf32>
    %248 = vector.broadcast %148 : vector<1x128xf32> to vector<128x128xf32>
    %249 = arith.addf %247, %248 : vector<128x128xf32>
    %250 = vector.extract_strided_slice %249 {offsets = [0, 0], sizes = [128, 64], strides = [1, 1]} : vector<128x128xf32> to vector<128x64xf32>
    %251 = arith.negf %250 : vector<128x64xf32>
    %252 = math.exp %251 : vector<128x64xf32>
    %cst_111 = arith.constant 1.000000e+00 : f32
    %253 = vector.broadcast %cst_111 : f32 to vector<128x64xf32>
    %254 = arith.addf %253, %252 : vector<128x64xf32>
    %255 = arith.divf %253, %254 : vector<128x64xf32>
    %256 = arith.mulf %250, %255 : vector<128x64xf32>
    %257 = vector.extract_strided_slice %249 {offsets = [0, 64], sizes = [128, 64], strides = [1, 1]} : vector<128x128xf32> to vector<128x64xf32>
    %258 = arith.mulf %256, %257 : vector<128x64xf32>
    %c1_112 = arith.constant 1 : index
    %c0_113 = arith.constant 0 : index
    %c0_114 = arith.constant 0 : index
    %259 = vector.load %arg6[%c1_112, %c0_113, %c0_114] : memref<2x64x32xf32, #tpu.memory_space<vmem>>, vector<1x64x32xf32>
    %260 = vector.shape_cast %259 : vector<1x64x32xf32> to vector<64x32xf32>
    %cst_115 = arith.constant dense<0.000000e+00> : vector<128x32xf32>
    %261 = tpu.matmul %258, %260, %cst_115 {dimension_numbers = #tpu.dot_dimension_numbers<[1], [0], [0], [1], [0, 0, 1, 1], [], []>} : vector<128x64xf32>, vector<64x32xf32>, vector<128x32xf32> -> vector<128x32xf32>
    %262 = arith.addf %222, %261 : vector<128x32xf32>
    %263 = vector.broadcast %150 : vector<1x32xf32> to vector<128x32xf32>
    %264 = arith.addf %262, %263 : vector<128x32xf32>
    %c0_116 = arith.constant 0 : index
    %c0_117 = arith.constant 0 : index
    %265 = vector.load %arg8[%c0_116, %c0_117] : memref<3x32xf32, #tpu.memory_space<vmem>>, vector<1x32xf32>
    %c1_118 = arith.constant 1 : index
    %c0_119 = arith.constant 0 : index
    %266 = vector.load %arg8[%c1_118, %c0_119] : memref<3x32xf32, #tpu.memory_space<vmem>>, vector<1x32xf32>
    %c2_120 = arith.constant 2 : index
    %c0_121 = arith.constant 0 : index
    %267 = vector.load %arg8[%c2_120, %c0_121] : memref<3x32xf32, #tpu.memory_space<vmem>>, vector<1x16xf32>
    %cst_122 = arith.constant dense<0.000000e+00> : vector<128xf32>
    %268 = vector.multi_reduction <add>, %264, %cst_122 [1] : vector<128x32xf32> to vector<128xf32>
    %269 = vector.shape_cast %268 : vector<128xf32> to vector<128x1xf32>
    %cst_123 = arith.constant 3.200000e+01 : f32
    %270 = vector.broadcast %cst_123 : f32 to vector<128x1xf32>
    %271 = arith.divf %269, %270 : vector<128x1xf32>
    %272 = arith.mulf %264, %264 : vector<128x32xf32>
    %cst_124 = arith.constant dense<0.000000e+00> : vector<128xf32>
    %273 = vector.multi_reduction <add>, %272, %cst_124 [1] : vector<128x32xf32> to vector<128xf32>
    %274 = vector.shape_cast %273 : vector<128xf32> to vector<128x1xf32>
    %cst_125 = arith.constant 3.200000e+01 : f32
    %275 = vector.broadcast %cst_125 : f32 to vector<128x1xf32>
    %276 = arith.divf %274, %275 : vector<128x1xf32>
    %277 = arith.mulf %271, %271 : vector<128x1xf32>
    %278 = arith.subf %276, %277 : vector<128x1xf32>
    %279 = vector.broadcast %271 : vector<128x1xf32> to vector<128x32xf32>
    %280 = arith.subf %264, %279 : vector<128x32xf32>
    %cst_126 = arith.constant 9.99999974E-6 : f32
    %281 = vector.broadcast %cst_126 : f32 to vector<128x1xf32>
    %282 = arith.addf %278, %281 : vector<128x1xf32>
    %283 = math.rsqrt %282 : vector<128x1xf32>
    %284 = vector.broadcast %283 : vector<128x1xf32> to vector<128x32xf32>
    %285 = arith.mulf %280, %284 : vector<128x32xf32>
    %286 = vector.broadcast %265 : vector<1x32xf32> to vector<128x32xf32>
    %287 = arith.mulf %285, %286 : vector<128x32xf32>
    %288 = vector.broadcast %266 : vector<1x32xf32> to vector<128x32xf32>
    %289 = arith.addf %287, %288 : vector<128x32xf32>
    %c0_127 = arith.constant 0 : index
    %c0_128 = arith.constant 0 : index
    %290 = vector.load %arg9[%c0_127, %c0_128] : memref<32x16xf32, #tpu.memory_space<vmem>>, vector<32x16xf32>
    %cst_129 = arith.constant dense<0.000000e+00> : vector<128x16xf32>
    %291 = tpu.matmul %289, %290, %cst_129 {dimension_numbers = #tpu.dot_dimension_numbers<[1], [0], [0], [1], [0, 0, 1, 1], [], []>} : vector<128x32xf32>, vector<32x16xf32>, vector<128x16xf32> -> vector<128x16xf32>
    %292 = vector.broadcast %267 : vector<1x16xf32> to vector<128x16xf32>
    %293 = arith.addf %291, %292 : vector<128x16xf32>
    %c0_130 = arith.constant 0 : index
    %c0_131 = arith.constant 0 : index
    %294 = vector.load %arg10[%c0_130, %c0_131] : memref<128x16xf32, #tpu.memory_space<vmem>>, vector<128x16xf32>
    tpu.vector_store %arg10[%c0_130, %c0_131], %293 {strides = array<i32>} : memref<128x16xf32, #tpu.memory_space<vmem>>, vector<128x16xf32>,
    return
  }
}

</mosaic_0001>

<bundles_post_ra>
// kernel: freq_transformer_encoder.1
= control target key start
LH: loop header
LB: loop body
LE: loop exit
PB: predicated region body
PF: predicated region fallthrough
CT: control target
= control target key end

     0   :  { %vm69_vm0 = vcmask 130048   ;;  %vm271_vm1 = vcmask 261120   ;;  %s9670_s28 = smov 96   ;;  %s9671_s29 = smov 64   ;;  %vm1076_vm2 = vcmask 523264   ;;  %s13100_s1 = inlined_call_operand.vmem [shape: f32[16,32], index: 1, kind: input, shape index: {}]   ;;  %s13101_s0 = inlined_call_operand.vmem [shape: f32[128,16], index: 0, kind: input, shape index: {}]   ;;  %s13102_s2 = inlined_call_operand.vmem [shape: f32[128,32], index: 2, kind: input, shape index: {}]   ;;  %s13103_s3 = inlined_call_operand.vmem [shape: f32[2,32,96], index: 3, kind: input, shape index: {}]   ;;  %s13104_s7 = inlined_call_operand.vmem [shape: f32[2,8,128], index: 7, kind: input, shape index: {}]   ;;  %s13105_s4 = inlined_call_operand.vmem [shape: f32[2,32,32], index: 4, kind: input, shape index: {}]   ;;  %s13106_s5 = inlined_call_operand.vmem [shape: f32[2,32,128], index: 5, kind: input, shape index: {}]   ;;  %s13107_s6 = inlined_call_operand.vmem [shape: f32[2,64,32], index: 6, kind: input, shape index: {}]   ;;  %s13108_s9 = inlined_call_operand.vmem [shape: f32[32,16], index: 9, kind: input, shape index: {}]   ;;  %s13109_s8 = inlined_call_operand.vmem [shape: f32[3,32], index: 8, kind: input, shape index: {}]   ;;  %s13110_s10 = inlined_call_operand.vmem [shape: f32[128,16], index: 10, kind: output, shape index: {}]  }
   0x1   :  { %v52_v0 = vld [vmem:[%s13100_s1 + $0x8] sm:$0xff]  ;;  %v51_v1 = vld [vmem:[%s13100_s1] sm:$0xff]  ;;  %v37_v4 = vld [vmem:[%s13101_s0 + $0x10] sm:$0xff]  ;;  %s9672_s30 = smov 80   ;;  %s9674_s11 = smov 48  }
   0x2   :  { %v35_v2 = vld [vmem:[%s13101_s0] sm:$0xff]  ;;  %8340 = vmatprep.subr.mxu0 %v52_v0  ;;  %v36_v3 = vld [vmem:[%s13101_s0 + $0x8] sm:$0xff]  ;;  %v38_v5 = vld [vmem:[%s13101_s0 + $0x18] sm:$0xff]  ;;  %s9675_s20 = smov 16  }
   0x3   :  { %8344 = vmatprep.mubr.msk.f32.mxu0 %vm69_vm0, %v35_v2  ;;  %8341 = vmatpush3.msra.mxu0 %v52_v0  ;;  %v39_v6 = vld [vmem:[%s13101_s0 + $0x20] sm:$0xff]  ;;  %v40_v7 = vld [vmem:[%s13101_s0 + $0x28] sm:$0xff]  ;;  %v41_v8 = vld [vmem:[%s13101_s0 + $0x30] sm:$0xff] }
   0x4   :  { %8342 = vmatprep.subr.mxu0 %v51_v1  ;;  %v42_v9 = vld [vmem:[%s13101_s0 + $0x38] sm:$0xff]  ;;  %v43_v10 = vld [vmem:[%s13101_s0 + $0x40] sm:$0xff]  ;;  %v44_v11 = vld [vmem:[%s13101_s0 + $0x48] sm:$0xff] }
   0x5   :  { %8343 = vmatpush3.msra.mxu0 %v51_v1  ;;  %v45_v12 = vld [vmem:[%s13101_s0 + $0x50] sm:$0xff]  ;;  %v46_v13 = vld [vmem:[%s13101_s0 + $0x58] sm:$0xff]  ;;  %v47_v14 = vld [vmem:[%s13101_s0 + $0x60] sm:$0xff] }
   0x6   :  { %8345 = vmatmul.mubr.msk.f32.vlgmr.msra.gmra.mxu0 %vm69_vm0, %v36_v3  ;;  %v48_v15 = vld [vmem:[%s13101_s0 + $0x68] sm:$0xff]  ;;  %v49_v16 = vld [vmem:[%s13101_s0 + $0x70] sm:$0xff]  ;;  %v50_v17 = vld [vmem:[%s13101_s0 + $0x78] sm:$0xff]  ;;  %s9673_s0 = smov 112  }
   0x7   :  { %8347 = vmatprep.mubr.msk.f32.mxu0 %vm69_vm0, %v37_v4  ;;  %v54_v18 = vld [vmem:[%s13102_s2 + $0x8] sm:$0xff]  ;;  %v53_v20 = vld [vmem:[%s13102_s2] sm:$0xff]  ;;  %v55_v27 = vld [vmem:[%s13102_s2 + $0x10] sm:$0xff] }
   0x8   :  { %v56_v30 = vld [vmem:[%s13102_s2 + $0x18] sm:$0xff]  ;;  %v57_v39 = vld [vmem:[%s13102_s2 + $0x20] sm:$0xff]  ;;  %v58_v44 = vld [vmem:[%s13102_s2 + $0x28] sm:$0xff] }
   0x9   :  { %v59_v51 = vld [vmem:[%s13102_s2 + $0x30] sm:$0xff]  ;;  %v60_v56 = vld [vmem:[%s13102_s2 + $0x38] sm:$0xff]  ;;  %v61_v63 = vld [vmem:[%s13102_s2 + $0x40] sm:$0xff] }
   0xa   :  { %8348 = vmatmul.mubr.msk.f32.gmra.mxu0 %vm69_vm0, %v38_v5  ;;  %v62_v4 = vld [vmem:[%s13102_s2 + $0x48] sm:$0xff] }
   0xb   :  { %8350 = vmatprep.mubr.msk.f32.mxu0 %vm69_vm0, %v39_v6 }
   0xe   :  { %8351 = vmatmul.mubr.msk.f32.gmra.mxu0 %vm69_vm0, %v40_v7 }
   0xf   :  { %8353 = vmatprep.mubr.msk.f32.mxu0 %vm69_vm0, %v41_v8 }
  0x12   :  { %8354 = vmatmul.mubr.msk.f32.gmra.mxu0 %vm69_vm0, %v42_v9 }
  0x13   :  { %8356 = vmatprep.mubr.msk.f32.mxu0 %vm69_vm0, %v43_v10 }
  0x16   :  { %8357 = vmatmul.mubr.msk.f32.gmra.mxu0 %vm69_vm0, %v44_v11  ;;  %v63_v11 = vld [vmem:[%s13102_s2 + $0x50] sm:$0xff] }
  0x17   :  { %8359 = vmatprep.mubr.msk.f32.mxu0 %vm69_vm0, %v45_v12 }
  0x1a   :  { %8360 = vmatmul.mubr.msk.f32.gmra.mxu0 %vm69_vm0, %v46_v13 }
  0x1b   :  { %8362 = vmatprep.mubr.msk.f32.mxu0 %vm69_vm0, %v47_v14 }
  0x1e   :  { %8363 = vmatmul.mubr.msk.f32.gmra.mxu0 %vm69_vm0, %v48_v15 }
  0x1f   :  { %8365 = vmatprep.mubr.msk.f32.mxu0 %vm69_vm0, %v49_v16  ;;  %v64_v16 = vld [vmem:[%s13102_s2 + $0x58] sm:$0xff] }
  0x22   :  { %8366 = vmatmul.mubr.msk.f32.gmra.mxu0 %vm69_vm0, %v50_v17 }
  0xc6   :  { %v8346_v19 = vpop.f32.mrf.mxu0 }
  0xc7   :  { %v9807_v21 = vadd.f32 %v8346_v19, %v54_v18  ;;  %v556_v19 = vld [vmem:[%s13103_s3 + $0x18] sm:$0xff] }
  0xc8   :  { %v184_v22 = vpop.f32.mrf.mxu0  ;;  %8368 = vmatprep.subr.mxu1 %v556_v19 }
  0xc9   :  { %13145 = vst [vmem:[#allocation2_spill] sm:$0xff] %v9807_v21  ;;  %v9809_v23 = vadd.f32 %v184_v22, %v53_v20  ;;  %v275_v24 = vsel %vm271_vm1, %v9807_v21, 0.0  ;;  %v338_v25 = vmul.f32 %v9807_v21, %v9807_v21  ;;  %8369 = vmatpush3.msra.mxu1 %v556_v19 }
  0xca   :  { %276 = vadd.xlane.f32.xlu0 %v275_v24  ;;  %v8349_v26 = vpop.f32.mrf.mxu0 }
  0xcb   :  { %13146 = vst [vmem:[#allocation3_spill] sm:$0xff] %v9809_v23  ;;  %v356_v28 = vsel %vm271_vm1, %v338_v25, 0.0  ;;  %v337_v29 = vmul.f32 %v9809_v23, %v9809_v23  ;;  %v272_v33 = vsel %vm271_vm1, %v9809_v23, 0.0  ;;  %v9828_v35 = vadd.f32 %v8349_v26, %v56_v30  ;;  %v555_v25 = vld [vmem:[%s13103_s3 + $0x10] sm:$0xff] }
  0xcc   :  { %357 = vadd.xlane.f32.xlu1 %v356_v28  ;;  %v194_v31 = vpop.f32.mrf.mxu0  ;;  %8370 = vmatprep.subr.mxu1 %v555_v25 }
  0xcd   :  { %v9824_v32 = vadd.f32 %v194_v31, %v55_v27  ;;  %13148 = vst [vmem:[#allocation5_spill] sm:$0xff] %v9828_v35  ;;  %v353_v36 = vsel %vm271_vm1, %v337_v29, 0.0  ;;  %v281_v41 = vsel %vm271_vm1, %v9828_v35, 0.0  ;;  %v340_v43 = vmul.f32 %v9828_v35, %v9828_v35  ;;  %v65_v27 = vld [vmem:[%s13102_s2 + $0x60] sm:$0xff]  ;;  %8371 = vmatpush3.msra.mxu1 %v555_v25  ;;  %v554_v29 = vld [vmem:[%s13103_s3 + $0x8] sm:$0xff] }
  0xce   :  { %273 = vadd.xlane.f32.xlu0 %v272_v33  ;;  %v8352_v34 = vpop.f32.mrf.mxu0  ;;  %8372 = vmatprep.subr.mxu1 %v554_v29 }
  0xcf   :  { %13147 = vst [vmem:[#allocation4_spill] sm:$0xff] %v9824_v32  ;;  %v278_v37 = vsel %vm271_vm1, %v9824_v32, 0.0  ;;  %v339_v40 = vmul.f32 %v9824_v32, %v9824_v32  ;;  %v9848_v47 = vadd.f32 %v8352_v34, %v58_v44  ;;  %v362_v48 = vsel %vm271_vm1, %v340_v43, 0.0  ;;  %8373 = vmatpush3.msra.mxu1 %v554_v29  ;;  %v553_v34 = vld [vmem:[%s13103_s3] sm:$0xff]  ;;  %v67_v44 = vld [vmem:[%s13102_s2 + $0x70] sm:$0xff] }
  0xd0   :  { %354 = vadd.xlane.f32.xlu1 %v353_v36  ;;  %v204_v38 = vpop.f32.mrf.mxu0  ;;  %v66_v36 = vld [vmem:[%s13102_s2 + $0x68] sm:$0xff]  ;;  %8374 = vmatprep.subr.mxu1 %v553_v34 }
  0xd1   :  { %v9840_v42 = vadd.f32 %v204_v38, %v57_v39  ;;  %v359_v46 = vsel %vm271_vm1, %v339_v40, 0.0  ;;  %13150 = vst [vmem:[#allocation7_spill] sm:$0xff] %v9848_v47  ;;  %v287_v53 = vsel %vm271_vm1, %v9848_v47, 0.0  ;;  %v342_v55 = vmul.f32 %v9848_v47, %v9848_v47  ;;  %8375 = vmatpush3.msra.mxu1 %v553_v34 }
  0xd2   :  { %279 = vadd.xlane.f32.xlu0 %v278_v37  ;;  %v8355_v45 = vpop.f32.mrf.mxu0 }
  0xd3   :  { %13149 = vst [vmem:[#allocation6_spill] sm:$0xff] %v9840_v42  ;;  %v284_v49 = vsel %vm271_vm1, %v9840_v42, 0.0  ;;  %v341_v52 = vmul.f32 %v9840_v42, %v9840_v42  ;;  %v9868_v59 = vadd.f32 %v8355_v45, %v60_v56  ;;  %v368_v60 = vsel %vm271_vm1, %v342_v55, 0.0 }
  0xd4   :  { %282 = vadd.xlane.f32.xlu1 %v281_v41  ;;  %v214_v50 = vpop.f32.mrf.mxu0 }
  0xd5   :  { %v9860_v54 = vadd.f32 %v214_v50, %v59_v51  ;;  %v365_v58 = vsel %vm271_vm1, %v341_v52, 0.0  ;;  %13152 = vst [vmem:[#allocation9_spill] sm:$0xff] %v9868_v59  ;;  %v293_v1 = vsel %vm271_vm1, %v9868_v59, 0.0  ;;  %v344_v3 = vmul.f32 %v9868_v59, %v9868_v59  ;;  %v68_v50 = vld [vmem:[%s13102_s2 + $0x78] sm:$0xff] }
  0xd6   :  { %360 = vadd.xlane.f32.xlu0 %v359_v46  ;;  %v8358_v57 = vpop.f32.mrf.mxu0 }
  0xd7   :  { %13151 = vst [vmem:[#allocation8_spill] sm:$0xff] %v9860_v54  ;;  %v290_v61 = vsel %vm271_vm1, %v9860_v54, 0.0  ;;  %v343_v0 = vmul.f32 %v9860_v54, %v9860_v54  ;;  %v9888_v7 = vadd.f32 %v8358_v57, %v62_v4  ;;  %v374_v8 = vsel %vm271_vm1, %v344_v3, 0.0 }
  0xd8   :  { %363 = vadd.xlane.f32.xlu1 %v362_v48  ;;  %v224_v62 = vpop.f32.mrf.mxu0 }
  0xd9   :  { %v9880_v2 = vadd.f32 %v224_v62, %v61_v63  ;;  %v371_v6 = vsel %vm271_vm1, %v343_v0, 0.0  ;;  %13154 = vst [vmem:[#allocation11_spill] sm:$0xff] %v9888_v7  ;;  %v299_v13 = vsel %vm271_vm1, %v9888_v7, 0.0  ;;  %v346_v15 = vmul.f32 %v9888_v7, %v9888_v7 }
  0xda   :  { %285 = vadd.xlane.f32.xlu0 %v284_v49  ;;  %v8361_v5 = vpop.f32.mrf.mxu0 }
  0xdb   :  { %13153 = vst [vmem:[#allocation10_spill] sm:$0xff] %v9880_v2  ;;  %v296_v9 = vsel %vm271_vm1, %v9880_v2, 0.0  ;;  %v345_v12 = vmul.f32 %v9880_v2, %v9880_v2  ;;  %v9911_v20 = vadd.f32 %v8361_v5, %v64_v16  ;;  %v380_v22 = vsel %vm271_vm1, %v346_v15, 0.0 }
  0xdc   :  { %288 = vadd.xlane.f32.xlu1 %v287_v53  ;;  %v234_v10 = vpop.f32.mrf.mxu0 }
  0xdd   :  { %v9900_v14 = vadd.f32 %v234_v10, %v63_v11  ;;  %v377_v18 = vsel %vm271_vm1, %v345_v12, 0.0  ;;  %13156 = vst [vmem:[#allocation13_spill] sm:$0xff] %v9911_v20  ;;  %v305_v30 = vsel %vm271_vm1, %v9911_v20, 0.0  ;;  %v348_v33 = vmul.f32 %v9911_v20, %v9911_v20 }
  0xde   :  { %366 = vadd.xlane.f32.xlu0 %v365_v58  ;;  %v8364_v17 = vpop.f32.mrf.mxu0 }
  0xdf   :  { %13155 = vst [vmem:[#allocation12_spill] sm:$0xff] %v9900_v14  ;;  %v302_v24 = vsel %vm271_vm1, %v9900_v14, 0.0  ;;  %v347_v28 = vmul.f32 %v9900_v14, %v9900_v14  ;;  %v9940_v39 = vadd.f32 %v8364_v17, %v66_v36  ;;  %v386_v40 = vsel %vm271_vm1, %v348_v33, 0.0 }
  0xe0   :  { %369 = vadd.xlane.f32.xlu1 %v368_v60  ;;  %v244_v26 = vpop.f32.mrf.mxu0 }
  0xe1   :  { %v9929_v31 = vadd.f32 %v244_v26, %v65_v27  ;;  %v383_v38 = vsel %vm271_vm1, %v347_v28, 0.0  ;;  %13158 = vst [vmem:[#allocation15_spill] sm:$0xff] %v9940_v39  ;;  %v311_v46 = vsel %vm271_vm1, %v9940_v39, 0.0  ;;  %v350_v49 = vmul.f32 %v9940_v39, %v9940_v39 }
  0xe2   :  { %291 = vadd.xlane.f32.xlu0 %v290_v61  ;;  %v8367_v37 = vpop.f32.mrf.mxu0 }
  0xe3   :  { %13157 = vst [vmem:[#allocation14_spill] sm:$0xff] %v9929_v31  ;;  %v308_v41 = vsel %vm271_vm1, %v9929_v31, 0.0  ;;  %v349_v45 = vmul.f32 %v9929_v31, %v9929_v31  ;;  %v9960_v52 = vadd.f32 %v8367_v37, %v68_v50  ;;  %v392_v53 = vsel %vm271_vm1, %v350_v49, 0.0 }
  0xe4   :  { %294 = vadd.xlane.f32.xlu1 %v293_v1  ;;  %v254_v43 = vpop.f32.mrf.mxu0 }
  0xe5   :  { %v9952_v48 = vadd.f32 %v254_v43, %v67_v44  ;;  %v389_v51 = vsel %vm271_vm1, %v349_v45, 0.0  ;;  %13160 = vst [vmem:[#allocation17_spill] sm:$0xff] %v9960_v52  ;;  %v317_v57 = vsel %vm271_vm1, %v9960_v52, 0.0  ;;  %v352_v58 = vmul.f32 %v9960_v52, %v9960_v52 }
  0xe6   :  { %372 = vadd.xlane.f32.xlu0 %v371_v6 }
  0xe7   :  { %13159 = vst [vmem:[#allocation16_spill] sm:$0xff] %v9952_v48  ;;  %v314_v55 = vsel %vm271_vm1, %v9952_v48, 0.0  ;;  %v351_v56 = vmul.f32 %v9952_v48, %v9952_v48  ;;  %v398_v61 = vsel %vm271_vm1, %v352_v58, 0.0 }
  0xe8   :  { %375 = vadd.xlane.f32.xlu1 %v374_v8 }
  0xe9   :  { %v395_v60 = vsel %vm271_vm1, %v351_v56, 0.0 }
  0xea   :  { %297 = vadd.xlane.f32.xlu0 %v296_v9 }
  0xec   :  { %300 = vadd.xlane.f32.xlu1 %v299_v13 }
  0xee   :  { %378 = vadd.xlane.f32.xlu0 %v377_v18 }
  0xf0   :  { %381 = vadd.xlane.f32.xlu1 %v380_v22 }
  0xf2   :  { %303 = vadd.xlane.f32.xlu0 %v302_v24 }
  0xf4   :  { %306 = vadd.xlane.f32.xlu1 %v305_v30 }
  0xf6   :  { %384 = vadd.xlane.f32.xlu0 %v383_v38 }
  0xf8   :  { %387 = vadd.xlane.f32.xlu1 %v386_v40 }
  0xfa   :  { %309 = vadd.xlane.f32.xlu0 %v308_v41 }
  0xfc   :  { %312 = vadd.xlane.f32.xlu1 %v311_v46 }
  0xfe   :  { %390 = vadd.xlane.f32.xlu0 %v389_v51 }
 0x100   :  { %393 = vadd.xlane.f32.xlu1 %v392_v53 }
 0x102   :  { %315 = vadd.xlane.f32.xlu0 %v314_v55 }
 0x104   :  { %318 = vadd.xlane.f32.xlu1 %v317_v57 }
 0x106   :  { %396 = vadd.xlane.f32.xlu0 %v395_v60  ;;  %v9995_v60 = vld [vmem:[%s13104_s7] ss:$0 sm:$0xff] }
 0x108   :  { %399 = vadd.xlane.f32.xlu1 %v398_v61 }
 0x153   :  { %v277_v62 = vpop.xlane.xlu0 %276 }
 0x154   :  { %v322_v63 = vmul.f32 0.03125, %v277_v62 }
 0x155   :  { %v358_v0 = vpop.xlane.xlu1 %357 }
 0x156   :  { %v418_v1 = vmul.f32 %v322_v63, %v322_v63  ;;  %v402_v3 = vmul.f32 0.03125, %v358_v0  ;;  %v450_v45 = vsub.f32 %v9807_v21, %v322_v63 }
 0x157   :  { %v274_v4 = vpop.xlane.xlu0 %273 }
 0x158   :  { %v434_v5 = vsub.f32 %v402_v3, %v418_v1  ;;  %v321_v6 = vmul.f32 0.03125, %v274_v4 }
 0x159   :  { %v355_v8 = vpop.xlane.xlu1 %354 }
 0x15a   :  { %v466_v9 = vadd.f32 1e-05, %v434_v5  ;;  %v417_v10 = vmul.f32 %v321_v6, %v321_v6  ;;  %v401_v11 = vmul.f32 0.03125, %v355_v8  ;;  %v449_v62 = vsub.f32 %v9809_v23, %v321_v6 }
 0x15b   :  { %v280_v12 = vpop.xlane.xlu0 %279 }
 0x15c   :  { %9126 = vrsqrt.f32 %v466_v9  ;;  %v433_v13 = vsub.f32 %v401_v11, %v417_v10  ;;  %v9973_v15 = vmul.f32 0.03125, %v280_v12  ;;  %v10006_v10 = vld [vmem:[%s13104_s7 + $0x1] ss:$0 sm:$0xff] }
 0x15d   :  { %v283_v16 = vpop.xlane.xlu1 %282 }
 0x15e   :  { %v465_v17 = vadd.f32 1e-05, %v433_v13  ;;  %v9975_v18 = vmul.f32 0.03125, %v283_v16  ;;  %v419_v22 = vmul.f32 %v9973_v15, %v9973_v15  ;;  %v451_v12 = vsub.f32 %v9824_v32, %v9973_v15 }
 0x15f   :  { %v361_v19 = vpop.xlane.xlu0 %360 }
 0x160   :  { %9128 = vrsqrt.f32 %v465_v17  ;;  %v403_v24 = vmul.f32 0.03125, %v361_v19  ;;  %v420_v26 = vmul.f32 %v9975_v18, %v9975_v18  ;;  %v452_v15 = vsub.f32 %v9828_v35, %v9975_v18 }
 0x161   :  { %v364_v25 = vpop.xlane.xlu1 %363 }
 0x162   :  { %v435_v27 = vsub.f32 %v403_v24, %v419_v22  ;;  %v404_v28 = vmul.f32 0.03125, %v364_v25 }
 0x163   :  { %v286_v29 = vpop.xlane.xlu0 %285 }
 0x164   :  { %v467_v30 = vadd.f32 1e-05, %v435_v27  ;;  %v436_v33 = vsub.f32 %v404_v28, %v420_v26  ;;  %v9981_v34 = vmul.f32 0.03125, %v286_v29 }
 0x165   :  { %v289_v36 = vpop.xlane.xlu1 %288 }
 0x166   :  { %9130 = vrsqrt.f32 %v467_v30  ;;  %v468_v37 = vadd.f32 1e-05, %v436_v33  ;;  %v9983_v38 = vmul.f32 0.03125, %v289_v36  ;;  %v421_v41 = vmul.f32 %v9981_v34, %v9981_v34 }
 0x167   :  { %v367_v40 = vpop.xlane.xlu0 %366 }
 0x168   :  { %9132 = vrsqrt.f32 %v468_v37  ;;  %v405_v43 = vmul.f32 0.03125, %v367_v40  ;;  %v422_v49 = vmul.f32 %v9983_v38, %v9983_v38 }
 0x169   :  { %v9127_v44 = vpop.eup %9126  ;;  %v370_v46 = vpop.xlane.xlu1 %369 }
 0x16a   :  { %v437_v50 = vsub.f32 %v405_v43, %v421_v41  ;;  %v406_v51 = vmul.f32 0.03125, %v370_v46  ;;  %v498_v55 = vmul.f32 %v9127_v44, %v450_v45 }
 0x16b   :  { %v292_v53 = vpop.xlane.xlu0 %291 }
 0x16c   :  { %v469_v56 = vadd.f32 1e-05, %v437_v50  ;;  %v438_v57 = vsub.f32 %v406_v51, %v422_v49  ;;  %v9990_v58 = vmul.f32 0.03125, %v292_v53  ;;  %v518_v5 = vmul.f32 %v9995_v60, %v498_v55 }
 0x16d   :  { %v9129_v61 = vpop.eup %9128  ;;  %v295_v63 = vpop.xlane.xlu1 %294  ;;  %v453_v50 = vsub.f32 %v9840_v42, %v9981_v34  ;;  %v454_v34 = vsub.f32 %v9848_v47, %v9983_v38 }
 0x16e   :  { %9134 = vrsqrt.f32 %v469_v56  ;;  %v470_v0 = vadd.f32 1e-05, %v438_v57  ;;  %v9998_v1 = vmul.f32 0.03125, %v295_v63  ;;  %v497_v4 = vmul.f32 %v9129_v61, %v449_v62 }
 0x16f   :  { %v373_v3 = vpop.xlane.xlu0 %372  ;;  %v423_v8 = vmul.f32 %v9990_v58, %v9990_v58  ;;  %v538_v25 = vadd.f32 %v10006_v10, %v518_v5 }
 0x170   :  { %9136 = vrsqrt.f32 %v470_v0  ;;  %v407_v9 = vmul.f32 0.03125, %v373_v3  ;;  %v517_v11 = vmul.f32 %v9995_v60, %v497_v4  ;;  %v424_v13 = vmul.f32 %v9998_v1, %v9998_v1 }
 0x171   :  { %v376_v6 = vpop.xlane.xlu1 %375 }
 0x172   :  { %v439_v16 = vsub.f32 %v407_v9, %v423_v8  ;;  %v408_v17 = vmul.f32 0.03125, %v376_v6  ;;  %v537_v24 = vadd.f32 %v10006_v10, %v517_v11 }
 0x173   :  { %v9131_v19 = vpop.eup %9130  ;;  %v298_v22 = vpop.xlane.xlu0 %297 }
 0x174   :  { %v471_v26 = vadd.f32 1e-05, %v439_v16  ;;  %v440_v27 = vsub.f32 %v408_v17, %v424_v13  ;;  %v10015_v28 = vmul.f32 0.03125, %v298_v22  ;;  %v499_v29 = vmul.f32 %v9131_v19, %v451_v12  ;;  %8376 = vmatprep.mubr.msk.f32.mxu1 %vm271_vm1, %v537_v24 }
 0x175   :  { %v9133_v30 = vpop.eup %9132  ;;  %v301_v33 = vpop.xlane.xlu1 %300  ;;  %8377 = vmatmul.mubr.msk.f32.vlgmr.msra.gmra.mxu1 %vm271_vm1, %v538_v25  ;;  %v455_v22 = vsub.f32 %v9860_v54, %v9990_v58  ;;  %v456_v58 = vsub.f32 %v9868_v59, %v9998_v1 }
 0x176   :  { %9138 = vrsqrt.f32 %v471_v26  ;;  %v472_v36 = vadd.f32 1e-05, %v440_v27  ;;  %v10021_v37 = vmul.f32 0.03125, %v301_v33  ;;  %v519_v41 = vmul.f32 %v9995_v60, %v499_v29 }
 0x177   :  { %v379_v40 = vpop.xlane.xlu0 %378  ;;  %v500_v43 = vmul.f32 %v9133_v30, %v452_v15  ;;  %v425_v44 = vmul.f32 %v10015_v28, %v10015_v28 }
 0x178   :  { %9140 = vrsqrt.f32 %v472_v36  ;;  %v409_v45 = vmul.f32 0.03125, %v379_v40  ;;  %v539_v18 = vadd.f32 %v10006_v10, %v519_v41  ;;  %v426_v51 = vmul.f32 %v10021_v37, %v10021_v37 }
 0x179   :  { %v382_v46 = vpop.xlane.xlu1 %381  ;;  %v520_v49 = vmul.f32 %v9995_v60, %v500_v43 }
 0x17a   :  { %v441_v53 = vsub.f32 %v409_v45, %v425_v44  ;;  %v410_v55 = vmul.f32 0.03125, %v382_v46  ;;  %8379 = vmatprep.mubr.msk.f32.mxu1 %vm271_vm1, %v539_v18 }
 0x17b   :  { %v9135_v56 = vpop.eup %9134  ;;  %v304_v57 = vpop.xlane.xlu0 %303  ;;  %v540_v61 = vadd.f32 %v10006_v10, %v520_v49 }
 0x17c   :  { %v473_v62 = vadd.f32 1e-05, %v441_v53  ;;  %v442_v63 = vsub.f32 %v410_v55, %v426_v51  ;;  %v10034_v0 = vmul.f32 0.03125, %v304_v57  ;;  %v501_v3 = vmul.f32 %v9135_v56, %v453_v50 }
 0x17d   :  { %v9137_v4 = vpop.eup %9136  ;;  %8380 = vmatmul.mubr.msk.f32.gmra.mxu1 %vm271_vm1, %v540_v61  ;;  %v307_v5 = vpop.xlane.xlu1 %306  ;;  %v457_v56 = vsub.f32 %v9880_v2, %v10015_v28 }
 0x17e   :  { %9142 = vrsqrt.f32 %v473_v62  ;;  %v474_v8 = vadd.f32 1e-05, %v442_v63  ;;  %v10039_v9 = vmul.f32 0.03125, %v307_v5  ;;  %v521_v11 = vmul.f32 %v9995_v60, %v501_v3 }
 0x17f   :  { %v385_v6 = vpop.xlane.xlu0 %384  ;;  %v502_v12 = vmul.f32 %v9137_v4, %v454_v34  ;;  %v427_v13 = vmul.f32 %v10034_v0, %v10034_v0 }
 0x180   :  { %9144 = vrsqrt.f32 %v474_v8  ;;  %v411_v16 = vmul.f32 0.03125, %v385_v6  ;;  %v541_v19 = vadd.f32 %v10006_v10, %v521_v11  ;;  %v428_v24 = vmul.f32 %v10039_v9, %v10039_v9 }
 0x181   :  { %v388_v17 = vpop.xlane.xlu1 %387  ;;  %v522_v38 = vmul.f32 %v9995_v60, %v502_v12  ;;  %v458_v12 = vsub.f32 %v9888_v7, %v10021_v37  ;;  %v459_v37 = vsub.f32 %v9900_v14, %v10034_v0 }
 0x182   :  { %v443_v25 = vsub.f32 %v411_v16, %v427_v13  ;;  %v412_v26 = vmul.f32 0.03125, %v388_v17  ;;  %8382 = vmatprep.mubr.msk.f32.mxu1 %vm271_vm1, %v541_v19 }
 0x183   :  { %v9139_v27 = vpop.eup %9138  ;;  %v310_v29 = vpop.xlane.xlu0 %309  ;;  %v542_v30 = vadd.f32 %v10006_v10, %v522_v38 }
 0x184   :  { %v475_v15 = vadd.f32 1e-05, %v443_v25  ;;  %v444_v33 = vsub.f32 %v412_v26, %v428_v24  ;;  %v10052_v36 = vmul.f32 0.03125, %v310_v29  ;;  %v503_v40 = vmul.f32 %v9139_v27, %v455_v22 }
 0x185   :  { %v9141_v41 = vpop.eup %9140  ;;  %8383 = vmatmul.mubr.msk.f32.gmra.mxu1 %vm271_vm1, %v542_v30  ;;  %v313_v43 = vpop.xlane.xlu1 %312 }
 0x186   :  { %9146 = vrsqrt.f32 %v475_v15  ;;  %v476_v44 = vadd.f32 1e-05, %v444_v33  ;;  %v10057_v45 = vmul.f32 0.03125, %v313_v43  ;;  %v523_v18 = vmul.f32 %v9995_v60, %v503_v40 }
 0x187   :  { %v391_v46 = vpop.xlane.xlu0 %390  ;;  %v504_v49 = vmul.f32 %v9141_v41, %v456_v58  ;;  %v429_v50 = vmul.f32 %v10052_v36, %v10052_v36  ;;  %v460_v41 = vsub.f32 %v9911_v20, %v10039_v9 }
 0x188   :  { %9148 = vrsqrt.f32 %v476_v44  ;;  %v413_v51 = vmul.f32 0.03125, %v391_v46  ;;  %v543_v55 = vadd.f32 %v10006_v10, %v523_v18  ;;  %v430_v57 = vmul.f32 %v10057_v45, %v10057_v45 }
 0x189   :  { %v394_v53 = vpop.xlane.xlu1 %393  ;;  %v524_v1 = vmul.f32 %v9995_v60, %v504_v49 }
 0x18a   :  { %v445_v61 = vsub.f32 %v413_v51, %v429_v50  ;;  %v414_v62 = vmul.f32 0.03125, %v394_v53  ;;  %8385 = vmatprep.mubr.msk.f32.mxu1 %vm271_vm1, %v543_v55  ;;  %v461_v53 = vsub.f32 %v9929_v31, %v10052_v36 }
 0x18b   :  { %v9143_v63 = vpop.eup %9142  ;;  %v316_v3 = vpop.xlane.xlu0 %315  ;;  %v544_v4 = vadd.f32 %v10006_v10, %v524_v1  ;;  %v462_v1 = vsub.f32 %v9940_v39, %v10057_v45 }
 0x18c   :  { %v477_v34 = vadd.f32 1e-05, %v445_v61  ;;  %v446_v5 = vsub.f32 %v414_v62, %v430_v57  ;;  %v335_v8 = vmul.f32 0.03125, %v316_v3  ;;  %v505_v6 = vmul.f32 %v9143_v63, %v457_v56 }
 0x18d   :  { %v9145_v11 = vpop.eup %9144  ;;  %8386 = vmatmul.mubr.msk.f32.gmra.mxu1 %vm271_vm1, %v544_v4  ;;  %v319_v28 = vpop.xlane.xlu1 %318 }
 0x18e   :  { %9150 = vrsqrt.f32 %v477_v34  ;;  %v478_v13 = vadd.f32 1e-05, %v446_v5  ;;  %v336_v16 = vmul.f32 0.03125, %v319_v28  ;;  %v525_v19 = vmul.f32 %v9995_v60, %v505_v6 }
 0x18f   :  { %v397_v17 = vpop.xlane.xlu0 %396  ;;  %v506_v38 = vmul.f32 %v9145_v11, %v458_v12  ;;  %v431_v22 = vmul.f32 %v335_v8, %v335_v8  ;;  %v463_v36 = vsub.f32 %v9952_v48, %v335_v8 }
 0x190   :  { %9152 = vrsqrt.f32 %v478_v13  ;;  %v415_v24 = vmul.f32 0.03125, %v397_v17  ;;  %v545_v26 = vadd.f32 %v10006_v10, %v525_v19  ;;  %v432_v29 = vmul.f32 %v336_v16, %v336_v16 }
 0x191   :  { %v400_v25 = vpop.xlane.xlu1 %399  ;;  %v526_v27 = vmul.f32 %v9995_v60, %v506_v38  ;;  %v464_v45 = vsub.f32 %v9960_v52, %v336_v16  ;;  %v7465_v16 = vld [vmem:[%s13104_s7 + $0x2] ss:$0 sm:$0xff] }
 0x192   :  { %v447_v30 = vsub.f32 %v415_v24, %v431_v22  ;;  %v416_v15 = vmul.f32 0.03125, %v400_v25  ;;  %8388 = vmatprep.mubr.msk.f32.mxu1 %vm271_vm1, %v545_v26 }
 0x193   :  { %v9147_v33 = vpop.eup %9146  ;;  %v546_v40 = vadd.f32 %v10006_v10, %v526_v27 }
 0x194   :  { %v479_v58 = vadd.f32 1e-05, %v447_v30  ;;  %v448_v43 = vsub.f32 %v416_v15, %v432_v29  ;;  %v507_v44 = vmul.f32 %v9147_v33, %v459_v37 }
 0x195   :  { %v9149_v46 = vpop.eup %9148  ;;  %8389 = vmatmul.mubr.msk.f32.gmra.mxu1 %vm271_vm1, %v546_v40 }
 0x196   :  { %9154 = vrsqrt.f32 %v479_v58  ;;  %v480_v18 = vadd.f32 1e-05, %v448_v43  ;;  %v527_v0 = vmul.f32 %v9995_v60, %v507_v44  ;;  %v508_v49 = vmul.f32 %v9149_v46, %v460_v41 }
 0x198   :  { %9156 = vrsqrt.f32 %v480_v18  ;;  %v547_v50 = vadd.f32 %v10006_v10, %v527_v0  ;;  %v528_v51 = vmul.f32 %v9995_v60, %v508_v49 }
 0x19a   :  { %8391 = vmatprep.mubr.msk.f32.mxu1 %vm271_vm1, %v547_v50  ;;  %v548_v9 = vadd.f32 %v10006_v10, %v528_v51 }
 0x19b   :  { %v9151_v55 = vpop.eup %9150 }
 0x19c   :  { %8392 = vmatmul.mubr.msk.f32.gmra.mxu1 %vm271_vm1, %v548_v9  ;;  %v509_v56 = vmul.f32 %v9151_v55, %v461_v53 }
 0x19d   :  { %v9153_v57 = vpop.eup %9152 }
 0x19e   :  { %v529_v61 = vmul.f32 %v9995_v60, %v509_v56  ;;  %v510_v62 = vmul.f32 %v9153_v57, %v462_v1 }
 0x1a0   :  { %v549_v63 = vadd.f32 %v10006_v10, %v529_v61  ;;  %v530_v3 = vmul.f32 %v9995_v60, %v510_v62 }
 0x1a2   :  { %8394 = vmatprep.mubr.msk.f32.mxu1 %vm271_vm1, %v549_v63  ;;  %v550_v4 = vadd.f32 %v10006_v10, %v530_v3 }
 0x1a3   :  { %v9155_v34 = vpop.eup %9154 }
 0x1a4   :  { %8395 = vmatmul.mubr.msk.f32.gmra.mxu1 %vm271_vm1, %v550_v4  ;;  %v511_v5 = vmul.f32 %v9155_v34, %v463_v36 }
 0x1a5   :  { %v9157_v6 = vpop.eup %9156 }
 0x1a6   :  { %v531_v11 = vmul.f32 %v9995_v60, %v511_v5  ;;  %v512_v12 = vmul.f32 %v9157_v6, %v464_v45 }
 0x1a8   :  { %v551_v28 = vadd.f32 %v10006_v10, %v531_v11  ;;  %v532_v13 = vmul.f32 %v9995_v60, %v512_v12 }
 0x1aa   :  { %8397 = vmatprep.mubr.msk.f32.mxu1 %vm271_vm1, %v551_v28  ;;  %v552_v8 = vadd.f32 %v10006_v10, %v532_v13 }
 0x1ac   :  { %8398 = vmatmul.mubr.msk.f32.gmra.mxu1 %vm271_vm1, %v552_v8 }
 0x235   :  { %v8378_v17 = vpop.f32.mrf.mxu1 }
 0x236   :  { %v10138_v43 = vadd.f32 %v8378_v17, %v7465_v16 }
 0x237   :  { %v675_v19 = vpop.f32.mrf.mxu1 }
 0x238   :  { %v10110_v38 = vadd.f32 %v7465_v16, %v675_v19 }
 0x23a   :  { %8416 = vmatprep.mubr.msk.f32.mxu0 %vm69_vm0, %v10110_v38 }
 0x23d   :  { %v8381_v22 = vpop.f32.mrf.mxu1 }
 0x23e   :  { %v10120_v29 = vadd.f32 %v8381_v22, %v7465_v16 }
 0x23f   :  { %v685_v24 = vpop.f32.mrf.mxu1 }
 0x240   :  { %v10128_v33 = vadd.f32 %v7465_v16, %v685_v24 }
 0x245   :  { %v8384_v60 = vpop.f32.mrf.mxu1 }
 0x246   :  { %v10124_v30 = vadd.f32 %v8384_v60, %v7465_v16 }
 0x247   :  { %v695_v25 = vpop.f32.mrf.mxu1 }
 0x248   :  { %v10132_v41 = vadd.f32 %v7465_v16, %v695_v25 }
 0x24d   :  { %v8387_v26 = vpop.f32.mrf.mxu1 }
 0x24e   :  { %v10114_v27 = vadd.f32 %v8387_v26, %v7465_v16 }
 0x24f   :  { %v705_v10 = vpop.f32.mrf.mxu1 }
 0x250   :  { %v10116_v37 = vadd.f32 %v7465_v16, %v705_v10  ;;  %776 = vrot.lane.b32.xlu0 %v10114_v27, %s9670_s28 }
 0x252   :  { %774 = vrot.lane.b32.xlu1 %v10116_v37, %s9670_s28 }
 0x254   :  { %768 = vrot.lane.b32.xlu0 %v10120_v29, %s9670_s28 }
 0x255   :  { %v8390_v15 = vpop.f32.mrf.mxu1 }
 0x256   :  { %772 = vrot.lane.b32.xlu1 %v10124_v30, %s9670_s28  ;;  %v10152_v0 = vadd.f32 %v8390_v15, %v7465_v16 }
 0x257   :  { %v715_v40 = vpop.f32.mrf.mxu1 }
 0x258   :  { %v10134_v58 = vadd.f32 %v7465_v16, %v715_v40  ;;  %766 = vrot.lane.b32.xlu0 %v10128_v33, %s9670_s28 }
 0x25a   :  { %770 = vrot.lane.b32.xlu1 %v10132_v41, %s9670_s28  ;;  %8444 = vmatprep.mubr.msk.f32.mxu1 %vm69_vm0, %v10134_v58 }
 0x25c   :  { %764 = vrot.lane.b32.xlu0 %v10138_v43, %s9670_s28  ;;  %v8393_v44 = vpop.f32.mrf.mxu1 }
 0x25d   :  { %v10148_v46 = vadd.f32 %v8393_v44, %v7465_v16 }
 0x25e   :  { %v725_v18 = vpop.f32.mrf.mxu1 }
 0x25f   :  { %v10182_v57 = vadd.f32 %v7465_v16, %v725_v18 }
 0x260   :  { %762 = vrot.lane.b32.xlu0 %v10110_v38, %s9670_s28 }
 0x264   :  { %929 = vrot.lane.b32.xlu0 %v10148_v46, %s9670_s28  ;;  %v8396_v49 = vpop.f32.mrf.mxu1 }
 0x265   :  { %v10170_v1 = vadd.f32 %v8396_v49, %v7465_v16 }
 0x266   :  { %v735_v50 = vpop.f32.mrf.mxu1 }
 0x267   :  { %v10176_v56 = vadd.f32 %v7465_v16, %v735_v50 }
 0x268   :  { %925 = vrot.lane.b32.xlu0 %v10152_v0, %s9670_s28 }
 0x26c   :  { %1267 = vrot.lane.b32.xlu0 %v10114_v27, %s9671_s29  ;;  %v8399_v51 = vpop.f32.mrf.mxu1 }
 0x26d   :  { %v10158_v53 = vadd.f32 %v8399_v51, %v7465_v16 }
 0x26e   :  { %v745_v9 = vpop.f32.mrf.mxu1 }
 0x26f   :  { %937 = vrot.lane.b32.xlu1 %v10158_v53, %s9670_s28  ;;  %v10164_v55 = vadd.f32 %v7465_v16, %v745_v9 }
 0x270   :  { %1263 = vrot.lane.b32.xlu0 %v10124_v30, %s9671_s29 }
 0x273   :  { %935 = vrot.lane.b32.xlu1 %v10164_v55, %s9670_s28 }
 0x274   :  { %1259 = vrot.lane.b32.xlu0 %v10120_v29, %s9671_s29 }
 0x277   :  { %933 = vrot.lane.b32.xlu1 %v10170_v1, %s9670_s28 }
 0x278   :  { %1253 = vrot.lane.b32.xlu0 %v10110_v38, %s9671_s29 }
 0x27b   :  { %931 = vrot.lane.b32.xlu1 %v10176_v56, %s9670_s28 }
 0x27c   :  { %1589 = vrot.lane.b32.xlu0 %v10114_v27, %s9672_s30 }
 0x27f   :  { %927 = vrot.lane.b32.xlu1 %v10182_v57, %s9670_s28 }
 0x280   :  { %1412 = vrot.lane.b32.xlu0 %v10148_v46, %s9671_s29 }
 0x283   :  { %923 = vrot.lane.b32.xlu1 %v10134_v58, %s9670_s28 }
 0x284   :  { %1410 = vrot.lane.b32.xlu0 %v10182_v57, %s9671_s29 }
 0x287   :  { %1265 = vrot.lane.b32.xlu1 %v10116_v37, %s9671_s29 }
 0x288   :  { %1408 = vrot.lane.b32.xlu0 %v10152_v0, %s9671_s29 }
 0x28b   :  { %1261 = vrot.lane.b32.xlu1 %v10132_v41, %s9671_s29 }
 0x28c   :  { %1581 = vrot.lane.b32.xlu0 %v10120_v29, %s9672_s30 }
 0x28f   :  { %1257 = vrot.lane.b32.xlu1 %v10128_v33, %s9671_s29 }
 0x290   :  { %1579 = vrot.lane.b32.xlu0 %v10128_v33, %s9672_s30 }
 0x293   :  { %1255 = vrot.lane.b32.xlu1 %v10138_v43, %s9671_s29 }
 0x294   :  { %1577 = vrot.lane.b32.xlu0 %v10138_v43, %s9672_s30 }
 0x297   :  { %1420 = vrot.lane.b32.xlu1 %v10158_v53, %s9671_s29 }
 0x298   :  { %1575 = vrot.lane.b32.xlu0 %v10110_v38, %s9672_s30 }
 0x29b   :  { %1416 = vrot.lane.b32.xlu1 %v10170_v1, %s9671_s29 }
 0x29c   :  { %1559 = vrot.lane.b32.xlu0 %v10110_v38, %s9673_s0 }
 0x29f   :  { %1587 = vrot.lane.b32.xlu1 %v10116_v37, %s9672_s30 }
 0x2a0   :  { %1750 = vrot.lane.b32.xlu0 %v10148_v46, %s9672_s30 }
 0x2a3   :  { %1414 = vrot.lane.b32.xlu1 %v10176_v56, %s9671_s29 }
 0x2a4   :  { %1565 = vrot.lane.b32.xlu0 %v10120_v29, %s9673_s0 }
 0x2a7   :  { %1585 = vrot.lane.b32.xlu1 %v10124_v30, %s9672_s30 }
 0x2ab   :  { %1583 = vrot.lane.b32.xlu1 %v10132_v41, %s9672_s30 }
 0x2af   :  { %1406 = vrot.lane.b32.xlu1 %v10134_v58, %s9671_s29 }
 0x2b3   :  { %1758 = vrot.lane.b32.xlu1 %v10158_v53, %s9672_s30 }
 0x2b7   :  { %1754 = vrot.lane.b32.xlu1 %v10170_v1, %s9672_s30 }
 0x2bb   :  { %1752 = vrot.lane.b32.xlu1 %v10176_v56, %s9672_s30 }
 0x2bf   :  { %1561 = vrot.lane.b32.xlu1 %v10138_v43, %s9673_s0 }
 0x2c2   :  { %v777_v61 = vpop.permute.xlu0 %776 }
 0x2c3   :  { %8400 = vmatprep.subr.msk.mxu0 %vm69_vm0, %v777_v61  ;;  %1563 = vrot.lane.b32.xlu1 %v10128_v33, %s9673_s0 }
 0x2c4   :  { %v775_v62 = vpop.permute.xlu1 %774  ;;  %8401 = vmatpush3.xpose.msk.msra.mxu0 %vm69_vm0, %v777_v61 }
 0x2c5   :  { %8402 = vmatprep.subr.msk.mxu0 %vm69_vm0, %v775_v62 }
 0x2c6   :  { %v769_v63 = vpop.permute.xlu0 %768 }
 0x2c7   :  { %1748 = vrot.lane.b32.xlu1 %v10182_v57, %s9672_s30 }
 0x2c8   :  { %v773_v3 = vpop.permute.xlu1 %772  ;;  %8403 = vmatpush3.xpose.msk.msra.mxu0 %vm69_vm0, %v775_v62 }
 0x2c9   :  { %8404 = vmatprep.subr.msk.mxu0 %vm69_vm0, %v773_v3 }
 0x2ca   :  { %v767_v36 = vpop.permute.xlu0 %766 }
 0x2cb   :  { %1418 = vrot.lane.b32.xlu1 %v10164_v55, %s9671_s29 }
 0x2cc   :  { %v771_v4 = vpop.permute.xlu1 %770  ;;  %8405 = vmatpush3.xpose.msk.msra.mxu0 %vm69_vm0, %v773_v3 }
 0x2cd   :  { %8406 = vmatprep.subr.msk.mxu0 %vm69_vm0, %v771_v4 }
 0x2ce   :  { %v765_v34 = vpop.permute.xlu0 %764 }
 0x2cf   :  { %1756 = vrot.lane.b32.xlu1 %v10164_v55, %s9672_s30 }
 0x2d0   :  { %8407 = vmatpush3.xpose.msk.msra.mxu0 %vm69_vm0, %v771_v4 }
 0x2d1   :  { %8408 = vmatprep.subr.msk.mxu0 %vm69_vm0, %v769_v63 }
 0x2d2   :  { %v763_v45 = vpop.permute.xlu0 %762 }
 0x2d4   :  { %8409 = vmatpush3.xpose.msk.msra.mxu0 %vm69_vm0, %v769_v63 }
 0x2d5   :  { %8410 = vmatprep.subr.msk.mxu0 %vm69_vm0, %v767_v36 }
 0x2d6   :  { %v930_v5 = vpop.permute.xlu0 %929 }
 0x2d8   :  { %8411 = vmatpush3.xpose.msk.msra.mxu0 %vm69_vm0, %v767_v36 }
 0x2d9   :  { %8412 = vmatprep.subr.msk.mxu0 %vm69_vm0, %v765_v34 }
 0x2da   :  { %v926_v6 = vpop.permute.xlu0 %925 }
 0x2dc   :  { %8413 = vmatpush3.xpose.msk.msra.mxu0 %vm69_vm0, %v765_v34 }
 0x2dd   :  { %8414 = vmatprep.subr.msk.mxu0 %vm69_vm0, %v763_v45 }
 0x2de   :  { %v1268_v11 = vpop.permute.xlu0 %1267 }
 0x2e0   :  { %8415 = vmatpush3.xpose.msk.msra.mxu0 %vm69_vm0, %v763_v45 }
 0x2e1   :  { %8456 = vmatprep.subr.mxu0 %v1268_v11  ;;  %v938_v12 = vpop.permute.xlu1 %937 }
 0x2e2   :  { %8428 = vmatprep.subr.msk.mxu1 %vm69_vm0, %v938_v12  ;;  %v1264_v19 = vpop.permute.xlu0 %1263 }
 0x2e3   :  { %8417 = vmatmul.mubr.msk.f32.vlgmr.msra.gmra.mxu0 %vm69_vm0, %v10138_v43  ;;  %8429 = vmatpush3.xpose.msk.msra.mxu1 %vm69_vm0, %v938_v12 }
 0x2e4   :  { %8419 = vmatprep.mubr.msk.f32.mxu0 %vm69_vm0, %v10128_v33  ;;  %8457 = vmatpush3.msra.mxu0 %v1268_v11 }
 0x2e5   :  { %v936_v28 = vpop.permute.xlu1 %935 }
 0x2e6   :  { %8430 = vmatprep.subr.msk.mxu1 %vm69_vm0, %v936_v28  ;;  %v1260_v60 = vpop.permute.xlu0 %1259 }
 0x2e7   :  { %8420 = vmatmul.mubr.msk.f32.gmra.mxu0 %vm69_vm0, %v10120_v29  ;;  %8431 = vmatpush3.xpose.msk.msra.mxu1 %vm69_vm0, %v936_v28 }
 0x2e8   :  { %8422 = vmatprep.mubr.msk.f32.mxu0 %vm69_vm0, %v10132_v41 }
 0x2e9   :  { %v934_v13 = vpop.permute.xlu1 %933 }
 0x2ea   :  { %8432 = vmatprep.subr.msk.mxu1 %vm69_vm0, %v934_v13  ;;  %v1254_v26 = vpop.permute.xlu0 %1253 }
 0x2eb   :  { %8423 = vmatmul.mubr.msk.f32.gmra.mxu0 %vm69_vm0, %v10124_v30  ;;  %8433 = vmatpush3.xpose.msk.msra.mxu1 %vm69_vm0, %v934_v13 }
 0x2ec   :  { %8425 = vmatprep.mubr.msk.f32.mxu0 %vm69_vm0, %v10116_v37 }
 0x2ed   :  { %v932_v8 = vpop.permute.xlu1 %931 }
 0x2ee   :  { %8434 = vmatprep.subr.msk.mxu1 %vm69_vm0, %v932_v8  ;;  %v10300_v40 = vpop.permute.xlu0 %1589 }
 0x2ef   :  { %8426 = vmatmul.mubr.msk.f32.gmra.mxu0 %vm69_vm0, %v10114_v27  ;;  %8435 = vmatpush3.xpose.msk.msra.mxu1 %vm69_vm0, %v932_v8 }
 0x2f0   :  { %8436 = vmatprep.subr.msk.mxu1 %vm69_vm0, %v930_v5 }
 0x2f1   :  { %v928_v17 = vpop.permute.xlu1 %927 }
 0x2f2   :  { %v1413_v34 = vpop.permute.xlu0 %1412 }
 0x2f3   :  { %8437 = vmatpush3.xpose.msk.msra.mxu1 %vm69_vm0, %v930_v5 }
 0x2f4   :  { %8438 = vmatprep.subr.msk.mxu1 %vm69_vm0, %v928_v17 }
 0x2f5   :  { %v924_v16 = vpop.permute.xlu1 %923 }
 0x2f6   :  { %v1411_v5 = vpop.permute.xlu0 %1410 }
 0x2f7   :  { %8439 = vmatpush3.xpose.msk.msra.mxu1 %vm69_vm0, %v928_v17 }
 0x2f8   :  { %8440 = vmatprep.subr.msk.mxu1 %vm69_vm0, %v926_v6 }
 0x2f9   :  { %v1266_v22 = vpop.permute.xlu1 %1265 }
 0x2fa   :  { %8458 = vmatprep.subr.mxu0 %v1266_v22 }
 0x2fb   :  { %8441 = vmatpush3.xpose.msk.msra.mxu1 %vm69_vm0, %v926_v6  ;;  %8459 = vmatpush3.msra.mxu0 %v1266_v22  ;;  %v1409_v6 = vpop.permute.xlu0 %1408 }
 0x2fc   :  { %8442 = vmatprep.subr.msk.mxu1 %vm69_vm0, %v924_v16  ;;  %8460 = vmatprep.subr.mxu0 %v1264_v19 }
 0x2fd   :  { %v1262_v24 = vpop.permute.xlu1 %1261  ;;  %8461 = vmatpush3.msra.mxu0 %v1264_v19 }
 0x2fe   :  { %8462 = vmatprep.subr.mxu0 %v1262_v24 }
 0x2ff   :  { %8443 = vmatpush3.xpose.msk.msra.mxu1 %vm69_vm0, %v924_v16  ;;  %8463 = vmatpush3.msra.mxu0 %v1262_v24 }
 0x300   :  { %8464 = vmatprep.subr.mxu0 %v1260_v60 }
 0x301   :  { %v1258_v25 = vpop.permute.xlu1 %1257  ;;  %8465 = vmatpush3.msra.mxu0 %v1260_v60 }
 0x302   :  { %8445 = vmatmul.mubr.msk.f32.vlgmr.msra.gmra.mxu1 %vm69_vm0, %v10152_v0  ;;  %8466 = vmatprep.subr.mxu0 %v1258_v25 }
 0x303   :  { %8447 = vmatprep.mubr.msk.f32.mxu1 %vm69_vm0, %v10182_v57  ;;  %8467 = vmatpush3.msra.mxu0 %v1258_v25 }
 0x305   :  { %v1256_v10 = vpop.permute.xlu1 %1255 }
 0x306   :  { %8448 = vmatmul.mubr.msk.f32.gmra.mxu1 %vm69_vm0, %v10148_v46  ;;  %8468 = vmatprep.subr.mxu0 %v1256_v10 }
 0x307   :  { %8450 = vmatprep.mubr.msk.f32.mxu1 %vm69_vm0, %v10176_v56  ;;  %8469 = vmatpush3.msra.mxu0 %v1256_v10 }
 0x308   :  { %8470 = vmatprep.subr.mxu0 %v1254_v26 }
 0x309   :  { %v1421_v15 = vpop.permute.xlu1 %1420  ;;  %8471 = vmatpush3.msra.mxu0 %v1254_v26 }
 0x30a   :  { %8451 = vmatmul.mubr.msk.f32.gmra.mxu1 %vm69_vm0, %v10170_v1  ;;  %8484 = vmatprep.subr.mxu1 %v1421_v15 }
 0x30b   :  { %8512 = vmatprep.subr.msk.mxu0 %vm69_vm0, %v10300_v40  ;;  %8453 = vmatprep.mubr.msk.f32.mxu1 %vm69_vm0, %v10164_v55 }
 0x30c   :  { %8485 = vmatpush3.msra.mxu1 %v1421_v15 }
 0x30d   :  { %v1417_v44 = vpop.permute.xlu1 %1416 }
 0x30e   :  { %8454 = vmatmul.mubr.msk.f32.gmra.mxu1 %vm69_vm0, %v10158_v53 }
 0x311   :  { %v10310_v18 = vpop.permute.xlu1 %1587 }
 0x315   :  { %v1415_v49 = vpop.permute.xlu1 %1414 }
 0x319   :  { %v10312_v50 = vpop.permute.xlu1 %1585 }
 0x31d   :  { %v10314_v51 = vpop.permute.xlu1 %1583 }
 0x321   :  { %v1407_v9 = vpop.permute.xlu1 %1406 }
 0x325   :  { %v10316_v61 = vpop.permute.xlu1 %1758 }
 0x329   :  { %v10318_v62 = vpop.permute.xlu1 %1754 }
 0x32d   :  { %v10320_v63 = vpop.permute.xlu1 %1752 }
 0x331   :  { %v10322_v3 = vpop.permute.xlu1 %1561 }
 0x335   :  { %v10324_v36 = vpop.permute.xlu1 %1563 }
 0x339   :  { %v10326_v4 = vpop.permute.xlu1 %1748 }
 0x33a   :  { %13161 = vst [vmem:[#allocation18_spill] sm:$0xff] %v10326_v4 }
 0x33d   :  { %v1419_v45 = vpop.permute.xlu1 %1418 }
 0x33e   :  { %8486 = vmatprep.subr.mxu1 %v1419_v45 }
 0x33f   :  { %8487 = vmatpush3.msra.mxu1 %v1419_v45 }
 0x340   :  { %8488 = vmatprep.subr.mxu1 %v1417_v44 }
 0x341   :  { %8489 = vmatpush3.msra.mxu1 %v1417_v44  ;;  %v10404_v52 = vpop.permute.xlu1 %1756 }
 0x342   :  { %8490 = vmatprep.subr.mxu1 %v1415_v49 }
 0x343   :  { %8491 = vmatpush3.msra.mxu1 %v1415_v49 }
 0x344   :  { %8492 = vmatprep.subr.mxu1 %v1413_v34 }
 0x345   :  { %8493 = vmatpush3.msra.mxu1 %v1413_v34 }
 0x346   :  { %8494 = vmatprep.subr.mxu1 %v1411_v5 }
 0x347   :  { %8495 = vmatpush3.msra.mxu1 %v1411_v5 }
 0x348   :  { %8496 = vmatprep.subr.mxu1 %v1409_v6 }
 0x349   :  { %8497 = vmatpush3.msra.mxu1 %v1409_v6 }
 0x34a   :  { %8498 = vmatprep.subr.mxu1 %v1407_v9 }
 0x34b   :  { %8499 = vmatpush3.msra.mxu1 %v1407_v9 }
 0x34c   :  { %8540 = vmatprep.subr.msk.mxu1 %vm69_vm0, %v10316_v61 }
 0x3a3   :  { %v8418_v11 = vpop.f32.mrf.mxu0 }
 0x3a4   :  { %v1080_v12 = vsel %vm1076_vm2, %v8418_v11, -inf }
 0x3a5   :  { %1081 = vmax.xlane.f32.xlu1 %v1080_v12  ;;  %v876_v28 = vpop.f32.mrf.mxu0 }
 0x3a6   :  { %v1077_v13 = vsel %vm1076_vm2, %v876_v28, -inf }
 0x3a7   :  { %1078 = vmax.xlane.f32.xlu0 %v1077_v13  ;;  %v10332_v8 = vpop.f32.mrf.mxu0 }
 0x3a8   :  { %v1086_v17 = vsel %vm1076_vm2, %v10332_v8, -inf }
 0x3a9   :  { %1087 = vmax.xlane.f32.xlu1 %v1086_v17  ;;  %v10336_v16 = vpop.f32.mrf.mxu0 }
 0x3aa   :  { %v1083_v19 = vsel %vm1076_vm2, %v10336_v16, -inf }
 0x3ab   :  { %1084 = vmax.xlane.f32.xlu0 %v1083_v19  ;;  %v10340_v22 = vpop.f32.mrf.mxu0 }
 0x3ac   :  { %v1092_v24 = vsel %vm1076_vm2, %v10340_v22, -inf }
 0x3ad   :  { %1093 = vmax.xlane.f32.xlu1 %v1092_v24  ;;  %v10344_v60 = vpop.f32.mrf.mxu0 }
 0x3ae   :  { %v1089_v25 = vsel %vm1076_vm2, %v10344_v60, -inf }
 0x3af   :  { %1090 = vmax.xlane.f32.xlu0 %v1089_v25  ;;  %v10348_v26 = vpop.f32.mrf.mxu0 }
 0x3b0   :  { %v1098_v10 = vsel %vm1076_vm2, %v10348_v26, -inf }
 0x3b1   :  { %1099 = vmax.xlane.f32.xlu1 %v1098_v10  ;;  %v10352_v15 = vpop.f32.mrf.mxu0 }
 0x3b2   :  { %v1095_v44 = vsel %vm1076_vm2, %v10352_v15, -inf }
 0x3b3   :  { %1096 = vmax.xlane.f32.xlu0 %v1095_v44 }
 0x3c2   :  { %v10356_v49 = vpop.f32.mrf.mxu1 }
 0x3c3   :  { %v1104_v9 = vsel %vm1076_vm2, %v10356_v49, -inf }
 0x3c4   :  { %1105 = vmax.xlane.f32.xlu0 %v1104_v9  ;;  %v10360_v34 = vpop.f32.mrf.mxu1 }
 0x3c5   :  { %v1101_v5 = vsel %vm1076_vm2, %v10360_v34, -inf }
 0x3c6   :  { %v10362_v45 = vpop.f32.mrf.mxu1 }
 0x3c7   :  { %v1110_v6 = vsel %vm1076_vm2, %v10362_v45, -inf }
 0x3c8   :  { %1102 = vmax.xlane.f32.xlu0 %v1101_v5  ;;  %1111 = vmax.xlane.f32.xlu1 %v1110_v6  ;;  %v10368_v12 = vpop.f32.mrf.mxu1  ;;  %v10392_v6 = vpop.permute.xlu0 %1581 }
 0x3c9   :  { %v1107_v17 = vsel %vm1076_vm2, %v10368_v12, -inf }
 0x3ca   :  { %v10370_v13 = vpop.f32.mrf.mxu1 }
 0x3cb   :  { %v1116_v19 = vsel %vm1076_vm2, %v10370_v13, -inf }
 0x3cc   :  { %1108 = vmax.xlane.f32.xlu0 %v1107_v17  ;;  %1117 = vmax.xlane.f32.xlu1 %v1116_v19  ;;  %v10376_v24 = vpop.f32.mrf.mxu1  ;;  %v10394_v17 = vpop.permute.xlu0 %1579 }
 0x3cd   :  { %v1113_v10 = vsel %vm1076_vm2, %v10376_v24, -inf }
 0x3ce   :  { %v10378_v25 = vpop.f32.mrf.mxu1 }
 0x3cf   :  { %v1122_v44 = vsel %vm1076_vm2, %v10378_v25, -inf }
 0x3d0   :  { %1114 = vmax.xlane.f32.xlu0 %v1113_v10  ;;  %1123 = vmax.xlane.f32.xlu1 %v1122_v44  ;;  %v10384_v9 = vpop.f32.mrf.mxu1  ;;  %v10396_v19 = vpop.permute.xlu0 %1577 }
 0x3d1   :  { %v1119_v5 = vsel %vm1076_vm2, %v10384_v9, -inf }
 0x3d4   :  { %1120 = vmax.xlane.f32.xlu0 %v1119_v5  ;;  %v10398_v10 = vpop.permute.xlu0 %1575 }
 0x3d8   :  { %v10400_v44 = vpop.permute.xlu0 %1559 }
 0x3dc   :  { %v10402_v48 = vpop.permute.xlu0 %1750 }
 0x3e0   :  { %v10406_v5 = vpop.permute.xlu0 %1565 }
 0x3e1   :  { %1569 = vrot.lane.b32.xlu1 %v10124_v30, %s9673_s0 }
 0x3ea   :  { %1567 = vrot.lane.b32.xlu0 %v10132_v41, %s9673_s0 }
 0x42e   :  { %v1082_v31 = vpop.xlane.xlu1 %1081 }
 0x42f   :  { %v1126_v39 = vsub.f32 %v8418_v11, %v1082_v31 }
 0x430   :  { %v1079_v14 = vpop.xlane.xlu0 %1078 }
 0x431   :  { %v1143_v20 = vmul.f32 1.442695, %v1126_v39  ;;  %v1125_v2 = vsub.f32 %v876_v28, %v1079_v14 }
 0x432   :  { %v1088_v7 = vpop.xlane.xlu1 %1087 }
 0x433   :  { %9158 = vpow2.f32 %v1143_v20  ;;  %v1141_v54 = vmul.f32 1.442695, %v1125_v2  ;;  %v1128_v59 = vsub.f32 %v10332_v8, %v1088_v7 }
 0x434   :  { %v1085_v42 = vpop.xlane.xlu0 %1084 }
 0x435   :  { %9160 = vpow2.f32 %v1141_v54  ;;  %v1147_v47 = vmul.f32 1.442695, %v1128_v59  ;;  %v1127_v32 = vsub.f32 %v10336_v16, %v1085_v42 }
 0x436   :  { %v1094_v35 = vpop.xlane.xlu1 %1093 }
 0x437   :  { %9162 = vpow2.f32 %v1147_v47  ;;  %v1145_v23 = vmul.f32 1.442695, %v1127_v32  ;;  %v1130_v21 = vsub.f32 %v10340_v22, %v1094_v35 }
 0x438   :  { %v1091_v4 = vpop.xlane.xlu0 %1090 }
 0x439   :  { %v1129_v31 = vsub.f32 %v10344_v60, %v1091_v4  ;;  %9164 = vpow2.f32 %v1145_v23  ;;  %v1151_v14 = vmul.f32 1.442695, %v1130_v21 }
 0x43a   :  { %v1100_v39 = vpop.xlane.xlu1 %1099 }
 0x43b   :  { %v1149_v20 = vmul.f32 1.442695, %v1129_v31  ;;  %v1132_v2 = vsub.f32 %v10348_v26, %v1100_v39 }
 0x43c   :  { %v1097_v7 = vpop.xlane.xlu0 %1096 }
 0x43d   :  { %9166 = vpow2.f32 %v1149_v20  ;;  %v1131_v54 = vsub.f32 %v10352_v15, %v1097_v7  ;;  %v1155_v42 = vmul.f32 1.442695, %v1132_v2 }
 0x43e   :  { %9168 = vpow2.f32 %v1151_v14 }
 0x43f   :  { %v1153_v59 = vmul.f32 1.442695, %v1131_v54 }
 0x440   :  { %v10414_v47 = vpop.eup %9158 }
 0x441   :  { %9170 = vpow2.f32 %v1153_v59  ;;  %v1176_v32 = vsel %vm1076_vm2, %v10414_v47, 0.0 }
 0x442   :  { %v10418_v35 = vpop.eup %9160  ;;  %1177 = vadd.xlane.f32.xlu1 %v1176_v32  ;;  %9172 = vpow2.f32 %v1155_v42 }
 0x443   :  { %v1173_v21 = vsel %vm1076_vm2, %v10418_v35, 0.0 }
 0x444   :  { %v10422_v23 = vpop.eup %9162  ;;  %1174 = vadd.xlane.f32.xlu0 %v1173_v21 }
 0x445   :  { %v1182_v4 = vsel %vm1076_vm2, %v10422_v23, 0.0 }
 0x446   :  { %v10426_v11 = vpop.eup %9164 }
 0x447   :  { %v1179_v8 = vsel %vm1076_vm2, %v10426_v11, 0.0 }
 0x448   :  { %1183 = vadd.xlane.f32.xlu0 %v1182_v4 }
 0x44a   :  { %v10428_v28 = vpop.eup %9166 }
 0x44b   :  { %v1185_v16 = vsel %vm1076_vm2, %v10428_v28, 0.0  ;;  %v10434_v22 = vpop.eup %9168 }
 0x44c   :  { %1180 = vadd.xlane.f32.xlu0 %v1179_v8  ;;  %1186 = vadd.xlane.f32.xlu1 %v1185_v16  ;;  %v1188_v31 = vsel %vm1076_vm2, %v10434_v22, 0.0 }
 0x44d   :  { %v1106_v60 = vpop.xlane.xlu0 %1105 }
 0x44e   :  { %v10436_v26 = vpop.eup %9170  ;;  %v1134_v15 = vsub.f32 %v10356_v49, %v1106_v60 }
 0x44f   :  { %v1191_v39 = vsel %vm1076_vm2, %v10436_v26, 0.0  ;;  %v10443_v14 = vpop.eup %9172 }
 0x450   :  { %v1159_v20 = vmul.f32 1.442695, %v1134_v15  ;;  %1189 = vadd.xlane.f32.xlu0 %v1188_v31  ;;  %1192 = vadd.xlane.f32.xlu1 %v1191_v39  ;;  %v1194_v54 = vsel %vm1076_vm2, %v10443_v14, 0.0 }
 0x451   :  { %v1103_v2 = vpop.xlane.xlu0 %1102 }
 0x452   :  { %9174 = vpow2.f32 %v1159_v20  ;;  %v1133_v7 = vsub.f32 %v10360_v34, %v1103_v2  ;;  %v1112_v34 = vpop.xlane.xlu1 %1111 }
 0x453   :  { %v1136_v39 = vsub.f32 %v10362_v45, %v1112_v34 }
 0x454   :  { %v1157_v42 = vmul.f32 1.442695, %v1133_v7  ;;  %1195 = vadd.xlane.f32.xlu0 %v1194_v54 }
 0x455   :  { %v1109_v4 = vpop.xlane.xlu0 %1108  ;;  %v1163_v54 = vmul.f32 1.442695, %v1136_v39 }
 0x456   :  { %9176 = vpow2.f32 %v1157_v42  ;;  %v1135_v16 = vsub.f32 %v10368_v12, %v1109_v4  ;;  %v1118_v60 = vpop.xlane.xlu1 %1117 }
 0x457   :  { %v1138_v15 = vsub.f32 %v10370_v13, %v1118_v60 }
 0x458   :  { %v1161_v31 = vmul.f32 1.442695, %v1135_v16 }
 0x459   :  { %v1115_v8 = vpop.xlane.xlu0 %1114  ;;  %v1167_v2 = vmul.f32 1.442695, %v1138_v15 }
 0x45a   :  { %9178 = vpow2.f32 %v1161_v31  ;;  %v1137_v42 = vsub.f32 %v10376_v24, %v1115_v8 }
 0x45b   :  { %9180 = vpow2.f32 %v1167_v2 }
 0x45c   :  { %9182 = vpow2.f32 %v1163_v54  ;;  %v1165_v4 = vmul.f32 1.442695, %v1137_v42 }
 0x45d   :  { %v1121_v20 = vpop.xlane.xlu0 %1120 }
 0x45e   :  { %v1139_v7 = vsub.f32 %v10384_v9, %v1121_v20 }
 0x45f   :  { %v10448_v49 = vpop.eup %9174 }
 0x460   :  { %v1200_v59 = vsel %vm1076_vm2, %v10448_v49, 0.0 }
 0x461   :  { %1201 = vadd.xlane.f32.xlu0 %v1200_v59  ;;  %v1124_v59 = vpop.xlane.xlu1 %1123 }
 0x462   :  { %v1140_v12 = vsub.f32 %v10378_v25, %v1124_v59 }
 0x463   :  { %v10452_v32 = vpop.eup %9176 }
 0x464   :  { %v1197_v21 = vsel %vm1076_vm2, %v10452_v32, 0.0  ;;  %v1171_v13 = vmul.f32 1.442695, %v1140_v12 }
 0x465   :  { %1198 = vadd.xlane.f32.xlu1 %v1197_v21  ;;  %v1169_v21 = vmul.f32 1.442695, %v1139_v7  ;;  %v10510_v2 = vpop.permute.xlu1 %1569  ;;  %v10516_v7 = vpop.permute.xlu0 %1567 }
 0x467   :  { %9184 = vpow2.f32 %v1169_v21  ;;  %v10466_v16 = vpop.eup %9178 }
 0x468   :  { %9186 = vpow2.f32 %v1165_v4  ;;  %v1203_v45 = vsel %vm1076_vm2, %v10466_v16, 0.0  ;;  %v10470_v9 = vpop.eup %9180 }
 0x469   :  { %9188 = vpow2.f32 %v1171_v13  ;;  %v10472_v24 = vpop.eup %9182  ;;  %v1212_v34 = vsel %vm1076_vm2, %v10470_v9, 0.0 }
 0x46a   :  { %v1206_v25 = vsel %vm1076_vm2, %v10472_v24, 0.0 }
 0x474   :  { %v10476_v8 = vpop.eup %9184 }
 0x475   :  { %v10480_v60 = vpop.eup %9186  ;;  %v1215_v15 = vsel %vm1076_vm2, %v10476_v8, 0.0 }
 0x476   :  { %1571 = vrot.lane.b32.xlu1 %v10116_v37, %s9673_s0  ;;  %v1209_v31 = vsel %vm1076_vm2, %v10480_v60, 0.0  ;;  %v10486_v39 = vpop.eup %9188 }
 0x477   :  { %1746 = vrot.lane.b32.xlu0 %v10152_v0, %s9672_s30  ;;  %v1218_v20 = vsel %vm1076_vm2, %v10486_v39, 0.0 }
 0x496   :  { %1204 = vadd.xlane.f32.xlu0 %v1203_v45 }
 0x49a   :  { %1213 = vadd.xlane.f32.xlu0 %v1212_v34  ;;  %1207 = vadd.xlane.f32.xlu1 %v1206_v25 }
 0x49e   :  { %1216 = vadd.xlane.f32.xlu0 %v1215_v15  ;;  %1210 = vadd.xlane.f32.xlu1 %v1209_v31 }
 0x4a2   :  { %1219 = vadd.xlane.f32.xlu1 %v1218_v20 }
 0x4b3   :  { %1744 = vrot.lane.b32.xlu1 %v10134_v58, %s9672_s30 }
 0x4b4   :  { %1573 = vrot.lane.b32.xlu0 %v10114_v27, %s9673_s0 }
 0x4b7   :  { %1730 = vrot.lane.b32.xlu1 %v10152_v0, %s9673_s0 }
 0x4b8   :  { %1728 = vrot.lane.b32.xlu0 %v10134_v58, %s9673_s0 }
 0x4bb   :  { %1734 = vrot.lane.b32.xlu1 %v10148_v46, %s9673_s0 }
 0x4bc   :  { %1732 = vrot.lane.b32.xlu0 %v10182_v57, %s9673_s0 }
 0x4bf   :  { %1738 = vrot.lane.b32.xlu1 %v10170_v1, %s9673_s0 }
 0x4c0   :  { %1736 = vrot.lane.b32.xlu0 %v10176_v56, %s9673_s0 }
 0x4c3   :  { %1742 = vrot.lane.b32.xlu1 %v10158_v53, %s9673_s0 }
 0x4c4   :  { %1740 = vrot.lane.b32.xlu0 %v10164_v55, %s9673_s0 }
 0x4c7   :  { %2085 = vrot.lane.b32.xlu1 %v10116_v37, %s9674_s11 }
 0x4c8   :  { %2087 = vrot.lane.b32.xlu0 %v10114_v27, %s9674_s11 }
 0x4cb   :  { %v1178_v54 = vpop.xlane.xlu1 %1177  ;;  %2081 = vrot.lane.b32.xlu1 %v10132_v41, %s9674_s11 }
 0x4cc   :  { %2083 = vrot.lane.b32.xlu0 %v10124_v30, %s9674_s11  ;;  %9190 = vrcp.f32 %v1178_v54 }
 0x4cd   :  { %v1175_v42 = vpop.xlane.xlu0 %1174 }
 0x4ce   :  { %9192 = vrcp.f32 %v1175_v42 }
 0x4cf   :  { %2077 = vrot.lane.b32.xlu1 %v10128_v33, %s9674_s11 }
 0x4d0   :  { %2079 = vrot.lane.b32.xlu0 %v10120_v29, %s9674_s11 }
 0x4d1   :  { %v1184_v37 = vpop.xlane.xlu0 %1183 }
 0x4d2   :  { %9194 = vrcp.f32 %v1184_v37 }
 0x4d3   :  { %2073 = vrot.lane.b32.xlu1 %v10110_v38, %s9674_s11 }
 0x4d4   :  { %2075 = vrot.lane.b32.xlu0 %v10138_v43, %s9674_s11 }
 0x4d5   :  { %v1187_v27 = vpop.xlane.xlu1 %1186  ;;  %v1181_v41 = vpop.xlane.xlu0 %1180 }
 0x4d6   :  { %9196 = vrcp.f32 %v1187_v27 }
 0x4d7   :  { %9198 = vrcp.f32 %v1181_v41  ;;  %2238 = vrot.lane.b32.xlu1 %v10164_v55, %s9674_s11 }
 0x4d8   :  { %2240 = vrot.lane.b32.xlu0 %v10158_v53, %s9674_s11 }
 0x4d9   :  { %v1193_v30 = vpop.xlane.xlu1 %1192  ;;  %v1190_v29 = vpop.xlane.xlu0 %1189 }
 0x4da   :  { %v9191_v33 = vpop.eup %9190  ;;  %9200 = vrcp.f32 %v1193_v30 }
 0x4db   :  { %v9193_v59 = vpop.eup %9192  ;;  %9202 = vrcp.f32 %v1190_v29  ;;  %2236 = vrot.lane.b32.xlu1 %v10170_v1, %s9674_s11  ;;  %v1238_v43 = vmul.f32 %v9191_v33, %v10414_v47 }
 0x4dc   :  { %v1237_v38 = vmul.f32 %v9193_v59, %v10418_v35 }
 0x4dd   :  { %v1196_v21 = vpop.xlane.xlu0 %1195 }
 0x4de   :  { %9204 = vrcp.f32 %v1196_v21  ;;  %8472 = vmatprep.mubr.msk.f32.mxu0 %vm1076_vm2, %v1237_v38 }
 0x4df   :  { %8473 = vmatmul.mubr.msk.f32.vlgmr.msra.gmra.mxu0 %vm1076_vm2, %v1238_v43  ;;  %2234 = vrot.lane.b32.xlu1 %v10176_v56, %s9674_s11  ;;  %v9195_v53 = vpop.eup %9194 }
 0x4e0   :  { %8513 = vmatpush3.xpose.msk.msra.mxu0 %vm69_vm0, %v10300_v40  ;;  %v1240_v35 = vmul.f32 %v9195_v53, %v10422_v23 }
 0x4e1   :  { %8514 = vmatprep.subr.msk.mxu0 %vm69_vm0, %v10310_v18 }
 0x4e3   :  { %v9197_v55 = vpop.eup %9196 }
 0x4e4   :  { %v9199_v1 = vpop.eup %9198  ;;  %8515 = vmatpush3.xpose.msk.msra.mxu0 %vm69_vm0, %v10310_v18  ;;  %v1241_v56 = vmul.f32 %v9197_v55, %v10428_v28 }
 0x4e5   :  { %8516 = vmatprep.subr.msk.mxu0 %vm69_vm0, %v10312_v50  ;;  %v1239_v47 = vmul.f32 %v9199_v1, %v10426_v11 }
 0x4e7   :  { %v9201_v40 = vpop.eup %9200  ;;  %8475 = vmatprep.mubr.msk.f32.mxu0 %vm1076_vm2, %v1239_v47 }
 0x4e8   :  { %v9203_v12 = vpop.eup %9202  ;;  %8476 = vmatmul.mubr.msk.f32.gmra.mxu0 %vm1076_vm2, %v1240_v35  ;;  %v1243_v23 = vmul.f32 %v9201_v40, %v10436_v26 }
 0x4e9   :  { %8517 = vmatpush3.xpose.msk.msra.mxu0 %vm69_vm0, %v10312_v50  ;;  %8478 = vmatprep.mubr.msk.f32.mxu0 %vm1076_vm2, %v1241_v56  ;;  %v1242_v18 = vmul.f32 %v9203_v12, %v10434_v22 }
 0x4ea   :  { %8518 = vmatprep.subr.msk.mxu0 %vm69_vm0, %v10314_v51  ;;  %v1202_v4 = vpop.xlane.xlu0 %1201 }
 0x4eb   :  { %v9205_v11 = vpop.eup %9204  ;;  %9206 = vrcp.f32 %v1202_v4 }
 0x4ec   :  { %8479 = vmatmul.mubr.msk.f32.gmra.mxu0 %vm1076_vm2, %v1242_v18  ;;  %v1244_v28 = vmul.f32 %v9205_v11, %v10443_v14 }
 0x4ed   :  { %8519 = vmatpush3.xpose.msk.msra.mxu0 %vm69_vm0, %v10314_v51  ;;  %8481 = vmatprep.mubr.msk.f32.mxu0 %vm1076_vm2, %v1243_v23 }
 0x4ee   :  { %8520 = vmatprep.subr.msk.mxu0 %vm69_vm0, %v10392_v6  ;;  %v1199_v50 = vpop.xlane.xlu1 %1198 }
 0x4ef   :  { %9208 = vrcp.f32 %v1199_v50 }
 0x4f0   :  { %8482 = vmatmul.mubr.msk.f32.gmra.mxu0 %vm1076_vm2, %v1244_v28 }
 0x4f1   :  { %8521 = vmatpush3.xpose.msk.msra.mxu0 %vm69_vm0, %v10392_v6  ;;  %8528 = vmatprep.mubr.msk.f32.mxu0 %vm69_vm0, %v10400_v44 }
 0x4f2   :  { %8522 = vmatprep.subr.msk.mxu0 %vm69_vm0, %v10394_v17 }
 0x4f5   :  { %8523 = vmatpush3.xpose.msk.msra.mxu0 %vm69_vm0, %v10394_v17 }
 0x4f6   :  { %8524 = vmatprep.subr.msk.mxu0 %vm69_vm0, %v10396_v19 }
 0x4f8   :  { %v9207_v51 = vpop.eup %9206 }
 0x4f9   :  { %8525 = vmatpush3.xpose.msk.msra.mxu0 %vm69_vm0, %v10396_v19  ;;  %v1246_v22 = vmul.f32 %v9207_v51, %v10448_v49 }
 0x4fa   :  { %8526 = vmatprep.subr.msk.mxu0 %vm69_vm0, %v10398_v10 }
 0x4fc   :  { %v9209_v6 = vpop.eup %9208 }
 0x4fd   :  { %8527 = vmatpush3.xpose.msk.msra.mxu0 %vm69_vm0, %v10398_v10  ;;  %v1245_v44 = vmul.f32 %v9209_v6, %v10452_v32 }
 0x4ff   :  { %8500 = vmatprep.mubr.msk.f32.mxu1 %vm1076_vm2, %v1245_v44 }
 0x500   :  { %8529 = vmatmul.mubr.msk.f32.vlgmr.msra.gmra.mxu0 %vm69_vm0, %v10322_v3  ;;  %8501 = vmatmul.mubr.msk.f32.vlgmr.msra.gmra.mxu1 %vm1076_vm2, %v1246_v22  ;;  %v1572_v3 = vpop.permute.xlu1 %1571 }
 0x501   :  { %8531 = vmatprep.mubr.msk.f32.mxu0 %vm69_vm0, %v10324_v36  ;;  %8541 = vmatpush3.xpose.msk.msra.mxu1 %vm69_vm0, %v10316_v61  ;;  %v1747_v61 = vpop.permute.xlu0 %1746 }
 0x502   :  { %8542 = vmatprep.subr.msk.mxu1 %vm69_vm0, %v10404_v52 }
 0x504   :  { %8532 = vmatmul.mubr.msk.f32.gmra.mxu0 %vm69_vm0, %v10406_v5 }
 0x505   :  { %8534 = vmatprep.mubr.msk.f32.mxu0 %vm69_vm0, %v10516_v7  ;;  %8543 = vmatpush3.xpose.msk.msra.mxu1 %vm69_vm0, %v10404_v52  ;;  %v13162_v52 = vld [vmem:[#allocation18_spill] sm:$0xff] }
 0x506   :  { %8544 = vmatprep.subr.msk.mxu1 %vm69_vm0, %v10318_v62 }
 0x508   :  { %8535 = vmatmul.mubr.msk.f32.gmra.mxu0 %vm69_vm0, %v10510_v2 }
 0x509   :  { %8537 = vmatprep.mubr.msk.f32.mxu0 %vm69_vm0, %v1572_v3  ;;  %8545 = vmatpush3.xpose.msk.msra.mxu1 %vm69_vm0, %v10318_v62 }
 0x50a   :  { %8546 = vmatprep.subr.msk.mxu1 %vm69_vm0, %v10320_v63 }
 0x50d   :  { %8547 = vmatpush3.xpose.msk.msra.mxu1 %vm69_vm0, %v10320_v63 }
 0x50e   :  { %8548 = vmatprep.subr.msk.mxu1 %vm69_vm0, %v10402_v48 }
 0x511   :  { %8549 = vmatpush3.xpose.msk.msra.mxu1 %vm69_vm0, %v10402_v48 }
 0x512   :  { %8550 = vmatprep.subr.msk.mxu1 %vm69_vm0, %v13162_v52 }
 0x515   :  { %8551 = vmatpush3.xpose.msk.msra.mxu1 %vm69_vm0, %v13162_v52 }
 0x516   :  { %8552 = vmatprep.subr.msk.mxu1 %vm69_vm0, %v1747_v61 }
 0x519   :  { %8553 = vmatpush3.xpose.msk.msra.mxu1 %vm69_vm0, %v1747_v61 }
 0x51f   :  { %v1205_v62 = vpop.xlane.xlu0 %1204 }
 0x520   :  { %9210 = vrcp.f32 %v1205_v62 }
 0x523   :  { %v1214_v63 = vpop.xlane.xlu0 %1213  ;;  %v1208_v36 = vpop.xlane.xlu1 %1207 }
 0x524   :  { %9212 = vrcp.f32 %v1208_v36 }
 0x525   :  { %9214 = vrcp.f32 %v1214_v63 }
 0x527   :  { %v1217_v17 = vpop.xlane.xlu0 %1216  ;;  %v1211_v19 = vpop.xlane.xlu1 %1210 }
 0x528   :  { %9216 = vrcp.f32 %v1217_v17 }
 0x529   :  { %9218 = vrcp.f32 %v1211_v19 }
 0x52b   :  { %v1574_v48 = vpop.permute.xlu0 %1573  ;;  %v1220_v10 = vpop.xlane.xlu1 %1219 }
 0x52c   :  { %8538 = vmatmul.mubr.msk.f32.gmra.mxu0 %vm69_vm0, %v1574_v48  ;;  %9220 = vrcp.f32 %v1220_v10 }
 0x52d   :  { %v9211_v5 = vpop.eup %9210 }
 0x52e   :  { %v1247_v26 = vmul.f32 %v9211_v5, %v10466_v16 }
 0x52f   :  { %v1729_v14 = vpop.permute.xlu0 %1728  ;;  %v1745_v49 = vpop.permute.xlu1 %1744 }
 0x530   :  { %8503 = vmatprep.mubr.msk.f32.mxu1 %vm1076_vm2, %v1247_v26  ;;  %8554 = vmatprep.subr.msk.mxu1 %vm69_vm0, %v1745_v49 }
 0x531   :  { %v9213_v32 = vpop.eup %9212  ;;  %8555 = vmatpush3.xpose.msk.msra.mxu1 %vm69_vm0, %v1745_v49 }
 0x532   :  { %v1248_v45 = vmul.f32 %v9213_v32, %v10472_v24  ;;  %v9215_v34 = vpop.eup %9214 }
 0x533   :  { %v1733_v13 = vpop.permute.xlu0 %1732  ;;  %v1731_v25 = vpop.permute.xlu1 %1730  ;;  %v1250_v7 = vmul.f32 %v9215_v34, %v10470_v9 }
 0x534   :  { %8504 = vmatmul.mubr.msk.f32.gmra.mxu1 %vm1076_vm2, %v1248_v45 }
 0x535   :  { %v9217_v15 = vpop.eup %9216 }
 0x536   :  { %v9219_v31 = vpop.eup %9218  ;;  %v1251_v54 = vmul.f32 %v9217_v15, %v10476_v8 }
 0x537   :  { %v1737_v20 = vpop.permute.xlu0 %1736  ;;  %v1249_v16 = vmul.f32 %v9219_v31, %v10480_v60  ;;  %v1735_v2 = vpop.permute.xlu1 %1734 }
 0x539   :  { %8506 = vmatprep.mubr.msk.f32.mxu1 %vm1076_vm2, %v1249_v16  ;;  %v9221_v42 = vpop.eup %9220 }
 0x53a   :  { %8507 = vmatmul.mubr.msk.f32.gmra.mxu1 %vm1076_vm2, %v1250_v7  ;;  %v1252_v37 = vmul.f32 %v9221_v42, %v10486_v39 }
 0x53b   :  { %8509 = vmatprep.mubr.msk.f32.mxu1 %vm1076_vm2, %v1251_v54  ;;  %v1741_v24 = vpop.permute.xlu0 %1740  ;;  %v1739_v27 = vpop.permute.xlu1 %1738 }
 0x53e   :  { %8510 = vmatmul.mubr.msk.f32.gmra.mxu1 %vm1076_vm2, %v1252_v37 }
 0x53f   :  { %8556 = vmatprep.mubr.msk.f32.mxu1 %vm69_vm0, %v1729_v14  ;;  %v2088_v60 = vpop.permute.xlu0 %2087  ;;  %v1743_v41 = vpop.permute.xlu1 %1742 }
 0x540   :  { %8568 = vmatprep.subr.mxu0 %v2088_v60 }
 0x541   :  { %8569 = vmatpush3.msra.mxu0 %v2088_v60 }
 0x542   :  { %8557 = vmatmul.mubr.msk.f32.vlgmr.msra.gmra.mxu1 %vm69_vm0, %v1731_v25 }
 0x543   :  { %8559 = vmatprep.mubr.msk.f32.mxu1 %vm69_vm0, %v1733_v13  ;;  %v2084_v9 = vpop.permute.xlu0 %2083  ;;  %v2086_v8 = vpop.permute.xlu1 %2085 }
 0x544   :  { %8570 = vmatprep.subr.mxu0 %v2086_v8 }
 0x545   :  { %8571 = vmatpush3.msra.mxu0 %v2086_v8 }
 0x546   :  { %8560 = vmatmul.mubr.msk.f32.gmra.mxu1 %vm69_vm0, %v1735_v2  ;;  %8572 = vmatprep.subr.mxu0 %v2084_v9 }
 0x547   :  { %8562 = vmatprep.mubr.msk.f32.mxu1 %vm69_vm0, %v1737_v20  ;;  %v2080_v39 = vpop.permute.xlu0 %2079  ;;  %v2082_v30 = vpop.permute.xlu1 %2081  ;;  %8573 = vmatpush3.msra.mxu0 %v2084_v9 }
 0x548   :  { %8574 = vmatprep.subr.mxu0 %v2082_v30 }
 0x549   :  { %8575 = vmatpush3.msra.mxu0 %v2082_v30 }
 0x54a   :  { %8563 = vmatmul.mubr.msk.f32.gmra.mxu1 %vm69_vm0, %v1739_v27  ;;  %8576 = vmatprep.subr.mxu0 %v2080_v39 }
 0x54b   :  { %8565 = vmatprep.mubr.msk.f32.mxu1 %vm69_vm0, %v1741_v24  ;;  %v2076_v29 = vpop.permute.xlu0 %2075  ;;  %v2078_v33 = vpop.permute.xlu1 %2077  ;;  %8577 = vmatpush3.msra.mxu0 %v2080_v39 }
 0x54c   :  { %8578 = vmatprep.subr.mxu0 %v2078_v33 }
 0x54d   :  { %8579 = vmatpush3.msra.mxu0 %v2078_v33 }
 0x54e   :  { %8566 = vmatmul.mubr.msk.f32.gmra.mxu1 %vm69_vm0, %v1743_v41  ;;  %8580 = vmatprep.subr.mxu0 %v2076_v29 }
 0x54f   :  { %v2241_v59 = vpop.permute.xlu0 %2240  ;;  %v2074_v38 = vpop.permute.xlu1 %2073  ;;  %8581 = vmatpush3.msra.mxu0 %v2076_v29 }
 0x550   :  { %8596 = vmatprep.subr.mxu1 %v2241_v59  ;;  %8582 = vmatprep.subr.mxu0 %v2074_v38 }
 0x551   :  { %8597 = vmatpush3.msra.mxu1 %v2241_v59  ;;  %8583 = vmatpush3.msra.mxu0 %v2074_v38 }
 0x553   :  { %v2239_v43 = vpop.permute.xlu1 %2238 }
 0x554   :  { %8598 = vmatprep.subr.mxu1 %v2239_v43 }
 0x555   :  { %8599 = vmatpush3.msra.mxu1 %v2239_v43 }
 0x557   :  { %v2237_v21 = vpop.permute.xlu1 %2236 }
 0x558   :  { %8600 = vmatprep.subr.mxu1 %v2237_v21 }
 0x559   :  { %8601 = vmatpush3.msra.mxu1 %v2237_v21 }
 0x55b   :  { %v2235_v53 = vpop.permute.xlu1 %2234 }
 0x55c   :  { %8602 = vmatprep.subr.mxu1 %v2235_v53 }
 0x55d   :  { %8603 = vmatpush3.msra.mxu1 %v2235_v53 }
 0x59f   :  { %v10648_v55 = vpop.f32.mrf.mxu0 }
 0x5a1   :  { %v10650_v1 = vpop.f32.mrf.mxu0 }
 0x5a8   :  { %v10652_v47 = vpop.f32.mrf.mxu0 }
 0x5aa   :  { %v10654_v35 = vpop.f32.mrf.mxu0 }
 0x5ac   :  { %v10656_v40 = vpop.f32.mrf.mxu0 }
 0x5ae   :  { %v10658_v56 = vpop.f32.mrf.mxu0 }
 0x5b0   :  { %v10660_v12 = vpop.f32.mrf.mxu0 }
 0x5b2   :  { %v10662_v18 = vpop.f32.mrf.mxu0 }
 0x5c0   :  { %v8530_v11 = vpop.f32.mrf.mxu0  ;;  %v10688_v17 = vpop.f32.mrf.mxu1 }
 0x5c1   :  { %v1900_v23 = vsel %vm1076_vm2, %v8530_v11, -inf }
 0x5c2   :  { %1901 = vmax.xlane.f32.xlu1 %v1900_v23  ;;  %v1689_v4 = vpop.f32.mrf.mxu0  ;;  %v10692_v48 = vpop.f32.mrf.mxu1 }
 0x5c3   :  { %v1897_v28 = vsel %vm1076_vm2, %v1689_v4, -inf }
 0x5c4   :  { %1898 = vmax.xlane.f32.xlu0 %v1897_v28  ;;  %v10666_v50 = vpop.f32.mrf.mxu0 }
 0x5c5   :  { %v1906_v6 = vsel %vm1076_vm2, %v10666_v50, -inf }
 0x5c6   :  { %v10668_v51 = vpop.f32.mrf.mxu0 }
 0x5c7   :  { %v1903_v3 = vsel %vm1076_vm2, %v10668_v51, -inf }
 0x5c8   :  { %1907 = vmax.xlane.f32.xlu0 %v1906_v6  ;;  %v10672_v44 = vpop.f32.mrf.mxu0 }
 0x5c9   :  { %v1912_v22 = vsel %vm1076_vm2, %v10672_v44, -inf }
 0x5ca   :  { %1913 = vmax.xlane.f32.xlu1 %v1912_v22  ;;  %v10678_v52 = vpop.f32.mrf.mxu0 }
 0x5cb   :  { %v1909_v61 = vsel %vm1076_vm2, %v10678_v52, -inf }
 0x5cc   :  { %1904 = vmax.xlane.f32.xlu0 %v1903_v3 }
 0x5d0   :  { %1910 = vmax.xlane.f32.xlu0 %v1909_v61 }
 0x5ec   :  { %v10682_v62 = vpop.f32.mrf.mxu0 }
 0x5ed   :  { %v1918_v63 = vsel %vm1076_vm2, %v10682_v62, -inf }
 0x5ee   :  { %1919 = vmax.xlane.f32.xlu1 %v1918_v63  ;;  %v10686_v36 = vpop.f32.mrf.mxu0 }
 0x5ef   :  { %v1915_v19 = vsel %vm1076_vm2, %v10686_v36, -inf }
 0x5f0   :  { %1916 = vmax.xlane.f32.xlu0 %v1915_v19 }
 0x5f4   :  { %v10694_v10 = vpop.f32.mrf.mxu1 }
 0x5f6   :  { %v10696_v5 = vpop.f32.mrf.mxu1 }
 0x5fa   :  { %v10698_v26 = vpop.f32.mrf.mxu1 }
 0x5fc   :  { %v10700_v14 = vpop.f32.mrf.mxu1 }
 0x5fe   :  { %v10702_v49 = vpop.f32.mrf.mxu1 }
 0x600   :  { %v10704_v32 = vpop.f32.mrf.mxu1 }
 0x602   :  { %v10706_v13 = vpop.f32.mrf.mxu1 }
 0x603   :  { %v1924_v45 = vsel %vm1076_vm2, %v10706_v13, -inf }
 0x604   :  { %1925 = vmax.xlane.f32.xlu1 %v1924_v45  ;;  %v10710_v34 = vpop.f32.mrf.mxu1 }
 0x605   :  { %v1921_v25 = vsel %vm1076_vm2, %v10710_v34, -inf }
 0x606   :  { %1922 = vmax.xlane.f32.xlu0 %v1921_v25  ;;  %v10714_v15 = vpop.f32.mrf.mxu1 }
 0x607   :  { %v1930_v31 = vsel %vm1076_vm2, %v10714_v15, -inf }
 0x608   :  { %1931 = vmax.xlane.f32.xlu1 %v1930_v31  ;;  %v10718_v20 = vpop.f32.mrf.mxu1 }
 0x609   :  { %v1927_v16 = vsel %vm1076_vm2, %v10718_v20, -inf }
 0x60a   :  { %1928 = vmax.xlane.f32.xlu0 %v1927_v16  ;;  %v10722_v2 = vpop.f32.mrf.mxu1 }
 0x60b   :  { %v1936_v7 = vsel %vm1076_vm2, %v10722_v2, -inf }
 0x60c   :  { %1937 = vmax.xlane.f32.xlu1 %v1936_v7  ;;  %v10726_v54 = vpop.f32.mrf.mxu1 }
 0x60d   :  { %v1933_v42 = vsel %vm1076_vm2, %v10726_v54, -inf }
 0x60e   :  { %1934 = vmax.xlane.f32.xlu0 %v1933_v42  ;;  %v10730_v24 = vpop.f32.mrf.mxu1 }
 0x60f   :  { %v1942_v37 = vsel %vm1076_vm2, %v10730_v24, -inf }
 0x610   :  { %1943 = vmax.xlane.f32.xlu1 %v1942_v37  ;;  %v10734_v27 = vpop.f32.mrf.mxu1 }
 0x611   :  { %v1939_v60 = vsel %vm1076_vm2, %v10734_v27, -inf }
 0x612   :  { %1940 = vmax.xlane.f32.xlu0 %v1939_v60 }
 0x621   :  { %2230 = vrot.lane.b32.xlu1 %v10182_v57, %s9674_s11 }
 0x628   :  { %2232 = vrot.lane.b32.xlu0 %v10148_v46, %s9674_s11 }
 0x64b   :  { %v1902_v41 = vpop.xlane.xlu1 %1901 }
 0x64c   :  { %v1946_v9 = vsub.f32 %v8530_v11, %v1902_v41 }
 0x64d   :  { %v1899_v8 = vpop.xlane.xlu0 %1898 }
 0x64e   :  { %v1963_v39 = vmul.f32 1.442695, %v1946_v9  ;;  %v1945_v30 = vsub.f32 %v1689_v4, %v1899_v8 }
 0x650   :  { %9222 = vpow2.f32 %v1963_v39  ;;  %v1961_v29 = vmul.f32 1.442695, %v1945_v30 }
 0x651   :  { %v1908_v33 = vpop.xlane.xlu0 %1907 }
 0x652   :  { %9224 = vpow2.f32 %v1961_v29  ;;  %v1948_v59 = vsub.f32 %v10666_v50, %v1908_v33 }
 0x653   :  { %v1914_v38 = vpop.xlane.xlu1 %1913 }
 0x654   :  { %v1967_v43 = vmul.f32 1.442695, %v1948_v59  ;;  %v1950_v21 = vsub.f32 %v10672_v44, %v1914_v38 }
 0x655   :  { %v1905_v53 = vpop.xlane.xlu0 %1904 }
 0x656   :  { %9226 = vpow2.f32 %v1967_v43  ;;  %v1971_v57 = vmul.f32 1.442695, %v1950_v21  ;;  %v1947_v46 = vsub.f32 %v10668_v51, %v1905_v53 }
 0x658   :  { %9228 = vpow2.f32 %v1971_v57  ;;  %v1965_v11 = vmul.f32 1.442695, %v1947_v46 }
 0x659   :  { %v1911_v23 = vpop.xlane.xlu0 %1910 }
 0x65a   :  { %9230 = vpow2.f32 %v1965_v11  ;;  %v1949_v4 = vsub.f32 %v10678_v52, %v1911_v23 }
 0x65c   :  { %v1969_v28 = vmul.f32 1.442695, %v1949_v4 }
 0x65d   :  { %v10746_v6 = vpop.eup %9222 }
 0x65e   :  { %9232 = vpow2.f32 %v1969_v28  ;;  %v1996_v50 = vsel %vm1076_vm2, %v10746_v6, 0.0 }
 0x65f   :  { %v10750_v22 = vpop.eup %9224  ;;  %1997 = vadd.xlane.f32.xlu1 %v1996_v50 }
 0x660   :  { %v1993_v44 = vsel %vm1076_vm2, %v10750_v22, 0.0 }
 0x661   :  { %1994 = vadd.xlane.f32.xlu0 %v1993_v44 }
 0x663   :  { %v10754_v51 = vpop.eup %9226 }
 0x664   :  { %v2002_v3 = vsel %vm1076_vm2, %v10754_v51, 0.0 }
 0x665   :  { %v10758_v52 = vpop.eup %9228  ;;  %2003 = vadd.xlane.f32.xlu1 %v2002_v3 }
 0x666   :  { %v2008_v63 = vsel %vm1076_vm2, %v10758_v52, 0.0 }
 0x667   :  { %v10760_v61 = vpop.eup %9230 }
 0x668   :  { %v1999_v19 = vsel %vm1076_vm2, %v10760_v61, 0.0 }
 0x669   :  { %2009 = vadd.xlane.f32.xlu1 %v2008_v63  ;;  %2000 = vadd.xlane.f32.xlu0 %v1999_v19 }
 0x66b   :  { %v10766_v45 = vpop.eup %9232 }
 0x66c   :  { %v2005_v25 = vsel %vm1076_vm2, %v10766_v45, 0.0 }
 0x66d   :  { %2006 = vadd.xlane.f32.xlu0 %v2005_v25 }
 0x677   :  { %v1920_v31 = vpop.xlane.xlu1 %1919 }
 0x678   :  { %v1952_v16 = vsub.f32 %v10682_v62, %v1920_v31 }
 0x679   :  { %v1917_v7 = vpop.xlane.xlu0 %1916 }
 0x67a   :  { %v1975_v42 = vmul.f32 1.442695, %v1952_v16  ;;  %v1951_v37 = vsub.f32 %v10686_v36, %v1917_v7 }
 0x67c   :  { %9234 = vpow2.f32 %v1975_v42  ;;  %v1973_v60 = vmul.f32 1.442695, %v1951_v37 }
 0x67e   :  { %9236 = vpow2.f32 %v1973_v60 }
 0x689   :  { %v10772_v41 = vpop.eup %9234 }
 0x68a   :  { %v2014_v9 = vsel %vm1076_vm2, %v10772_v41, 0.0 }
 0x68b   :  { %v10776_v8 = vpop.eup %9236  ;;  %2015 = vadd.xlane.f32.xlu1 %v2014_v9 }
 0x68c   :  { %v2011_v39 = vsel %vm1076_vm2, %v10776_v8, 0.0 }
 0x68d   :  { %v1926_v30 = vpop.xlane.xlu1 %1925  ;;  %2012 = vadd.xlane.f32.xlu0 %v2011_v39 }
 0x68e   :  { %v1954_v62 = vsub.f32 %v10706_v13, %v1926_v30 }
 0x68f   :  { %v1923_v29 = vpop.xlane.xlu0 %1922 }
 0x690   :  { %v1979_v36 = vmul.f32 1.442695, %v1954_v62  ;;  %v1953_v33 = vsub.f32 %v10710_v34, %v1923_v29 }
 0x691   :  { %v1932_v59 = vpop.xlane.xlu1 %1931 }
 0x692   :  { %9238 = vpow2.f32 %v1979_v36  ;;  %v1977_v38 = vmul.f32 1.442695, %v1953_v33  ;;  %v1956_v43 = vsub.f32 %v10714_v15, %v1932_v59 }
 0x693   :  { %v1929_v21 = vpop.xlane.xlu0 %1928 }
 0x694   :  { %9240 = vpow2.f32 %v1977_v38  ;;  %v1983_v53 = vmul.f32 1.442695, %v1956_v43  ;;  %v1955_v57 = vsub.f32 %v10718_v20, %v1929_v21 }
 0x695   :  { %v1938_v46 = vpop.xlane.xlu1 %1937 }
 0x696   :  { %9242 = vpow2.f32 %v1983_v53  ;;  %v1981_v11 = vmul.f32 1.442695, %v1955_v57  ;;  %v1958_v23 = vsub.f32 %v10722_v2, %v1938_v46 }
 0x697   :  { %v1935_v13 = vpop.xlane.xlu0 %1934 }
 0x698   :  { %9244 = vpow2.f32 %v1981_v11  ;;  %v1987_v4 = vmul.f32 1.442695, %v1958_v23  ;;  %v1957_v34 = vsub.f32 %v10726_v54, %v1935_v13 }
 0x699   :  { %v1944_v28 = vpop.xlane.xlu1 %1943 }
 0x69a   :  { %9246 = vpow2.f32 %v1987_v4  ;;  %v1985_v50 = vmul.f32 1.442695, %v1957_v34  ;;  %v1960_v15 = vsub.f32 %v10730_v24, %v1944_v28 }
 0x69b   :  { %v1941_v44 = vpop.xlane.xlu0 %1940 }
 0x69c   :  { %9248 = vpow2.f32 %v1985_v50  ;;  %v1991_v3 = vmul.f32 1.442695, %v1960_v15  ;;  %v1959_v20 = vsub.f32 %v10734_v27, %v1941_v44 }
 0x69d   :  { %v2231_v31 = vpop.permute.xlu1 %2230 }
 0x69e   :  { %9250 = vpow2.f32 %v1991_v3  ;;  %v1989_v63 = vmul.f32 1.442695, %v1959_v20 }
 0x69f   :  { %v10788_v19 = vpop.eup %9238  ;;  %v2233_v2 = vpop.permute.xlu0 %2232 }
 0x6a0   :  { %9252 = vpow2.f32 %v1989_v63  ;;  %8604 = vmatprep.subr.mxu1 %v2233_v2  ;;  %v2020_v54 = vsel %vm1076_vm2, %v10788_v19, 0.0 }
 0x6a1   :  { %v10792_v25 = vpop.eup %9240  ;;  %2021 = vadd.xlane.f32.xlu0 %v2020_v54  ;;  %8605 = vmatpush3.msra.mxu1 %v2233_v2 }
 0x6a2   :  { %8606 = vmatprep.subr.mxu1 %v2231_v31  ;;  %v2017_v24 = vsel %vm1076_vm2, %v10792_v25, 0.0 }
 0x6a3   :  { %v10796_v27 = vpop.eup %9242  ;;  %2018 = vadd.xlane.f32.xlu1 %v2017_v24  ;;  %8607 = vmatpush3.msra.mxu1 %v2231_v31 }
 0x6a4   :  { %v2026_v16 = vsel %vm1076_vm2, %v10796_v27, 0.0 }
 0x6a5   :  { %v10800_v7 = vpop.eup %9244  ;;  %2027 = vadd.xlane.f32.xlu0 %v2026_v16 }
 0x6a6   :  { %v2023_v42 = vsel %vm1076_vm2, %v10800_v7, 0.0 }
 0x6a7   :  { %v10804_v37 = vpop.eup %9246  ;;  %2024 = vadd.xlane.f32.xlu1 %v2023_v42 }
 0x6a8   :  { %v2032_v60 = vsel %vm1076_vm2, %v10804_v37, 0.0 }
 0x6a9   :  { %v10808_v9 = vpop.eup %9248  ;;  %2033 = vadd.xlane.f32.xlu0 %v2032_v60 }
 0x6aa   :  { %v2029_v39 = vsel %vm1076_vm2, %v10808_v9, 0.0 }
 0x6ab   :  { %v10812_v30 = vpop.eup %9250  ;;  %2030 = vadd.xlane.f32.xlu1 %v2029_v39 }
 0x6ac   :  { %v2038_v62 = vsel %vm1076_vm2, %v10812_v30, 0.0 }
 0x6ad   :  { %v10816_v29 = vpop.eup %9252  ;;  %2039 = vadd.xlane.f32.xlu0 %v2038_v62 }
 0x6ae   :  { %v2035_v36 = vsel %vm1076_vm2, %v10816_v29, 0.0 }
 0x6af   :  { %2036 = vadd.xlane.f32.xlu1 %v2035_v36 }
 0x6c0   :  { %2226 = vrot.lane.b32.xlu1 %v10134_v58, %s9674_s11 }
 0x6c3   :  { %2228 = vrot.lane.b32.xlu0 %v10152_v0, %s9674_s11 }
 0x6e8   :  { %v1998_v33 = vpop.xlane.xlu1 %1997 }
 0x6e9   :  { %9254 = vrcp.f32 %v1998_v33 }
 0x6ea   :  { %v1995_v59 = vpop.xlane.xlu0 %1994 }
 0x6eb   :  { %9256 = vrcp.f32 %v1995_v59 }
 0x6ee   :  { %v2004_v38 = vpop.xlane.xlu1 %2003 }
 0x6ef   :  { %9258 = vrcp.f32 %v2004_v38 }
 0x6f2   :  { %v2001_v43 = vpop.xlane.xlu0 %2000  ;;  %v2010_v21 = vpop.xlane.xlu1 %2009 }
 0x6f3   :  { %9260 = vrcp.f32 %v2001_v43 }
 0x6f4   :  { %9262 = vrcp.f32 %v2010_v21 }
 0x6f6   :  { %v2007_v53 = vpop.xlane.xlu0 %2006  ;;  %v9255_v57 = vpop.eup %9254 }
 0x6f7   :  { %9264 = vrcp.f32 %v2007_v53  ;;  %v2058_v58 = vmul.f32 %v9255_v57, %v10746_v6 }
 0x6f8   :  { %v9257_v46 = vpop.eup %9256 }
 0x6f9   :  { %v2057_v11 = vmul.f32 %v9257_v46, %v10750_v22 }
 0x6fb   :  { %8584 = vmatprep.mubr.msk.f32.mxu0 %vm1076_vm2, %v2057_v11 }
 0x6fc   :  { %8585 = vmatmul.mubr.msk.f32.vlgmr.msra.gmra.mxu0 %vm1076_vm2, %v2058_v58  ;;  %v9259_v0 = vpop.eup %9258 }
 0x6fd   :  { %v2060_v34 = vmul.f32 %v9259_v0, %v10754_v51 }
 0x700   :  { %v9261_v23 = vpop.eup %9260 }
 0x701   :  { %v2059_v13 = vmul.f32 %v9261_v23, %v10760_v61  ;;  %v9263_v4 = vpop.eup %9262 }
 0x702   :  { %v2062_v6 = vmul.f32 %v9263_v4, %v10758_v52 }
 0x703   :  { %8587 = vmatprep.mubr.msk.f32.mxu0 %vm1076_vm2, %v2059_v13 }
 0x704   :  { %v9265_v28 = vpop.eup %9264  ;;  %8588 = vmatmul.mubr.msk.f32.gmra.mxu0 %vm1076_vm2, %v2060_v34 }
 0x705   :  { %v2061_v22 = vmul.f32 %v9265_v28, %v10766_v45 }
 0x707   :  { %8590 = vmatprep.mubr.msk.f32.mxu0 %vm1076_vm2, %v2061_v22 }
 0x708   :  { %8591 = vmatmul.mubr.msk.f32.gmra.mxu0 %vm1076_vm2, %v2062_v6 }
 0x714   :  { %v2016_v50 = vpop.xlane.xlu1 %2015 }
 0x715   :  { %9266 = vrcp.f32 %v2016_v50 }
 0x716   :  { %v2013_v15 = vpop.xlane.xlu0 %2012 }
 0x717   :  { %9268 = vrcp.f32 %v2013_v15 }
 0x722   :  { %v9267_v61 = vpop.eup %9266 }
 0x723   :  { %v2064_v3 = vmul.f32 %v9267_v61, %v10772_v41 }
 0x724   :  { %v9269_v44 = vpop.eup %9268 }
 0x725   :  { %v2063_v51 = vmul.f32 %v9269_v44, %v10776_v8 }
 0x727   :  { %8593 = vmatprep.mubr.msk.f32.mxu0 %vm1076_vm2, %v2063_v51 }
 0x728   :  { %8594 = vmatmul.mubr.msk.f32.gmra.mxu0 %vm1076_vm2, %v2064_v3 }
 0x72a   :  { %v2022_v45 = vpop.xlane.xlu0 %2021 }
 0x72b   :  { %9270 = vrcp.f32 %v2022_v45 }
 0x72c   :  { %v2019_v20 = vpop.xlane.xlu1 %2018 }
 0x72d   :  { %9272 = vrcp.f32 %v2019_v20 }
 0x72e   :  { %v2028_v52 = vpop.xlane.xlu0 %2027 }
 0x72f   :  { %9274 = vrcp.f32 %v2028_v52 }
 0x730   :  { %v2025_v63 = vpop.xlane.xlu1 %2024 }
 0x731   :  { %9276 = vrcp.f32 %v2025_v63 }
 0x732   :  { %v2034_v2 = vpop.xlane.xlu0 %2033 }
 0x733   :  { %9278 = vrcp.f32 %v2034_v2 }
 0x734   :  { %v2031_v54 = vpop.xlane.xlu1 %2030 }
 0x735   :  { %9280 = vrcp.f32 %v2031_v54 }
 0x736   :  { %v2040_v31 = vpop.xlane.xlu0 %2039 }
 0x737   :  { %9282 = vrcp.f32 %v2040_v31 }
 0x738   :  { %v2037_v8 = vpop.xlane.xlu1 %2036  ;;  %v9271_v41 = vpop.eup %9270 }
 0x739   :  { %9284 = vrcp.f32 %v2037_v8  ;;  %v2066_v62 = vmul.f32 %v9271_v41, %v10788_v19 }
 0x73a   :  { %v9273_v24 = vpop.eup %9272  ;;  %v2229_v16 = vpop.permute.xlu0 %2228 }
 0x73b   :  { %8608 = vmatprep.subr.mxu1 %v2229_v16  ;;  %v2065_v42 = vmul.f32 %v9273_v24, %v10792_v25 }
 0x73c   :  { %v2227_v60 = vpop.permute.xlu1 %2226  ;;  %8609 = vmatpush3.msra.mxu1 %v2229_v16  ;;  %v9275_v39 = vpop.eup %9274 }
 0x73d   :  { %8610 = vmatprep.subr.mxu1 %v2227_v60  ;;  %8612 = vmatprep.mubr.msk.f32.mxu1 %vm1076_vm2, %v2065_v42  ;;  %v2068_v38 = vmul.f32 %v9275_v39, %v10796_v27  ;;  %v2462_v27 = vld [vmem:[%s13105_s4 + $0x18] sm:$0xff] }
 0x73e   :  { %v9277_v36 = vpop.eup %9276  ;;  %8611 = vmatpush3.msra.mxu1 %v2227_v60  ;;  %8624 = vmatprep.subr.mxu0 %v2462_v27 }
 0x73f   :  { %8613 = vmatmul.mubr.msk.f32.vlgmr.msra.gmra.mxu1 %vm1076_vm2, %v2066_v62  ;;  %v2067_v33 = vmul.f32 %v9277_v36, %v10800_v7  ;;  %8625 = vmatpush3.msra.mxu0 %v2462_v27 }
 0x740   :  { %v9279_v59 = vpop.eup %9278 }
 0x741   :  { %8615 = vmatprep.mubr.msk.f32.mxu1 %vm1076_vm2, %v2067_v33  ;;  %v2070_v21 = vmul.f32 %v9279_v59, %v10804_v37  ;;  %v2460_v37 = vld [vmem:[%s13105_s4 + $0x8] sm:$0xff] }
 0x742   :  { %v9281_v25 = vpop.eup %9280 }
 0x743   :  { %8616 = vmatmul.mubr.msk.f32.gmra.mxu1 %vm1076_vm2, %v2068_v38  ;;  %v2069_v43 = vmul.f32 %v9281_v25, %v10808_v9  ;;  %v2461_v9 = vld [vmem:[%s13105_s4 + $0x10] sm:$0xff]  ;;  %v13163_v38 = vld [vmem:[#allocation2_spill] sm:$0xff] }
 0x744   :  { %v9283_v19 = vpop.eup %9282  ;;  %8626 = vmatprep.subr.mxu0 %v2461_v9 }
 0x745   :  { %8618 = vmatprep.mubr.msk.f32.mxu1 %vm1076_vm2, %v2069_v43  ;;  %v2072_v57 = vmul.f32 %v9283_v19, %v10812_v30  ;;  %8627 = vmatpush3.msra.mxu0 %v2461_v9  ;;  %v2459_v30 = vld [vmem:[%s13105_s4] sm:$0xff]  ;;  %v13165_v9 = vld [vmem:[#allocation5_spill] sm:$0xff] }
 0x746   :  { %v9285_v53 = vpop.eup %9284  ;;  %8628 = vmatprep.subr.mxu0 %v2460_v37 }
 0x747   :  { %8619 = vmatmul.mubr.msk.f32.gmra.mxu1 %vm1076_vm2, %v2070_v21  ;;  %v2071_v7 = vmul.f32 %v9285_v53, %v10816_v29  ;;  %8629 = vmatpush3.msra.mxu0 %v2460_v37 }
 0x748   :  { %8630 = vmatprep.subr.mxu0 %v2459_v30 }
 0x749   :  { %8621 = vmatprep.mubr.msk.f32.mxu1 %vm1076_vm2, %v2071_v7  ;;  %8631 = vmatpush3.msra.mxu0 %v2459_v30 }
 0x74b   :  { %8622 = vmatmul.mubr.msk.f32.gmra.mxu1 %vm1076_vm2, %v2072_v57 }
 0x7bc   :  { %v8586_v29 = vpop.f32.mrf.mxu0 }
 0x7bd   :  { %2397 = vrot.lane.b32.xlu1 %v8586_v29, %s9675_s20 }
 0x7be   :  { %v2187_v46 = vpop.f32.mrf.mxu0 }
 0x7bf   :  { %2395 = vrot.lane.b32.xlu0 %v2187_v46, %s9675_s20 }
 0x7c4   :  { %v8589_v11 = vpop.f32.mrf.mxu0 }
 0x7c5   :  { %2401 = vrot.lane.b32.xlu1 %v8589_v11, %s9675_s20 }
 0x7c6   :  { %v2197_v58 = vpop.f32.mrf.mxu0 }
 0x7c7   :  { %2399 = vrot.lane.b32.xlu0 %v2197_v58, %s9675_s20  ;;  %v13166_v58 = vld [vmem:[#allocation4_spill] sm:$0xff] }
 0x7c8   :  { %v8592_v0 = vpop.f32.mrf.mxu0 }
 0x7c9   :  { %2405 = vrot.lane.b32.xlu1 %v8592_v0, %s9675_s20 }
 0x7ca   :  { %v2207_v23 = vpop.f32.mrf.mxu0 }
 0x7cb   :  { %2403 = vrot.lane.b32.xlu0 %v2207_v23, %s9675_s20 }
 0x7e8   :  { %v8595_v13 = vpop.f32.mrf.mxu0 }
 0x7e9   :  { %2409 = vrot.lane.b32.xlu1 %v8595_v13, %s9675_s20  ;;  %v13167_v13 = vld [vmem:[#allocation7_spill] sm:$0xff] }
 0x7ea   :  { %v2217_v4 = vpop.f32.mrf.mxu0 }
 0x7eb   :  { %2407 = vrot.lane.b32.xlu0 %v2217_v4, %s9675_s20 }
 0x7ff   :  { %v8614_v34 = vpop.f32.mrf.mxu1 }
 0x800   :  { %2413 = vrot.lane.b32.xlu1 %v8614_v34, %s9675_s20 }
 0x801   :  { %v2340_v28 = vpop.f32.mrf.mxu1 }
 0x802   :  { %2411 = vrot.lane.b32.xlu0 %v2340_v28, %s9675_s20 }
 0x803   :  { %v8617_v22 = vpop.f32.mrf.mxu1 }
 0x804   :  { %2417 = vrot.lane.b32.xlu1 %v8617_v22, %s9675_s20 }
 0x805   :  { %v2350_v6 = vpop.f32.mrf.mxu1 }
 0x806   :  { %2415 = vrot.lane.b32.xlu0 %v2350_v6, %s9675_s20 }
 0x807   :  { %v8620_v50 = vpop.f32.mrf.mxu1 }
 0x808   :  { %2421 = vrot.lane.b32.xlu1 %v8620_v50, %s9675_s20 }
 0x809   :  { %v2360_v15 = vpop.f32.mrf.mxu1 }
 0x80a   :  { %2419 = vrot.lane.b32.xlu0 %v2360_v15, %s9675_s20 }
 0x80b   :  { %v8623_v61 = vpop.f32.mrf.mxu1 }
 0x80c   :  { %2425 = vrot.lane.b32.xlu1 %v8623_v61, %s9675_s20 }
 0x80d   :  { %v2370_v44 = vpop.f32.mrf.mxu1 }
 0x80e   :  { %2423 = vrot.lane.b32.xlu0 %v2370_v44, %s9675_s20  ;;  %v13168_v44 = vld [vmem:[#allocation6_spill] sm:$0xff] }
 0x82f   :  { %v2398_v51 = vpop.permute.xlu1 %2397 }
 0x830   :  { %v2444_v20 = vsel %vm69_vm0, %v10648_v55, %v2398_v51 }
 0x831   :  { %v2396_v3 = vpop.permute.xlu0 %2395 }
 0x832   :  { %v2443_v45 = vsel %vm69_vm0, %v10650_v1, %v2396_v3 }
 0x833   :  { %8632 = vmatprep.mubr.msk.f32.mxu0 %vm271_vm1, %v2443_v45 }
 0x834   :  { %8633 = vmatmul.mubr.msk.f32.vlgmr.msra.gmra.mxu0 %vm271_vm1, %v2444_v20 }
 0x837   :  { %v2402_v52 = vpop.permute.xlu1 %2401 }
 0x838   :  { %v2446_v54 = vsel %vm69_vm0, %v10652_v47, %v2402_v52 }
 0x839   :  { %v2400_v63 = vpop.permute.xlu0 %2399 }
 0x83a   :  { %v2445_v2 = vsel %vm69_vm0, %v10654_v35, %v2400_v63 }
 0x83b   :  { %8635 = vmatprep.mubr.msk.f32.mxu0 %vm271_vm1, %v2445_v2  ;;  %v2406_v31 = vpop.permute.xlu1 %2405 }
 0x83c   :  { %8636 = vmatmul.mubr.msk.f32.gmra.mxu0 %vm271_vm1, %v2446_v54  ;;  %v2448_v8 = vsel %vm69_vm0, %v10656_v40, %v2406_v31 }
 0x83d   :  { %v2404_v1 = vpop.permute.xlu0 %2403 }
 0x83e   :  { %v2447_v55 = vsel %vm69_vm0, %v10658_v56, %v2404_v1 }
 0x83f   :  { %8638 = vmatprep.mubr.msk.f32.mxu0 %vm271_vm1, %v2447_v55 }
 0x840   :  { %8639 = vmatmul.mubr.msk.f32.gmra.mxu0 %vm271_vm1, %v2448_v8 }
 0x85b   :  { %v2410_v35 = vpop.permute.xlu1 %2409 }
 0x85c   :  { %v2450_v24 = vsel %vm69_vm0, %v10660_v12, %v2410_v35  ;;  %v13169_v35 = vld [vmem:[#allocation9_spill] sm:$0xff] }
 0x85d   :  { %v2408_v41 = vpop.permute.xlu0 %2407 }
 0x85e   :  { %v2449_v47 = vsel %vm69_vm0, %v10662_v18, %v2408_v41 }
 0x85f   :  { %8641 = vmatprep.mubr.msk.f32.mxu0 %vm271_vm1, %v2449_v47 }
 0x860   :  { %8642 = vmatmul.mubr.msk.f32.gmra.mxu0 %vm271_vm1, %v2450_v24  ;;  %v2975_v24 = vld [vmem:[%s13106_s5 + $0x18] sm:$0xff] }
 0x861   :  { %8656 = vmatprep.subr.mxu1 %v2975_v24 }
 0x862   :  { %8657 = vmatpush3.msra.mxu1 %v2975_v24 }
 0x872   :  { %v2414_v56 = vpop.permute.xlu1 %2413 }
 0x873   :  { %v2452_v42 = vsel %vm69_vm0, %v10688_v17, %v2414_v56 }
 0x874   :  { %v2412_v16 = vpop.permute.xlu0 %2411 }
 0x875   :  { %v2451_v40 = vsel %vm69_vm0, %v10692_v48, %v2412_v16  ;;  %v13170_v16 = vld [vmem:[#allocation8_spill] sm:$0xff] }
 0x876   :  { %v2418_v60 = vpop.permute.xlu1 %2417  ;;  %8644 = vmatprep.mubr.msk.f32.mxu0 %vm271_vm1, %v2451_v40 }
 0x877   :  { %8645 = vmatmul.mubr.msk.f32.gmra.mxu0 %vm271_vm1, %v2452_v42  ;;  %v2454_v39 = vsel %vm69_vm0, %v10694_v10, %v2418_v60  ;;  %v2974_v42 = vld [vmem:[%s13106_s5 + $0x10] sm:$0xff]  ;;  %v2973_v60 = vld [vmem:[%s13106_s5 + $0x8] sm:$0xff] }
 0x878   :  { %v2416_v18 = vpop.permute.xlu0 %2415  ;;  %8658 = vmatprep.subr.mxu1 %v2974_v42 }
 0x879   :  { %v2453_v12 = vsel %vm69_vm0, %v10696_v5, %v2416_v18  ;;  %8659 = vmatpush3.msra.mxu1 %v2974_v42 }
 0x87a   :  { %v2422_v62 = vpop.permute.xlu1 %2421  ;;  %8647 = vmatprep.mubr.msk.f32.mxu0 %vm271_vm1, %v2453_v12  ;;  %8660 = vmatprep.subr.mxu1 %v2973_v60 }
 0x87b   :  { %8648 = vmatmul.mubr.msk.f32.gmra.mxu0 %vm271_vm1, %v2454_v39  ;;  %v2456_v36 = vsel %vm69_vm0, %v10698_v26, %v2422_v62  ;;  %v10935_v26 = vld [vmem:[%s13104_s7 + $0x3] ss:$0 sm:$0xff]  ;;  %8661 = vmatpush3.msra.mxu1 %v2973_v60 }
 0x87c   :  { %v2420_v48 = vpop.permute.xlu0 %2419  ;;  %v2972_v62 = vld [vmem:[%s13106_s5] sm:$0xff] }
 0x87d   :  { %v2455_v17 = vsel %vm69_vm0, %v10700_v14, %v2420_v48  ;;  %8662 = vmatprep.subr.mxu1 %v2972_v62 }
 0x87e   :  { %8650 = vmatprep.mubr.msk.f32.mxu0 %vm271_vm1, %v2455_v17  ;;  %v2426_v33 = vpop.permute.xlu1 %2425  ;;  %8663 = vmatpush3.msra.mxu1 %v2972_v62 }
 0x87f   :  { %8651 = vmatmul.mubr.msk.f32.gmra.mxu0 %vm271_vm1, %v2456_v36  ;;  %v2458_v59 = vsel %vm69_vm0, %v10702_v49, %v2426_v33 }
 0x880   :  { %v2424_v5 = vpop.permute.xlu0 %2423 }
 0x881   :  { %v2457_v10 = vsel %vm69_vm0, %v10704_v32, %v2424_v5  ;;  %v13164_v32 = vld [vmem:[#allocation3_spill] sm:$0xff] }
 0x882   :  { %8653 = vmatprep.mubr.msk.f32.mxu0 %vm271_vm1, %v2457_v10  ;;  %v13171_v10 = vld [vmem:[#allocation11_spill] sm:$0xff] }
 0x883   :  { %8654 = vmatmul.mubr.msk.f32.gmra.mxu0 %vm271_vm1, %v2458_v59 }
 0x8f4   :  { %v8634_v14 = vpop.f32.mrf.mxu0 }
 0x8f5   :  { %v2657_v25 = vadd.f32 %v8634_v14, %v13163_v38 }
 0x8f6   :  { %v2577_v43 = vpop.f32.mrf.mxu0 }
 0x8f7   :  { %v10939_v19 = vadd.f32 %v10935_v26, %v2657_v25  ;;  %v2656_v21 = vadd.f32 %v2577_v43, %v13164_v32  ;;  %v13172_v25 = vld [vmem:[#allocation10_spill] sm:$0xff] }
 0x8f9   :  { %v10943_v49 = vadd.f32 %v10935_v26, %v2656_v21  ;;  %v2695_v53 = vsel %vm271_vm1, %v10939_v19, 0.0  ;;  %v2757_v57 = vmul.f32 %v10939_v19, %v10939_v19 }
 0x8fa   :  { %2696 = vadd.xlane.f32.xlu1 %v2695_v53  ;;  %v13173_v53 = vld [vmem:[#allocation13_spill] sm:$0xff] }
 0x8fb   :  { %v2692_v7 = vsel %vm271_vm1, %v10943_v49, 0.0  ;;  %v2775_v29 = vsel %vm271_vm1, %v2757_v57, 0.0  ;;  %v2756_v46 = vmul.f32 %v10943_v49, %v10943_v49 }
 0x8fc   :  { %2693 = vadd.xlane.f32.xlu0 %v2692_v7  ;;  %v8637_v27 = vpop.f32.mrf.mxu0 }
 0x8fd   :  { %v2659_v37 = vadd.f32 %v8637_v27, %v13165_v9  ;;  %v2772_v6 = vsel %vm271_vm1, %v2756_v46, 0.0 }
 0x8fe   :  { %v2587_v30 = vpop.f32.mrf.mxu0 }
 0x8ff   :  { %v10956_v11 = vadd.f32 %v10935_v26, %v2659_v37  ;;  %v2658_v0 = vadd.f32 %v2587_v30, %v13166_v58  ;;  %v13174_v37 = vld [vmem:[#allocation12_spill] sm:$0xff] }
 0x900   :  { %2776 = vadd.xlane.f32.xlu0 %v2775_v29  ;;  %v8640_v23 = vpop.f32.mrf.mxu0 }
 0x901   :  { %v2661_v4 = vadd.f32 %v8640_v23, %v13167_v13  ;;  %v2701_v34 = vsel %vm271_vm1, %v10956_v11, 0.0  ;;  %v2759_v28 = vmul.f32 %v10956_v11, %v10956_v11  ;;  %v10965_v22 = vadd.f32 %v10935_v26, %v2658_v0 }
 0x902   :  { %2702 = vadd.xlane.f32.xlu1 %v2701_v34  ;;  %v2597_v50 = vpop.f32.mrf.mxu0 }
 0x903   :  { %v10969_v15 = vadd.f32 %v10935_v26, %v2661_v4  ;;  %v2781_v61 = vsel %vm271_vm1, %v2759_v28, 0.0  ;;  %v2660_v51 = vadd.f32 %v2597_v50, %v13168_v44  ;;  %v2698_v3 = vsel %vm271_vm1, %v10965_v22, 0.0  ;;  %v13175_v28 = vld [vmem:[#allocation15_spill] sm:$0xff]  ;;  %v13176_v44 = vld [vmem:[#allocation14_spill] sm:$0xff] }
 0x904   :  { %2773 = vadd.xlane.f32.xlu0 %v2772_v6  ;;  %v2758_v45 = vmul.f32 %v10965_v22, %v10965_v22 }
 0x905   :  { %v2707_v20 = vsel %vm271_vm1, %v10969_v15, 0.0  ;;  %v2761_v52 = vmul.f32 %v10969_v15, %v10969_v15  ;;  %v10982_v63 = vadd.f32 %v10935_v26, %v2660_v51 }
 0x906   :  { %2782 = vadd.xlane.f32.xlu1 %v2781_v61  ;;  %v2778_v2 = vsel %vm271_vm1, %v2758_v45, 0.0 }
 0x907   :  { %v2787_v54 = vsel %vm271_vm1, %v2761_v52, 0.0  ;;  %v2704_v31 = vsel %vm271_vm1, %v10982_v63, 0.0  ;;  %v2760_v1 = vmul.f32 %v10982_v63, %v10982_v63 }
 0x908   :  { %2699 = vadd.xlane.f32.xlu0 %v2698_v3 }
 0x909   :  { %v2784_v55 = vsel %vm271_vm1, %v2760_v1, 0.0 }
 0x90a   :  { %2708 = vadd.xlane.f32.xlu1 %v2707_v20 }
 0x90c   :  { %2779 = vadd.xlane.f32.xlu0 %v2778_v2 }
 0x90e   :  { %2788 = vadd.xlane.f32.xlu1 %v2787_v54 }
 0x910   :  { %2705 = vadd.xlane.f32.xlu0 %v2704_v31 }
 0x914   :  { %2785 = vadd.xlane.f32.xlu0 %v2784_v55  ;;  %v13177_v55 = vld [vmem:[#allocation17_spill] sm:$0xff] }
 0x920   :  { %v8643_v8 = vpop.f32.mrf.mxu0 }
 0x921   :  { %v2663_v41 = vadd.f32 %v8643_v8, %v13169_v35 }
 0x922   :  { %v2607_v47 = vpop.f32.mrf.mxu0 }
 0x923   :  { %v10996_v56 = vadd.f32 %v10935_v26, %v2663_v41  ;;  %v2662_v40 = vadd.f32 %v2607_v47, %v13170_v16  ;;  %v13178_v47 = vld [vmem:[#allocation16_spill] sm:$0xff] }
 0x925   :  { %v11006_v18 = vadd.f32 %v10935_v26, %v2662_v40  ;;  %v2713_v12 = vsel %vm271_vm1, %v10996_v56, 0.0  ;;  %v2763_v39 = vmul.f32 %v10996_v56, %v10996_v56 }
 0x926   :  { %2714 = vadd.xlane.f32.xlu1 %v2713_v12 }
 0x927   :  { %v2710_v48 = vsel %vm271_vm1, %v11006_v18, 0.0  ;;  %v2762_v17 = vmul.f32 %v11006_v18, %v11006_v18  ;;  %v2793_v36 = vsel %vm271_vm1, %v2763_v39, 0.0 }
 0x928   :  { %2711 = vadd.xlane.f32.xlu0 %v2710_v48 }
 0x929   :  { %v2790_v33 = vsel %vm271_vm1, %v2762_v17, 0.0 }
 0x92a   :  { %2794 = vadd.xlane.f32.xlu1 %v2793_v36 }
 0x92c   :  { %2791 = vadd.xlane.f32.xlu0 %v2790_v33 }
 0x937   :  { %v8646_v5 = vpop.f32.mrf.mxu0 }
 0x938   :  { %v2665_v59 = vadd.f32 %v8646_v5, %v13171_v10 }
 0x939   :  { %v2617_v14 = vpop.f32.mrf.mxu0 }
 0x93a   :  { %v11023_v38 = vadd.f32 %v10935_v26, %v2665_v59  ;;  %v2664_v43 = vadd.f32 %v2617_v14, %v13172_v25 }
 0x93b   :  { %v8649_v32 = vpop.f32.mrf.mxu0 }
 0x93c   :  { %v11027_v21 = vadd.f32 %v10935_v26, %v2664_v43  ;;  %v2667_v7 = vadd.f32 %v8649_v32, %v13173_v53  ;;  %v2719_v57 = vsel %vm271_vm1, %v11023_v38, 0.0  ;;  %v2765_v27 = vmul.f32 %v11023_v38, %v11023_v38 }
 0x93d   :  { %2720 = vadd.xlane.f32.xlu1 %v2719_v57  ;;  %v2627_v9 = vpop.f32.mrf.mxu0 }
 0x93e   :  { %v2666_v30 = vadd.f32 %v2627_v9, %v13174_v37  ;;  %v2716_v29 = vsel %vm271_vm1, %v11027_v21, 0.0  ;;  %v2764_v58 = vmul.f32 %v11027_v21, %v11027_v21  ;;  %v11040_v0 = vadd.f32 %v10935_v26, %v2667_v7 }
 0x93f   :  { %2717 = vadd.xlane.f32.xlu0 %v2716_v29  ;;  %v8652_v46 = vpop.f32.mrf.mxu0  ;;  %v2799_v23 = vsel %vm271_vm1, %v2765_v27, 0.0 }
 0x940   :  { %v11044_v13 = vadd.f32 %v10935_v26, %v2666_v30  ;;  %v2796_v4 = vsel %vm271_vm1, %v2764_v58, 0.0  ;;  %v2669_v6 = vadd.f32 %v8652_v46, %v13175_v28  ;;  %v2725_v50 = vsel %vm271_vm1, %v11040_v0, 0.0 }
 0x941   :  { %2800 = vadd.xlane.f32.xlu1 %v2799_v23  ;;  %v2637_v34 = vpop.f32.mrf.mxu0  ;;  %v2767_v61 = vmul.f32 %v11040_v0, %v11040_v0 }
 0x942   :  { %v2668_v51 = vadd.f32 %v2637_v34, %v13176_v44  ;;  %v2722_v3 = vsel %vm271_vm1, %v11044_v13, 0.0  ;;  %v2766_v45 = vmul.f32 %v11044_v13, %v11044_v13  ;;  %v11058_v52 = vadd.f32 %v10935_v26, %v2669_v6 }
 0x943   :  { %2797 = vadd.xlane.f32.xlu0 %v2796_v4  ;;  %v8655_v20 = vpop.f32.mrf.mxu0  ;;  %v2805_v2 = vsel %vm271_vm1, %v2767_v61, 0.0 }
 0x944   :  { %v11062_v54 = vadd.f32 %v10935_v26, %v2668_v51  ;;  %v2802_v31 = vsel %vm271_vm1, %v2766_v45, 0.0  ;;  %v2671_v8 = vadd.f32 %v8655_v20, %v13177_v55  ;;  %v2731_v35 = vsel %vm271_vm1, %v11058_v52, 0.0 }
 0x945   :  { %2726 = vadd.xlane.f32.xlu1 %v2725_v50  ;;  %v2647_v1 = vpop.f32.mrf.mxu0  ;;  %v2769_v41 = vmul.f32 %v11058_v52, %v11058_v52 }
 0x946   :  { %v2670_v24 = vadd.f32 %v2647_v1, %v13178_v47  ;;  %v2728_v16 = vsel %vm271_vm1, %v11062_v54, 0.0  ;;  %v2768_v40 = vmul.f32 %v11062_v54, %v11062_v54  ;;  %v11076_v42 = vadd.f32 %v10935_v26, %v2671_v8 }
 0x947   :  { %2723 = vadd.xlane.f32.xlu0 %v2722_v3  ;;  %v2811_v60 = vsel %vm271_vm1, %v2769_v41, 0.0 }
 0x948   :  { %v11080_v12 = vadd.f32 %v10935_v26, %v2670_v24  ;;  %v2808_v39 = vsel %vm271_vm1, %v2768_v40, 0.0  ;;  %v2737_v62 = vsel %vm271_vm1, %v11076_v42, 0.0  ;;  %v2771_v48 = vmul.f32 %v11076_v42, %v11076_v42 }
 0x949   :  { %2806 = vadd.xlane.f32.xlu1 %v2805_v2 }
 0x94a   :  { %v2734_v17 = vsel %vm271_vm1, %v11080_v12, 0.0  ;;  %v2770_v36 = vmul.f32 %v11080_v12, %v11080_v12  ;;  %v2817_v26 = vsel %vm271_vm1, %v2771_v48, 0.0 }
 0x94b   :  { %2803 = vadd.xlane.f32.xlu0 %v2802_v31 }
 0x94c   :  { %v2814_v33 = vsel %vm271_vm1, %v2770_v36, 0.0  ;;  %v11098_v36 = vld [vmem:[%s13104_s7 + $0x4] ss:$0 sm:$0xff] }
 0x94d   :  { %2732 = vadd.xlane.f32.xlu1 %v2731_v35 }
 0x94f   :  { %2729 = vadd.xlane.f32.xlu0 %v2728_v16 }
 0x951   :  { %2812 = vadd.xlane.f32.xlu1 %v2811_v60 }
 0x953   :  { %2809 = vadd.xlane.f32.xlu0 %v2808_v39 }
 0x955   :  { %2738 = vadd.xlane.f32.xlu1 %v2737_v62 }
 0x957   :  { %2735 = vadd.xlane.f32.xlu0 %v2734_v17 }
 0x959   :  { %2818 = vadd.xlane.f32.xlu1 %v2817_v26 }
 0x95b   :  { %2815 = vadd.xlane.f32.xlu0 %v2814_v33 }
 0x983   :  { %v2697_v5 = vpop.xlane.xlu1 %2696 }
 0x984   :  { %v2741_v59 = vmul.f32 0.03125, %v2697_v5 }
 0x985   :  { %v2694_v10 = vpop.xlane.xlu0 %2693 }
 0x986   :  { %v2837_v25 = vmul.f32 %v2741_v59, %v2741_v59  ;;  %v2740_v43 = vmul.f32 0.03125, %v2694_v10  ;;  %v2869_v24 = vsub.f32 %v10939_v19, %v2741_v59 }
 0x988   :  { %v2836_v9 = vmul.f32 %v2740_v43, %v2740_v43  ;;  %v2868_v48 = vsub.f32 %v10943_v49, %v2740_v43 }
 0x989   :  { %v2777_v14 = vpop.xlane.xlu0 %2776 }
 0x98a   :  { %v2821_v32 = vmul.f32 0.03125, %v2777_v14  ;;  %v11104_v14 = vld [vmem:[%s13104_s7 + $0x5] ss:$0 sm:$0xff] }
 0x98b   :  { %v2703_v7 = vpop.xlane.xlu1 %2702 }
 0x98c   :  { %v2853_v53 = vsub.f32 %v2821_v32, %v2837_v25  ;;  %v2743_v57 = vmul.f32 0.03125, %v2703_v7 }
 0x98d   :  { %v2774_v27 = vpop.xlane.xlu0 %2773 }
 0x98e   :  { %v2885_v37 = vadd.f32 1e-05, %v2853_v53  ;;  %v2820_v30 = vmul.f32 0.03125, %v2774_v27  ;;  %v2839_v58 = vmul.f32 %v2743_v57, %v2743_v57  ;;  %v2871_v43 = vsub.f32 %v10956_v11, %v2743_v57 }
 0x98f   :  { %v2783_v46 = vpop.xlane.xlu1 %2782 }
 0x990   :  { %9286 = vrsqrt.f32 %v2885_v37  ;;  %v2852_v29 = vsub.f32 %v2820_v30, %v2836_v9  ;;  %v2823_v23 = vmul.f32 0.03125, %v2783_v46 }
 0x991   :  { %v2700_v4 = vpop.xlane.xlu0 %2699 }
 0x992   :  { %v2884_v34 = vadd.f32 1e-05, %v2852_v29  ;;  %v2742_v28 = vmul.f32 0.03125, %v2700_v4  ;;  %v2855_v6 = vsub.f32 %v2823_v23, %v2839_v58 }
 0x993   :  { %v2709_v50 = vpop.xlane.xlu1 %2708 }
 0x994   :  { %9288 = vrsqrt.f32 %v2884_v34  ;;  %v2887_v61 = vadd.f32 1e-05, %v2855_v6  ;;  %v2745_v44 = vmul.f32 0.03125, %v2709_v50  ;;  %v2838_v3 = vmul.f32 %v2742_v28, %v2742_v28 }
 0x995   :  { %v2780_v51 = vpop.xlane.xlu0 %2779  ;;  %v2870_v27 = vsub.f32 %v10965_v22, %v2742_v28 }
 0x996   :  { %v2822_v45 = vmul.f32 0.03125, %v2780_v51  ;;  %9290 = vrsqrt.f32 %v2887_v61  ;;  %v2841_v31 = vmul.f32 %v2745_v44, %v2745_v44  ;;  %v2873_v57 = vsub.f32 %v10969_v15, %v2745_v44 }
 0x997   :  { %v2789_v2 = vpop.xlane.xlu1 %2788 }
 0x998   :  { %v2854_v20 = vsub.f32 %v2822_v45, %v2838_v3  ;;  %v2825_v1 = vmul.f32 0.03125, %v2789_v2 }
 0x999   :  { %v2706_v55 = vpop.xlane.xlu0 %2705 }
 0x99a   :  { %v2886_v8 = vadd.f32 1e-05, %v2854_v20  ;;  %v2744_v35 = vmul.f32 0.03125, %v2706_v55  ;;  %v2857_v41 = vsub.f32 %v2825_v1, %v2841_v31 }
 0x99c   :  { %9292 = vrsqrt.f32 %v2886_v8  ;;  %v2889_v16 = vadd.f32 1e-05, %v2857_v41  ;;  %v2840_v60 = vmul.f32 %v2744_v35, %v2744_v35  ;;  %v2872_v28 = vsub.f32 %v10982_v63, %v2744_v35 }
 0x99d   :  { %v9287_v47 = vpop.eup %9286  ;;  %v2786_v40 = vpop.xlane.xlu0 %2785 }
 0x99e   :  { %v2824_v39 = vmul.f32 0.03125, %v2786_v40  ;;  %v2917_v62 = vmul.f32 %v9287_v47, %v2869_v24  ;;  %9294 = vrsqrt.f32 %v2889_v16 }
 0x9a0   :  { %v2856_v17 = vsub.f32 %v2824_v39, %v2840_v60  ;;  %v2937_v10 = vmul.f32 %v11098_v36, %v2917_v62 }
 0x9a1   :  { %v9289_v26 = vpop.eup %9288 }
 0x9a2   :  { %v2888_v33 = vadd.f32 1e-05, %v2856_v17  ;;  %v2916_v5 = vmul.f32 %v9289_v26, %v2868_v48  ;;  %v2957_v53 = vadd.f32 %v11104_v14, %v2937_v10 }
 0x9a3   :  { %v9291_v59 = vpop.eup %9290 }
 0x9a4   :  { %9296 = vrsqrt.f32 %v2888_v33  ;;  %v2936_v25 = vmul.f32 %v11098_v36, %v2916_v5  ;;  %v2919_v7 = vmul.f32 %v9291_v59, %v2871_v43 }
 0x9a6   :  { %v2956_v32 = vadd.f32 %v11104_v14, %v2936_v25  ;;  %v2939_v30 = vmul.f32 %v11098_v36, %v2919_v7 }
 0x9a8   :  { %8664 = vmatprep.mubr.msk.f32.mxu1 %vm271_vm1, %v2956_v32  ;;  %v2959_v23 = vadd.f32 %v11104_v14, %v2939_v30 }
 0x9a9   :  { %v9293_v9 = vpop.eup %9292  ;;  %8665 = vmatmul.mubr.msk.f32.vlgmr.msra.gmra.mxu1 %vm271_vm1, %v2957_v53 }
 0x9aa   :  { %v2918_v37 = vmul.f32 %v9293_v9, %v2870_v27 }
 0x9ab   :  { %v9295_v29 = vpop.eup %9294 }
 0x9ac   :  { %v2938_v46 = vmul.f32 %v11098_v36, %v2918_v37  ;;  %v2921_v34 = vmul.f32 %v9295_v29, %v2873_v57 }
 0x9ae   :  { %v2958_v58 = vadd.f32 %v11104_v14, %v2938_v46  ;;  %v2941_v44 = vmul.f32 %v11098_v36, %v2921_v34 }
 0x9af   :  { %v2715_v4 = vpop.xlane.xlu1 %2714 }
 0x9b0   :  { %8667 = vmatprep.mubr.msk.f32.mxu1 %vm271_vm1, %v2958_v58  ;;  %v2747_v6 = vmul.f32 0.03125, %v2715_v4  ;;  %v2961_v47 = vadd.f32 %v11104_v14, %v2941_v44 }
 0x9b1   :  { %v9297_v50 = vpop.eup %9296  ;;  %8668 = vmatmul.mubr.msk.f32.gmra.mxu1 %vm271_vm1, %v2959_v23  ;;  %v2712_v61 = vpop.xlane.xlu0 %2711 }
 0x9b2   :  { %v2746_v51 = vmul.f32 0.03125, %v2712_v61  ;;  %v2920_v3 = vmul.f32 %v9297_v50, %v2872_v28  ;;  %v2843_v20 = vmul.f32 %v2747_v6, %v2747_v6  ;;  %v2875_v60 = vsub.f32 %v10996_v56, %v2747_v6 }
 0x9b3   :  { %v2795_v45 = vpop.xlane.xlu1 %2794 }
 0x9b4   :  { %v2827_v2 = vmul.f32 0.03125, %v2795_v45  ;;  %v2940_v31 = vmul.f32 %v11098_v36, %v2920_v3  ;;  %v2842_v55 = vmul.f32 %v2746_v51, %v2746_v51  ;;  %v2874_v17 = vsub.f32 %v11006_v18, %v2746_v51 }
 0x9b5   :  { %v2792_v1 = vpop.xlane.xlu0 %2791 }
 0x9b6   :  { %v2859_v8 = vsub.f32 %v2827_v2, %v2843_v20  ;;  %v2960_v35 = vadd.f32 %v11104_v14, %v2940_v31  ;;  %v2826_v41 = vmul.f32 0.03125, %v2792_v1 }
 0x9b8   :  { %v2891_v24 = vadd.f32 1e-05, %v2859_v8  ;;  %8670 = vmatprep.mubr.msk.f32.mxu1 %vm271_vm1, %v2960_v35  ;;  %v2858_v16 = vsub.f32 %v2826_v41, %v2842_v55 }
 0x9b9   :  { %8671 = vmatmul.mubr.msk.f32.gmra.mxu1 %vm271_vm1, %v2961_v47 }
 0x9ba   :  { %9298 = vrsqrt.f32 %v2891_v24  ;;  %v2890_v40 = vadd.f32 1e-05, %v2858_v16 }
 0x9bc   :  { %9300 = vrsqrt.f32 %v2890_v40 }
 0x9c6   :  { %v2721_v39 = vpop.xlane.xlu1 %2720 }
 0x9c7   :  { %v9299_v62 = vpop.eup %9298  ;;  %v2749_v48 = vmul.f32 0.03125, %v2721_v39 }
 0x9c8   :  { %v2718_v26 = vpop.xlane.xlu0 %2717  ;;  %v2923_v33 = vmul.f32 %v9299_v62, %v2875_v60 }
 0x9c9   :  { %v9301_v5 = vpop.eup %9300  ;;  %v2748_v10 = vmul.f32 0.03125, %v2718_v26  ;;  %v2845_v43 = vmul.f32 %v2749_v48, %v2749_v48  ;;  %v2877_v60 = vsub.f32 %v11023_v38, %v2749_v48 }
 0x9ca   :  { %v2801_v59 = vpop.xlane.xlu1 %2800  ;;  %v2922_v25 = vmul.f32 %v9301_v5, %v2874_v17  ;;  %v2943_v53 = vmul.f32 %v11098_v36, %v2923_v33 }
 0x9cb   :  { %v2829_v32 = vmul.f32 0.03125, %v2801_v59  ;;  %v2844_v9 = vmul.f32 %v2748_v10, %v2748_v10 }
 0x9cc   :  { %v2798_v7 = vpop.xlane.xlu0 %2797  ;;  %v2942_v27 = vmul.f32 %v11098_v36, %v2922_v25  ;;  %v2963_v4 = vadd.f32 %v11104_v14, %v2943_v53  ;;  %v2876_v53 = vsub.f32 %v11027_v21, %v2748_v10 }
 0x9cd   :  { %v2861_v37 = vsub.f32 %v2829_v32, %v2845_v43  ;;  %v2828_v30 = vmul.f32 0.03125, %v2798_v7 }
 0x9ce   :  { %v2727_v29 = vpop.xlane.xlu1 %2726  ;;  %v2962_v46 = vadd.f32 %v11104_v14, %v2942_v27 }
 0x9cf   :  { %v2893_v57 = vadd.f32 1e-05, %v2861_v37  ;;  %v2860_v58 = vsub.f32 %v2828_v30, %v2844_v9  ;;  %v11132_v23 = vmul.f32 0.03125, %v2727_v29 }
 0x9d0   :  { %v2724_v34 = vpop.xlane.xlu0 %2723  ;;  %8673 = vmatprep.mubr.msk.f32.mxu1 %vm271_vm1, %v2962_v46 }
 0x9d1   :  { %9302 = vrsqrt.f32 %v2893_v57  ;;  %v2892_v28 = vadd.f32 1e-05, %v2860_v58  ;;  %8674 = vmatmul.mubr.msk.f32.gmra.mxu1 %vm271_vm1, %v2963_v4  ;;  %v11137_v6 = vmul.f32 0.03125, %v2724_v34  ;;  %v2847_v61 = vmul.f32 %v11132_v23, %v11132_v23 }
 0x9d2   :  { %v2807_v50 = vpop.xlane.xlu1 %2806  ;;  %v2879_v4 = vsub.f32 %v11040_v0, %v11132_v23 }
 0x9d3   :  { %9304 = vrsqrt.f32 %v2892_v28  ;;  %v2831_v51 = vmul.f32 0.03125, %v2807_v50  ;;  %v2846_v45 = vmul.f32 %v11137_v6, %v11137_v6 }
 0x9d4   :  { %v2804_v3 = vpop.xlane.xlu0 %2803 }
 0x9d5   :  { %v2863_v44 = vsub.f32 %v2831_v51, %v2847_v61  ;;  %v2830_v20 = vmul.f32 0.03125, %v2804_v3  ;;  %v2878_v61 = vsub.f32 %v11044_v13, %v11137_v6 }
 0x9d6   :  { %v2733_v2 = vpop.xlane.xlu1 %2732 }
 0x9d7   :  { %v2895_v31 = vadd.f32 1e-05, %v2863_v44  ;;  %v2862_v1 = vsub.f32 %v2830_v20, %v2846_v45  ;;  %v2753_v55 = vmul.f32 0.03125, %v2733_v2 }
 0x9d8   :  { %v2730_v8 = vpop.xlane.xlu0 %2729 }
 0x9d9   :  { %9306 = vrsqrt.f32 %v2895_v31  ;;  %v2894_v35 = vadd.f32 1e-05, %v2862_v1  ;;  %v2752_v41 = vmul.f32 0.03125, %v2730_v8  ;;  %v2849_v24 = vmul.f32 %v2753_v55, %v2753_v55 }
 0x9da   :  { %v2813_v47 = vpop.xlane.xlu1 %2812  ;;  %v2881_v8 = vsub.f32 %v11058_v52, %v2753_v55 }
 0x9db   :  { %9308 = vrsqrt.f32 %v2894_v35  ;;  %v2833_v16 = vmul.f32 0.03125, %v2813_v47  ;;  %v2848_v39 = vmul.f32 %v2752_v41, %v2752_v41 }
 0x9dc   :  { %v2810_v40 = vpop.xlane.xlu0 %2809 }
 0x9dd   :  { %v2865_v62 = vsub.f32 %v2833_v16, %v2849_v24  ;;  %v2832_v17 = vmul.f32 0.03125, %v2810_v40  ;;  %v2880_v16 = vsub.f32 %v11062_v54, %v2752_v41 }
 0x9de   :  { %v9303_v26 = vpop.eup %9302  ;;  %v2739_v33 = vpop.xlane.xlu1 %2738 }
 0x9df   :  { %v2897_v5 = vadd.f32 1e-05, %v2865_v62  ;;  %v2864_v59 = vsub.f32 %v2832_v17, %v2848_v39  ;;  %v2755_v25 = vmul.f32 0.03125, %v2739_v33  ;;  %v2925_v43 = vmul.f32 %v9303_v26, %v2877_v60 }
 0x9e0   :  { %v9305_v32 = vpop.eup %9304  ;;  %v2736_v7 = vpop.xlane.xlu0 %2735 }
 0x9e1   :  { %9310 = vrsqrt.f32 %v2897_v5  ;;  %v2896_v27 = vadd.f32 1e-05, %v2864_v59  ;;  %v2754_v9 = vmul.f32 0.03125, %v2736_v7  ;;  %v2924_v30 = vmul.f32 %v9305_v32, %v2876_v53 }
 0x9e2   :  { %v2819_v37 = vpop.xlane.xlu1 %2818  ;;  %v2851_v48 = vmul.f32 %v2755_v25, %v2755_v25  ;;  %v2945_v46 = vmul.f32 %v11098_v36, %v2925_v43  ;;  %v2883_v55 = vsub.f32 %v11076_v42, %v2755_v25 }
 0x9e3   :  { %9312 = vrsqrt.f32 %v2896_v27  ;;  %v2835_v29 = vmul.f32 0.03125, %v2819_v37  ;;  %v2944_v58 = vmul.f32 %v11098_v36, %v2924_v30  ;;  %v2850_v34 = vmul.f32 %v2754_v9, %v2754_v9  ;;  %v3371_v37 = vld [vmem:[%s13107_s6 + $0x30] sm:$0xff]  ;;  %v3368_v30 = vld [vmem:[%s13107_s6 + $0x18] sm:$0xff] }
 0x9e4   :  { %v2816_v57 = vpop.xlane.xlu0 %2815  ;;  %v2965_v44 = vadd.f32 %v11104_v14, %v2945_v46  ;;  %v2882_v41 = vsub.f32 %v11080_v12, %v2754_v9  ;;  %v3372_v9 = vld [vmem:[%s13107_s6 + $0x38] sm:$0xff]  ;;  %v3365_v46 = vld [vmem:[%s13107_s6] sm:$0xff] }
 0x9e5   :  { %v2867_v28 = vsub.f32 %v2835_v29, %v2851_v48  ;;  %v2834_v10 = vmul.f32 0.03125, %v2816_v57  ;;  %v2964_v51 = vadd.f32 %v11104_v14, %v2944_v58  ;;  %8688 = vmatprep.subr.mxu0 %v3372_v9  ;;  %v3367_v48 = vld [vmem:[%s13107_s6 + $0x10] sm:$0xff]  ;;  %v3366_v29 = vld [vmem:[%s13107_s6 + $0x8] sm:$0xff]  ;;  %v7597_v57 = vld [vmem:[%s13104_s7 + $0x6] ss:$0 sm:$0xff] }
 0x9e6   :  { %v9307_v50 = vpop.eup %9306  ;;  %8689 = vmatpush3.msra.mxu0 %v3372_v9 }
 0x9e7   :  { %v2899_v3 = vadd.f32 1e-05, %v2867_v28  ;;  %v2866_v45 = vsub.f32 %v2834_v10, %v2850_v34  ;;  %v2927_v20 = vmul.f32 %v9307_v50, %v2879_v4  ;;  %8676 = vmatprep.mubr.msk.f32.mxu1 %vm271_vm1, %v2964_v51  ;;  %8690 = vmatprep.subr.mxu0 %v3371_v37 }
 0x9e8   :  { %v9309_v2 = vpop.eup %9308  ;;  %8677 = vmatmul.mubr.msk.f32.gmra.mxu1 %vm271_vm1, %v2965_v44  ;;  %8691 = vmatpush3.msra.mxu0 %v3371_v37 }
 0x9e9   :  { %9314 = vrsqrt.f32 %v2899_v3  ;;  %v2898_v31 = vadd.f32 1e-05, %v2866_v45  ;;  %v2926_v23 = vmul.f32 %v9309_v2, %v2878_v61  ;;  %v2947_v1 = vmul.f32 %v11098_v36, %v2927_v20 }
 0x9eb   :  { %9316 = vrsqrt.f32 %v2898_v31  ;;  %v2946_v6 = vmul.f32 %v11098_v36, %v2926_v23  ;;  %v2967_v24 = vadd.f32 %v11104_v14, %v2947_v1 }
 0x9ed   :  { %v2966_v35 = vadd.f32 %v11104_v14, %v2946_v6 }
 0x9ee   :  { %v9311_v47 = vpop.eup %9310 }
 0x9ef   :  { %8679 = vmatprep.mubr.msk.f32.mxu1 %vm271_vm1, %v2966_v35  ;;  %v2929_v40 = vmul.f32 %v9311_v47, %v2881_v8 }
 0x9f0   :  { %v9313_v60 = vpop.eup %9312  ;;  %8680 = vmatmul.mubr.msk.f32.gmra.mxu1 %vm271_vm1, %v2967_v24 }
 0x9f1   :  { %v2928_v39 = vmul.f32 %v9313_v60, %v2880_v16  ;;  %v2949_v62 = vmul.f32 %v11098_v36, %v2929_v40 }
 0x9f3   :  { %v2948_v17 = vmul.f32 %v11098_v36, %v2928_v39  ;;  %v2969_v5 = vadd.f32 %v11104_v14, %v2949_v62 }
 0x9f5   :  { %v2968_v26 = vadd.f32 %v11104_v14, %v2948_v17 }
 0x9f6   :  { %v9315_v33 = vpop.eup %9314 }
 0x9f7   :  { %8682 = vmatprep.mubr.msk.f32.mxu1 %vm271_vm1, %v2968_v26  ;;  %v2931_v59 = vmul.f32 %v9315_v33, %v2883_v55 }
 0x9f8   :  { %v9317_v43 = vpop.eup %9316  ;;  %8683 = vmatmul.mubr.msk.f32.gmra.mxu1 %vm271_vm1, %v2969_v5 }
 0x9f9   :  { %v2930_v32 = vmul.f32 %v9317_v43, %v2882_v41  ;;  %v2951_v53 = vmul.f32 %v11098_v36, %v2931_v59 }
 0x9fb   :  { %v2950_v7 = vmul.f32 %v11098_v36, %v2930_v32  ;;  %v2971_v27 = vadd.f32 %v11104_v14, %v2951_v53  ;;  %v3370_v36 = vld [vmem:[%s13107_s6 + $0x28] sm:$0xff] }
 0x9fc   :  { %8692 = vmatprep.subr.mxu0 %v3370_v36 }
 0x9fd   :  { %v2970_v25 = vadd.f32 %v11104_v14, %v2950_v7  ;;  %v3369_v14 = vld [vmem:[%s13107_s6 + $0x20] sm:$0xff]  ;;  %8693 = vmatpush3.msra.mxu0 %v3370_v36 }
 0x9fe   :  { %8694 = vmatprep.subr.mxu0 %v3369_v14 }
 0x9ff   :  { %8685 = vmatprep.mubr.msk.f32.mxu1 %vm271_vm1, %v2970_v25  ;;  %8695 = vmatpush3.msra.mxu0 %v3369_v14 }
 0xa00   :  { %8686 = vmatmul.mubr.msk.f32.gmra.mxu1 %vm271_vm1, %v2971_v27  ;;  %8696 = vmatprep.subr.mxu0 %v3368_v30 }
 0xa01   :  { %8697 = vmatpush3.msra.mxu0 %v3368_v30 }
 0xa02   :  { %8698 = vmatprep.subr.mxu0 %v3367_v48 }
 0xa03   :  { %8699 = vmatpush3.msra.mxu0 %v3367_v48 }
 0xa04   :  { %8700 = vmatprep.subr.mxu0 %v3366_v29 }
 0xa05   :  { %8701 = vmatpush3.msra.mxu0 %v3366_v29 }
 0xa06   :  { %8702 = vmatprep.subr.mxu0 %v3365_v46 }
 0xa07   :  { %8703 = vmatpush3.msra.mxu0 %v3365_v46 }
 0xa69   :  { %v8666_v58 = vpop.f32.mrf.mxu1 }
 0xa6a   :  { %v11204_v4 = vadd.f32 %v8666_v58, %v7597_v57 }
 0xa6b   :  { %v3094_v34 = vpop.f32.mrf.mxu1 }
 0xa6c   :  { %v11206_v28 = vadd.f32 %v7597_v57, %v3094_v34  ;;  %3303 = vrot.lane.b32.xlu1 %v11204_v4, %s9671_s29  ;;  %v7615_v62 = vmul.f32 -1.442695, %v11204_v4 }
 0xa6e   :  { %3301 = vrot.lane.b32.xlu0 %v11206_v28, %s9671_s29  ;;  %v7614_v39 = vmul.f32 -1.442695, %v11206_v28 }
 0xa70   :  { %9318 = vpow2.f32 %v7614_v39 }
 0xa71   :  { %v8669_v10 = vpop.f32.mrf.mxu1  ;;  %9320 = vpow2.f32 %v7615_v62 }
 0xa72   :  { %v11216_v51 = vadd.f32 %v8669_v10, %v7597_v57 }
 0xa73   :  { %v3104_v50 = vpop.f32.mrf.mxu1 }
 0xa74   :  { %v11212_v61 = vadd.f32 %v7597_v57, %v3104_v50  ;;  %v7617_v32 = vmul.f32 -1.442695, %v11216_v51 }
 0xa76   :  { %3305 = vrot.lane.b32.xlu1 %v11212_v61, %s9671_s29  ;;  %v7616_v5 = vmul.f32 -1.442695, %v11212_v61 }
 0xa78   :  { %9322 = vpow2.f32 %v7616_v5 }
 0xa79   :  { %v8672_v3 = vpop.f32.mrf.mxu1  ;;  %9324 = vpow2.f32 %v7617_v32 }
 0xa7a   :  { %3307 = vrot.lane.b32.xlu1 %v11216_v51, %s9671_s29  ;;  %v11220_v44 = vadd.f32 %v8672_v3, %v7597_v57 }
 0xa7b   :  { %v3114_v45 = vpop.f32.mrf.mxu1 }
 0xa7c   :  { %v11222_v20 = vadd.f32 %v7597_v57, %v3114_v45  ;;  %v7619_v7 = vmul.f32 -1.442695, %v11220_v44 }
 0xa7d   :  { %v9319_v27 = vpop.eup %9318 }
 0xa7e   :  { %3311 = vrot.lane.b32.xlu1 %v11220_v44, %s9671_s29  ;;  %3309 = vrot.lane.b32.xlu0 %v11222_v20, %s9671_s29  ;;  %v7618_v25 = vmul.f32 -1.442695, %v11222_v20  ;;  %v9321_v9 = vpop.eup %9320  ;;  %9326 = vpow2.f32 %v7619_v7  ;;  %v3221_v37 = vadd.f32 1.0, %v9319_v27 }
 0xa7f   :  { %v3222_v36 = vadd.f32 1.0, %v9321_v9 }
 0xa80   :  { %9328 = vpow2.f32 %v7618_v25 }
 0xa81   :  { %9330 = vrcp.f32 %v3221_v37 }
 0xa82   :  { %9332 = vrcp.f32 %v3222_v36 }
 0xa85   :  { %v9323_v14 = vpop.eup %9322 }
 0xa86   :  { %v3223_v30 = vadd.f32 1.0, %v9323_v14  ;;  %v9325_v48 = vpop.eup %9324 }
 0xa87   :  { %v3224_v46 = vadd.f32 1.0, %v9325_v48 }
 0xa88   :  { %9334 = vrcp.f32 %v3223_v30 }
 0xa89   :  { %9336 = vrcp.f32 %v3224_v46 }
 0xa8b   :  { %v9327_v29 = vpop.eup %9326 }
 0xa8c   :  { %v3226_v58 = vadd.f32 1.0, %v9327_v29 }
 0xa8e   :  { %9338 = vrcp.f32 %v3226_v58 }
 0xa91   :  { %v8675_v2 = vpop.f32.mrf.mxu1 }
 0xa92   :  { %v11228_v31 = vadd.f32 %v8675_v2, %v7597_v57 }
 0xa93   :  { %v3124_v23 = vpop.f32.mrf.mxu1 }
 0xa94   :  { %v11230_v1 = vadd.f32 %v7597_v57, %v3124_v23  ;;  %3315 = vrot.lane.b32.xlu1 %v11228_v31, %s9671_s29  ;;  %v7621_v23 = vmul.f32 -1.442695, %v11228_v31 }
 0xa96   :  { %3313 = vrot.lane.b32.xlu0 %v11230_v1, %s9671_s29  ;;  %v7620_v3 = vmul.f32 -1.442695, %v11230_v1 }
 0xaa8   :  { %v8678_v6 = vpop.f32.mrf.mxu1 }
 0xaa9   :  { %v11236_v8 = vadd.f32 %v8678_v6, %v7597_v57 }
 0xaaa   :  { %v3134_v35 = vpop.f32.mrf.mxu1 }
 0xaab   :  { %v11238_v47 = vadd.f32 %v7597_v57, %v3134_v35  ;;  %3319 = vrot.lane.b32.xlu1 %v11236_v8, %s9671_s29 }
 0xaad   :  { %3317 = vrot.lane.b32.xlu0 %v11238_v47, %s9671_s29 }
 0xab0   :  { %v8681_v24 = vpop.f32.mrf.mxu1 }
 0xab1   :  { %v11244_v16 = vadd.f32 %v8681_v24, %v7597_v57 }
 0xab2   :  { %v3144_v40 = vpop.f32.mrf.mxu1 }
 0xab3   :  { %v11246_v60 = vadd.f32 %v7597_v57, %v3144_v40  ;;  %3323 = vrot.lane.b32.xlu1 %v11244_v16, %s9671_s29  ;;  %v7625_v29 = vmul.f32 -1.442695, %v11244_v16 }
 0xab5   :  { %3321 = vrot.lane.b32.xlu0 %v11246_v60, %s9671_s29 }
 0xab8   :  { %v8684_v17 = vpop.f32.mrf.mxu1 }
 0xab9   :  { %v11254_v55 = vadd.f32 %v8684_v17, %v7597_v57 }
 0xaba   :  { %v3154_v26 = vpop.f32.mrf.mxu1 }
 0xabb   :  { %v11256_v33 = vadd.f32 %v7597_v57, %v3154_v26  ;;  %3327 = vrot.lane.b32.xlu1 %v11254_v55, %s9671_s29 }
 0xabd   :  { %3325 = vrot.lane.b32.xlu0 %v11256_v33, %s9671_s29  ;;  %v7626_v58 = vmul.f32 -1.442695, %v11256_v33 }
 0xac0   :  { %v8687_v41 = vpop.f32.mrf.mxu1 }
 0xac1   :  { %v11263_v59 = vadd.f32 %v8687_v41, %v7597_v57 }
 0xac2   :  { %v3164_v43 = vpop.f32.mrf.mxu1 }
 0xac3   :  { %v11266_v53 = vadd.f32 %v7597_v57, %v3164_v43  ;;  %3331 = vrot.lane.b32.xlu1 %v11263_v59, %s9671_s29  ;;  %v9329_v57 = vpop.eup %9328 }
 0xac4   :  { %v3225_v34 = vadd.f32 1.0, %v9329_v57  ;;  %v9331_v10 = vpop.eup %9330 }
 0xac5   :  { %3329 = vrot.lane.b32.xlu0 %v11266_v53, %s9671_s29  ;;  %v9333_v50 = vpop.eup %9332  ;;  %v3269_v2 = vmul.f32 %v9331_v10, %v11206_v28 }
 0xac6   :  { %9340 = vrcp.f32 %v3225_v34  ;;  %v3270_v6 = vmul.f32 %v9333_v50, %v11204_v4  ;;  %v9335_v39 = vpop.eup %9334  ;;  %v7627_v34 = vmul.f32 -1.442695, %v11254_v55 }
 0xac7   :  { %9342 = vpow2.f32 %v7620_v3  ;;  %v3271_v62 = vmul.f32 %v9335_v39, %v11212_v61  ;;  %v9337_v17 = vpop.eup %9336  ;;  %v7628_v39 = vmul.f32 -1.442695, %v11266_v53 }
 0xac8   :  { %9344 = vpow2.f32 %v7621_v23  ;;  %v9339_v28 = vpop.eup %9338  ;;  %v3272_v4 = vmul.f32 %v9337_v17, %v11216_v51  ;;  %v7622_v51 = vmul.f32 -1.442695, %v11238_v47 }
 0xac9   :  { %v3274_v7 = vmul.f32 %v9339_v28, %v11220_v44  ;;  %v7623_v44 = vmul.f32 -1.442695, %v11236_v8 }
 0xad3   :  { %v9341_v41 = vpop.eup %9340 }
 0xad4   :  { %v3273_v25 = vmul.f32 %v9341_v41, %v11222_v20  ;;  %v9343_v27 = vpop.eup %9342  ;;  %v7624_v20 = vmul.f32 -1.442695, %v11246_v60 }
 0xad5   :  { %v9345_v37 = vpop.eup %9344  ;;  %v3227_v30 = vadd.f32 1.0, %v9343_v27 }
 0xad6   :  { %v3228_v48 = vadd.f32 1.0, %v9345_v37 }
 0xad7   :  { %9346 = vrcp.f32 %v3227_v30 }
 0xad8   :  { %9348 = vrcp.f32 %v3228_v48 }
 0xad9   :  { %9350 = vpow2.f32 %v7622_v51 }
 0xada   :  { %9352 = vpow2.f32 %v7623_v44 }
 0xadb   :  { %9354 = vpow2.f32 %v7624_v20 }
 0xadc   :  { %9356 = vpow2.f32 %v7625_v29 }
 0xadd   :  { %9358 = vpow2.f32 %v7626_v58 }
 0xade   :  { %v3304_v45 = vpop.permute.xlu1 %3303  ;;  %9360 = vpow2.f32 %v7627_v34 }
 0xadf   :  { %v3350_v40 = vmul.f32 %v3304_v45, %v3270_v6 }
 0xae0   :  { %v3302_v35 = vpop.permute.xlu0 %3301 }
 0xae1   :  { %v3349_v24 = vmul.f32 %v3302_v35, %v3269_v2 }
 0xae3   :  { %8704 = vmatprep.mubr.msk.f32.mxu0 %vm1076_vm2, %v3349_v24 }
 0xae4   :  { %8705 = vmatmul.mubr.msk.f32.vlgmr.msra.gmra.mxu0 %vm1076_vm2, %v3350_v40  ;;  %v9347_v46 = vpop.eup %9346 }
 0xae5   :  { %v9349_v57 = vpop.eup %9348  ;;  %v3275_v50 = vmul.f32 %v9347_v46, %v11230_v1  ;;  %v7629_v1 = vmul.f32 -1.442695, %v11263_v59 }
 0xae6   :  { %v9351_v3 = vpop.eup %9350  ;;  %v3276_v45 = vmul.f32 %v9349_v57, %v11228_v31 }
 0xae7   :  { %v9353_v23 = vpop.eup %9352  ;;  %v3229_v24 = vadd.f32 1.0, %v9351_v3 }
 0xae8   :  { %v3306_v26 = vpop.permute.xlu1 %3305  ;;  %v3230_v40 = vadd.f32 1.0, %v9353_v23 }
 0xae9   :  { %v3351_v5 = vmul.f32 %v3306_v26, %v3271_v62  ;;  %v9355_v62 = vpop.eup %9354  ;;  %9362 = vrcp.f32 %v3229_v24 }
 0xaea   :  { %v9357_v17 = vpop.eup %9356  ;;  %9364 = vrcp.f32 %v3230_v40  ;;  %v3231_v31 = vadd.f32 1.0, %v9355_v62 }
 0xaeb   :  { %8707 = vmatprep.mubr.msk.f32.mxu0 %vm1076_vm2, %v3351_v5  ;;  %9366 = vpow2.f32 %v7628_v39  ;;  %v3232_v26 = vadd.f32 1.0, %v9357_v17  ;;  %v9359_v5 = vpop.eup %9358 }
 0xaec   :  { %v3308_v43 = vpop.permute.xlu1 %3307  ;;  %9368 = vpow2.f32 %v7629_v1  ;;  %v9361_v28 = vpop.eup %9360 }
 0xaed   :  { %v3352_v32 = vmul.f32 %v3308_v43, %v3272_v4  ;;  %9370 = vrcp.f32 %v3231_v31  ;;  %v3233_v4 = vadd.f32 1.0, %v9359_v5  ;;  %v3234_v41 = vadd.f32 1.0, %v9361_v28 }
 0xaee   :  { %9372 = vrcp.f32 %v3232_v26 }
 0xaef   :  { %8708 = vmatmul.mubr.msk.f32.gmra.mxu0 %vm1076_vm2, %v3352_v32  ;;  %9374 = vrcp.f32 %v3233_v4 }
 0xaf0   :  { %v3312_v9 = vpop.permute.xlu1 %3311  ;;  %v3310_v61 = vpop.permute.xlu0 %3309  ;;  %9376 = vrcp.f32 %v3234_v41 }
 0xaf1   :  { %v3354_v36 = vmul.f32 %v3312_v9, %v3274_v7  ;;  %v3353_v14 = vmul.f32 %v3310_v61, %v3273_v25 }
 0xaf3   :  { %8710 = vmatprep.mubr.msk.f32.mxu0 %vm1076_vm2, %v3353_v14 }
 0xaf4   :  { %8711 = vmatmul.mubr.msk.f32.gmra.mxu0 %vm1076_vm2, %v3354_v36 }
 0xaf6   :  { %v9363_v43 = vpop.eup %9362 }
 0xaf7   :  { %v9365_v32 = vpop.eup %9364  ;;  %v3277_v27 = vmul.f32 %v9363_v43, %v11238_v47 }
 0xaf8   :  { %v9367_v7 = vpop.eup %9366  ;;  %v3278_v61 = vmul.f32 %v9365_v32, %v11236_v8 }
 0xaf9   :  { %v9369_v9 = vpop.eup %9368  ;;  %v3235_v14 = vadd.f32 1.0, %v9367_v7 }
 0xafa   :  { %v9371_v48 = vpop.eup %9370  ;;  %v3236_v51 = vadd.f32 1.0, %v9369_v9 }
 0xafb   :  { %v9373_v44 = vpop.eup %9372  ;;  %9378 = vrcp.f32 %v3235_v14  ;;  %v3279_v29 = vmul.f32 %v9371_v48, %v11246_v60 }
 0xafc   :  { %9380 = vrcp.f32 %v3236_v51  ;;  %v3280_v47 = vmul.f32 %v9373_v44, %v11244_v16  ;;  %v9375_v58 = vpop.eup %9374 }
 0xafd   :  { %v9377_v34 = vpop.eup %9376 }
 0xafe   :  { %v3282_v3 = vmul.f32 %v9377_v34, %v11254_v55  ;;  %v11319_v55 = vld [vmem:[%s13104_s7 + $0x7] ss:$0 sm:$0xff] }
 0xb06   :  { %v3316_v10 = vpop.permute.xlu1 %3315 }
 0xb07   :  { %v3356_v35 = vmul.f32 %v3316_v10, %v3276_v45 }
 0xb08   :  { %v3314_v2 = vpop.permute.xlu0 %3313  ;;  %v9379_v16 = vpop.eup %9378 }
 0xb09   :  { %v3355_v6 = vmul.f32 %v3314_v2, %v3275_v50  ;;  %v3281_v50 = vmul.f32 %v9375_v58, %v11256_v33  ;;  %v9381_v23 = vpop.eup %9380 }
 0xb0a   :  { %v3284_v24 = vmul.f32 %v9381_v23, %v11263_v59  ;;  %v7658_v23 = vld [vmem:[%s13103_s3 + $0x28] sm:$0xff] }
 0xb0b   :  { %8713 = vmatprep.mubr.msk.f32.mxu0 %vm1076_vm2, %v3355_v6 }
 0xb0c   :  { %8714 = vmatmul.mubr.msk.f32.gmra.mxu0 %vm1076_vm2, %v3356_v35  ;;  %v3283_v35 = vmul.f32 %v9379_v16, %v11266_v53  ;;  %v7659_v16 = vld [vmem:[%s13103_s3 + $0x30] sm:$0xff] }
 0xb1d   :  { %v3320_v25 = vpop.permute.xlu1 %3319 }
 0xb1e   :  { %v3358_v30 = vmul.f32 %v3320_v25, %v3278_v61 }
 0xb1f   :  { %v3318_v37 = vpop.permute.xlu0 %3317 }
 0xb20   :  { %v3357_v36 = vmul.f32 %v3318_v37, %v3277_v27 }
 0xb22   :  { %8716 = vmatprep.mubr.msk.f32.mxu0 %vm1076_vm2, %v3357_v36 }
 0xb23   :  { %8717 = vmatmul.mubr.msk.f32.gmra.mxu0 %vm1076_vm2, %v3358_v30 }
 0xb25   :  { %v3324_v20 = vpop.permute.xlu1 %3323 }
 0xb26   :  { %v3360_v57 = vmul.f32 %v3324_v20, %v3280_v47 }
 0xb27   :  { %v3322_v46 = vpop.permute.xlu0 %3321 }
 0xb28   :  { %v3359_v8 = vmul.f32 %v3322_v46, %v3279_v29 }
 0xb2a   :  { %8719 = vmatprep.mubr.msk.f32.mxu0 %vm1076_vm2, %v3359_v8 }
 0xb2b   :  { %8720 = vmatmul.mubr.msk.f32.gmra.mxu0 %vm1076_vm2, %v3360_v57 }
 0xb2d   :  { %v3328_v10 = vpop.permute.xlu1 %3327 }
 0xb2e   :  { %v3362_v60 = vmul.f32 %v3328_v10, %v3282_v3 }
 0xb2f   :  { %v3326_v45 = vpop.permute.xlu0 %3325 }
 0xb30   :  { %v3361_v2 = vmul.f32 %v3326_v45, %v3281_v50 }
 0xb32   :  { %8722 = vmatprep.mubr.msk.f32.mxu0 %vm1076_vm2, %v3361_v2 }
 0xb33   :  { %8723 = vmatmul.mubr.msk.f32.gmra.mxu0 %vm1076_vm2, %v3362_v60 }
 0xb35   :  { %v3332_v6 = vpop.permute.xlu1 %3331 }
 0xb36   :  { %v3364_v62 = vmul.f32 %v3332_v6, %v3284_v24 }
 0xb37   :  { %v3330_v40 = vpop.permute.xlu0 %3329 }
 0xb38   :  { %v3363_v39 = vmul.f32 %v3330_v40, %v3283_v35  ;;  %v7657_v35 = vld [vmem:[%s13103_s3 + $0x20] sm:$0xff] }
 0xb3a   :  { %8725 = vmatprep.mubr.msk.f32.mxu0 %vm1076_vm2, %v3363_v39 }
 0xb3b   :  { %8726 = vmatmul.mubr.msk.f32.gmra.mxu0 %vm1076_vm2, %v3364_v62 }
 0xba4   :  { %v8706_v33 = vpop.f32.mrf.mxu0 }
 0xba5   :  { %v3567_v1 = vadd.f32 %v8706_v33, %v10939_v19 }
 0xba6   :  { %v3487_v17 = vpop.f32.mrf.mxu0 }
 0xba7   :  { %v11323_v53 = vadd.f32 %v11319_v55, %v3567_v1  ;;  %v3566_v59 = vadd.f32 %v3487_v17, %v10943_v49 }
 0xba9   :  { %13179 = vst [vmem:[#allocation18_spill] sm:$0xff] %v11323_v53  ;;  %v11327_v31 = vadd.f32 %v11319_v55, %v3566_v59  ;;  %v3614_v26 = vsel %vm271_vm1, %v11323_v53, 0.0  ;;  %v3676_v28 = vmul.f32 %v11323_v53, %v11323_v53 }
 0xbaa   :  { %3615 = vadd.xlane.f32.xlu1 %v3614_v26 }
 0xbab   :  { %13180 = vst [vmem:[#allocation2_spill] sm:$0xff] %v11327_v31  ;;  %v3611_v5 = vsel %vm271_vm1, %v11327_v31, 0.0  ;;  %v3694_v4 = vsel %vm271_vm1, %v3676_v28, 0.0  ;;  %v3675_v49 = vmul.f32 %v11327_v31, %v11327_v31 }
 0xbac   :  { %3612 = vadd.xlane.f32.xlu0 %v3611_v5 }
 0xbad   :  { %v3691_v25 = vsel %vm271_vm1, %v3675_v49, 0.0 }
 0xbaf   :  { %v8709_v19 = vpop.f32.mrf.mxu0 }
 0xbb0   :  { %v3569_v41 = vadd.f32 %v8709_v19, %v10956_v11  ;;  %3695 = vadd.xlane.f32.xlu0 %v3694_v4 }
 0xbb1   :  { %v3497_v43 = vpop.f32.mrf.mxu0 }
 0xbb2   :  { %v11340_v32 = vadd.f32 %v11319_v55, %v3569_v41  ;;  %v3568_v7 = vadd.f32 %v3497_v43, %v10965_v22 }
 0xbb4   :  { %13181 = vst [vmem:[#allocation3_spill] sm:$0xff] %v11340_v32  ;;  %v11345_v27 = vadd.f32 %v11319_v55, %v3568_v7  ;;  %3692 = vadd.xlane.f32.xlu0 %v3691_v25  ;;  %v8712_v9 = vpop.f32.mrf.mxu0  ;;  %v3620_v61 = vsel %vm271_vm1, %v11340_v32, 0.0  ;;  %v3678_v11 = vmul.f32 %v11340_v32, %v11340_v32 }
 0xbb5   :  { %v3571_v37 = vadd.f32 %v8712_v9, %v10969_v15  ;;  %3621 = vadd.xlane.f32.xlu1 %v3620_v61 }
 0xbb6   :  { %13182 = vst [vmem:[#allocation5_spill] sm:$0xff] %v11345_v27  ;;  %v3507_v36 = vpop.f32.mrf.mxu0  ;;  %v3617_v22 = vsel %vm271_vm1, %v11345_v27, 0.0  ;;  %v3677_v30 = vmul.f32 %v11345_v27, %v11345_v27  ;;  %v3700_v51 = vsel %vm271_vm1, %v3678_v11, 0.0 }
 0xbb7   :  { %v3570_v14 = vadd.f32 %v3507_v36, %v10982_v63  ;;  %v11358_v48 = vadd.f32 %v11319_v55, %v3571_v37 }
 0xbb8   :  { %3618 = vadd.xlane.f32.xlu0 %v3617_v22  ;;  %v3697_v15 = vsel %vm271_vm1, %v3677_v30, 0.0 }
 0xbb9   :  { %13183 = vst [vmem:[#allocation4_spill] sm:$0xff] %v11358_v48  ;;  %3701 = vadd.xlane.f32.xlu1 %v3700_v51  ;;  %v11362_v44 = vadd.f32 %v11319_v55, %v3570_v14  ;;  %v3626_v20 = vsel %vm271_vm1, %v11358_v48, 0.0  ;;  %v3680_v63 = vmul.f32 %v11358_v48, %v11358_v48 }
 0xbbb   :  { %13184 = vst [vmem:[#allocation7_spill] sm:$0xff] %v11362_v44  ;;  %v3623_v29 = vsel %vm271_vm1, %v11362_v44, 0.0  ;;  %v3679_v47 = vmul.f32 %v11362_v44, %v11362_v44  ;;  %v3706_v46 = vsel %vm271_vm1, %v3680_v63, 0.0 }
 0xbbc   :  { %3698 = vadd.xlane.f32.xlu0 %v3697_v15 }
 0xbbd   :  { %3627 = vadd.xlane.f32.xlu1 %v3626_v20  ;;  %v3703_v8 = vsel %vm271_vm1, %v3679_v47, 0.0 }
 0xbc0   :  { %3624 = vadd.xlane.f32.xlu0 %v3623_v29 }
 0xbc1   :  { %3707 = vadd.xlane.f32.xlu1 %v3706_v46 }
 0xbc4   :  { %3704 = vadd.xlane.f32.xlu0 %v3703_v8 }
 0xbcc   :  { %v8715_v57 = vpop.f32.mrf.mxu0 }
 0xbcd   :  { %v3573_v58 = vadd.f32 %v8715_v57, %v10996_v56  ;;  %v7660_v56 = vld [vmem:[%s13103_s3 + $0x38] sm:$0xff] }
 0xbce   :  { %v3517_v34 = vpop.f32.mrf.mxu0  ;;  %8728 = vmatprep.subr.mxu1 %v7660_v56 }
 0xbcf   :  { %v11377_v10 = vadd.f32 %v11319_v55, %v3573_v58  ;;  %v3572_v50 = vadd.f32 %v3517_v34, %v11006_v18  ;;  %8729 = vmatpush3.msra.mxu1 %v7660_v56 }
 0xbd0   :  { %8730 = vmatprep.subr.mxu1 %v7659_v16 }
 0xbd1   :  { %13185 = vst [vmem:[#allocation6_spill] sm:$0xff] %v11377_v10  ;;  %v11381_v3 = vadd.f32 %v11319_v55, %v3572_v50  ;;  %v3632_v45 = vsel %vm271_vm1, %v11377_v10, 0.0  ;;  %v3682_v2 = vmul.f32 %v11377_v10, %v11377_v10  ;;  %8731 = vmatpush3.msra.mxu1 %v7659_v16 }
 0xbd2   :  { %3633 = vadd.xlane.f32.xlu1 %v3632_v45  ;;  %8732 = vmatprep.subr.mxu1 %v7658_v23 }
 0xbd3   :  { %13186 = vst [vmem:[#allocation9_spill] sm:$0xff] %v11381_v3  ;;  %v3629_v60 = vsel %vm271_vm1, %v11381_v3, 0.0  ;;  %v3681_v18 = vmul.f32 %v11381_v3, %v11381_v3  ;;  %v3712_v6 = vsel %vm271_vm1, %v3682_v2, 0.0  ;;  %8733 = vmatpush3.msra.mxu1 %v7658_v23 }
 0xbd4   :  { %3630 = vadd.xlane.f32.xlu0 %v3629_v60  ;;  %8734 = vmatprep.subr.mxu1 %v7657_v35 }
 0xbd5   :  { %v3709_v24 = vsel %vm271_vm1, %v3681_v18, 0.0  ;;  %8735 = vmatpush3.msra.mxu1 %v7657_v35 }
 0xbd6   :  { %3713 = vadd.xlane.f32.xlu1 %v3712_v6 }
 0xbd8   :  { %3710 = vadd.xlane.f32.xlu0 %v3709_v24 }
 0xbe3   :  { %v8718_v40 = vpop.f32.mrf.mxu0 }
 0xbe4   :  { %v3575_v39 = vadd.f32 %v8718_v40, %v11023_v38 }
 0xbe5   :  { %v3527_v62 = vpop.f32.mrf.mxu0 }
 0xbe6   :  { %v11407_v33 = vadd.f32 %v11319_v55, %v3575_v39  ;;  %v3574_v1 = vadd.f32 %v3527_v62, %v11027_v21 }
 0xbe8   :  { %13187 = vst [vmem:[#allocation8_spill] sm:$0xff] %v11407_v33  ;;  %v11411_v17 = vadd.f32 %v11319_v55, %v3574_v1  ;;  %v3638_v59 = vsel %vm271_vm1, %v11407_v33, 0.0  ;;  %v3684_v26 = vmul.f32 %v11407_v33, %v11407_v33 }
 0xbe9   :  { %3639 = vadd.xlane.f32.xlu1 %v3638_v59 }
 0xbea   :  { %13188 = vst [vmem:[#allocation11_spill] sm:$0xff] %v11411_v17  ;;  %v3635_v5 = vsel %vm271_vm1, %v11411_v17, 0.0  ;;  %v3683_v28 = vmul.f32 %v11411_v17, %v11411_v17  ;;  %v3718_v19 = vsel %vm271_vm1, %v3684_v26, 0.0 }
 0xbeb   :  { %v8721_v38 = vpop.f32.mrf.mxu0  ;;  %3636 = vadd.xlane.f32.xlu0 %v3635_v5 }
 0xbec   :  { %v3577_v21 = vadd.f32 %v8721_v38, %v11040_v0  ;;  %v3715_v43 = vsel %vm271_vm1, %v3683_v28, 0.0 }
 0xbed   :  { %v3537_v4 = vpop.f32.mrf.mxu0  ;;  %3719 = vadd.xlane.f32.xlu1 %v3718_v19 }
 0xbee   :  { %v11424_v49 = vadd.f32 %v11319_v55, %v3577_v21  ;;  %v3576_v41 = vadd.f32 %v3537_v4, %v11044_v13 }
 0xbef   :  { %3716 = vadd.xlane.f32.xlu0 %v3715_v43 }
 0xbf0   :  { %13189 = vst [vmem:[#allocation10_spill] sm:$0xff] %v11424_v49  ;;  %v11429_v7 = vadd.f32 %v11319_v55, %v3576_v41  ;;  %v3644_v25 = vsel %vm271_vm1, %v11424_v49, 0.0  ;;  %v3686_v0 = vmul.f32 %v11424_v49, %v11424_v49 }
 0xbf1   :  { %3645 = vadd.xlane.f32.xlu1 %v3644_v25 }
 0xbf2   :  { %13190 = vst [vmem:[#allocation13_spill] sm:$0xff] %v11429_v7  ;;  %v3641_v9 = vsel %vm271_vm1, %v11429_v7, 0.0  ;;  %v3685_v13 = vmul.f32 %v11429_v7, %v11429_v7  ;;  %v3724_v37 = vsel %vm271_vm1, %v3686_v0, 0.0 }
 0xbf3   :  { %v8724_v61 = vpop.f32.mrf.mxu0  ;;  %3642 = vadd.xlane.f32.xlu0 %v3641_v9 }
 0xbf4   :  { %v3579_v11 = vadd.f32 %v8724_v61, %v11058_v52  ;;  %v3721_v30 = vsel %vm271_vm1, %v3685_v13, 0.0 }
 0xbf5   :  { %v3547_v36 = vpop.f32.mrf.mxu0  ;;  %3725 = vadd.xlane.f32.xlu1 %v3724_v37 }
 0xbf6   :  { %v11442_v22 = vadd.f32 %v11319_v55, %v3579_v11  ;;  %v3578_v14 = vadd.f32 %v3547_v36, %v11062_v54 }
 0xbf7   :  { %3722 = vadd.xlane.f32.xlu0 %v3721_v30 }
 0xbf8   :  { %13191 = vst [vmem:[#allocation12_spill] sm:$0xff] %v11442_v22  ;;  %v11447_v51 = vadd.f32 %v11319_v55, %v3578_v14  ;;  %v3650_v15 = vsel %vm271_vm1, %v11442_v22, 0.0  ;;  %v3688_v52 = vmul.f32 %v11442_v22, %v11442_v22 }
 0xbf9   :  { %3651 = vadd.xlane.f32.xlu1 %v3650_v15 }
 0xbfa   :  { %13192 = vst [vmem:[#allocation15_spill] sm:$0xff] %v11447_v51  ;;  %v3647_v20 = vsel %vm271_vm1, %v11447_v51, 0.0  ;;  %v3687_v54 = vmul.f32 %v11447_v51, %v11447_v51  ;;  %v3730_v47 = vsel %vm271_vm1, %v3688_v52, 0.0 }
 0xbfb   :  { %v8727_v63 = vpop.f32.mrf.mxu0  ;;  %3648 = vadd.xlane.f32.xlu0 %v3647_v20 }
 0xbfc   :  { %v3581_v29 = vadd.f32 %v8727_v63, %v11076_v42  ;;  %v3727_v58 = vsel %vm271_vm1, %v3687_v54, 0.0 }
 0xbfd   :  { %v3557_v46 = vpop.f32.mrf.mxu0  ;;  %3731 = vadd.xlane.f32.xlu1 %v3730_v47 }
 0xbfe   :  { %v11460_v8 = vadd.f32 %v11319_v55, %v3581_v29  ;;  %v3580_v57 = vadd.f32 %v3557_v46, %v11080_v12 }
 0xbff   :  { %3728 = vadd.xlane.f32.xlu0 %v3727_v58 }
 0xc00   :  { %13193 = vst [vmem:[#allocation14_spill] sm:$0xff] %v11460_v8  ;;  %v11465_v34 = vadd.f32 %v11319_v55, %v3580_v57  ;;  %v3656_v50 = vsel %vm271_vm1, %v11460_v8, 0.0  ;;  %v3690_v42 = vmul.f32 %v11460_v8, %v11460_v8 }
 0xc01   :  { %3657 = vadd.xlane.f32.xlu1 %v3656_v50 }
 0xc02   :  { %13194 = vst [vmem:[#allocation17_spill] sm:$0xff] %v11465_v34  ;;  %v3653_v45 = vsel %vm271_vm1, %v11465_v34, 0.0  ;;  %v3689_v2 = vmul.f32 %v11465_v34, %v11465_v34  ;;  %v3736_v12 = vsel %vm271_vm1, %v3690_v42, 0.0 }
 0xc03   :  { %3654 = vadd.xlane.f32.xlu0 %v3653_v45 }
 0xc04   :  { %v3733_v55 = vsel %vm271_vm1, %v3689_v2, 0.0  ;;  %v11482_v2 = vld [vmem:[%s13104_s7 + $0x8] ss:$0 sm:$0xff] }
 0xc05   :  { %3737 = vadd.xlane.f32.xlu1 %v3736_v12 }
 0xc07   :  { %3734 = vadd.xlane.f32.xlu0 %v3733_v55 }
 0xc33   :  { %v3616_v56 = vpop.xlane.xlu1 %3615 }
 0xc34   :  { %v3660_v18 = vmul.f32 0.03125, %v3616_v56 }
 0xc35   :  { %v3613_v60 = vpop.xlane.xlu0 %3612 }
 0xc36   :  { %v3756_v23 = vmul.f32 %v3660_v18, %v3660_v18  ;;  %v3659_v6 = vmul.f32 0.03125, %v3613_v60  ;;  %v3788_v54 = vsub.f32 %v11323_v53, %v3660_v18  ;;  %v11488_v18 = vld [vmem:[%s13104_s7 + $0x9] ss:$0 sm:$0xff] }
 0xc38   :  { %v3755_v39 = vmul.f32 %v3659_v6, %v3659_v6  ;;  %v3787_v42 = vsub.f32 %v11327_v31, %v3659_v6 }
 0xc39   :  { %v3696_v16 = vpop.xlane.xlu0 %3695 }
 0xc3a   :  { %v3740_v35 = vmul.f32 0.03125, %v3696_v16 }
 0xc3c   :  { %v3772_v24 = vsub.f32 %v3740_v35, %v3756_v23 }
 0xc3d   :  { %v3693_v40 = vpop.xlane.xlu0 %3692 }
 0xc3e   :  { %v3804_v62 = vadd.f32 1e-05, %v3772_v24  ;;  %v3739_v1 = vmul.f32 0.03125, %v3693_v40  ;;  %v3622_v59 = vpop.xlane.xlu1 %3621 }
 0xc3f   :  { %v3662_v26 = vmul.f32 0.03125, %v3622_v59 }
 0xc40   :  { %9382 = vrsqrt.f32 %v3804_v62  ;;  %v3771_v5 = vsub.f32 %v3739_v1, %v3755_v39 }
 0xc41   :  { %v3619_v38 = vpop.xlane.xlu0 %3618  ;;  %v3758_v4 = vmul.f32 %v3662_v26, %v3662_v26  ;;  %v3790_v23 = vsub.f32 %v11340_v32, %v3662_v26 }
 0xc42   :  { %v3803_v28 = vadd.f32 1e-05, %v3771_v5  ;;  %v3661_v21 = vmul.f32 0.03125, %v3619_v38  ;;  %v3702_v19 = vpop.xlane.xlu1 %3701 }
 0xc43   :  { %v3742_v41 = vmul.f32 0.03125, %v3702_v19 }
 0xc44   :  { %9384 = vrsqrt.f32 %v3803_v28  ;;  %v3757_v0 = vmul.f32 %v3661_v21, %v3661_v21  ;;  %v3789_v39 = vsub.f32 %v11345_v27, %v3661_v21 }
 0xc45   :  { %v3774_v43 = vsub.f32 %v3742_v41, %v3758_v4  ;;  %v3699_v25 = vpop.xlane.xlu0 %3698 }
 0xc46   :  { %v3741_v9 = vmul.f32 0.03125, %v3699_v25  ;;  %v3628_v61 = vpop.xlane.xlu1 %3627 }
 0xc47   :  { %v3806_v13 = vadd.f32 1e-05, %v3774_v43  ;;  %v3664_v11 = vmul.f32 0.03125, %v3628_v61 }
 0xc48   :  { %v3773_v37 = vsub.f32 %v3741_v9, %v3757_v0 }
 0xc49   :  { %9386 = vrsqrt.f32 %v3806_v13  ;;  %v3625_v36 = vpop.xlane.xlu0 %3624  ;;  %v3760_v52 = vmul.f32 %v3664_v11, %v3664_v11  ;;  %v3792_v28 = vsub.f32 %v11358_v48, %v3664_v11 }
 0xc4a   :  { %v3805_v14 = vadd.f32 1e-05, %v3773_v37  ;;  %v3663_v30 = vmul.f32 0.03125, %v3625_v36  ;;  %v3708_v15 = vpop.xlane.xlu1 %3707 }
 0xc4b   :  { %v3744_v20 = vmul.f32 0.03125, %v3708_v15 }
 0xc4c   :  { %9388 = vrsqrt.f32 %v3805_v14  ;;  %v3759_v46 = vmul.f32 %v3663_v30, %v3663_v30  ;;  %v3791_v9 = vsub.f32 %v11362_v44, %v3663_v30 }
 0xc4d   :  { %v9383_v63 = vpop.eup %9382  ;;  %v3776_v29 = vsub.f32 %v3744_v20, %v3760_v52  ;;  %v3705_v47 = vpop.xlane.xlu0 %3704 }
 0xc4e   :  { %v3743_v57 = vmul.f32 0.03125, %v3705_v47  ;;  %v3836_v58 = vmul.f32 %v9383_v63, %v3788_v54 }
 0xc4f   :  { %v3808_v50 = vadd.f32 1e-05, %v3776_v29 }
 0xc50   :  { %v3775_v45 = vsub.f32 %v3743_v57, %v3759_v46  ;;  %v3856_v60 = vmul.f32 %v11482_v2, %v3836_v58 }
 0xc51   :  { %v9385_v12 = vpop.eup %9384  ;;  %9390 = vrsqrt.f32 %v3808_v50 }
 0xc52   :  { %v3807_v55 = vadd.f32 1e-05, %v3775_v45  ;;  %v3835_v56 = vmul.f32 %v9385_v12, %v3787_v42  ;;  %v3876_v24 = vadd.f32 %v11488_v18, %v3856_v60 }
 0xc54   :  { %9392 = vrsqrt.f32 %v3807_v55  ;;  %v3855_v16 = vmul.f32 %v11482_v2, %v3835_v56 }
 0xc56   :  { %v9387_v6 = vpop.eup %9386  ;;  %v3875_v35 = vadd.f32 %v11488_v18, %v3855_v16 }
 0xc57   :  { %v3838_v40 = vmul.f32 %v9387_v6, %v3790_v23 }
 0xc58   :  { %8736 = vmatprep.mubr.msk.f32.mxu1 %vm271_vm1, %v3875_v35 }
 0xc59   :  { %v9389_v62 = vpop.eup %9388  ;;  %8737 = vmatmul.mubr.msk.f32.vlgmr.msra.gmra.mxu1 %vm271_vm1, %v3876_v24  ;;  %v3858_v5 = vmul.f32 %v11482_v2, %v3838_v40 }
 0xc5a   :  { %v3837_v1 = vmul.f32 %v9389_v62, %v3789_v39 }
 0xc5b   :  { %v3634_v59 = vpop.xlane.xlu1 %3633  ;;  %v3878_v21 = vadd.f32 %v11488_v18, %v3858_v5 }
 0xc5c   :  { %v3666_v38 = vmul.f32 0.03125, %v3634_v59  ;;  %v3857_v26 = vmul.f32 %v11482_v2, %v3837_v1 }
 0xc5d   :  { %v3631_v19 = vpop.xlane.xlu0 %3630 }
 0xc5e   :  { %v9391_v4 = vpop.eup %9390  ;;  %v3877_v41 = vadd.f32 %v11488_v18, %v3857_v26  ;;  %v3665_v43 = vmul.f32 0.03125, %v3631_v19  ;;  %v3762_v61 = vmul.f32 %v3666_v38, %v3666_v38  ;;  %v3794_v57 = vsub.f32 %v11377_v10, %v3666_v38 }
 0xc5f   :  { %v3714_v25 = vpop.xlane.xlu1 %3713  ;;  %v3840_v0 = vmul.f32 %v9391_v4, %v3792_v28 }
 0xc60   :  { %8739 = vmatprep.mubr.msk.f32.mxu1 %vm271_vm1, %v3877_v41  ;;  %v3746_v13 = vmul.f32 0.03125, %v3714_v25  ;;  %v3761_v11 = vmul.f32 %v3665_v43, %v3665_v43  ;;  %v3793_v42 = vsub.f32 %v11381_v3, %v3665_v43 }
 0xc61   :  { %v9393_v37 = vpop.eup %9392  ;;  %8740 = vmatmul.mubr.msk.f32.gmra.mxu1 %vm271_vm1, %v3878_v21  ;;  %v3711_v36 = vpop.xlane.xlu0 %3710  ;;  %v3860_v20 = vmul.f32 %v11482_v2, %v3840_v0 }
 0xc62   :  { %v3778_v14 = vsub.f32 %v3746_v13, %v3762_v61  ;;  %v3745_v15 = vmul.f32 0.03125, %v3711_v36  ;;  %v3839_v52 = vmul.f32 %v9393_v37, %v3791_v9 }
 0xc63   :  { %v3880_v46 = vadd.f32 %v11488_v18, %v3860_v20 }
 0xc64   :  { %v3810_v63 = vadd.f32 1e-05, %v3778_v14  ;;  %v3777_v54 = vsub.f32 %v3745_v15, %v3761_v11  ;;  %v3859_v29 = vmul.f32 %v11482_v2, %v3839_v52 }
 0xc66   :  { %9394 = vrsqrt.f32 %v3810_v63  ;;  %v3809_v30 = vadd.f32 1e-05, %v3777_v54  ;;  %v3879_v47 = vadd.f32 %v11488_v18, %v3859_v29 }
 0xc68   :  { %9396 = vrsqrt.f32 %v3809_v30  ;;  %8742 = vmatprep.mubr.msk.f32.mxu1 %vm271_vm1, %v3879_v47 }
 0xc69   :  { %8743 = vmatmul.mubr.msk.f32.gmra.mxu1 %vm271_vm1, %v3880_v46 }
 0xc72   :  { %v3640_v50 = vpop.xlane.xlu1 %3639 }
 0xc73   :  { %v9395_v58 = vpop.eup %9394  ;;  %v3668_v45 = vmul.f32 0.03125, %v3640_v50 }
 0xc74   :  { %v3842_v12 = vmul.f32 %v9395_v58, %v3794_v57  ;;  %v3637_v56 = vpop.xlane.xlu0 %3636 }
 0xc75   :  { %v9397_v55 = vpop.eup %9396  ;;  %v3667_v60 = vmul.f32 0.03125, %v3637_v56  ;;  %v3764_v35 = vmul.f32 %v3668_v45, %v3668_v45  ;;  %v3796_v57 = vsub.f32 %v11407_v33, %v3668_v45 }
 0xc76   :  { %v3841_v16 = vmul.f32 %v9397_v55, %v3793_v42  ;;  %v3720_v23 = vpop.xlane.xlu1 %3719  ;;  %v3862_v6 = vmul.f32 %v11482_v2, %v3842_v12 }
 0xc77   :  { %v3748_v24 = vmul.f32 0.03125, %v3720_v23  ;;  %v3763_v62 = vmul.f32 %v3667_v60, %v3667_v60 }
 0xc78   :  { %v3861_v40 = vmul.f32 %v11482_v2, %v3841_v16  ;;  %v3717_v39 = vpop.xlane.xlu0 %3716  ;;  %v3882_v26 = vadd.f32 %v11488_v18, %v3862_v6 }
 0xc79   :  { %v3780_v1 = vsub.f32 %v3748_v24, %v3764_v35  ;;  %v3747_v59 = vmul.f32 0.03125, %v3717_v39  ;;  %v3795_v24 = vsub.f32 %v11411_v17, %v3667_v60 }
 0xc7a   :  { %v3881_v5 = vadd.f32 %v11488_v18, %v3861_v40  ;;  %v3646_v38 = vpop.xlane.xlu1 %3645 }
 0xc7b   :  { %v3812_v28 = vadd.f32 1e-05, %v3780_v1  ;;  %v3779_v19 = vsub.f32 %v3747_v59, %v3763_v62  ;;  %v11517_v4 = vmul.f32 0.03125, %v3646_v38 }
 0xc7c   :  { %8745 = vmatprep.mubr.msk.f32.mxu1 %vm271_vm1, %v3881_v5  ;;  %v3643_v41 = vpop.xlane.xlu0 %3642 }
 0xc7d   :  { %8746 = vmatmul.mubr.msk.f32.gmra.mxu1 %vm271_vm1, %v3882_v26  ;;  %9398 = vrsqrt.f32 %v3812_v28  ;;  %v3811_v43 = vadd.f32 1e-05, %v3779_v19  ;;  %v11521_v21 = vmul.f32 0.03125, %v3643_v41  ;;  %v3766_v0 = vmul.f32 %v11517_v4, %v11517_v4 }
 0xc7e   :  { %v3726_v25 = vpop.xlane.xlu1 %3725  ;;  %v3798_v19 = vsub.f32 %v11424_v49, %v11517_v4 }
 0xc7f   :  { %9400 = vrsqrt.f32 %v3811_v43  ;;  %v3750_v9 = vmul.f32 0.03125, %v3726_v25  ;;  %v3765_v13 = vmul.f32 %v11521_v21, %v11521_v21 }
 0xc80   :  { %v3723_v61 = vpop.xlane.xlu0 %3722 }
 0xc81   :  { %v3782_v37 = vsub.f32 %v3750_v9, %v3766_v0  ;;  %v3749_v36 = vmul.f32 0.03125, %v3723_v61  ;;  %v3797_v0 = vsub.f32 %v11429_v7, %v11521_v21 }
 0xc82   :  { %v3652_v11 = vpop.xlane.xlu1 %3651 }
 0xc83   :  { %v3814_v14 = vadd.f32 1e-05, %v3782_v37  ;;  %v3781_v15 = vsub.f32 %v3749_v36, %v3765_v13  ;;  %v3672_v52 = vmul.f32 0.03125, %v3652_v11 }
 0xc84   :  { %v3649_v20 = vpop.xlane.xlu0 %3648 }
 0xc85   :  { %9402 = vrsqrt.f32 %v3814_v14  ;;  %v3813_v63 = vadd.f32 1e-05, %v3781_v15  ;;  %v3671_v54 = vmul.f32 0.03125, %v3649_v20  ;;  %v3768_v30 = vmul.f32 %v3672_v52, %v3672_v52 }
 0xc86   :  { %v3732_v29 = vpop.xlane.xlu1 %3731  ;;  %v3800_v20 = vsub.f32 %v11442_v22, %v3672_v52 }
 0xc87   :  { %9404 = vrsqrt.f32 %v3813_v63  ;;  %v3752_v47 = vmul.f32 0.03125, %v3732_v29  ;;  %v3767_v58 = vmul.f32 %v3671_v54, %v3671_v54 }
 0xc88   :  { %v3729_v46 = vpop.xlane.xlu0 %3728 }
 0xc89   :  { %v3784_v50 = vsub.f32 %v3752_v47, %v3768_v30  ;;  %v3751_v42 = vmul.f32 0.03125, %v3729_v46  ;;  %v3799_v47 = vsub.f32 %v11447_v51, %v3671_v54 }
 0xc8a   :  { %v9399_v12 = vpop.eup %9398  ;;  %v3658_v55 = vpop.xlane.xlu1 %3657 }
 0xc8b   :  { %v3816_v56 = vadd.f32 1e-05, %v3784_v50  ;;  %v3783_v16 = vsub.f32 %v3751_v42, %v3767_v58  ;;  %v3674_v23 = vmul.f32 0.03125, %v3658_v55  ;;  %v3844_v6 = vmul.f32 %v9399_v12, %v3796_v57 }
 0xc8c   :  { %v9401_v35 = vpop.eup %9400  ;;  %v3655_v40 = vpop.xlane.xlu0 %3654 }
 0xc8d   :  { %9406 = vrsqrt.f32 %v3816_v56  ;;  %v3815_v39 = vadd.f32 1e-05, %v3783_v16  ;;  %v3673_v62 = vmul.f32 0.03125, %v3655_v40  ;;  %v3843_v59 = vmul.f32 %v9401_v35, %v3795_v24 }
 0xc8e   :  { %v3738_v1 = vpop.xlane.xlu1 %3737  ;;  %v3770_v45 = vmul.f32 %v3674_v23, %v3674_v23  ;;  %v3864_v38 = vmul.f32 %v11482_v2, %v3844_v6  ;;  %v3802_v52 = vsub.f32 %v11460_v8, %v3674_v23 }
 0xc8f   :  { %9408 = vrsqrt.f32 %v3815_v39  ;;  %v3754_v5 = vmul.f32 0.03125, %v3738_v1  ;;  %v3863_v28 = vmul.f32 %v11482_v2, %v3843_v59  ;;  %v3769_v41 = vmul.f32 %v3673_v62, %v3673_v62  ;;  %v7661_v1 = vld [vmem:[%s13104_s7 + $0xa] ss:$0 sm:$0xff] }
 0xc90   :  { %v3735_v26 = vpop.xlane.xlu0 %3734  ;;  %v3884_v37 = vadd.f32 %v11488_v18, %v3864_v38  ;;  %v3801_v54 = vsub.f32 %v11465_v34, %v3673_v62 }
 0xc91   :  { %v3786_v43 = vsub.f32 %v3754_v5, %v3770_v45  ;;  %v3753_v60 = vmul.f32 0.03125, %v3735_v26  ;;  %v3883_v9 = vadd.f32 %v11488_v18, %v3863_v28 }
 0xc92   :  { %v9403_v25 = vpop.eup %9402 }
 0xc93   :  { %v3818_v61 = vadd.f32 1e-05, %v3786_v43  ;;  %v3785_v13 = vsub.f32 %v3753_v60, %v3769_v41  ;;  %v3846_v36 = vmul.f32 %v9403_v25, %v3798_v19  ;;  %8748 = vmatprep.mubr.msk.f32.mxu1 %vm271_vm1, %v3883_v9 }
 0xc94   :  { %v9405_v11 = vpop.eup %9404  ;;  %8749 = vmatmul.mubr.msk.f32.gmra.mxu1 %vm271_vm1, %v3884_v37 }
 0xc95   :  { %9410 = vrsqrt.f32 %v3818_v61  ;;  %v3817_v14 = vadd.f32 1e-05, %v3785_v13  ;;  %v3845_v4 = vmul.f32 %v9405_v11, %v3797_v0  ;;  %v3866_v15 = vmul.f32 %v11482_v2, %v3846_v36 }
 0xc97   :  { %9412 = vrsqrt.f32 %v3817_v14  ;;  %v3865_v21 = vmul.f32 %v11482_v2, %v3845_v4  ;;  %v3886_v30 = vadd.f32 %v11488_v18, %v3866_v15 }
 0xc99   :  { %v3885_v63 = vadd.f32 %v11488_v18, %v3865_v21 }
 0xc9a   :  { %v9407_v29 = vpop.eup %9406 }
 0xc9b   :  { %8751 = vmatprep.mubr.msk.f32.mxu1 %vm271_vm1, %v3885_v63  ;;  %v3848_v46 = vmul.f32 %v9407_v29, %v3800_v20 }
 0xc9c   :  { %v9409_v57 = vpop.eup %9408  ;;  %8752 = vmatmul.mubr.msk.f32.gmra.mxu1 %vm271_vm1, %v3886_v30 }
 0xc9d   :  { %v3847_v58 = vmul.f32 %v9409_v57, %v3799_v47  ;;  %v3868_v50 = vmul.f32 %v11482_v2, %v3848_v46 }
 0xc9f   :  { %v3867_v42 = vmul.f32 %v11482_v2, %v3847_v58  ;;  %v3888_v56 = vadd.f32 %v11488_v18, %v3868_v50 }
 0xca1   :  { %v3887_v12 = vadd.f32 %v11488_v18, %v3867_v42 }
 0xca2   :  { %v9411_v55 = vpop.eup %9410 }
 0xca3   :  { %8754 = vmatprep.mubr.msk.f32.mxu1 %vm271_vm1, %v3887_v12  ;;  %v3850_v16 = vmul.f32 %v9411_v55, %v3802_v52 }
 0xca4   :  { %v9413_v6 = vpop.eup %9412  ;;  %8755 = vmatmul.mubr.msk.f32.gmra.mxu1 %vm271_vm1, %v3888_v56 }
 0xca5   :  { %v3849_v35 = vmul.f32 %v9413_v6, %v3801_v54  ;;  %v3870_v24 = vmul.f32 %v11482_v2, %v3850_v16 }
 0xca7   :  { %v3869_v40 = vmul.f32 %v11482_v2, %v3849_v35  ;;  %v3890_v39 = vadd.f32 %v11488_v18, %v3870_v24 }
 0xca9   :  { %v3889_v23 = vadd.f32 %v11488_v18, %v3869_v40 }
 0xcab   :  { %8757 = vmatprep.mubr.msk.f32.mxu1 %vm271_vm1, %v3889_v23 }
 0xcac   :  { %8758 = vmatmul.mubr.msk.f32.gmra.mxu1 %vm271_vm1, %v3890_v39 }
 0xd19   :  { %v8738_v62 = vpop.f32.mrf.mxu1 }
 0xd1a   :  { %v11590_v9 = vadd.f32 %v8738_v62, %v7661_v1 }
 0xd1b   :  { %v4014_v59 = vpop.f32.mrf.mxu1 }
 0xd1c   :  { %v11564_v45 = vadd.f32 %v7661_v1, %v4014_v59 }
 0xd1e   :  { %8776 = vmatprep.mubr.msk.f32.mxu0 %vm69_vm0, %v11564_v45 }
 0xd21   :  { %v8741_v2 = vpop.f32.mrf.mxu1 }
 0xd22   :  { %v11574_v43 = vadd.f32 %v8741_v2, %v7661_v1 }
 0xd23   :  { %v4024_v5 = vpop.f32.mrf.mxu1 }
 0xd24   :  { %v11582_v25 = vadd.f32 %v7661_v1, %v4024_v5 }
 0xd29   :  { %v8744_v38 = vpop.f32.mrf.mxu1 }
 0xd2a   :  { %v11578_v60 = vadd.f32 %v8744_v38, %v7661_v1 }
 0xd2b   :  { %v4034_v26 = vpop.f32.mrf.mxu1 }
 0xd2c   :  { %v11586_v0 = vadd.f32 %v7661_v1, %v4034_v26 }
 0xd3d   :  { %v8747_v18 = vpop.f32.mrf.mxu1 }
 0xd3e   :  { %v11568_v28 = vadd.f32 %v8747_v18, %v7661_v1 }
 0xd3f   :  { %v4044_v19 = vpop.f32.mrf.mxu1 }
 0xd40   :  { %v11570_v41 = vadd.f32 %v7661_v1, %v4044_v19  ;;  %4115 = vrot.lane.b32.xlu0 %v11568_v28, %s9670_s28 }
 0xd42   :  { %4113 = vrot.lane.b32.xlu1 %v11570_v41, %s9670_s28 }
 0xd44   :  { %4107 = vrot.lane.b32.xlu0 %v11574_v43, %s9670_s28 }
 0xd46   :  { %4111 = vrot.lane.b32.xlu1 %v11578_v60, %s9670_s28 }
 0xd48   :  { %4105 = vrot.lane.b32.xlu0 %v11582_v25, %s9670_s28 }
 0xd4a   :  { %4109 = vrot.lane.b32.xlu1 %v11586_v0, %s9670_s28 }
 0xd4c   :  { %4103 = vrot.lane.b32.xlu0 %v11590_v9, %s9670_s28 }
 0xd50   :  { %4101 = vrot.lane.b32.xlu0 %v11564_v45, %s9670_s28 }
 0xd54   :  { %v8750_v61 = vpop.f32.mrf.mxu1 }
 0xd55   :  { %v11606_v14 = vadd.f32 %v8750_v61, %v7661_v1 }
 0xd56   :  { %v4054_v13 = vpop.f32.mrf.mxu1 }
 0xd57   :  { %v11598_v37 = vadd.f32 %v7661_v1, %v4054_v13 }
 0xd59   :  { %8804 = vmatprep.mubr.msk.f32.mxu1 %vm69_vm0, %v11598_v37 }
 0xd5c   :  { %v8753_v36 = vpop.f32.mrf.mxu1 }
 0xd5d   :  { %v11602_v11 = vadd.f32 %v8753_v36, %v7661_v1 }
 0xd5e   :  { %v4064_v4 = vpop.f32.mrf.mxu1 }
 0xd5f   :  { %4268 = vrot.lane.b32.xlu0 %v11602_v11, %s9670_s28  ;;  %v11638_v57 = vadd.f32 %v7661_v1, %v4064_v4 }
 0xd63   :  { %4264 = vrot.lane.b32.xlu0 %v11606_v14, %s9670_s28 }
 0xd64   :  { %v8756_v15 = vpop.f32.mrf.mxu1 }
 0xd65   :  { %v11626_v47 = vadd.f32 %v8756_v15, %v7661_v1 }
 0xd66   :  { %v4074_v21 = vpop.f32.mrf.mxu1 }
 0xd67   :  { %4605 = vrot.lane.b32.xlu0 %v11568_v28, %s9671_s29  ;;  %v11632_v46 = vadd.f32 %v7661_v1, %v4074_v21 }
 0xd6b   :  { %4601 = vrot.lane.b32.xlu0 %v11578_v60, %s9671_s29 }
 0xd6c   :  { %v8759_v20 = vpop.f32.mrf.mxu1 }
 0xd6d   :  { %v11614_v63 = vadd.f32 %v8759_v20, %v7661_v1 }
 0xd6e   :  { %v4084_v29 = vpop.f32.mrf.mxu1 }
 0xd6f   :  { %4597 = vrot.lane.b32.xlu0 %v11574_v43, %s9671_s29  ;;  %4276 = vrot.lane.b32.xlu1 %v11614_v63, %s9670_s28  ;;  %v11620_v30 = vadd.f32 %v7661_v1, %v4084_v29 }
 0xd73   :  { %4591 = vrot.lane.b32.xlu0 %v11564_v45, %s9671_s29  ;;  %4274 = vrot.lane.b32.xlu1 %v11620_v30, %s9670_s28 }
 0xd77   :  { %4927 = vrot.lane.b32.xlu0 %v11568_v28, %s9672_s30  ;;  %4272 = vrot.lane.b32.xlu1 %v11626_v47, %s9670_s28 }
 0xd7b   :  { %4750 = vrot.lane.b32.xlu0 %v11602_v11, %s9671_s29  ;;  %4270 = vrot.lane.b32.xlu1 %v11632_v46, %s9670_s28 }
 0xd7f   :  { %4748 = vrot.lane.b32.xlu0 %v11638_v57, %s9671_s29  ;;  %4266 = vrot.lane.b32.xlu1 %v11638_v57, %s9670_s28 }
 0xd83   :  { %4746 = vrot.lane.b32.xlu0 %v11606_v14, %s9671_s29  ;;  %4262 = vrot.lane.b32.xlu1 %v11598_v37, %s9670_s28 }
 0xd87   :  { %4919 = vrot.lane.b32.xlu0 %v11574_v43, %s9672_s30  ;;  %4603 = vrot.lane.b32.xlu1 %v11570_v41, %s9671_s29 }
 0xd8b   :  { %4917 = vrot.lane.b32.xlu0 %v11582_v25, %s9672_s30  ;;  %4599 = vrot.lane.b32.xlu1 %v11586_v0, %s9671_s29 }
 0xd8f   :  { %4915 = vrot.lane.b32.xlu0 %v11590_v9, %s9672_s30  ;;  %4595 = vrot.lane.b32.xlu1 %v11582_v25, %s9671_s29 }
 0xd93   :  { %4913 = vrot.lane.b32.xlu0 %v11564_v45, %s9672_s30  ;;  %4593 = vrot.lane.b32.xlu1 %v11590_v9, %s9671_s29 }
 0xd97   :  { %4897 = vrot.lane.b32.xlu0 %v11564_v45, %s9673_s0  ;;  %4758 = vrot.lane.b32.xlu1 %v11614_v63, %s9671_s29 }
 0xd9b   :  { %5088 = vrot.lane.b32.xlu0 %v11602_v11, %s9672_s30  ;;  %4754 = vrot.lane.b32.xlu1 %v11626_v47, %s9671_s29 }
 0xd9f   :  { %4903 = vrot.lane.b32.xlu0 %v11574_v43, %s9673_s0  ;;  %4925 = vrot.lane.b32.xlu1 %v11570_v41, %s9672_s30 }
 0xda3   :  { %4752 = vrot.lane.b32.xlu1 %v11632_v46, %s9671_s29 }
 0xda7   :  { %4923 = vrot.lane.b32.xlu1 %v11578_v60, %s9672_s30 }
 0xdab   :  { %4921 = vrot.lane.b32.xlu1 %v11586_v0, %s9672_s30 }
 0xdaf   :  { %4744 = vrot.lane.b32.xlu1 %v11598_v37, %s9671_s29 }
 0xdb2   :  { %v4116_v58 = vpop.permute.xlu0 %4115 }
 0xdb3   :  { %8760 = vmatprep.subr.msk.mxu0 %vm69_vm0, %v4116_v58  ;;  %5096 = vrot.lane.b32.xlu1 %v11614_v63, %s9672_s30 }
 0xdb4   :  { %v4114_v50 = vpop.permute.xlu1 %4113  ;;  %8761 = vmatpush3.xpose.msk.msra.mxu0 %vm69_vm0, %v4116_v58 }
 0xdb5   :  { %8762 = vmatprep.subr.msk.mxu0 %vm69_vm0, %v4114_v50 }
 0xdb6   :  { %v4108_v52 = vpop.permute.xlu0 %4107 }
 0xdb7   :  { %5092 = vrot.lane.b32.xlu1 %v11626_v47, %s9672_s30 }
 0xdb8   :  { %v4112_v42 = vpop.permute.xlu1 %4111  ;;  %8763 = vmatpush3.xpose.msk.msra.mxu0 %vm69_vm0, %v4114_v50 }
 0xdb9   :  { %8764 = vmatprep.subr.msk.mxu0 %vm69_vm0, %v4112_v42 }
 0xdba   :  { %v4106_v55 = vpop.permute.xlu0 %4105 }
 0xdbb   :  { %5090 = vrot.lane.b32.xlu1 %v11632_v46, %s9672_s30 }
 0xdbc   :  { %v4110_v12 = vpop.permute.xlu1 %4109  ;;  %8765 = vmatpush3.xpose.msk.msra.mxu0 %vm69_vm0, %v4112_v42 }
 0xdbd   :  { %8766 = vmatprep.subr.msk.mxu0 %vm69_vm0, %v4110_v12 }
 0xdbe   :  { %v4104_v56 = vpop.permute.xlu0 %4103 }
 0xdbf   :  { %4899 = vrot.lane.b32.xlu1 %v11590_v9, %s9673_s0 }
 0xdc0   :  { %8767 = vmatpush3.xpose.msk.msra.mxu0 %vm69_vm0, %v4110_v12 }
 0xdc1   :  { %8768 = vmatprep.subr.msk.mxu0 %vm69_vm0, %v4108_v52 }
 0xdc2   :  { %v4102_v54 = vpop.permute.xlu0 %4101 }
 0xdc3   :  { %4901 = vrot.lane.b32.xlu1 %v11582_v25, %s9673_s0 }
 0xdc4   :  { %8769 = vmatpush3.xpose.msk.msra.mxu0 %vm69_vm0, %v4108_v52 }
 0xdc5   :  { %8770 = vmatprep.subr.msk.mxu0 %vm69_vm0, %v4106_v55 }
 0xdc7   :  { %5086 = vrot.lane.b32.xlu1 %v11638_v57, %s9672_s30 }
 0xdc8   :  { %8771 = vmatpush3.xpose.msk.msra.mxu0 %vm69_vm0, %v4106_v55 }
 0xdc9   :  { %8772 = vmatprep.subr.msk.mxu0 %vm69_vm0, %v4104_v56 }
 0xdcb   :  { %4756 = vrot.lane.b32.xlu1 %v11620_v30, %s9671_s29 }
 0xdcc   :  { %8773 = vmatpush3.xpose.msk.msra.mxu0 %vm69_vm0, %v4104_v56 }
 0xdcd   :  { %8774 = vmatprep.subr.msk.mxu0 %vm69_vm0, %v4102_v54 }
 0xdcf   :  { %5094 = vrot.lane.b32.xlu1 %v11620_v30, %s9672_s30 }
 0xdd0   :  { %8775 = vmatpush3.xpose.msk.msra.mxu0 %vm69_vm0, %v4102_v54 }
 0xdd1   :  { %v4269_v16 = vpop.permute.xlu0 %4268 }
 0xdd3   :  { %8777 = vmatmul.mubr.msk.f32.vlgmr.msra.gmra.mxu0 %vm69_vm0, %v11590_v9 }
 0xdd4   :  { %8779 = vmatprep.mubr.msk.f32.mxu0 %vm69_vm0, %v11582_v25 }
 0xdd5   :  { %v4265_v6 = vpop.permute.xlu0 %4264 }
 0xdd7   :  { %8780 = vmatmul.mubr.msk.f32.gmra.mxu0 %vm69_vm0, %v11574_v43 }
 0xdd8   :  { %8782 = vmatprep.mubr.msk.f32.mxu0 %vm69_vm0, %v11586_v0 }
 0xdd9   :  { %v4606_v35 = vpop.permute.xlu0 %4605 }
 0xdda   :  { %8816 = vmatprep.subr.mxu0 %v4606_v35 }
 0xddb   :  { %8783 = vmatmul.mubr.msk.f32.gmra.mxu0 %vm69_vm0, %v11578_v60 }
 0xddc   :  { %8817 = vmatpush3.msra.mxu0 %v4606_v35  ;;  %8785 = vmatprep.mubr.msk.f32.mxu0 %vm69_vm0, %v11570_v41 }
 0xddd   :  { %v4602_v59 = vpop.permute.xlu0 %4601 }
 0xddf   :  { %8786 = vmatmul.mubr.msk.f32.gmra.mxu0 %vm69_vm0, %v11568_v28 }
 0xde1   :  { %v4277_v24 = vpop.permute.xlu1 %4276  ;;  %v4598_v38 = vpop.permute.xlu0 %4597 }
 0xde2   :  { %8788 = vmatprep.subr.msk.mxu1 %vm69_vm0, %v4277_v24 }
 0xde3   :  { %8789 = vmatpush3.xpose.msk.msra.mxu1 %vm69_vm0, %v4277_v24 }
 0xde5   :  { %v4275_v40 = vpop.permute.xlu1 %4274  ;;  %v4592_v18 = vpop.permute.xlu0 %4591 }
 0xde6   :  { %8790 = vmatprep.subr.msk.mxu1 %vm69_vm0, %v4275_v40 }
 0xde7   :  { %8791 = vmatpush3.xpose.msk.msra.mxu1 %vm69_vm0, %v4275_v40 }
 0xde9   :  { %v4273_v23 = vpop.permute.xlu1 %4272  ;;  %v11754_v13 = vpop.permute.xlu0 %4927 }
 0xdea   :  { %8792 = vmatprep.subr.msk.mxu1 %vm69_vm0, %v4273_v23 }
 0xdeb   :  { %8793 = vmatpush3.xpose.msk.msra.mxu1 %vm69_vm0, %v4273_v23 }
 0xded   :  { %v4271_v39 = vpop.permute.xlu1 %4270  ;;  %v4751_v56 = vpop.permute.xlu0 %4750 }
 0xdee   :  { %8794 = vmatprep.subr.msk.mxu1 %vm69_vm0, %v4271_v39 }
 0xdef   :  { %8795 = vmatpush3.xpose.msk.msra.mxu1 %vm69_vm0, %v4271_v39 }
 0xdf0   :  { %8796 = vmatprep.subr.msk.mxu1 %vm69_vm0, %v4269_v16 }
 0xdf1   :  { %v4267_v62 = vpop.permute.xlu1 %4266 }
 0xdf3   :  { %8797 = vmatpush3.xpose.msk.msra.mxu1 %vm69_vm0, %v4269_v16  ;;  %v4749_v16 = vpop.permute.xlu0 %4748 }
 0xdf4   :  { %8798 = vmatprep.subr.msk.mxu1 %vm69_vm0, %v4267_v62 }
 0xdf5   :  { %v4263_v1 = vpop.permute.xlu1 %4262 }
 0xdf7   :  { %8799 = vmatpush3.xpose.msk.msra.mxu1 %vm69_vm0, %v4267_v62 }
 0xdf8   :  { %8800 = vmatprep.subr.msk.mxu1 %vm69_vm0, %v4265_v6 }
 0xdf9   :  { %v4604_v2 = vpop.permute.xlu1 %4603 }
 0xdfa   :  { %8818 = vmatprep.subr.mxu0 %v4604_v2 }
 0xdfb   :  { %8801 = vmatpush3.xpose.msk.msra.mxu1 %vm69_vm0, %v4265_v6  ;;  %8819 = vmatpush3.msra.mxu0 %v4604_v2  ;;  %v4747_v6 = vpop.permute.xlu0 %4746 }
 0xdfc   :  { %8802 = vmatprep.subr.msk.mxu1 %vm69_vm0, %v4263_v1  ;;  %8820 = vmatprep.subr.mxu0 %v4602_v59 }
 0xdfd   :  { %v4600_v5 = vpop.permute.xlu1 %4599  ;;  %8821 = vmatpush3.msra.mxu0 %v4602_v59 }
 0xdfe   :  { %8822 = vmatprep.subr.mxu0 %v4600_v5 }
 0xdff   :  { %8803 = vmatpush3.xpose.msk.msra.mxu1 %vm69_vm0, %v4263_v1  ;;  %8823 = vmatpush3.msra.mxu0 %v4600_v5 }
 0xe00   :  { %8824 = vmatprep.subr.mxu0 %v4598_v38 }
 0xe01   :  { %v4596_v26 = vpop.permute.xlu1 %4595  ;;  %8825 = vmatpush3.msra.mxu0 %v4598_v38 }
 0xe02   :  { %8805 = vmatmul.mubr.msk.f32.vlgmr.msra.gmra.mxu1 %vm69_vm0, %v11606_v14  ;;  %8826 = vmatprep.subr.mxu0 %v4596_v26 }
 0xe03   :  { %8807 = vmatprep.mubr.msk.f32.mxu1 %vm69_vm0, %v11638_v57  ;;  %8827 = vmatpush3.msra.mxu0 %v4596_v26 }
 0xe05   :  { %v4594_v19 = vpop.permute.xlu1 %4593 }
 0xe06   :  { %8808 = vmatmul.mubr.msk.f32.gmra.mxu1 %vm69_vm0, %v11602_v11  ;;  %8828 = vmatprep.subr.mxu0 %v4594_v19 }
 0xe07   :  { %8810 = vmatprep.mubr.msk.f32.mxu1 %vm69_vm0, %v11632_v46  ;;  %8829 = vmatpush3.msra.mxu0 %v4594_v19 }
 0xe08   :  { %8830 = vmatprep.subr.mxu0 %v4592_v18 }
 0xe09   :  { %v4759_v61 = vpop.permute.xlu1 %4758  ;;  %8831 = vmatpush3.msra.mxu0 %v4592_v18 }
 0xe0a   :  { %8811 = vmatmul.mubr.msk.f32.gmra.mxu1 %vm69_vm0, %v11626_v47  ;;  %8844 = vmatprep.subr.mxu1 %v4759_v61 }
 0xe0b   :  { %8872 = vmatprep.subr.msk.mxu0 %vm69_vm0, %v11754_v13  ;;  %8813 = vmatprep.mubr.msk.f32.mxu1 %vm69_vm0, %v11620_v30 }
 0xe0c   :  { %8845 = vmatpush3.msra.mxu1 %v4759_v61 }
 0xe0d   :  { %v4755_v36 = vpop.permute.xlu1 %4754 }
 0xe0e   :  { %8814 = vmatmul.mubr.msk.f32.gmra.mxu1 %vm69_vm0, %v11614_v63 }
 0xe11   :  { %v11764_v4 = vpop.permute.xlu1 %4925 }
 0xe15   :  { %v4753_v15 = vpop.permute.xlu1 %4752 }
 0xe19   :  { %v11766_v21 = vpop.permute.xlu1 %4923 }
 0xe1d   :  { %v11768_v20 = vpop.permute.xlu1 %4921 }
 0xe21   :  { %v4745_v29 = vpop.permute.xlu1 %4744 }
 0xe25   :  { %v11770_v58 = vpop.permute.xlu1 %5096 }
 0xe29   :  { %v11772_v50 = vpop.permute.xlu1 %5092 }
 0xe2d   :  { %v11774_v42 = vpop.permute.xlu1 %5090 }
 0xe31   :  { %v11776_v52 = vpop.permute.xlu1 %4899 }
 0xe35   :  { %v11778_v12 = vpop.permute.xlu1 %4901 }
 0xe39   :  { %v11780_v55 = vpop.permute.xlu1 %5086 }
 0xe3a   :  { %13195 = vst [vmem:[#allocation16_spill] sm:$0xff] %v11780_v55 }
 0xe3d   :  { %v4757_v54 = vpop.permute.xlu1 %4756 }
 0xe3e   :  { %8846 = vmatprep.subr.mxu1 %v4757_v54 }
 0xe3f   :  { %8847 = vmatpush3.msra.mxu1 %v4757_v54 }
 0xe40   :  { %8848 = vmatprep.subr.mxu1 %v4755_v36 }
 0xe41   :  { %8849 = vmatpush3.msra.mxu1 %v4755_v36  ;;  %v11858_v8 = vpop.permute.xlu1 %5094 }
 0xe42   :  { %8850 = vmatprep.subr.mxu1 %v4753_v15 }
 0xe43   :  { %8851 = vmatpush3.msra.mxu1 %v4753_v15 }
 0xe44   :  { %8852 = vmatprep.subr.mxu1 %v4751_v56 }
 0xe45   :  { %8853 = vmatpush3.msra.mxu1 %v4751_v56 }
 0xe46   :  { %8854 = vmatprep.subr.mxu1 %v4749_v16 }
 0xe47   :  { %8855 = vmatpush3.msra.mxu1 %v4749_v16 }
 0xe48   :  { %8856 = vmatprep.subr.mxu1 %v4747_v6 }
 0xe49   :  { %8857 = vmatpush3.msra.mxu1 %v4747_v6 }
 0xe4a   :  { %8858 = vmatprep.subr.mxu1 %v4745_v29 }
 0xe4b   :  { %8859 = vmatpush3.msra.mxu1 %v4745_v29 }
 0xe4c   :  { %8900 = vmatprep.subr.msk.mxu1 %vm69_vm0, %v11770_v58 }
 0xe93   :  { %v8778_v35 = vpop.f32.mrf.mxu0 }
 0xe94   :  { %v4418_v24 = vsel %vm1076_vm2, %v8778_v35, -inf }
 0xe95   :  { %4419 = vmax.xlane.f32.xlu1 %v4418_v24  ;;  %v4215_v40 = vpop.f32.mrf.mxu0 }
 0xe96   :  { %v4415_v23 = vsel %vm1076_vm2, %v4215_v40, -inf }
 0xe97   :  { %4416 = vmax.xlane.f32.xlu0 %v4415_v23  ;;  %v11786_v39 = vpop.f32.mrf.mxu0 }
 0xe98   :  { %v4424_v62 = vsel %vm1076_vm2, %v11786_v39, -inf }
 0xe99   :  { %4425 = vmax.xlane.f32.xlu1 %v4424_v62  ;;  %v11790_v1 = vpop.f32.mrf.mxu0 }
 0xe9a   :  { %v4421_v59 = vsel %vm1076_vm2, %v11790_v1, -inf }
 0xe9b   :  { %4422 = vmax.xlane.f32.xlu0 %v4421_v59  ;;  %v11794_v2 = vpop.f32.mrf.mxu0 }
 0xe9c   :  { %v4430_v5 = vsel %vm1076_vm2, %v11794_v2, -inf }
 0xe9d   :  { %4431 = vmax.xlane.f32.xlu1 %v4430_v5  ;;  %v11798_v38 = vpop.f32.mrf.mxu0 }
 0xe9e   :  { %v4427_v26 = vsel %vm1076_vm2, %v11798_v38, -inf }
 0xe9f   :  { %4428 = vmax.xlane.f32.xlu0 %v4427_v26  ;;  %v11802_v18 = vpop.f32.mrf.mxu0 }
 0xea0   :  { %v4436_v19 = vsel %vm1076_vm2, %v11802_v18, -inf }
 0xea1   :  { %4437 = vmax.xlane.f32.xlu1 %v4436_v19  ;;  %v11806_v61 = vpop.f32.mrf.mxu0 }
 0xea2   :  { %v4433_v36 = vsel %vm1076_vm2, %v11806_v61, -inf }
 0xea3   :  { %4434 = vmax.xlane.f32.xlu0 %v4433_v36 }
 0xec2   :  { %v11810_v15 = vpop.f32.mrf.mxu1 }
 0xec3   :  { %v4442_v29 = vsel %vm1076_vm2, %v11810_v15, -inf }
 0xec4   :  { %4443 = vmax.xlane.f32.xlu0 %v4442_v29  ;;  %v11814_v56 = vpop.f32.mrf.mxu1 }
 0xec5   :  { %v4439_v16 = vsel %vm1076_vm2, %v11814_v56, -inf }
 0xec6   :  { %v11816_v54 = vpop.f32.mrf.mxu1 }
 0xec7   :  { %v4448_v6 = vsel %vm1076_vm2, %v11816_v54, -inf }
 0xec8   :  { %4440 = vmax.xlane.f32.xlu0 %v4439_v16  ;;  %4449 = vmax.xlane.f32.xlu1 %v4448_v6  ;;  %v11822_v24 = vpop.f32.mrf.mxu1  ;;  %v11846_v6 = vpop.permute.xlu0 %4919 }
 0xec9   :  { %v4445_v62 = vsel %vm1076_vm2, %v11822_v24, -inf }
 0xeca   :  { %v11824_v23 = vpop.f32.mrf.mxu1 }
 0xecb   :  { %v4454_v59 = vsel %vm1076_vm2, %v11824_v23, -inf }
 0xecc   :  { %4446 = vmax.xlane.f32.xlu0 %v4445_v62  ;;  %4455 = vmax.xlane.f32.xlu1 %v4454_v59  ;;  %v11830_v5 = vpop.f32.mrf.mxu1  ;;  %v11848_v62 = vpop.permute.xlu0 %4917 }
 0xecd   :  { %v4451_v19 = vsel %vm1076_vm2, %v11830_v5, -inf }
 0xece   :  { %v11832_v26 = vpop.f32.mrf.mxu1 }
 0xecf   :  { %v4460_v36 = vsel %vm1076_vm2, %v11832_v26, -inf }
 0xed0   :  { %4452 = vmax.xlane.f32.xlu0 %v4451_v19  ;;  %4461 = vmax.xlane.f32.xlu1 %v4460_v36  ;;  %v11838_v29 = vpop.f32.mrf.mxu1  ;;  %v11850_v59 = vpop.permute.xlu0 %4915 }
 0xed1   :  { %v4457_v16 = vsel %vm1076_vm2, %v11838_v29, -inf }
 0xed4   :  { %4458 = vmax.xlane.f32.xlu0 %v4457_v16  ;;  %v11852_v19 = vpop.permute.xlu0 %4913 }
 0xed8   :  { %v11854_v36 = vpop.permute.xlu0 %4897 }
 0xedc   :  { %v11856_v34 = vpop.permute.xlu0 %5088 }
 0xee0   :  { %v11860_v16 = vpop.permute.xlu0 %4903 }
 0xee1   :  { %4907 = vrot.lane.b32.xlu1 %v11578_v60, %s9673_s0 }
 0xeea   :  { %4905 = vrot.lane.b32.xlu0 %v11586_v0, %s9673_s0 }
 0xf1e   :  { %v4420_v51 = vpop.xlane.xlu1 %4419 }
 0xf1f   :  { %v4464_v22 = vsub.f32 %v8778_v35, %v4420_v51 }
 0xf20   :  { %v4417_v7 = vpop.xlane.xlu0 %4416 }
 0xf21   :  { %v4481_v49 = vmul.f32 1.442695, %v4464_v22  ;;  %v4463_v17 = vsub.f32 %v4215_v40, %v4417_v7 }
 0xf22   :  { %v4426_v33 = vpop.xlane.xlu1 %4425 }
 0xf23   :  { %9414 = vpow2.f32 %v4481_v49  ;;  %v4479_v3 = vmul.f32 1.442695, %v4463_v17  ;;  %v4466_v10 = vsub.f32 %v11786_v39, %v4426_v33 }
 0xf24   :  { %v4423_v44 = vpop.xlane.xlu0 %4422 }
 0xf25   :  { %9416 = vpow2.f32 %v4479_v3  ;;  %v4485_v48 = vmul.f32 1.442695, %v4466_v10  ;;  %v4465_v27 = vsub.f32 %v11790_v1, %v4423_v44 }
 0xf26   :  { %v4432_v32 = vpop.xlane.xlu1 %4431 }
 0xf27   :  { %9418 = vpow2.f32 %v4485_v48  ;;  %v4483_v31 = vmul.f32 1.442695, %v4465_v27  ;;  %v4468_v53 = vsub.f32 %v11794_v2, %v4432_v32 }
 0xf28   :  { %v4429_v55 = vpop.xlane.xlu0 %4428 }
 0xf29   :  { %v4467_v51 = vsub.f32 %v11798_v38, %v4429_v55  ;;  %9420 = vpow2.f32 %v4483_v31  ;;  %v4489_v7 = vmul.f32 1.442695, %v4468_v53 }
 0xf2a   :  { %v4438_v22 = vpop.xlane.xlu1 %4437 }
 0xf2b   :  { %v4487_v49 = vmul.f32 1.442695, %v4467_v51  ;;  %v4470_v17 = vsub.f32 %v11802_v18, %v4438_v22 }
 0xf2c   :  { %v4435_v33 = vpop.xlane.xlu0 %4434 }
 0xf2d   :  { %9422 = vpow2.f32 %v4487_v49  ;;  %v4469_v10 = vsub.f32 %v11806_v61, %v4435_v33  ;;  %v4493_v44 = vmul.f32 1.442695, %v4470_v17 }
 0xf2e   :  { %9424 = vpow2.f32 %v4489_v7 }
 0xf2f   :  { %v4491_v3 = vmul.f32 1.442695, %v4469_v10 }
 0xf30   :  { %v11868_v48 = vpop.eup %9414 }
 0xf31   :  { %9426 = vpow2.f32 %v4491_v3  ;;  %v4514_v32 = vsel %vm1076_vm2, %v11868_v48, 0.0 }
 0xf32   :  { %v11872_v27 = vpop.eup %9416  ;;  %4515 = vadd.xlane.f32.xlu1 %v4514_v32  ;;  %9428 = vpow2.f32 %v4493_v44 }
 0xf33   :  { %v4511_v53 = vsel %vm1076_vm2, %v11872_v27, 0.0 }
 0xf34   :  { %v11876_v31 = vpop.eup %9418  ;;  %4512 = vadd.xlane.f32.xlu0 %v4511_v53 }
 0xf35   :  { %v4520_v55 = vsel %vm1076_vm2, %v11876_v31, 0.0 }
 0xf36   :  { %v11880_v35 = vpop.eup %9420 }
 0xf37   :  { %v4517_v39 = vsel %vm1076_vm2, %v11880_v35, 0.0 }
 0xf38   :  { %4521 = vadd.xlane.f32.xlu0 %v4520_v55 }
 0xf3a   :  { %v11882_v40 = vpop.eup %9422 }
 0xf3b   :  { %v4523_v1 = vsel %vm1076_vm2, %v11882_v40, 0.0  ;;  %v11888_v2 = vpop.eup %9424 }
 0xf3c   :  { %4518 = vadd.xlane.f32.xlu0 %v4517_v39  ;;  %4524 = vadd.xlane.f32.xlu1 %v4523_v1  ;;  %v4526_v18 = vsel %vm1076_vm2, %v11888_v2, 0.0 }
 0xf3e   :  { %v11890_v38 = vpop.eup %9426 }
 0xf3f   :  { %v4529_v61 = vsel %vm1076_vm2, %v11890_v38, 0.0  ;;  %v11896_v51 = vpop.eup %9428 }
 0xf40   :  { %4527 = vadd.xlane.f32.xlu0 %v4526_v18  ;;  %4530 = vadd.xlane.f32.xlu1 %v4529_v61  ;;  %v4532_v22 = vsel %vm1076_vm2, %v11896_v51, 0.0 }
 0xf44   :  { %4533 = vadd.xlane.f32.xlu0 %v4532_v22 }
 0xf4d   :  { %v4444_v7 = vpop.xlane.xlu0 %4443 }
 0xf4e   :  { %v4472_v49 = vsub.f32 %v11810_v15, %v4444_v7 }
 0xf50   :  { %v4497_v17 = vmul.f32 1.442695, %v4472_v49 }
 0xf51   :  { %v4441_v33 = vpop.xlane.xlu0 %4440 }
 0xf52   :  { %9430 = vpow2.f32 %v4497_v17  ;;  %v4471_v10 = vsub.f32 %v11814_v56, %v4441_v33  ;;  %v4450_v56 = vpop.xlane.xlu1 %4449 }
 0xf53   :  { %v4474_v7 = vsub.f32 %v11816_v54, %v4450_v56 }
 0xf54   :  { %v4495_v44 = vmul.f32 1.442695, %v4471_v10 }
 0xf55   :  { %v4447_v15 = vpop.xlane.xlu0 %4446  ;;  %v4501_v10 = vmul.f32 1.442695, %v4474_v7 }
 0xf56   :  { %9432 = vpow2.f32 %v4495_v44  ;;  %v4473_v1 = vsub.f32 %v11822_v24, %v4447_v15  ;;  %v4456_v18 = vpop.xlane.xlu1 %4455 }
 0xf57   :  { %v4476_v61 = vsub.f32 %v11824_v23, %v4456_v18 }
 0xf58   :  { %v4499_v22 = vmul.f32 1.442695, %v4473_v1 }
 0xf59   :  { %v4453_v39 = vpop.xlane.xlu0 %4452  ;;  %v4505_v17 = vmul.f32 1.442695, %v4476_v61 }
 0xf5a   :  { %9434 = vpow2.f32 %v4499_v22  ;;  %v4475_v44 = vsub.f32 %v11830_v5, %v4453_v39 }
 0xf5b   :  { %9436 = vpow2.f32 %v4505_v17 }
 0xf5c   :  { %9438 = vpow2.f32 %v4501_v10  ;;  %v4503_v15 = vmul.f32 1.442695, %v4475_v44 }
 0xf5d   :  { %v4459_v49 = vpop.xlane.xlu0 %4458 }
 0xf5e   :  { %v4477_v33 = vsub.f32 %v11838_v29, %v4459_v49 }
 0xf5f   :  { %v11902_v3 = vpop.eup %9430 }
 0xf60   :  { %v4538_v32 = vsel %vm1076_vm2, %v11902_v3, 0.0 }
 0xf61   :  { %4539 = vadd.xlane.f32.xlu0 %v4538_v32  ;;  %v4462_v32 = vpop.xlane.xlu1 %4461 }
 0xf62   :  { %v4478_v24 = vsub.f32 %v11832_v26, %v4462_v32 }
 0xf63   :  { %v11906_v53 = vpop.eup %9432 }
 0xf64   :  { %v4535_v55 = vsel %vm1076_vm2, %v11906_v53, 0.0  ;;  %v4509_v23 = vmul.f32 1.442695, %v4478_v24 }
 0xf65   :  { %4536 = vadd.xlane.f32.xlu1 %v4535_v55  ;;  %v4507_v55 = vmul.f32 1.442695, %v4477_v33  ;;  %v11948_v17 = vpop.permute.xlu1 %4907  ;;  %v11950_v33 = vpop.permute.xlu0 %4905 }
 0xf67   :  { %9440 = vpow2.f32 %v4507_v55  ;;  %v11920_v1 = vpop.eup %9434 }
 0xf68   :  { %9442 = vpow2.f32 %v4503_v15  ;;  %v4541_v54 = vsel %vm1076_vm2, %v11920_v1, 0.0  ;;  %v11924_v29 = vpop.eup %9436 }
 0xf69   :  { %9444 = vpow2.f32 %v4509_v23  ;;  %v11926_v5 = vpop.eup %9438  ;;  %v4550_v56 = vsel %vm1076_vm2, %v11924_v29, 0.0 }
 0xf6a   :  { %v4544_v26 = vsel %vm1076_vm2, %v11926_v5, 0.0 }
 0xf74   :  { %v11930_v39 = vpop.eup %9440 }
 0xf75   :  { %v11934_v18 = vpop.eup %9442  ;;  %v4553_v61 = vsel %vm1076_vm2, %v11930_v39, 0.0 }
 0xf76   :  { %4909 = vrot.lane.b32.xlu1 %v11570_v41, %s9673_s0  ;;  %v4547_v22 = vsel %vm1076_vm2, %v11934_v18, 0.0  ;;  %v11940_v7 = vpop.eup %9444 }
 0xf77   :  { %5084 = vrot.lane.b32.xlu0 %v11606_v14, %s9672_s30  ;;  %v4556_v49 = vsel %vm1076_vm2, %v11940_v7, 0.0 }
 0xf96   :  { %4542 = vadd.xlane.f32.xlu0 %v4541_v54 }
 0xf9a   :  { %4551 = vadd.xlane.f32.xlu0 %v4550_v56  ;;  %4545 = vadd.xlane.f32.xlu1 %v4544_v26 }
 0xf9e   :  { %4554 = vadd.xlane.f32.xlu0 %v4553_v61  ;;  %4548 = vadd.xlane.f32.xlu1 %v4547_v22 }
 0xfa2   :  { %4557 = vadd.xlane.f32.xlu1 %v4556_v49 }
 0xfb3   :  { %5082 = vrot.lane.b32.xlu1 %v11598_v37, %s9672_s30 }
 0xfb4   :  { %4911 = vrot.lane.b32.xlu0 %v11568_v28, %s9673_s0 }
 0xfb7   :  { %5068 = vrot.lane.b32.xlu1 %v11606_v14, %s9673_s0 }
 0xfb8   :  { %5066 = vrot.lane.b32.xlu0 %v11598_v37, %s9673_s0 }
 0xfbb   :  { %v4516_v10 = vpop.xlane.xlu1 %4515  ;;  %5072 = vrot.lane.b32.xlu1 %v11602_v11, %s9673_s0 }
 0xfbc   :  { %9446 = vrcp.f32 %v4516_v10  ;;  %5070 = vrot.lane.b32.xlu0 %v11638_v57, %s9673_s0 }
 0xfbd   :  { %v4513_v44 = vpop.xlane.xlu0 %4512 }
 0xfbe   :  { %9448 = vrcp.f32 %v4513_v44 }
 0xfbf   :  { %5076 = vrot.lane.b32.xlu1 %v11626_v47, %s9673_s0 }
 0xfc0   :  { %5074 = vrot.lane.b32.xlu0 %v11632_v46, %s9673_s0 }
 0xfc1   :  { %v4522_v32 = vpop.xlane.xlu0 %4521 }
 0xfc2   :  { %9450 = vrcp.f32 %v4522_v32 }
 0xfc3   :  { %5080 = vrot.lane.b32.xlu1 %v11614_v63, %s9673_s0 }
 0xfc4   :  { %5078 = vrot.lane.b32.xlu0 %v11620_v30, %s9673_s0 }
 0xfc5   :  { %v4525_v55 = vpop.xlane.xlu1 %4524  ;;  %v4519_v24 = vpop.xlane.xlu0 %4518 }
 0xfc6   :  { %9452 = vrcp.f32 %v4519_v24 }
 0xfc7   :  { %9454 = vrcp.f32 %v4525_v55  ;;  %5423 = vrot.lane.b32.xlu1 %v11570_v41, %s9674_s11 }
 0xfc8   :  { %5425 = vrot.lane.b32.xlu0 %v11568_v28, %s9674_s11 }
 0xfc9   :  { %v4531_v15 = vpop.xlane.xlu1 %4530  ;;  %v4528_v23 = vpop.xlane.xlu0 %4527 }
 0xfca   :  { %v9447_v54 = vpop.eup %9446  ;;  %9456 = vrcp.f32 %v4531_v15 }
 0xfcb   :  { %v9449_v56 = vpop.eup %9448  ;;  %9458 = vrcp.f32 %v4528_v23  ;;  %v4576_v61 = vmul.f32 %v9447_v54, %v11868_v48  ;;  %5419 = vrot.lane.b32.xlu1 %v11586_v0, %s9674_s11 }
 0xfcc   :  { %v4575_v26 = vmul.f32 %v9449_v56, %v11872_v27  ;;  %5421 = vrot.lane.b32.xlu0 %v11578_v60, %s9674_s11 }
 0xfcd   :  { %v4534_v41 = vpop.xlane.xlu0 %4533 }
 0xfce   :  { %9460 = vrcp.f32 %v4534_v41  ;;  %8832 = vmatprep.mubr.msk.f32.mxu0 %vm1076_vm2, %v4575_v26 }
 0xfcf   :  { %8833 = vmatmul.mubr.msk.f32.vlgmr.msra.gmra.mxu0 %vm1076_vm2, %v4576_v61  ;;  %5415 = vrot.lane.b32.xlu1 %v11582_v25, %s9674_s11  ;;  %v9451_v28 = vpop.eup %9450 }
 0xfd0   :  { %8873 = vmatpush3.xpose.msk.msra.mxu0 %vm69_vm0, %v11754_v13  ;;  %5417 = vrot.lane.b32.xlu0 %v11574_v43, %s9674_s11  ;;  %v4578_v43 = vmul.f32 %v9451_v28, %v11876_v31 }
 0xfd1   :  { %8874 = vmatprep.subr.msk.mxu0 %vm69_vm0, %v11764_v4 }
 0xfd3   :  { %v9453_v60 = vpop.eup %9452  ;;  %5411 = vrot.lane.b32.xlu1 %v11564_v45, %s9674_s11 }
 0xfd4   :  { %8875 = vmatpush3.xpose.msk.msra.mxu0 %vm69_vm0, %v11764_v4  ;;  %v9455_v0 = vpop.eup %9454  ;;  %5413 = vrot.lane.b32.xlu0 %v11590_v9, %s9674_s11  ;;  %v4577_v25 = vmul.f32 %v9453_v60, %v11880_v35 }
 0xfd5   :  { %8876 = vmatprep.subr.msk.mxu0 %vm69_vm0, %v11766_v21  ;;  %v4579_v4 = vmul.f32 %v9455_v0, %v11882_v40 }
 0xfd6   :  { %8835 = vmatprep.mubr.msk.f32.mxu0 %vm1076_vm2, %v4577_v25 }
 0xfd7   :  { %v9457_v13 = vpop.eup %9456  ;;  %8836 = vmatmul.mubr.msk.f32.gmra.mxu0 %vm1076_vm2, %v4578_v43  ;;  %5576 = vrot.lane.b32.xlu1 %v11620_v30, %s9674_s11 }
 0xfd8   :  { %v9459_v48 = vpop.eup %9458  ;;  %5578 = vrot.lane.b32.xlu0 %v11614_v63, %s9674_s11  ;;  %8877 = vmatpush3.xpose.msk.msra.mxu0 %vm69_vm0, %v11766_v21  ;;  %v4581_v27 = vmul.f32 %v9457_v13, %v11890_v38 }
 0xfd9   :  { %v4580_v45 = vmul.f32 %v9459_v48, %v11888_v2  ;;  %8838 = vmatprep.mubr.msk.f32.mxu0 %vm1076_vm2, %v4579_v4  ;;  %8878 = vmatprep.subr.msk.mxu0 %vm69_vm0, %v11768_v20 }
 0xfdb   :  { %v9461_v9 = vpop.eup %9460  ;;  %8839 = vmatmul.mubr.msk.f32.gmra.mxu0 %vm1076_vm2, %v4580_v45  ;;  %5574 = vrot.lane.b32.xlu1 %v11626_v47, %s9674_s11 }
 0xfdc   :  { %v4582_v30 = vmul.f32 %v9461_v9, %v11896_v51  ;;  %8841 = vmatprep.mubr.msk.f32.mxu0 %vm1076_vm2, %v4581_v27  ;;  %8879 = vmatpush3.xpose.msk.msra.mxu0 %vm69_vm0, %v11768_v20 }
 0xfdd   :  { %8880 = vmatprep.subr.msk.mxu0 %vm69_vm0, %v11846_v6 }
 0xfdf   :  { %8842 = vmatmul.mubr.msk.f32.gmra.mxu0 %vm1076_vm2, %v4582_v30  ;;  %5572 = vrot.lane.b32.xlu1 %v11632_v46, %s9674_s11 }
 0xfe0   :  { %8888 = vmatprep.mubr.msk.f32.mxu0 %vm69_vm0, %v11854_v36  ;;  %8881 = vmatpush3.xpose.msk.msra.mxu0 %vm69_vm0, %v11846_v6 }
 0xfe1   :  { %8882 = vmatprep.subr.msk.mxu0 %vm69_vm0, %v11848_v62 }
 0xfe4   :  { %8883 = vmatpush3.xpose.msk.msra.mxu0 %vm69_vm0, %v11848_v62 }
 0xfe5   :  { %8884 = vmatprep.subr.msk.mxu0 %vm69_vm0, %v11850_v59 }
 0xfe8   :  { %8885 = vmatpush3.xpose.msk.msra.mxu0 %vm69_vm0, %v11850_v59 }
 0xfe9   :  { %8886 = vmatprep.subr.msk.mxu0 %vm69_vm0, %v11852_v19 }
 0xfea   :  { %v4540_v63 = vpop.xlane.xlu0 %4539 }
 0xfeb   :  { %9462 = vrcp.f32 %v4540_v63 }
 0xfec   :  { %8887 = vmatpush3.xpose.msk.msra.mxu0 %vm69_vm0, %v11852_v19 }
 0xfee   :  { %v4537_v47 = vpop.xlane.xlu1 %4536 }
 0xfef   :  { %9464 = vrcp.f32 %v4537_v47  ;;  %8889 = vmatmul.mubr.msk.f32.vlgmr.msra.gmra.mxu0 %vm69_vm0, %v11776_v52 }
 0xff0   :  { %8891 = vmatprep.mubr.msk.f32.mxu0 %vm69_vm0, %v11778_v12 }
 0xff2   :  { %v4910_v46 = vpop.permute.xlu1 %4909 }
 0xff3   :  { %8892 = vmatmul.mubr.msk.f32.gmra.mxu0 %vm69_vm0, %v11860_v16 }
 0xff4   :  { %8894 = vmatprep.mubr.msk.f32.mxu0 %vm69_vm0, %v11950_v33 }
 0xff7   :  { %8895 = vmatmul.mubr.msk.f32.gmra.mxu0 %vm69_vm0, %v11948_v17 }
 0xff8   :  { %8897 = vmatprep.mubr.msk.f32.mxu0 %vm69_vm0, %v4910_v46  ;;  %v9463_v21 = vpop.eup %9462 }
 0xff9   :  { %v4584_v52 = vmul.f32 %v9463_v21, %v11902_v3 }
 0xffc   :  { %v9465_v20 = vpop.eup %9464 }
 0xffd   :  { %v4583_v6 = vmul.f32 %v9465_v20, %v11906_v53 }
 0xfff   :  { %8860 = vmatprep.mubr.msk.f32.mxu1 %vm1076_vm2, %v4583_v6 }
0x1000   :  { %8861 = vmatmul.mubr.msk.f32.vlgmr.msra.gmra.mxu1 %vm1076_vm2, %v4584_v52 }
0x1001   :  { %8901 = vmatpush3.xpose.msk.msra.mxu1 %vm69_vm0, %v11770_v58  ;;  %v13196_v58 = vld [vmem:[#allocation16_spill] sm:$0xff] }
0x1002   :  { %8902 = vmatprep.subr.msk.mxu1 %vm69_vm0, %v11858_v8 }
0x1005   :  { %8903 = vmatpush3.xpose.msk.msra.mxu1 %vm69_vm0, %v11858_v8  ;;  %v5085_v8 = vpop.permute.xlu0 %5084 }
0x1006   :  { %8904 = vmatprep.subr.msk.mxu1 %vm69_vm0, %v11772_v50 }
0x1009   :  { %8905 = vmatpush3.xpose.msk.msra.mxu1 %vm69_vm0, %v11772_v50 }
0x100a   :  { %8906 = vmatprep.subr.msk.mxu1 %vm69_vm0, %v11774_v42 }
0x100d   :  { %8907 = vmatpush3.xpose.msk.msra.mxu1 %vm69_vm0, %v11774_v42 }
0x100e   :  { %8908 = vmatprep.subr.msk.mxu1 %vm69_vm0, %v11856_v34 }
0x1011   :  { %8909 = vmatpush3.xpose.msk.msra.mxu1 %vm69_vm0, %v11856_v34 }
0x1012   :  { %8910 = vmatprep.subr.msk.mxu1 %vm69_vm0, %v13196_v58 }
0x1015   :  { %8911 = vmatpush3.xpose.msk.msra.mxu1 %vm69_vm0, %v13196_v58 }
0x1016   :  { %8912 = vmatprep.subr.msk.mxu1 %vm69_vm0, %v5085_v8 }
0x1019   :  { %8913 = vmatpush3.xpose.msk.msra.mxu1 %vm69_vm0, %v5085_v8 }
0x101f   :  { %v4543_v50 = vpop.xlane.xlu0 %4542 }
0x1020   :  { %9466 = vrcp.f32 %v4543_v50 }
0x1023   :  { %v4552_v42 = vpop.xlane.xlu0 %4551  ;;  %v4546_v12 = vpop.xlane.xlu1 %4545 }
0x1024   :  { %9468 = vrcp.f32 %v4546_v12 }
0x1025   :  { %9470 = vrcp.f32 %v4552_v42 }
0x1027   :  { %v4555_v62 = vpop.xlane.xlu0 %4554  ;;  %v4549_v59 = vpop.xlane.xlu1 %4548 }
0x1028   :  { %9472 = vrcp.f32 %v4555_v62 }
0x1029   :  { %9474 = vrcp.f32 %v4549_v59 }
0x102b   :  { %v4912_v34 = vpop.permute.xlu0 %4911  ;;  %v4558_v19 = vpop.xlane.xlu1 %4557 }
0x102c   :  { %8898 = vmatmul.mubr.msk.f32.gmra.mxu0 %vm69_vm0, %v4912_v34  ;;  %9476 = vrcp.f32 %v4558_v19 }
0x102d   :  { %v9467_v36 = vpop.eup %9466 }
0x102e   :  { %v4585_v16 = vmul.f32 %v9467_v36, %v11920_v1 }
0x102f   :  { %v5067_v31 = vpop.permute.xlu0 %5066  ;;  %v5083_v35 = vpop.permute.xlu1 %5082 }
0x1030   :  { %8863 = vmatprep.mubr.msk.f32.mxu1 %vm1076_vm2, %v4585_v16  ;;  %8914 = vmatprep.subr.msk.mxu1 %vm69_vm0, %v5083_v35 }
0x1031   :  { %v9469_v40 = vpop.eup %9468  ;;  %8915 = vmatpush3.xpose.msk.msra.mxu1 %vm69_vm0, %v5083_v35 }
0x1032   :  { %v4586_v38 = vmul.f32 %v9469_v40, %v11926_v5  ;;  %v9471_v51 = vpop.eup %9470 }
0x1033   :  { %v5071_v2 = vpop.permute.xlu0 %5070  ;;  %v5069_v3 = vpop.permute.xlu1 %5068  ;;  %v4588_v33 = vmul.f32 %v9471_v51, %v11924_v29 }
0x1034   :  { %8864 = vmatmul.mubr.msk.f32.gmra.mxu1 %vm1076_vm2, %v4586_v38 }
0x1035   :  { %v9473_v53 = vpop.eup %9472 }
0x1036   :  { %v9475_v22 = vpop.eup %9474  ;;  %v4589_v10 = vmul.f32 %v9473_v53, %v11930_v39 }
0x1037   :  { %v5075_v49 = vpop.permute.xlu0 %5074  ;;  %v4587_v1 = vmul.f32 %v9475_v22, %v11934_v18  ;;  %v5073_v17 = vpop.permute.xlu1 %5072 }
0x1039   :  { %8866 = vmatprep.mubr.msk.f32.mxu1 %vm1076_vm2, %v4587_v1  ;;  %v9477_v44 = vpop.eup %9476 }
0x103a   :  { %8867 = vmatmul.mubr.msk.f32.gmra.mxu1 %vm1076_vm2, %v4588_v33  ;;  %v4590_v32 = vmul.f32 %v9477_v44, %v11940_v7 }
0x103b   :  { %8869 = vmatprep.mubr.msk.f32.mxu1 %vm1076_vm2, %v4589_v10  ;;  %v5079_v5 = vpop.permute.xlu0 %5078  ;;  %v5077_v55 = vpop.permute.xlu1 %5076 }
0x103e   :  { %8870 = vmatmul.mubr.msk.f32.gmra.mxu1 %vm1076_vm2, %v4590_v32 }
0x103f   :  { %8916 = vmatprep.mubr.msk.f32.mxu1 %vm69_vm0, %v5067_v31  ;;  %v5426_v18 = vpop.permute.xlu0 %5425  ;;  %v5081_v24 = vpop.permute.xlu1 %5080 }
0x1040   :  { %8928 = vmatprep.subr.mxu0 %v5426_v18 }
0x1041   :  { %8929 = vmatpush3.msra.mxu0 %v5426_v18 }
0x1042   :  { %8917 = vmatmul.mubr.msk.f32.vlgmr.msra.gmra.mxu1 %vm69_vm0, %v5069_v3 }
0x1043   :  { %8919 = vmatprep.mubr.msk.f32.mxu1 %vm69_vm0, %v5071_v2  ;;  %v5422_v29 = vpop.permute.xlu0 %5421  ;;  %v5424_v39 = vpop.permute.xlu1 %5423 }
0x1044   :  { %8930 = vmatprep.subr.mxu0 %v5424_v39 }
0x1045   :  { %8931 = vmatpush3.msra.mxu0 %v5424_v39 }
0x1046   :  { %8920 = vmatmul.mubr.msk.f32.gmra.mxu1 %vm69_vm0, %v5073_v17  ;;  %8932 = vmatprep.subr.mxu0 %v5422_v29 }
0x1047   :  { %8922 = vmatprep.mubr.msk.f32.mxu1 %vm69_vm0, %v5075_v49  ;;  %v5418_v7 = vpop.permute.xlu0 %5417  ;;  %v5420_v15 = vpop.permute.xlu1 %5419  ;;  %8933 = vmatpush3.msra.mxu0 %v5422_v29 }
0x1048   :  { %8934 = vmatprep.subr.mxu0 %v5420_v15 }
0x1049   :  { %8935 = vmatpush3.msra.mxu0 %v5420_v15 }
0x104a   :  { %8923 = vmatmul.mubr.msk.f32.gmra.mxu1 %vm69_vm0, %v5077_v55  ;;  %8936 = vmatprep.subr.mxu0 %v5418_v7 }
0x104b   :  { %8925 = vmatprep.mubr.msk.f32.mxu1 %vm69_vm0, %v5079_v5  ;;  %v5414_v23 = vpop.permute.xlu0 %5413  ;;  %v5416_v54 = vpop.permute.xlu1 %5415  ;;  %8937 = vmatpush3.msra.mxu0 %v5418_v7 }
0x104c   :  { %8938 = vmatprep.subr.mxu0 %v5416_v54 }
0x104d   :  { %8939 = vmatpush3.msra.mxu0 %v5416_v54 }
0x104e   :  { %8926 = vmatmul.mubr.msk.f32.gmra.mxu1 %vm69_vm0, %v5081_v24  ;;  %8940 = vmatprep.subr.mxu0 %v5414_v23 }
0x104f   :  { %v5579_v56 = vpop.permute.xlu0 %5578  ;;  %v5412_v26 = vpop.permute.xlu1 %5411  ;;  %8941 = vmatpush3.msra.mxu0 %v5414_v23 }
0x1050   :  { %8956 = vmatprep.subr.mxu1 %v5579_v56  ;;  %8942 = vmatprep.subr.mxu0 %v5412_v26 }
0x1051   :  { %8957 = vmatpush3.msra.mxu1 %v5579_v56  ;;  %8943 = vmatpush3.msra.mxu0 %v5412_v26 }
0x1053   :  { %v5577_v61 = vpop.permute.xlu1 %5576 }
0x1054   :  { %8958 = vmatprep.subr.mxu1 %v5577_v61 }
0x1055   :  { %8959 = vmatpush3.msra.mxu1 %v5577_v61 }
0x1057   :  { %v5575_v41 = vpop.permute.xlu1 %5574 }
0x1058   :  { %8960 = vmatprep.subr.mxu1 %v5575_v41 }
0x1059   :  { %8961 = vmatpush3.msra.mxu1 %v5575_v41 }
0x105b   :  { %v5573_v28 = vpop.permute.xlu1 %5572 }
0x105c   :  { %8962 = vmatprep.subr.mxu1 %v5573_v28 }
0x105d   :  { %8963 = vmatpush3.msra.mxu1 %v5573_v28 }
0x108f   :  { %v12102_v60 = vpop.f32.mrf.mxu0 }
0x1091   :  { %v12104_v0 = vpop.f32.mrf.mxu0 }
0x1097   :  { %v12106_v25 = vpop.f32.mrf.mxu0 }
0x1099   :  { %v12108_v43 = vpop.f32.mrf.mxu0 }
0x109b   :  { %v12110_v13 = vpop.f32.mrf.mxu0 }
0x109d   :  { %v12112_v48 = vpop.f32.mrf.mxu0 }
0x109f   :  { %v12114_v4 = vpop.f32.mrf.mxu0 }
0x10a1   :  { %v12116_v45 = vpop.f32.mrf.mxu0 }
0x10af   :  { %v8890_v9 = vpop.f32.mrf.mxu0 }
0x10b0   :  { %v5238_v27 = vsel %vm1076_vm2, %v8890_v9, -inf }
0x10b1   :  { %5239 = vmax.xlane.f32.xlu1 %v5238_v27  ;;  %v5027_v30 = vpop.f32.mrf.mxu0 }
0x10b2   :  { %v5235_v63 = vsel %vm1076_vm2, %v5027_v30, -inf }
0x10b3   :  { %5236 = vmax.xlane.f32.xlu0 %v5235_v63  ;;  %v12120_v47 = vpop.f32.mrf.mxu0 }
0x10b4   :  { %v5244_v21 = vsel %vm1076_vm2, %v12120_v47, -inf }
0x10b5   :  { %v12122_v46 = vpop.f32.mrf.mxu0 }
0x10b6   :  { %v5241_v52 = vsel %vm1076_vm2, %v12122_v46, -inf }
0x10b7   :  { %5245 = vmax.xlane.f32.xlu0 %v5244_v21  ;;  %v12126_v20 = vpop.f32.mrf.mxu0 }
0x10b8   :  { %v5250_v6 = vsel %vm1076_vm2, %v12126_v20, -inf }
0x10b9   :  { %5251 = vmax.xlane.f32.xlu1 %v5250_v6  ;;  %v12132_v58 = vpop.f32.mrf.mxu0 }
0x10ba   :  { %v5247_v8 = vsel %vm1076_vm2, %v12132_v58, -inf }
0x10bb   :  { %5242 = vmax.xlane.f32.xlu0 %v5241_v52 }
0x10bf   :  { %5248 = vmax.xlane.f32.xlu0 %v5247_v8 }
0x10c0   :  { %v12142_v62 = vpop.f32.mrf.mxu1 }
0x10c2   :  { %v12146_v34 = vpop.f32.mrf.mxu1 }
0x10ec   :  { %v12136_v50 = vpop.f32.mrf.mxu0 }
0x10ed   :  { %v5256_v42 = vsel %vm1076_vm2, %v12136_v50, -inf }
0x10ee   :  { %5257 = vmax.xlane.f32.xlu1 %v5256_v42  ;;  %v12140_v12 = vpop.f32.mrf.mxu0 }
0x10ef   :  { %v5253_v59 = vsel %vm1076_vm2, %v12140_v12, -inf }
0x10f0   :  { %5254 = vmax.xlane.f32.xlu0 %v5253_v59 }
0x10f4   :  { %v12148_v19 = vpop.f32.mrf.mxu1 }
0x10f6   :  { %v12150_v36 = vpop.f32.mrf.mxu1 }
0x10fa   :  { %v12152_v16 = vpop.f32.mrf.mxu1 }
0x10fc   :  { %v12154_v31 = vpop.f32.mrf.mxu1 }
0x10fe   :  { %v12156_v35 = vpop.f32.mrf.mxu1 }
0x1100   :  { %v12158_v40 = vpop.f32.mrf.mxu1 }
0x1102   :  { %v12160_v2 = vpop.f32.mrf.mxu1 }
0x1103   :  { %v5262_v38 = vsel %vm1076_vm2, %v12160_v2, -inf }
0x1104   :  { %5263 = vmax.xlane.f32.xlu1 %v5262_v38  ;;  %v12164_v51 = vpop.f32.mrf.mxu1 }
0x1105   :  { %v5259_v3 = vsel %vm1076_vm2, %v12164_v51, -inf }
0x1106   :  { %5260 = vmax.xlane.f32.xlu0 %v5259_v3  ;;  %v12168_v53 = vpop.f32.mrf.mxu1 }
0x1107   :  { %v5268_v22 = vsel %vm1076_vm2, %v12168_v53, -inf }
0x1108   :  { %5269 = vmax.xlane.f32.xlu1 %v5268_v22  ;;  %v12172_v49 = vpop.f32.mrf.mxu1 }
0x1109   :  { %v5265_v1 = vsel %vm1076_vm2, %v12172_v49, -inf }
0x110a   :  { %5266 = vmax.xlane.f32.xlu0 %v5265_v1  ;;  %v12176_v17 = vpop.f32.mrf.mxu1 }
0x110b   :  { %v5274_v33 = vsel %vm1076_vm2, %v12176_v17, -inf }
0x110c   :  { %5275 = vmax.xlane.f32.xlu1 %v5274_v33  ;;  %v12180_v10 = vpop.f32.mrf.mxu1 }
0x110d   :  { %v5271_v44 = vsel %vm1076_vm2, %v12180_v10, -inf }
0x110e   :  { %5272 = vmax.xlane.f32.xlu0 %v5271_v44  ;;  %v12184_v5 = vpop.f32.mrf.mxu1 }
0x110f   :  { %v5280_v32 = vsel %vm1076_vm2, %v12184_v5, -inf }
0x1110   :  { %5281 = vmax.xlane.f32.xlu1 %v5280_v32  ;;  %v12188_v55 = vpop.f32.mrf.mxu1 }
0x1111   :  { %v5277_v18 = vsel %vm1076_vm2, %v12188_v55, -inf }
0x1112   :  { %5278 = vmax.xlane.f32.xlu0 %v5277_v18 }
0x1121   :  { %5568 = vrot.lane.b32.xlu1 %v11638_v57, %s9674_s11 }
0x1128   :  { %5570 = vrot.lane.b32.xlu0 %v11602_v11, %s9674_s11 }
0x113a   :  { %v5240_v24 = vpop.xlane.xlu1 %5239 }
0x113b   :  { %v5284_v29 = vsub.f32 %v8890_v9, %v5240_v24 }
0x113c   :  { %v5237_v39 = vpop.xlane.xlu0 %5236 }
0x113d   :  { %v5301_v7 = vmul.f32 1.442695, %v5284_v29  ;;  %v5283_v15 = vsub.f32 %v5027_v30, %v5237_v39 }
0x113f   :  { %9478 = vpow2.f32 %v5301_v7  ;;  %v5299_v23 = vmul.f32 1.442695, %v5283_v15 }
0x1140   :  { %v5246_v54 = vpop.xlane.xlu0 %5245 }
0x1141   :  { %9480 = vpow2.f32 %v5299_v23  ;;  %v5286_v56 = vsub.f32 %v12120_v47, %v5246_v54 }
0x1142   :  { %v5252_v26 = vpop.xlane.xlu1 %5251 }
0x1143   :  { %v5305_v61 = vmul.f32 1.442695, %v5286_v56  ;;  %v5288_v41 = vsub.f32 %v12126_v20, %v5252_v26 }
0x1144   :  { %v5243_v28 = vpop.xlane.xlu0 %5242 }
0x1145   :  { %9482 = vpow2.f32 %v5305_v61  ;;  %v5309_v57 = vmul.f32 1.442695, %v5288_v41  ;;  %v5285_v11 = vsub.f32 %v12122_v46, %v5243_v28 }
0x1147   :  { %9484 = vpow2.f32 %v5309_v57  ;;  %v5303_v9 = vmul.f32 1.442695, %v5285_v11 }
0x1148   :  { %v5249_v27 = vpop.xlane.xlu0 %5248 }
0x1149   :  { %9486 = vpow2.f32 %v5303_v9  ;;  %v5287_v30 = vsub.f32 %v12132_v58, %v5249_v27 }
0x114b   :  { %v5307_v63 = vmul.f32 1.442695, %v5287_v30 }
0x114c   :  { %v12200_v21 = vpop.eup %9478 }
0x114d   :  { %9488 = vpow2.f32 %v5307_v63  ;;  %v5334_v47 = vsel %vm1076_vm2, %v12200_v21, 0.0 }
0x114e   :  { %v12204_v6 = vpop.eup %9480  ;;  %5335 = vadd.xlane.f32.xlu1 %v5334_v47 }
0x114f   :  { %v5331_v20 = vsel %vm1076_vm2, %v12204_v6, 0.0 }
0x1150   :  { %5332 = vadd.xlane.f32.xlu0 %v5331_v20 }
0x1152   :  { %v12208_v46 = vpop.eup %9482 }
0x1153   :  { %v5340_v52 = vsel %vm1076_vm2, %v12208_v46, 0.0 }
0x1154   :  { %v12212_v58 = vpop.eup %9484  ;;  %5341 = vadd.xlane.f32.xlu1 %v5340_v52 }
0x1155   :  { %v5346_v42 = vsel %vm1076_vm2, %v12212_v58, 0.0 }
0x1156   :  { %v12214_v8 = vpop.eup %9486 }
0x1157   :  { %v5337_v59 = vsel %vm1076_vm2, %v12214_v8, 0.0 }
0x1158   :  { %5347 = vadd.xlane.f32.xlu1 %v5346_v42  ;;  %5338 = vadd.xlane.f32.xlu0 %v5337_v59 }
0x115a   :  { %v12220_v38 = vpop.eup %9488 }
0x115b   :  { %v5343_v3 = vsel %vm1076_vm2, %v12220_v38, 0.0 }
0x115c   :  { %5344 = vadd.xlane.f32.xlu0 %v5343_v3 }
0x1177   :  { %v5258_v22 = vpop.xlane.xlu1 %5257 }
0x1178   :  { %v5290_v1 = vsub.f32 %v12136_v50, %v5258_v22 }
0x1179   :  { %v5255_v33 = vpop.xlane.xlu0 %5254 }
0x117a   :  { %v5313_v44 = vmul.f32 1.442695, %v5290_v1  ;;  %v5289_v32 = vsub.f32 %v12140_v12, %v5255_v33 }
0x117c   :  { %9490 = vpow2.f32 %v5313_v44  ;;  %v5311_v18 = vmul.f32 1.442695, %v5289_v32 }
0x117e   :  { %9492 = vpow2.f32 %v5311_v18 }
0x1189   :  { %v12226_v24 = vpop.eup %9490 }
0x118a   :  { %v5352_v29 = vsel %vm1076_vm2, %v12226_v24, 0.0 }
0x118b   :  { %v12230_v39 = vpop.eup %9492  ;;  %5353 = vadd.xlane.f32.xlu1 %v5352_v29 }
0x118c   :  { %v5349_v7 = vsel %vm1076_vm2, %v12230_v39, 0.0 }
0x118d   :  { %v5264_v15 = vpop.xlane.xlu1 %5263  ;;  %5350 = vadd.xlane.f32.xlu0 %v5349_v7 }
0x118e   :  { %v5292_v50 = vsub.f32 %v12160_v2, %v5264_v15 }
0x118f   :  { %v5261_v23 = vpop.xlane.xlu0 %5260 }
0x1190   :  { %v5317_v12 = vmul.f32 1.442695, %v5292_v50  ;;  %v5291_v54 = vsub.f32 %v12164_v51, %v5261_v23 }
0x1191   :  { %v5270_v56 = vpop.xlane.xlu1 %5269 }
0x1192   :  { %9494 = vpow2.f32 %v5317_v12  ;;  %v5315_v26 = vmul.f32 1.442695, %v5291_v54  ;;  %v5294_v61 = vsub.f32 %v12168_v53, %v5270_v56 }
0x1193   :  { %v5267_v41 = vpop.xlane.xlu0 %5266 }
0x1194   :  { %9496 = vpow2.f32 %v5315_v26  ;;  %v5321_v28 = vmul.f32 1.442695, %v5294_v61  ;;  %v5293_v57 = vsub.f32 %v12172_v49, %v5267_v41 }
0x1195   :  { %v5276_v11 = vpop.xlane.xlu1 %5275 }
0x1196   :  { %9498 = vpow2.f32 %v5321_v28  ;;  %v5319_v9 = vmul.f32 1.442695, %v5293_v57  ;;  %v5296_v27 = vsub.f32 %v12176_v17, %v5276_v11 }
0x1197   :  { %v5273_v2 = vpop.xlane.xlu0 %5272 }
0x1198   :  { %9500 = vpow2.f32 %v5319_v9  ;;  %v5325_v30 = vmul.f32 1.442695, %v5296_v27  ;;  %v5295_v51 = vsub.f32 %v12180_v10, %v5273_v2 }
0x1199   :  { %v5282_v63 = vpop.xlane.xlu1 %5281 }
0x119a   :  { %9502 = vpow2.f32 %v5325_v30  ;;  %v5323_v47 = vmul.f32 1.442695, %v5295_v51  ;;  %v5298_v53 = vsub.f32 %v12184_v5, %v5282_v63 }
0x119b   :  { %v5279_v20 = vpop.xlane.xlu0 %5278 }
0x119c   :  { %9504 = vpow2.f32 %v5323_v47  ;;  %v5329_v52 = vmul.f32 1.442695, %v5298_v53  ;;  %v5297_v49 = vsub.f32 %v12188_v55, %v5279_v20 }
0x119d   :  { %v5569_v22 = vpop.permute.xlu1 %5568 }
0x119e   :  { %9506 = vpow2.f32 %v5329_v52  ;;  %v5327_v42 = vmul.f32 1.442695, %v5297_v49 }
0x119f   :  { %v12242_v59 = vpop.eup %9494  ;;  %v5571_v17 = vpop.permute.xlu0 %5570 }
0x11a0   :  { %9508 = vpow2.f32 %v5327_v42  ;;  %8964 = vmatprep.subr.mxu1 %v5571_v17  ;;  %v5358_v10 = vsel %vm1076_vm2, %v12242_v59, 0.0 }
0x11a1   :  { %v12246_v3 = vpop.eup %9496  ;;  %5359 = vadd.xlane.f32.xlu0 %v5358_v10  ;;  %8965 = vmatpush3.msra.mxu1 %v5571_v17 }
0x11a2   :  { %8966 = vmatprep.subr.mxu1 %v5569_v22  ;;  %v5355_v5 = vsel %vm1076_vm2, %v12246_v3, 0.0 }
0x11a3   :  { %v12250_v55 = vpop.eup %9498  ;;  %5356 = vadd.xlane.f32.xlu1 %v5355_v5  ;;  %8967 = vmatpush3.msra.mxu1 %v5569_v22 }
0x11a4   :  { %v5364_v1 = vsel %vm1076_vm2, %v12250_v55, 0.0 }
0x11a5   :  { %v12254_v33 = vpop.eup %9500  ;;  %5365 = vadd.xlane.f32.xlu0 %v5364_v1 }
0x11a6   :  { %v5361_v44 = vsel %vm1076_vm2, %v12254_v33, 0.0 }
0x11a7   :  { %v12258_v32 = vpop.eup %9502  ;;  %5362 = vadd.xlane.f32.xlu1 %v5361_v44 }
0x11a8   :  { %v5370_v18 = vsel %vm1076_vm2, %v12258_v32, 0.0 }
0x11a9   :  { %v12262_v29 = vpop.eup %9504  ;;  %5371 = vadd.xlane.f32.xlu0 %v5370_v18 }
0x11aa   :  { %v5367_v7 = vsel %vm1076_vm2, %v12262_v29, 0.0 }
0x11ab   :  { %v12266_v15 = vpop.eup %9506  ;;  %5368 = vadd.xlane.f32.xlu1 %v5367_v7 }
0x11ac   :  { %v5376_v50 = vsel %vm1076_vm2, %v12266_v15, 0.0 }
0x11ad   :  { %v12270_v23 = vpop.eup %9508  ;;  %5377 = vadd.xlane.f32.xlu0 %v5376_v50 }
0x11ae   :  { %v5373_v12 = vsel %vm1076_vm2, %v12270_v23, 0.0 }
0x11af   :  { %5374 = vadd.xlane.f32.xlu1 %v5373_v12 }
0x11c0   :  { %5564 = vrot.lane.b32.xlu1 %v11598_v37, %s9674_s11 }
0x11c3   :  { %5566 = vrot.lane.b32.xlu0 %v11606_v14, %s9674_s11 }
0x11d7   :  { %v5336_v54 = vpop.xlane.xlu1 %5335 }
0x11d8   :  { %9510 = vrcp.f32 %v5336_v54 }
0x11d9   :  { %v5333_v56 = vpop.xlane.xlu0 %5332 }
0x11da   :  { %9512 = vrcp.f32 %v5333_v56 }
0x11dd   :  { %v5342_v26 = vpop.xlane.xlu1 %5341 }
0x11de   :  { %9514 = vrcp.f32 %v5342_v26 }
0x11e1   :  { %v5339_v61 = vpop.xlane.xlu0 %5338  ;;  %v5348_v41 = vpop.xlane.xlu1 %5347 }
0x11e2   :  { %9516 = vrcp.f32 %v5339_v61 }
0x11e3   :  { %9518 = vrcp.f32 %v5348_v41 }
0x11e5   :  { %v5345_v28 = vpop.xlane.xlu0 %5344  ;;  %v9511_v57 = vpop.eup %9510 }
0x11e6   :  { %9520 = vrcp.f32 %v5345_v28  ;;  %v5396_v37 = vmul.f32 %v9511_v57, %v12200_v21 }
0x11e7   :  { %v9513_v11 = vpop.eup %9512 }
0x11e8   :  { %v5395_v9 = vmul.f32 %v9513_v11, %v12204_v6 }
0x11ea   :  { %8944 = vmatprep.mubr.msk.f32.mxu0 %vm1076_vm2, %v5395_v9 }
0x11eb   :  { %8945 = vmatmul.mubr.msk.f32.vlgmr.msra.gmra.mxu0 %vm1076_vm2, %v5396_v37  ;;  %v9515_v14 = vpop.eup %9514 }
0x11ec   :  { %v5398_v51 = vmul.f32 %v9515_v14, %v12208_v46 }
0x11ef   :  { %v9517_v27 = vpop.eup %9516 }
0x11f0   :  { %v5397_v2 = vmul.f32 %v9517_v27, %v12214_v8  ;;  %v9519_v30 = vpop.eup %9518 }
0x11f1   :  { %v5400_v21 = vmul.f32 %v9519_v30, %v12212_v58 }
0x11f2   :  { %8947 = vmatprep.mubr.msk.f32.mxu0 %vm1076_vm2, %v5397_v2 }
0x11f3   :  { %v9521_v63 = vpop.eup %9520  ;;  %8948 = vmatmul.mubr.msk.f32.gmra.mxu0 %vm1076_vm2, %v5398_v51 }
0x11f4   :  { %v5399_v6 = vmul.f32 %v9521_v63, %v12220_v38 }
0x11f6   :  { %8950 = vmatprep.mubr.msk.f32.mxu0 %vm1076_vm2, %v5399_v6 }
0x11f7   :  { %8951 = vmatmul.mubr.msk.f32.gmra.mxu0 %vm1076_vm2, %v5400_v21 }
0x1214   :  { %v5354_v47 = vpop.xlane.xlu1 %5353 }
0x1215   :  { %9522 = vrcp.f32 %v5354_v47 }
0x1216   :  { %v5351_v53 = vpop.xlane.xlu0 %5350 }
0x1217   :  { %9524 = vrcp.f32 %v5351_v53 }
0x1222   :  { %v9523_v8 = vpop.eup %9522 }
0x1223   :  { %v5402_v52 = vmul.f32 %v9523_v8, %v12226_v24 }
0x1224   :  { %v9525_v20 = vpop.eup %9524 }
0x1225   :  { %v5401_v46 = vmul.f32 %v9525_v20, %v12230_v39 }
0x1227   :  { %8953 = vmatprep.mubr.msk.f32.mxu0 %vm1076_vm2, %v5401_v46 }
0x1228   :  { %8954 = vmatmul.mubr.msk.f32.gmra.mxu0 %vm1076_vm2, %v5402_v52 }
0x122a   :  { %v5360_v38 = vpop.xlane.xlu0 %5359 }
0x122b   :  { %9526 = vrcp.f32 %v5360_v38 }
0x122c   :  { %v5357_v49 = vpop.xlane.xlu1 %5356 }
0x122d   :  { %9528 = vrcp.f32 %v5357_v49 }
0x122e   :  { %v5366_v58 = vpop.xlane.xlu0 %5365 }
0x122f   :  { %9530 = vrcp.f32 %v5366_v58 }
0x1230   :  { %v5363_v42 = vpop.xlane.xlu1 %5362 }
0x1231   :  { %9532 = vrcp.f32 %v5363_v42 }
0x1232   :  { %v5372_v17 = vpop.xlane.xlu0 %5371 }
0x1233   :  { %9534 = vrcp.f32 %v5372_v17 }
0x1234   :  { %v5369_v10 = vpop.xlane.xlu1 %5368 }
0x1235   :  { %9536 = vrcp.f32 %v5369_v10 }
0x1236   :  { %v5378_v22 = vpop.xlane.xlu0 %5377 }
0x1237   :  { %9538 = vrcp.f32 %v5378_v22 }
0x1238   :  { %v5375_v39 = vpop.xlane.xlu1 %5374  ;;  %v9527_v24 = vpop.eup %9526 }
0x1239   :  { %9540 = vrcp.f32 %v5375_v39  ;;  %v5404_v50 = vmul.f32 %v9527_v24, %v12242_v59 }
0x123a   :  { %v9529_v5 = vpop.eup %9528  ;;  %v5567_v1 = vpop.permute.xlu0 %5566 }
0x123b   :  { %8968 = vmatprep.subr.mxu1 %v5567_v1  ;;  %v5403_v44 = vmul.f32 %v9529_v5, %v12246_v3 }
0x123c   :  { %v5565_v18 = vpop.permute.xlu1 %5564  ;;  %8969 = vmatpush3.msra.mxu1 %v5567_v1  ;;  %v9531_v7 = vpop.eup %9530 }
0x123d   :  { %8970 = vmatprep.subr.mxu1 %v5565_v18  ;;  %8972 = vmatprep.mubr.msk.f32.mxu1 %vm1076_vm2, %v5403_v44  ;;  %v5406_v26 = vmul.f32 %v9531_v7, %v12250_v55  ;;  %v7777_v55 = vld [vmem:[%s13105_s4 + $0x38] sm:$0xff] }
0x123e   :  { %v9533_v12 = vpop.eup %9532  ;;  %8971 = vmatpush3.msra.mxu1 %v5565_v18  ;;  %8984 = vmatprep.subr.mxu0 %v7777_v55 }
0x123f   :  { %8973 = vmatmul.mubr.msk.f32.vlgmr.msra.gmra.mxu1 %vm1076_vm2, %v5404_v50  ;;  %v5405_v54 = vmul.f32 %v9533_v12, %v12254_v33  ;;  %8985 = vmatpush3.msra.mxu0 %v7777_v55 }
0x1240   :  { %v9535_v56 = vpop.eup %9534 }
0x1241   :  { %8975 = vmatprep.mubr.msk.f32.mxu1 %vm1076_vm2, %v5405_v54  ;;  %v5408_v41 = vmul.f32 %v9535_v56, %v12258_v32  ;;  %v7775_v32 = vld [vmem:[%s13105_s4 + $0x28] sm:$0xff] }
0x1242   :  { %v9537_v3 = vpop.eup %9536 }
0x1243   :  { %8976 = vmatmul.mubr.msk.f32.gmra.mxu1 %vm1076_vm2, %v5406_v26  ;;  %v5407_v61 = vmul.f32 %v9537_v3, %v12262_v29  ;;  %v7776_v29 = vld [vmem:[%s13105_s4 + $0x30] sm:$0xff]  ;;  %v13197_v26 = vld [vmem:[#allocation18_spill] sm:$0xff] }
0x1244   :  { %v9539_v59 = vpop.eup %9538  ;;  %8986 = vmatprep.subr.mxu0 %v7776_v29 }
0x1245   :  { %8978 = vmatprep.mubr.msk.f32.mxu1 %vm1076_vm2, %v5407_v61  ;;  %v5410_v57 = vmul.f32 %v9539_v59, %v12266_v15  ;;  %8987 = vmatpush3.msra.mxu0 %v7776_v29  ;;  %v7774_v15 = vld [vmem:[%s13105_s4 + $0x20] sm:$0xff]  ;;  %v13199_v29 = vld [vmem:[#allocation3_spill] sm:$0xff] }
0x1246   :  { %v9541_v28 = vpop.eup %9540  ;;  %8988 = vmatprep.subr.mxu0 %v7775_v32 }
0x1247   :  { %8979 = vmatmul.mubr.msk.f32.gmra.mxu1 %vm1076_vm2, %v5408_v41  ;;  %v5409_v33 = vmul.f32 %v9541_v28, %v12270_v23  ;;  %8989 = vmatpush3.msra.mxu0 %v7775_v32 }
0x1248   :  { %8990 = vmatprep.subr.mxu0 %v7774_v15 }
0x1249   :  { %8981 = vmatprep.mubr.msk.f32.mxu1 %vm1076_vm2, %v5409_v33  ;;  %8991 = vmatpush3.msra.mxu0 %v7774_v15 }
0x124b   :  { %8982 = vmatmul.mubr.msk.f32.gmra.mxu1 %vm1076_vm2, %v5410_v57 }
0x12ab   :  { %v8946_v23 = vpop.f32.mrf.mxu0 }
0x12ac   :  { %5735 = vrot.lane.b32.xlu1 %v8946_v23, %s9675_s20 }
0x12ad   :  { %v5525_v11 = vpop.f32.mrf.mxu0 }
0x12ae   :  { %5733 = vrot.lane.b32.xlu0 %v5525_v11, %s9675_s20 }
0x12b3   :  { %v8949_v9 = vpop.f32.mrf.mxu0 }
0x12b4   :  { %5739 = vrot.lane.b32.xlu1 %v8949_v9, %s9675_s20 }
0x12b5   :  { %v5535_v37 = vpop.f32.mrf.mxu0 }
0x12b6   :  { %5737 = vrot.lane.b32.xlu0 %v5535_v37, %s9675_s20  ;;  %v13200_v37 = vld [vmem:[#allocation5_spill] sm:$0xff] }
0x12b7   :  { %v8952_v14 = vpop.f32.mrf.mxu0 }
0x12b8   :  { %5743 = vrot.lane.b32.xlu1 %v8952_v14, %s9675_s20 }
0x12b9   :  { %v5545_v27 = vpop.f32.mrf.mxu0 }
0x12ba   :  { %5741 = vrot.lane.b32.xlu0 %v5545_v27, %s9675_s20 }
0x12e8   :  { %v8955_v2 = vpop.f32.mrf.mxu0 }
0x12e9   :  { %5747 = vrot.lane.b32.xlu1 %v8955_v2, %s9675_s20  ;;  %v13201_v2 = vld [vmem:[#allocation4_spill] sm:$0xff] }
0x12ea   :  { %v5555_v30 = vpop.f32.mrf.mxu0 }
0x12eb   :  { %5745 = vrot.lane.b32.xlu0 %v5555_v30, %s9675_s20 }
0x12ff   :  { %v8974_v51 = vpop.f32.mrf.mxu1 }
0x1300   :  { %5751 = vrot.lane.b32.xlu1 %v8974_v51, %s9675_s20 }
0x1301   :  { %v5678_v63 = vpop.f32.mrf.mxu1 }
0x1302   :  { %5749 = vrot.lane.b32.xlu0 %v5678_v63, %s9675_s20 }
0x1303   :  { %v8977_v6 = vpop.f32.mrf.mxu1 }
0x1304   :  { %5755 = vrot.lane.b32.xlu1 %v8977_v6, %s9675_s20 }
0x1305   :  { %v5688_v21 = vpop.f32.mrf.mxu1 }
0x1306   :  { %5753 = vrot.lane.b32.xlu0 %v5688_v21, %s9675_s20 }
0x1307   :  { %v8980_v47 = vpop.f32.mrf.mxu1 }
0x1308   :  { %5759 = vrot.lane.b32.xlu1 %v8980_v47, %s9675_s20 }
0x1309   :  { %v5698_v53 = vpop.f32.mrf.mxu1 }
0x130a   :  { %5757 = vrot.lane.b32.xlu0 %v5698_v53, %s9675_s20 }
0x130b   :  { %v8983_v8 = vpop.f32.mrf.mxu1 }
0x130c   :  { %5763 = vrot.lane.b32.xlu1 %v8983_v8, %s9675_s20 }
0x130d   :  { %v5708_v20 = vpop.f32.mrf.mxu1 }
0x130e   :  { %5761 = vrot.lane.b32.xlu0 %v5708_v20, %s9675_s20  ;;  %v13202_v20 = vld [vmem:[#allocation7_spill] sm:$0xff] }
0x131e   :  { %v5736_v46 = vpop.permute.xlu1 %5735 }
0x131f   :  { %v5782_v49 = vsel %vm69_vm0, %v12102_v60, %v5736_v46 }
0x1320   :  { %v5734_v52 = vpop.permute.xlu0 %5733 }
0x1321   :  { %v5781_v38 = vsel %vm69_vm0, %v12104_v0, %v5734_v52 }
0x1322   :  { %8992 = vmatprep.mubr.msk.f32.mxu0 %vm271_vm1, %v5781_v38 }
0x1323   :  { %8993 = vmatmul.mubr.msk.f32.vlgmr.msra.gmra.mxu0 %vm271_vm1, %v5782_v49 }
0x1326   :  { %v5740_v58 = vpop.permute.xlu1 %5739 }
0x1327   :  { %v5784_v10 = vsel %vm69_vm0, %v12106_v25, %v5740_v58 }
0x1328   :  { %v5738_v42 = vpop.permute.xlu0 %5737 }
0x1329   :  { %v5783_v17 = vsel %vm69_vm0, %v12108_v43, %v5738_v42 }
0x132a   :  { %8995 = vmatprep.mubr.msk.f32.mxu0 %vm271_vm1, %v5783_v17  ;;  %v5744_v22 = vpop.permute.xlu1 %5743 }
0x132b   :  { %8996 = vmatmul.mubr.msk.f32.gmra.mxu0 %vm271_vm1, %v5784_v10  ;;  %v5786_v39 = vsel %vm69_vm0, %v12110_v13, %v5744_v22 }
0x132c   :  { %v5742_v0 = vpop.permute.xlu0 %5741 }
0x132d   :  { %v5785_v60 = vsel %vm69_vm0, %v12112_v48, %v5742_v0 }
0x132e   :  { %8998 = vmatprep.mubr.msk.f32.mxu0 %vm271_vm1, %v5785_v60 }
0x132f   :  { %8999 = vmatmul.mubr.msk.f32.gmra.mxu0 %vm271_vm1, %v5786_v39  ;;  %v7800_v39 = vld [vmem:[%s13106_s5 + $0x38] sm:$0xff] }
0x1330   :  { %9016 = vmatprep.subr.mxu1 %v7800_v39 }
0x1331   :  { %9017 = vmatpush3.msra.mxu1 %v7800_v39 }
0x135b   :  { %v5748_v43 = vpop.permute.xlu1 %5747 }
0x135c   :  { %v5788_v5 = vsel %vm69_vm0, %v12114_v4, %v5748_v43  ;;  %v7799_v43 = vld [vmem:[%s13106_s5 + $0x30] sm:$0xff] }
0x135d   :  { %v5746_v24 = vpop.permute.xlu0 %5745  ;;  %9018 = vmatprep.subr.mxu1 %v7799_v43 }
0x135e   :  { %v5787_v25 = vsel %vm69_vm0, %v12116_v45, %v5746_v24  ;;  %v7798_v24 = vld [vmem:[%s13106_s5 + $0x28] sm:$0xff]  ;;  %9019 = vmatpush3.msra.mxu1 %v7799_v43 }
0x135f   :  { %9001 = vmatprep.mubr.msk.f32.mxu0 %vm271_vm1, %v5787_v25  ;;  %v7797_v25 = vld [vmem:[%s13106_s5 + $0x20] sm:$0xff]  ;;  %9020 = vmatprep.subr.mxu1 %v7798_v24 }
0x1360   :  { %9002 = vmatmul.mubr.msk.f32.gmra.mxu0 %vm271_vm1, %v5788_v5  ;;  %9021 = vmatpush3.msra.mxu1 %v7798_v24 }
0x1361   :  { %9022 = vmatprep.subr.mxu1 %v7797_v25 }
0x1362   :  { %9023 = vmatpush3.msra.mxu1 %v7797_v25  ;;  %v13212_v25 = vld [vmem:[#allocation17_spill] sm:$0xff] }
0x1372   :  { %v5752_v48 = vpop.permute.xlu1 %5751 }
0x1373   :  { %v5790_v44 = vsel %vm69_vm0, %v12142_v62, %v5752_v48  ;;  %v13203_v48 = vld [vmem:[#allocation6_spill] sm:$0xff] }
0x1374   :  { %v5750_v1 = vpop.permute.xlu0 %5749 }
0x1375   :  { %v5789_v13 = vsel %vm69_vm0, %v12146_v34, %v5750_v1 }
0x1376   :  { %v5756_v18 = vpop.permute.xlu1 %5755  ;;  %9004 = vmatprep.mubr.msk.f32.mxu0 %vm271_vm1, %v5789_v13 }
0x1377   :  { %9005 = vmatmul.mubr.msk.f32.gmra.mxu0 %vm271_vm1, %v5790_v44  ;;  %v5792_v7 = vsel %vm69_vm0, %v12148_v19, %v5756_v18  ;;  %v13204_v18 = vld [vmem:[#allocation9_spill] sm:$0xff] }
0x1378   :  { %v5754_v45 = vpop.permute.xlu0 %5753 }
0x1379   :  { %v5791_v4 = vsel %vm69_vm0, %v12150_v36, %v5754_v45 }
0x137a   :  { %v5760_v50 = vpop.permute.xlu1 %5759  ;;  %9007 = vmatprep.mubr.msk.f32.mxu0 %vm271_vm1, %v5791_v4 }
0x137b   :  { %9008 = vmatmul.mubr.msk.f32.gmra.mxu0 %vm271_vm1, %v5792_v7  ;;  %v5794_v12 = vsel %vm69_vm0, %v12152_v16, %v5760_v50  ;;  %v12389_v16 = vld [vmem:[%s13104_s7 + $0xb] ss:$0 sm:$0xff] }
0x137c   :  { %v5758_v34 = vpop.permute.xlu0 %5757 }
0x137d   :  { %v5793_v62 = vsel %vm69_vm0, %v12154_v31, %v5758_v34 }
0x137e   :  { %9010 = vmatprep.mubr.msk.f32.mxu0 %vm271_vm1, %v5793_v62  ;;  %v5764_v54 = vpop.permute.xlu1 %5763 }
0x137f   :  { %9011 = vmatmul.mubr.msk.f32.gmra.mxu0 %vm271_vm1, %v5794_v12  ;;  %v5796_v56 = vsel %vm69_vm0, %v12156_v35, %v5764_v54 }
0x1380   :  { %v5762_v36 = vpop.permute.xlu0 %5761 }
0x1381   :  { %v5795_v19 = vsel %vm69_vm0, %v12158_v40, %v5762_v36  ;;  %v13198_v40 = vld [vmem:[#allocation2_spill] sm:$0xff] }
0x1382   :  { %9013 = vmatprep.mubr.msk.f32.mxu0 %vm271_vm1, %v5795_v19  ;;  %v13205_v19 = vld [vmem:[#allocation8_spill] sm:$0xff] }
0x1383   :  { %9014 = vmatmul.mubr.msk.f32.gmra.mxu0 %vm271_vm1, %v5796_v56 }
0x13e3   :  { %v8994_v31 = vpop.f32.mrf.mxu0 }
0x13e4   :  { %v5996_v3 = vadd.f32 %v8994_v31, %v13197_v26 }
0x13e5   :  { %v5916_v61 = vpop.f32.mrf.mxu0 }
0x13e6   :  { %v12393_v59 = vadd.f32 %v12389_v16, %v5996_v3  ;;  %v5995_v41 = vadd.f32 %v5916_v61, %v13198_v40  ;;  %v13206_v3 = vld [vmem:[#allocation11_spill] sm:$0xff] }
0x13e8   :  { %v12397_v35 = vadd.f32 %v12389_v16, %v5995_v41  ;;  %v6034_v28 = vsel %vm271_vm1, %v12393_v59, 0.0  ;;  %v6096_v57 = vmul.f32 %v12393_v59, %v12393_v59 }
0x13e9   :  { %6035 = vadd.xlane.f32.xlu1 %v6034_v28  ;;  %v13207_v28 = vld [vmem:[#allocation10_spill] sm:$0xff] }
0x13ea   :  { %v6031_v33 = vsel %vm271_vm1, %v12397_v35, 0.0  ;;  %v6114_v23 = vsel %vm271_vm1, %v6096_v57, 0.0  ;;  %v6095_v11 = vmul.f32 %v12397_v35, %v12397_v35 }
0x13eb   :  { %6032 = vadd.xlane.f32.xlu0 %v6031_v33  ;;  %v8997_v55 = vpop.f32.mrf.mxu0 }
0x13ec   :  { %v5998_v32 = vadd.f32 %v8997_v55, %v13199_v29  ;;  %v6111_v21 = vsel %vm271_vm1, %v6095_v11, 0.0 }
0x13ed   :  { %v5926_v15 = vpop.f32.mrf.mxu0 }
0x13ee   :  { %v12410_v9 = vadd.f32 %v12389_v16, %v5998_v32  ;;  %v5997_v14 = vadd.f32 %v5926_v15, %v13200_v37  ;;  %v13208_v32 = vld [vmem:[#allocation13_spill] sm:$0xff] }
0x13ef   :  { %6115 = vadd.xlane.f32.xlu0 %v6114_v23  ;;  %v9000_v27 = vpop.f32.mrf.mxu0 }
0x13f0   :  { %v6000_v30 = vadd.f32 %v9000_v27, %v13201_v2  ;;  %v6040_v51 = vsel %vm271_vm1, %v12410_v9, 0.0  ;;  %v6098_v63 = vmul.f32 %v12410_v9, %v12410_v9  ;;  %v12419_v6 = vadd.f32 %v12389_v16, %v5997_v14 }
0x13f1   :  { %6041 = vadd.xlane.f32.xlu1 %v6040_v51  ;;  %v5936_v47 = vpop.f32.mrf.mxu0 }
0x13f2   :  { %v12423_v53 = vadd.f32 %v12389_v16, %v6000_v30  ;;  %v6120_v8 = vsel %vm271_vm1, %v6098_v63, 0.0  ;;  %v5999_v46 = vadd.f32 %v5936_v47, %v13202_v20  ;;  %v6037_v52 = vsel %vm271_vm1, %v12419_v6, 0.0  ;;  %v13209_v63 = vld [vmem:[#allocation12_spill] sm:$0xff]  ;;  %v13210_v20 = vld [vmem:[#allocation15_spill] sm:$0xff] }
0x13f3   :  { %6112 = vadd.xlane.f32.xlu0 %v6111_v21  ;;  %v6097_v38 = vmul.f32 %v12419_v6, %v12419_v6 }
0x13f4   :  { %v6046_v49 = vsel %vm271_vm1, %v12423_v53, 0.0  ;;  %v6100_v58 = vmul.f32 %v12423_v53, %v12423_v53  ;;  %v12436_v42 = vadd.f32 %v12389_v16, %v5999_v46 }
0x13f5   :  { %6121 = vadd.xlane.f32.xlu1 %v6120_v8  ;;  %v6117_v17 = vsel %vm271_vm1, %v6097_v38, 0.0 }
0x13f6   :  { %v6126_v10 = vsel %vm271_vm1, %v6100_v58, 0.0  ;;  %v6043_v22 = vsel %vm271_vm1, %v12436_v42, 0.0  ;;  %v6099_v0 = vmul.f32 %v12436_v42, %v12436_v42 }
0x13f7   :  { %6038 = vadd.xlane.f32.xlu0 %v6037_v52 }
0x13f8   :  { %v6123_v60 = vsel %vm271_vm1, %v6099_v0, 0.0 }
0x13f9   :  { %6047 = vadd.xlane.f32.xlu1 %v6046_v49 }
0x13fb   :  { %6118 = vadd.xlane.f32.xlu0 %v6117_v17 }
0x13fd   :  { %6127 = vadd.xlane.f32.xlu1 %v6126_v10 }
0x13ff   :  { %6044 = vadd.xlane.f32.xlu0 %v6043_v22 }
0x1403   :  { %6124 = vadd.xlane.f32.xlu0 %v6123_v60  ;;  %v13211_v60 = vld [vmem:[#allocation14_spill] sm:$0xff] }
0x1420   :  { %v9003_v5 = vpop.f32.mrf.mxu0 }
0x1421   :  { %v6002_v1 = vadd.f32 %v9003_v5, %v13203_v48 }
0x1422   :  { %v5946_v13 = vpop.f32.mrf.mxu0 }
0x1423   :  { %v12459_v44 = vadd.f32 %v12389_v16, %v6002_v1  ;;  %v6001_v45 = vadd.f32 %v5946_v13, %v13204_v18 }
0x1425   :  { %v12463_v4 = vadd.f32 %v12389_v16, %v6001_v45  ;;  %v6052_v7 = vsel %vm271_vm1, %v12459_v44, 0.0  ;;  %v6102_v50 = vmul.f32 %v12459_v44, %v12459_v44 }
0x1426   :  { %6053 = vadd.xlane.f32.xlu1 %v6052_v7 }
0x1427   :  { %v6049_v34 = vsel %vm271_vm1, %v12463_v4, 0.0  ;;  %v6101_v62 = vmul.f32 %v12463_v4, %v12463_v4  ;;  %v6132_v12 = vsel %vm271_vm1, %v6102_v50, 0.0 }
0x1428   :  { %6050 = vadd.xlane.f32.xlu0 %v6049_v34 }
0x1429   :  { %v6129_v54 = vsel %vm271_vm1, %v6101_v62, 0.0 }
0x142a   :  { %6133 = vadd.xlane.f32.xlu1 %v6132_v12 }
0x142c   :  { %6130 = vadd.xlane.f32.xlu0 %v6129_v54 }
0x1437   :  { %v9006_v36 = vpop.f32.mrf.mxu0 }
0x1438   :  { %v6004_v56 = vadd.f32 %v9006_v36, %v13205_v19 }
0x1439   :  { %v5956_v31 = vpop.f32.mrf.mxu0 }
0x143a   :  { %v12477_v26 = vadd.f32 %v12389_v16, %v6004_v56  ;;  %v6003_v61 = vadd.f32 %v5956_v31, %v13206_v3 }
0x143b   :  { %v9009_v40 = vpop.f32.mrf.mxu0 }
0x143c   :  { %v12481_v41 = vadd.f32 %v12389_v16, %v6003_v61  ;;  %v6006_v33 = vadd.f32 %v9009_v40, %v13207_v28  ;;  %v6058_v57 = vsel %vm271_vm1, %v12477_v26, 0.0  ;;  %v6104_v55 = vmul.f32 %v12477_v26, %v12477_v26 }
0x143d   :  { %6059 = vadd.xlane.f32.xlu1 %v6058_v57  ;;  %v5966_v29 = vpop.f32.mrf.mxu0 }
0x143e   :  { %v6005_v15 = vadd.f32 %v5966_v29, %v13208_v32  ;;  %v6055_v23 = vsel %vm271_vm1, %v12481_v41, 0.0  ;;  %v6103_v37 = vmul.f32 %v12481_v41, %v12481_v41  ;;  %v12494_v14 = vadd.f32 %v12389_v16, %v6006_v33 }
0x143f   :  { %6056 = vadd.xlane.f32.xlu0 %v6055_v23  ;;  %v9012_v11 = vpop.f32.mrf.mxu0  ;;  %v6138_v27 = vsel %vm271_vm1, %v6104_v55, 0.0 }
0x1440   :  { %v12498_v2 = vadd.f32 %v12389_v16, %v6005_v15  ;;  %v6135_v30 = vsel %vm271_vm1, %v6103_v37, 0.0  ;;  %v6008_v21 = vadd.f32 %v9012_v11, %v13209_v63  ;;  %v6064_v47 = vsel %vm271_vm1, %v12494_v14, 0.0 }
0x1441   :  { %6139 = vadd.xlane.f32.xlu1 %v6138_v27  ;;  %v5976_v51 = vpop.f32.mrf.mxu0  ;;  %v6106_v8 = vmul.f32 %v12494_v14, %v12494_v14 }
0x1442   :  { %v6007_v46 = vadd.f32 %v5976_v51, %v13210_v20  ;;  %v6061_v52 = vsel %vm271_vm1, %v12498_v2, 0.0  ;;  %v6105_v38 = vmul.f32 %v12498_v2, %v12498_v2  ;;  %v12512_v58 = vadd.f32 %v12389_v16, %v6008_v21 }
0x1443   :  { %6136 = vadd.xlane.f32.xlu0 %v6135_v30  ;;  %v9015_v49 = vpop.f32.mrf.mxu0  ;;  %v6144_v17 = vsel %vm271_vm1, %v6106_v8, 0.0 }
0x1444   :  { %v12516_v10 = vadd.f32 %v12389_v16, %v6007_v46  ;;  %v6141_v22 = vsel %vm271_vm1, %v6105_v38, 0.0  ;;  %v6010_v39 = vadd.f32 %v9015_v49, %v13211_v60  ;;  %v6070_v43 = vsel %vm271_vm1, %v12512_v58, 0.0 }
0x1445   :  { %6065 = vadd.xlane.f32.xlu1 %v6064_v47  ;;  %v5986_v0 = vpop.f32.mrf.mxu0  ;;  %v6108_v24 = vmul.f32 %v12512_v58, %v12512_v58 }
0x1446   :  { %v6009_v5 = vadd.f32 %v5986_v0, %v13212_v25  ;;  %v6067_v48 = vsel %vm271_vm1, %v12516_v10, 0.0  ;;  %v6107_v1 = vmul.f32 %v12516_v10, %v12516_v10  ;;  %v12530_v13 = vadd.f32 %v12389_v16, %v6010_v39 }
0x1447   :  { %6062 = vadd.xlane.f32.xlu0 %v6061_v52  ;;  %v6150_v18 = vsel %vm271_vm1, %v6108_v24, 0.0 }
0x1448   :  { %v12534_v45 = vadd.f32 %v12389_v16, %v6009_v5  ;;  %v6147_v7 = vsel %vm271_vm1, %v6107_v1, 0.0  ;;  %v6076_v50 = vsel %vm271_vm1, %v12530_v13, 0.0  ;;  %v6110_v34 = vmul.f32 %v12530_v13, %v12530_v13 }
0x1449   :  { %6145 = vadd.xlane.f32.xlu1 %v6144_v17 }
0x144a   :  { %v6073_v62 = vsel %vm271_vm1, %v12534_v45, 0.0  ;;  %v6109_v12 = vmul.f32 %v12534_v45, %v12534_v45  ;;  %v6156_v16 = vsel %vm271_vm1, %v6110_v34, 0.0 }
0x144b   :  { %6142 = vadd.xlane.f32.xlu0 %v6141_v22 }
0x144c   :  { %v6153_v54 = vsel %vm271_vm1, %v6109_v12, 0.0 }
0x144d   :  { %6071 = vadd.xlane.f32.xlu1 %v6070_v43 }
0x144f   :  { %6068 = vadd.xlane.f32.xlu0 %v6067_v48 }
0x1451   :  { %6151 = vadd.xlane.f32.xlu1 %v6150_v18 }
0x1453   :  { %6148 = vadd.xlane.f32.xlu0 %v6147_v7 }
0x1455   :  { %6077 = vadd.xlane.f32.xlu1 %v6076_v50 }
0x1457   :  { %6074 = vadd.xlane.f32.xlu0 %v6073_v62  ;;  %v12552_v62 = vld [vmem:[%s13104_s7 + $0xc] ss:$0 sm:$0xff] }
0x1459   :  { %6157 = vadd.xlane.f32.xlu1 %v6156_v16 }
0x145b   :  { %6154 = vadd.xlane.f32.xlu0 %v6153_v54 }
0x1472   :  { %v6036_v36 = vpop.xlane.xlu1 %6035 }
0x1473   :  { %v6080_v56 = vmul.f32 0.03125, %v6036_v36 }
0x1474   :  { %v6033_v19 = vpop.xlane.xlu0 %6032 }
0x1475   :  { %v6176_v3 = vmul.f32 %v6080_v56, %v6080_v56  ;;  %v6079_v61 = vmul.f32 0.03125, %v6033_v19  ;;  %v6208_v5 = vsub.f32 %v12393_v59, %v6080_v56 }
0x1477   :  { %v6175_v29 = vmul.f32 %v6079_v61, %v6079_v61  ;;  %v6207_v34 = vsub.f32 %v12397_v35, %v6079_v61 }
0x1478   :  { %v6116_v31 = vpop.xlane.xlu0 %6115 }
0x1479   :  { %v6160_v40 = vmul.f32 0.03125, %v6116_v31  ;;  %v12558_v31 = vld [vmem:[%s13104_s7 + $0xd] ss:$0 sm:$0xff] }
0x147a   :  { %v6042_v33 = vpop.xlane.xlu1 %6041 }
0x147b   :  { %v6192_v28 = vsub.f32 %v6160_v40, %v6176_v3  ;;  %v6082_v57 = vmul.f32 0.03125, %v6042_v33 }
0x147c   :  { %v6113_v55 = vpop.xlane.xlu0 %6112 }
0x147d   :  { %v6224_v32 = vadd.f32 1e-05, %v6192_v28  ;;  %v6159_v15 = vmul.f32 0.03125, %v6113_v55  ;;  %v6178_v37 = vmul.f32 %v6082_v57, %v6082_v57  ;;  %v6210_v61 = vsub.f32 %v12410_v9, %v6082_v57 }
0x147e   :  { %v6122_v11 = vpop.xlane.xlu1 %6121 }
0x147f   :  { %9542 = vrsqrt.f32 %v6224_v32  ;;  %v6191_v23 = vsub.f32 %v6159_v15, %v6175_v29  ;;  %v6162_v27 = vmul.f32 0.03125, %v6122_v11 }
0x1480   :  { %v6039_v30 = vpop.xlane.xlu0 %6038 }
0x1481   :  { %v6223_v51 = vadd.f32 1e-05, %v6191_v23  ;;  %v6081_v63 = vmul.f32 0.03125, %v6039_v30  ;;  %v6194_v21 = vsub.f32 %v6162_v27, %v6178_v37 }
0x1482   :  { %v6048_v47 = vpop.xlane.xlu1 %6047 }
0x1483   :  { %9544 = vrsqrt.f32 %v6223_v51  ;;  %v6226_v8 = vadd.f32 1e-05, %v6194_v21  ;;  %v6084_v20 = vmul.f32 0.03125, %v6048_v47  ;;  %v6177_v52 = vmul.f32 %v6081_v63, %v6081_v63 }
0x1484   :  { %v6119_v46 = vpop.xlane.xlu0 %6118  ;;  %v6209_v55 = vsub.f32 %v12419_v6, %v6081_v63 }
0x1485   :  { %v6161_v38 = vmul.f32 0.03125, %v6119_v46  ;;  %9546 = vrsqrt.f32 %v6226_v8  ;;  %v6180_v22 = vmul.f32 %v6084_v20, %v6084_v20  ;;  %v6212_v57 = vsub.f32 %v12423_v53, %v6084_v20 }
0x1486   :  { %v6128_v17 = vpop.xlane.xlu1 %6127 }
0x1487   :  { %v6193_v49 = vsub.f32 %v6161_v38, %v6177_v52  ;;  %v6164_v0 = vmul.f32 0.03125, %v6128_v17 }
0x1488   :  { %v6045_v60 = vpop.xlane.xlu0 %6044 }
0x1489   :  { %v6225_v39 = vadd.f32 1e-05, %v6193_v49  ;;  %v6083_v43 = vmul.f32 0.03125, %v6045_v60  ;;  %v6196_v24 = vsub.f32 %v6164_v0, %v6180_v22 }
0x148b   :  { %9548 = vrsqrt.f32 %v6225_v39  ;;  %v6228_v48 = vadd.f32 1e-05, %v6196_v24  ;;  %v6179_v18 = vmul.f32 %v6083_v43, %v6083_v43  ;;  %v6211_v51 = vsub.f32 %v12436_v42, %v6083_v43 }
0x148c   :  { %v9543_v25 = vpop.eup %9542  ;;  %v6125_v1 = vpop.xlane.xlu0 %6124 }
0x148d   :  { %v6163_v7 = vmul.f32 0.03125, %v6125_v1  ;;  %v6256_v50 = vmul.f32 %v9543_v25, %v6208_v5  ;;  %9550 = vrsqrt.f32 %v6228_v48 }
0x148f   :  { %v6195_v12 = vsub.f32 %v6163_v7, %v6179_v18  ;;  %v6276_v19 = vmul.f32 %v12552_v62, %v6256_v50 }
0x1490   :  { %v9545_v16 = vpop.eup %9544 }
0x1491   :  { %v6227_v54 = vadd.f32 1e-05, %v6195_v12  ;;  %v6255_v36 = vmul.f32 %v9545_v16, %v6207_v34  ;;  %v6296_v28 = vadd.f32 %v12558_v31, %v6276_v19 }
0x1492   :  { %v9547_v56 = vpop.eup %9546 }
0x1493   :  { %9552 = vrsqrt.f32 %v6227_v54  ;;  %v6275_v3 = vmul.f32 %v12552_v62, %v6255_v36  ;;  %v6258_v33 = vmul.f32 %v9547_v56, %v6210_v61 }
0x1495   :  { %v6295_v40 = vadd.f32 %v12558_v31, %v6275_v3  ;;  %v6278_v15 = vmul.f32 %v12552_v62, %v6258_v33 }
0x1497   :  { %9024 = vmatprep.mubr.msk.f32.mxu1 %vm271_vm1, %v6295_v40  ;;  %v6298_v27 = vadd.f32 %v12558_v31, %v6278_v15 }
0x1498   :  { %v9549_v29 = vpop.eup %9548  ;;  %9025 = vmatmul.mubr.msk.f32.vlgmr.msra.gmra.mxu1 %vm271_vm1, %v6296_v28 }
0x1499   :  { %v6257_v32 = vmul.f32 %v9549_v29, %v6209_v55 }
0x149a   :  { %v9551_v23 = vpop.eup %9550 }
0x149b   :  { %v6277_v11 = vmul.f32 %v12552_v62, %v6257_v32  ;;  %v6260_v30 = vmul.f32 %v9551_v23, %v6212_v57 }
0x149d   :  { %v6297_v37 = vadd.f32 %v12558_v31, %v6277_v11  ;;  %v6280_v47 = vmul.f32 %v12552_v62, %v6260_v30 }
0x149f   :  { %9027 = vmatprep.mubr.msk.f32.mxu1 %vm271_vm1, %v6297_v37  ;;  %v6300_v20 = vadd.f32 %v12558_v31, %v6280_v47 }
0x14a0   :  { %v9553_v63 = vpop.eup %9552  ;;  %9028 = vmatmul.mubr.msk.f32.gmra.mxu1 %vm271_vm1, %v6298_v27 }
0x14a1   :  { %v6259_v21 = vmul.f32 %v9553_v63, %v6211_v51 }
0x14a3   :  { %v6279_v8 = vmul.f32 %v12552_v62, %v6259_v21 }
0x14a5   :  { %v6299_v46 = vadd.f32 %v12558_v31, %v6279_v8 }
0x14a7   :  { %9030 = vmatprep.mubr.msk.f32.mxu1 %vm271_vm1, %v6299_v46 }
0x14a8   :  { %9031 = vmatmul.mubr.msk.f32.gmra.mxu1 %vm271_vm1, %v6300_v20 }
0x14af   :  { %v6054_v52 = vpop.xlane.xlu1 %6053 }
0x14b0   :  { %v6086_v38 = vmul.f32 0.03125, %v6054_v52 }
0x14b1   :  { %v6051_v49 = vpop.xlane.xlu0 %6050 }
0x14b2   :  { %v6085_v17 = vmul.f32 0.03125, %v6051_v49  ;;  %v6182_v0 = vmul.f32 %v6086_v38, %v6086_v38  ;;  %v6214_v18 = vsub.f32 %v12459_v44, %v6086_v38 }
0x14b3   :  { %v6134_v22 = vpop.xlane.xlu1 %6133 }
0x14b4   :  { %v6166_v60 = vmul.f32 0.03125, %v6134_v22  ;;  %v6181_v43 = vmul.f32 %v6085_v17, %v6085_v17  ;;  %v6213_v12 = vsub.f32 %v12463_v4, %v6085_v17 }
0x14b5   :  { %v6131_v39 = vpop.xlane.xlu0 %6130 }
0x14b6   :  { %v6198_v24 = vsub.f32 %v6166_v60, %v6182_v0  ;;  %v6165_v25 = vmul.f32 0.03125, %v6131_v39 }
0x14b8   :  { %v6230_v5 = vadd.f32 1e-05, %v6198_v24  ;;  %v6197_v48 = vsub.f32 %v6165_v25, %v6181_v43 }
0x14ba   :  { %9554 = vrsqrt.f32 %v6230_v5  ;;  %v6229_v1 = vadd.f32 1e-05, %v6197_v48 }
0x14bc   :  { %9556 = vrsqrt.f32 %v6229_v1 }
0x14c6   :  { %v6060_v7 = vpop.xlane.xlu1 %6059 }
0x14c7   :  { %v9555_v50 = vpop.eup %9554  ;;  %v6088_v34 = vmul.f32 0.03125, %v6060_v7 }
0x14c8   :  { %v6057_v16 = vpop.xlane.xlu0 %6056  ;;  %v6262_v54 = vmul.f32 %v9555_v50, %v6214_v18 }
0x14c9   :  { %v9557_v36 = vpop.eup %9556  ;;  %v6087_v19 = vmul.f32 0.03125, %v6057_v16  ;;  %v6184_v61 = vmul.f32 %v6088_v34, %v6088_v34  ;;  %v6216_v18 = vsub.f32 %v12477_v26, %v6088_v34 }
0x14ca   :  { %v6140_v56 = vpop.xlane.xlu1 %6139  ;;  %v6261_v3 = vmul.f32 %v9557_v36, %v6213_v12  ;;  %v6282_v28 = vmul.f32 %v12552_v62, %v6262_v54 }
0x14cb   :  { %v6168_v40 = vmul.f32 0.03125, %v6140_v56  ;;  %v6183_v29 = vmul.f32 %v6087_v19, %v6087_v19 }
0x14cc   :  { %v6137_v33 = vpop.xlane.xlu0 %6136  ;;  %v6281_v55 = vmul.f32 %v12552_v62, %v6261_v3  ;;  %v6302_v30 = vadd.f32 %v12558_v31, %v6282_v28  ;;  %v6215_v28 = vsub.f32 %v12481_v41, %v6087_v19 }
0x14cd   :  { %v6200_v32 = vsub.f32 %v6168_v40, %v6184_v61  ;;  %v6167_v15 = vmul.f32 0.03125, %v6137_v33 }
0x14ce   :  { %v6066_v23 = vpop.xlane.xlu1 %6065  ;;  %v6301_v11 = vadd.f32 %v12558_v31, %v6281_v55 }
0x14cf   :  { %v6232_v57 = vadd.f32 1e-05, %v6200_v32  ;;  %v6199_v37 = vsub.f32 %v6167_v15, %v6183_v29  ;;  %v12586_v27 = vmul.f32 0.03125, %v6066_v23 }
0x14d0   :  { %v6063_v51 = vpop.xlane.xlu0 %6062  ;;  %9033 = vmatprep.mubr.msk.f32.mxu1 %vm271_vm1, %v6301_v11 }
0x14d1   :  { %9558 = vrsqrt.f32 %v6232_v57  ;;  %v6231_v63 = vadd.f32 1e-05, %v6199_v37  ;;  %9034 = vmatmul.mubr.msk.f32.gmra.mxu1 %vm271_vm1, %v6302_v30  ;;  %v12591_v21 = vmul.f32 0.03125, %v6063_v51  ;;  %v6186_v8 = vmul.f32 %v12586_v27, %v12586_v27 }
0x14d2   :  { %v6146_v47 = vpop.xlane.xlu1 %6145  ;;  %v6218_v30 = vsub.f32 %v12494_v14, %v12586_v27 }
0x14d3   :  { %9560 = vrsqrt.f32 %v6231_v63  ;;  %v6170_v46 = vmul.f32 0.03125, %v6146_v47  ;;  %v6185_v52 = vmul.f32 %v12591_v21, %v12591_v21 }
0x14d4   :  { %v6143_v20 = vpop.xlane.xlu0 %6142 }
0x14d5   :  { %v6202_v38 = vsub.f32 %v6170_v46, %v6186_v8  ;;  %v6169_v49 = vmul.f32 0.03125, %v6143_v20  ;;  %v6217_v8 = vsub.f32 %v12498_v2, %v12591_v21 }
0x14d6   :  { %v6072_v17 = vpop.xlane.xlu1 %6071 }
0x14d7   :  { %v6234_v22 = vadd.f32 1e-05, %v6202_v38  ;;  %v6201_v0 = vsub.f32 %v6169_v49, %v6185_v52  ;;  %v6092_v60 = vmul.f32 0.03125, %v6072_v17 }
0x14d8   :  { %v6069_v39 = vpop.xlane.xlu0 %6068 }
0x14d9   :  { %9562 = vrsqrt.f32 %v6234_v22  ;;  %v6233_v43 = vadd.f32 1e-05, %v6201_v0  ;;  %v6091_v24 = vmul.f32 0.03125, %v6069_v39  ;;  %v6188_v5 = vmul.f32 %v6092_v60, %v6092_v60 }
0x14da   :  { %v6152_v25 = vpop.xlane.xlu1 %6151  ;;  %v6220_v39 = vsub.f32 %v12512_v58, %v6092_v60 }
0x14db   :  { %9564 = vrsqrt.f32 %v6233_v43  ;;  %v6172_v48 = vmul.f32 0.03125, %v6152_v25  ;;  %v6187_v7 = vmul.f32 %v6091_v24, %v6091_v24 }
0x14dc   :  { %v6149_v1 = vpop.xlane.xlu0 %6148 }
0x14dd   :  { %v6204_v50 = vsub.f32 %v6172_v48, %v6188_v5  ;;  %v6171_v12 = vmul.f32 0.03125, %v6149_v1  ;;  %v6219_v48 = vsub.f32 %v12516_v10, %v6091_v24 }
0x14de   :  { %v9559_v16 = vpop.eup %9558  ;;  %v6078_v54 = vpop.xlane.xlu1 %6077 }
0x14df   :  { %v6236_v36 = vadd.f32 1e-05, %v6204_v50  ;;  %v6203_v56 = vsub.f32 %v6171_v12, %v6187_v7  ;;  %v6094_v3 = vmul.f32 0.03125, %v6078_v54  ;;  %v6264_v61 = vmul.f32 %v9559_v16, %v6216_v18 }
0x14e0   :  { %v9561_v40 = vpop.eup %9560  ;;  %v6075_v33 = vpop.xlane.xlu0 %6074 }
0x14e1   :  { %9566 = vrsqrt.f32 %v6236_v36  ;;  %v6235_v55 = vadd.f32 1e-05, %v6203_v56  ;;  %v6093_v29 = vmul.f32 0.03125, %v6075_v33  ;;  %v6263_v15 = vmul.f32 %v9561_v40, %v6215_v28 }
0x14e2   :  { %v6158_v32 = vpop.xlane.xlu1 %6157  ;;  %v6190_v34 = vmul.f32 %v6094_v3, %v6094_v3  ;;  %v6284_v11 = vmul.f32 %v12552_v62, %v6264_v61  ;;  %v6222_v60 = vsub.f32 %v12530_v13, %v6094_v3 }
0x14e3   :  { %9568 = vrsqrt.f32 %v6235_v55  ;;  %v6174_v23 = vmul.f32 0.03125, %v6158_v32  ;;  %v6283_v37 = vmul.f32 %v12552_v62, %v6263_v15  ;;  %v6189_v51 = vmul.f32 %v6093_v29, %v6093_v29  ;;  %v7840_v32 = vld [vmem:[%s13107_s6 + $0x70] sm:$0xff]  ;;  %v7837_v15 = vld [vmem:[%s13107_s6 + $0x58] sm:$0xff] }
0x14e4   :  { %v6155_v57 = vpop.xlane.xlu0 %6154  ;;  %v6304_v38 = vadd.f32 %v12558_v31, %v6284_v11  ;;  %v6221_v24 = vsub.f32 %v12534_v45, %v6093_v29  ;;  %v7841_v29 = vld [vmem:[%s13107_s6 + $0x78] sm:$0xff]  ;;  %v7834_v11 = vld [vmem:[%s13107_s6 + $0x40] sm:$0xff] }
0x14e5   :  { %v6206_v63 = vsub.f32 %v6174_v23, %v6190_v34  ;;  %v6173_v19 = vmul.f32 0.03125, %v6155_v57  ;;  %v6303_v46 = vadd.f32 %v12558_v31, %v6283_v37  ;;  %9048 = vmatprep.subr.mxu0 %v7841_v29  ;;  %v7836_v34 = vld [vmem:[%s13107_s6 + $0x50] sm:$0xff]  ;;  %v7835_v23 = vld [vmem:[%s13107_s6 + $0x48] sm:$0xff] }
0x14e6   :  { %v9563_v47 = vpop.eup %9562  ;;  %9049 = vmatpush3.msra.mxu0 %v7841_v29  ;;  %v12658_v57 = vld [vmem:[%s13104_s7 + $0xe] ss:$0 sm:$0xff] }
0x14e7   :  { %v6238_v20 = vadd.f32 1e-05, %v6206_v63  ;;  %v6205_v52 = vsub.f32 %v6173_v19, %v6189_v51  ;;  %v6266_v49 = vmul.f32 %v9563_v47, %v6218_v30  ;;  %9036 = vmatprep.mubr.msk.f32.mxu1 %vm271_vm1, %v6303_v46  ;;  %9050 = vmatprep.subr.mxu0 %v7840_v32 }
0x14e8   :  { %v9565_v17 = vpop.eup %9564  ;;  %9037 = vmatmul.mubr.msk.f32.gmra.mxu1 %vm271_vm1, %v6304_v38  ;;  %9051 = vmatpush3.msra.mxu0 %v7840_v32 }
0x14e9   :  { %9570 = vrsqrt.f32 %v6238_v20  ;;  %v6237_v22 = vadd.f32 1e-05, %v6205_v52  ;;  %v6265_v27 = vmul.f32 %v9565_v17, %v6217_v8  ;;  %v6286_v0 = vmul.f32 %v12552_v62, %v6266_v49 }
0x14eb   :  { %9572 = vrsqrt.f32 %v6237_v22  ;;  %v6285_v21 = vmul.f32 %v12552_v62, %v6265_v27  ;;  %v6306_v5 = vadd.f32 %v12558_v31, %v6286_v0 }
0x14ed   :  { %v6305_v43 = vadd.f32 %v12558_v31, %v6285_v21 }
0x14ee   :  { %v9567_v25 = vpop.eup %9566 }
0x14ef   :  { %9039 = vmatprep.mubr.msk.f32.mxu1 %vm271_vm1, %v6305_v43  ;;  %v6268_v1 = vmul.f32 %v9567_v25, %v6220_v39 }
0x14f0   :  { %v9569_v18 = vpop.eup %9568  ;;  %9040 = vmatmul.mubr.msk.f32.gmra.mxu1 %vm271_vm1, %v6306_v5 }
0x14f1   :  { %v6267_v7 = vmul.f32 %v9569_v18, %v6219_v48  ;;  %v6288_v50 = vmul.f32 %v12552_v62, %v6268_v1 }
0x14f3   :  { %v6287_v12 = vmul.f32 %v12552_v62, %v6267_v7  ;;  %v6308_v36 = vadd.f32 %v12558_v31, %v6288_v50 }
0x14f5   :  { %v6307_v16 = vadd.f32 %v12558_v31, %v6287_v12 }
0x14f6   :  { %v9571_v54 = vpop.eup %9570 }
0x14f7   :  { %9042 = vmatprep.mubr.msk.f32.mxu1 %vm271_vm1, %v6307_v16  ;;  %v6270_v56 = vmul.f32 %v9571_v54, %v6222_v60 }
0x14f8   :  { %v9573_v61 = vpop.eup %9572  ;;  %9043 = vmatmul.mubr.msk.f32.gmra.mxu1 %vm271_vm1, %v6308_v36 }
0x14f9   :  { %v6269_v40 = vmul.f32 %v9573_v61, %v6221_v24  ;;  %v6290_v28 = vmul.f32 %v12552_v62, %v6270_v56 }
0x14fb   :  { %v6289_v33 = vmul.f32 %v12552_v62, %v6269_v40  ;;  %v6310_v55 = vadd.f32 %v12558_v31, %v6290_v28  ;;  %v7839_v62 = vld [vmem:[%s13107_s6 + $0x68] sm:$0xff] }
0x14fc   :  { %9052 = vmatprep.subr.mxu0 %v7839_v62 }
0x14fd   :  { %v6309_v3 = vadd.f32 %v12558_v31, %v6289_v33  ;;  %9053 = vmatpush3.msra.mxu0 %v7839_v62  ;;  %v7838_v31 = vld [vmem:[%s13107_s6 + $0x60] sm:$0xff] }
0x14fe   :  { %9054 = vmatprep.subr.mxu0 %v7838_v31 }
0x14ff   :  { %9045 = vmatprep.mubr.msk.f32.mxu1 %vm271_vm1, %v6309_v3  ;;  %9055 = vmatpush3.msra.mxu0 %v7838_v31 }
0x1500   :  { %9046 = vmatmul.mubr.msk.f32.gmra.mxu1 %vm271_vm1, %v6310_v55  ;;  %9056 = vmatprep.subr.mxu0 %v7837_v15 }
0x1501   :  { %9057 = vmatpush3.msra.mxu0 %v7837_v15 }
0x1502   :  { %9058 = vmatprep.subr.mxu0 %v7836_v34 }
0x1503   :  { %9059 = vmatpush3.msra.mxu0 %v7836_v34 }
0x1504   :  { %9060 = vmatprep.subr.mxu0 %v7835_v23 }
0x1505   :  { %9061 = vmatpush3.msra.mxu0 %v7835_v23 }
0x1506   :  { %9062 = vmatprep.subr.mxu0 %v7834_v11 }
0x1507   :  { %9063 = vmatpush3.msra.mxu0 %v7834_v11 }
0x1558   :  { %v9026_v37 = vpop.f32.mrf.mxu1 }
0x1559   :  { %v12661_v30 = vadd.f32 %v9026_v37, %v12658_v57 }
0x155a   :  { %v6434_v51 = vpop.f32.mrf.mxu1 }
0x155b   :  { %v12664_v63 = vadd.f32 %v12658_v57, %v6434_v51  ;;  %6643 = vrot.lane.b32.xlu1 %v12661_v30, %s9671_s29  ;;  %v7819_v39 = vmul.f32 -1.442695, %v12661_v30 }
0x155d   :  { %6641 = vrot.lane.b32.xlu0 %v12664_v63, %s9671_s29  ;;  %v7818_v21 = vmul.f32 -1.442695, %v12664_v63 }
0x155f   :  { %9574 = vpow2.f32 %v7818_v21 }
0x1560   :  { %v9029_v19 = vpop.f32.mrf.mxu1  ;;  %9576 = vpow2.f32 %v7819_v39 }
0x1561   :  { %v12676_v46 = vadd.f32 %v9029_v19, %v12658_v57 }
0x1562   :  { %v6444_v47 = vpop.f32.mrf.mxu1 }
0x1563   :  { %v12671_v8 = vadd.f32 %v12658_v57, %v6444_v47  ;;  %v7821_v12 = vmul.f32 -1.442695, %v12676_v46 }
0x1565   :  { %6645 = vrot.lane.b32.xlu1 %v12671_v8, %s9671_s29  ;;  %v7820_v1 = vmul.f32 -1.442695, %v12671_v8 }
0x1567   :  { %9578 = vpow2.f32 %v7820_v1 }
0x1568   :  { %v9032_v20 = vpop.f32.mrf.mxu1  ;;  %9580 = vpow2.f32 %v7821_v12 }
0x1569   :  { %6647 = vrot.lane.b32.xlu1 %v12676_v46, %s9671_s29  ;;  %v12681_v38 = vadd.f32 %v9032_v20, %v12658_v57 }
0x156a   :  { %v6454_v52 = vpop.f32.mrf.mxu1 }
0x156b   :  { %v12684_v49 = vadd.f32 %v12658_v57, %v6454_v52  ;;  %v7823_v16 = vmul.f32 -1.442695, %v12681_v38 }
0x156c   :  { %v9575_v36 = vpop.eup %9574 }
0x156d   :  { %6651 = vrot.lane.b32.xlu1 %v12681_v38, %s9671_s29  ;;  %6649 = vrot.lane.b32.xlu0 %v12684_v49, %s9671_s29  ;;  %v7822_v54 = vmul.f32 -1.442695, %v12684_v49  ;;  %v9577_v56 = vpop.eup %9576  ;;  %9582 = vpow2.f32 %v7823_v16  ;;  %v6561_v28 = vadd.f32 1.0, %v9575_v36 }
0x156e   :  { %v6562_v3 = vadd.f32 1.0, %v9577_v56 }
0x156f   :  { %9584 = vpow2.f32 %v7822_v54 }
0x1570   :  { %9586 = vrcp.f32 %v6561_v28 }
0x1571   :  { %9588 = vrcp.f32 %v6562_v3 }
0x1574   :  { %v9579_v55 = vpop.eup %9578 }
0x1575   :  { %v6563_v31 = vadd.f32 1.0, %v9579_v55  ;;  %v9581_v34 = vpop.eup %9580 }
0x1576   :  { %v6564_v11 = vadd.f32 1.0, %v9581_v34 }
0x1577   :  { %9590 = vrcp.f32 %v6563_v31 }
0x1578   :  { %9592 = vrcp.f32 %v6564_v11 }
0x157a   :  { %v9583_v23 = vpop.eup %9582 }
0x157b   :  { %v6566_v51 = vadd.f32 1.0, %v9583_v23 }
0x157c   :  { %v9585_v37 = vpop.eup %9584 }
0x157d   :  { %v6565_v19 = vadd.f32 1.0, %v9585_v37  ;;  %v9587_v47 = vpop.eup %9586  ;;  %9594 = vrcp.f32 %v6566_v51 }
0x157e   :  { %v9589_v20 = vpop.eup %9588  ;;  %v6609_v52 = vmul.f32 %v9587_v47, %v12664_v63 }
0x157f   :  { %9596 = vrcp.f32 %v6565_v19 }
0x1591   :  { %v9035_v17 = vpop.f32.mrf.mxu1 }
0x1592   :  { %v12691_v22 = vadd.f32 %v9035_v17, %v12658_v57  ;;  %v6610_v17 = vmul.f32 %v9589_v20, %v12661_v30 }
0x1593   :  { %v6464_v27 = vpop.f32.mrf.mxu1 }
0x1594   :  { %v12694_v0 = vadd.f32 %v12658_v57, %v6464_v27  ;;  %6655 = vrot.lane.b32.xlu1 %v12691_v22, %s9671_s29 }
0x1596   :  { %6653 = vrot.lane.b32.xlu0 %v12694_v0, %s9671_s29  ;;  %v7824_v36 = vmul.f32 -1.442695, %v12694_v0 }
0x1598   :  { %9598 = vpow2.f32 %v7824_v36 }
0x15a8   :  { %v9038_v43 = vpop.f32.mrf.mxu1 }
0x15a9   :  { %v12703_v25 = vadd.f32 %v9038_v43, %v12658_v57  ;;  %v9591_v43 = vpop.eup %9590 }
0x15aa   :  { %v6474_v5 = vpop.f32.mrf.mxu1  ;;  %v9593_v1 = vpop.eup %9592 }
0x15ab   :  { %v12706_v48 = vadd.f32 %v12658_v57, %v6474_v5  ;;  %6659 = vrot.lane.b32.xlu1 %v12703_v25, %s9671_s29  ;;  %v6611_v5 = vmul.f32 %v9591_v43, %v12671_v8  ;;  %v9595_v12 = vpop.eup %9594  ;;  %v6612_v63 = vmul.f32 %v9593_v1, %v12676_v46  ;;  %v7825_v8 = vmul.f32 -1.442695, %v12691_v22 }
0x15ac   :  { %v9597_v16 = vpop.eup %9596 }
0x15ad   :  { %6657 = vrot.lane.b32.xlu0 %v12706_v48, %s9671_s29  ;;  %v6613_v56 = vmul.f32 %v9597_v16, %v12684_v49  ;;  %9600 = vpow2.f32 %v7825_v8  ;;  %v9599_v46 = vpop.eup %9598  ;;  %v7827_v49 = vmul.f32 -1.442695, %v12703_v25 }
0x15b0   :  { %v9041_v18 = vpop.f32.mrf.mxu1 }
0x15b1   :  { %v12714_v7 = vadd.f32 %v9041_v18, %v12658_v57 }
0x15b2   :  { %v6484_v50 = vpop.f32.mrf.mxu1 }
0x15b3   :  { %v12718_v60 = vadd.f32 %v12658_v57, %v6484_v50  ;;  %6663 = vrot.lane.b32.xlu1 %v12714_v7, %s9671_s29  ;;  %v7829_v23 = vmul.f32 -1.442695, %v12714_v7 }
0x15b5   :  { %6661 = vrot.lane.b32.xlu0 %v12718_v60, %s9671_s29  ;;  %v7828_v34 = vmul.f32 -1.442695, %v12718_v60 }
0x15b8   :  { %v9044_v24 = vpop.f32.mrf.mxu1 }
0x15b9   :  { %v12727_v61 = vadd.f32 %v9044_v24, %v12658_v57  ;;  %v6614_v24 = vmul.f32 %v9595_v12, %v12681_v38  ;;  %v7826_v38 = vmul.f32 -1.442695, %v12706_v48 }
0x15ba   :  { %v6494_v40 = vpop.f32.mrf.mxu1 }
0x15bb   :  { %v12730_v33 = vadd.f32 %v12658_v57, %v6494_v40  ;;  %6667 = vrot.lane.b32.xlu1 %v12727_v61, %s9671_s29  ;;  %v7831_v19 = vmul.f32 -1.442695, %v12727_v61 }
0x15bd   :  { %6665 = vrot.lane.b32.xlu0 %v12730_v33, %s9671_s29  ;;  %v7830_v51 = vmul.f32 -1.442695, %v12730_v33 }
0x15c0   :  { %v9047_v29 = vpop.f32.mrf.mxu1 }
0x15c1   :  { %v12737_v32 = vadd.f32 %v9047_v29, %v12658_v57  ;;  %v9601_v29 = vpop.eup %9600 }
0x15c2   :  { %v6504_v62 = vpop.f32.mrf.mxu1  ;;  %v6568_v31 = vadd.f32 1.0, %v9601_v29 }
0x15c3   :  { %v12740_v15 = vadd.f32 %v12658_v57, %v6504_v62  ;;  %6671 = vrot.lane.b32.xlu1 %v12737_v32, %s9671_s29  ;;  %v6567_v62 = vadd.f32 1.0, %v9599_v46 }
0x15c5   :  { %6669 = vrot.lane.b32.xlu0 %v12740_v15, %s9671_s29  ;;  %9602 = vrcp.f32 %v6567_v62  ;;  %v7832_v1 = vmul.f32 -1.442695, %v12740_v15 }
0x15c6   :  { %9604 = vrcp.f32 %v6568_v31 }
0x15c7   :  { %9606 = vpow2.f32 %v7826_v38 }
0x15c8   :  { %9608 = vpow2.f32 %v7827_v49 }
0x15c9   :  { %9610 = vpow2.f32 %v7828_v34 }
0x15ca   :  { %9612 = vpow2.f32 %v7829_v23 }
0x15cb   :  { %9614 = vpow2.f32 %v7830_v51 }
0x15cc   :  { %9616 = vpow2.f32 %v7831_v19 }
0x15cd   :  { %v6644_v57 = vpop.permute.xlu1 %6643 }
0x15ce   :  { %v6690_v39 = vmul.f32 %v6644_v57, %v6610_v17 }
0x15cf   :  { %v6642_v27 = vpop.permute.xlu0 %6641 }
0x15d0   :  { %v6689_v21 = vmul.f32 %v6642_v27, %v6609_v52 }
0x15d2   :  { %9064 = vmatprep.mubr.msk.f32.mxu0 %vm1076_vm2, %v6689_v21  ;;  %v9603_v11 = vpop.eup %9602 }
0x15d3   :  { %9065 = vmatmul.mubr.msk.f32.vlgmr.msra.gmra.mxu0 %vm1076_vm2, %v6690_v39  ;;  %v9605_v37 = vpop.eup %9604  ;;  %v6615_v20 = vmul.f32 %v9603_v11, %v12694_v0  ;;  %v7833_v0 = vmul.f32 -1.442695, %v12737_v32 }
0x15d4   :  { %v9607_v57 = vpop.eup %9606  ;;  %v6616_v52 = vmul.f32 %v9605_v37, %v12691_v22 }
0x15d5   :  { %v9609_v27 = vpop.eup %9608  ;;  %v6569_v43 = vadd.f32 1.0, %v9607_v57 }
0x15d7   :  { %v6646_v18 = vpop.permute.xlu1 %6645  ;;  %9618 = vrcp.f32 %v6569_v43 }
0x15d8   :  { %v6691_v50 = vmul.f32 %v6646_v18, %v6611_v5  ;;  %v6570_v5 = vadd.f32 1.0, %v9609_v27  ;;  %v9611_v18 = vpop.eup %9610 }
0x15d9   :  { %v6571_v22 = vadd.f32 1.0, %v9611_v18 }
0x15da   :  { %9067 = vmatprep.mubr.msk.f32.mxu0 %vm1076_vm2, %v6691_v50  ;;  %v9613_v50 = vpop.eup %9612  ;;  %9620 = vrcp.f32 %v6570_v5 }
0x15db   :  { %v6648_v30 = vpop.permute.xlu1 %6647  ;;  %9622 = vpow2.f32 %v7832_v1  ;;  %v6572_v12 = vadd.f32 1.0, %v9613_v50 }
0x15dc   :  { %v6692_v54 = vmul.f32 %v6648_v30, %v6612_v63  ;;  %9624 = vpow2.f32 %v7833_v0  ;;  %v9615_v63 = vpop.eup %9614 }
0x15dd   :  { %9626 = vrcp.f32 %v6571_v22  ;;  %v9617_v16 = vpop.eup %9616  ;;  %v6573_v30 = vadd.f32 1.0, %v9615_v63 }
0x15de   :  { %9068 = vmatmul.mubr.msk.f32.gmra.mxu0 %vm1076_vm2, %v6692_v54  ;;  %9628 = vrcp.f32 %v6572_v12  ;;  %v6574_v54 = vadd.f32 1.0, %v9617_v16 }
0x15df   :  { %v6652_v40 = vpop.permute.xlu1 %6651  ;;  %v6650_v28 = vpop.permute.xlu0 %6649  ;;  %9630 = vrcp.f32 %v6573_v30 }
0x15e0   :  { %v6694_v3 = vmul.f32 %v6652_v40, %v6614_v24  ;;  %v6693_v55 = vmul.f32 %v6650_v28, %v6613_v56  ;;  %9632 = vrcp.f32 %v6574_v54 }
0x15e2   :  { %9070 = vmatprep.mubr.msk.f32.mxu0 %vm1076_vm2, %v6693_v55 }
0x15e3   :  { %9071 = vmatmul.mubr.msk.f32.gmra.mxu0 %vm1076_vm2, %v6694_v3 }
0x15e4   :  { %v9619_v36 = vpop.eup %9618 }
0x15e5   :  { %v6617_v40 = vmul.f32 %v9619_v36, %v12706_v48 }
0x15e7   :  { %v9621_v24 = vpop.eup %9620 }
0x15e8   :  { %v9623_v56 = vpop.eup %9622  ;;  %v6618_v3 = vmul.f32 %v9621_v24, %v12703_v25 }
0x15e9   :  { %v9625_v28 = vpop.eup %9624  ;;  %v6575_v29 = vadd.f32 1.0, %v9623_v56 }
0x15ea   :  { %v9627_v31 = vpop.eup %9626  ;;  %v6576_v38 = vadd.f32 1.0, %v9625_v28 }
0x15eb   :  { %v9629_v49 = vpop.eup %9628  ;;  %9634 = vrcp.f32 %v6575_v29  ;;  %v6619_v23 = vmul.f32 %v9627_v31, %v12718_v60 }
0x15ec   :  { %9636 = vrcp.f32 %v6576_v38  ;;  %v6620_v48 = vmul.f32 %v9629_v49, %v12714_v7  ;;  %v9631_v51 = vpop.eup %9630 }
0x15ed   :  { %v9633_v19 = vpop.eup %9632 }
0x15ee   :  { %v6622_v57 = vmul.f32 %v9633_v19, %v12727_v61  ;;  %v12791_v61 = vld [vmem:[%s13104_s7 + $0xf] ss:$0 sm:$0xff] }
0x15ef   :  { %v7227_v19 = vld [vmem:[%s13108_s9 + $0x8] sm:$0xff] }
0x15f8   :  { %v9635_v7 = vpop.eup %9634 }
0x15f9   :  { %v9637_v27 = vpop.eup %9636 }
0x15fa   :  { %v6624_v43 = vmul.f32 %v9637_v27, %v12737_v32 }
0x1606   :  { %v6656_v47 = vpop.permute.xlu1 %6655 }
0x1607   :  { %v6696_v39 = vmul.f32 %v6656_v47, %v6616_v52 }
0x1608   :  { %v6654_v17 = vpop.permute.xlu0 %6653 }
0x1609   :  { %v6695_v21 = vmul.f32 %v6654_v17, %v6615_v20  ;;  %v6621_v20 = vmul.f32 %v9631_v51, %v12730_v33  ;;  %v7228_v51 = vld [vmem:[%s13108_s9 + $0x10] sm:$0xff] }
0x160b   :  { %9073 = vmatprep.mubr.msk.f32.mxu0 %vm1076_vm2, %v6695_v21 }
0x160c   :  { %9074 = vmatmul.mubr.msk.f32.gmra.mxu0 %vm1076_vm2, %v6696_v39  ;;  %v6623_v39 = vmul.f32 %v9635_v7, %v12740_v15 }
0x161d   :  { %v6660_v8 = vpop.permute.xlu1 %6659 }
0x161e   :  { %v6698_v62 = vmul.f32 %v6660_v8, %v6618_v3 }
0x161f   :  { %v6658_v55 = vpop.permute.xlu0 %6657 }
0x1620   :  { %v6697_v46 = vmul.f32 %v6658_v55, %v6617_v40 }
0x1622   :  { %9076 = vmatprep.mubr.msk.f32.mxu0 %vm1076_vm2, %v6697_v46 }
0x1623   :  { %9077 = vmatmul.mubr.msk.f32.gmra.mxu0 %vm1076_vm2, %v6698_v62 }
0x1625   :  { %v6664_v34 = vpop.permute.xlu1 %6663 }
0x1626   :  { %v6700_v37 = vmul.f32 %v6664_v34, %v6620_v48 }
0x1627   :  { %v6662_v11 = vpop.permute.xlu0 %6661 }
0x1628   :  { %v6699_v25 = vmul.f32 %v6662_v11, %v6619_v23 }
0x162a   :  { %9079 = vmatprep.mubr.msk.f32.mxu0 %vm1076_vm2, %v6699_v25 }
0x162b   :  { %9080 = vmatmul.mubr.msk.f32.gmra.mxu0 %vm1076_vm2, %v6700_v37  ;;  %v7229_v37 = vld [vmem:[%s13108_s9 + $0x18] sm:$0xff] }
0x162c   :  { %9088 = vmatprep.subr.mxu1 %v7229_v37 }
0x162d   :  { %v6668_v47 = vpop.permute.xlu1 %6667  ;;  %9089 = vmatpush3.msra.mxu1 %v7229_v37 }
0x162e   :  { %v6702_v60 = vmul.f32 %v6668_v47, %v6622_v57  ;;  %9090 = vmatprep.subr.mxu1 %v7228_v51  ;;  %v7226_v47 = vld [vmem:[%s13108_s9] sm:$0xff] }
0x162f   :  { %v6666_v52 = vpop.permute.xlu0 %6665  ;;  %9091 = vmatpush3.msra.mxu1 %v7228_v51 }
0x1630   :  { %v6701_v17 = vmul.f32 %v6666_v52, %v6621_v20  ;;  %9092 = vmatprep.subr.mxu1 %v7227_v19 }
0x1631   :  { %9093 = vmatpush3.msra.mxu1 %v7227_v19 }
0x1632   :  { %9082 = vmatprep.mubr.msk.f32.mxu0 %vm1076_vm2, %v6701_v17  ;;  %9094 = vmatprep.subr.mxu1 %v7226_v47 }
0x1633   :  { %9083 = vmatmul.mubr.msk.f32.gmra.mxu0 %vm1076_vm2, %v6702_v60  ;;  %9095 = vmatpush3.msra.mxu1 %v7226_v47 }
0x1635   :  { %v6672_v21 = vpop.permute.xlu1 %6671 }
0x1636   :  { %v6704_v18 = vmul.f32 %v6672_v21, %v6624_v43 }
0x1637   :  { %v6670_v5 = vpop.permute.xlu0 %6669 }
0x1638   :  { %v6703_v1 = vmul.f32 %v6670_v5, %v6623_v39 }
0x163a   :  { %9085 = vmatprep.mubr.msk.f32.mxu0 %vm1076_vm2, %v6703_v1 }
0x163b   :  { %9086 = vmatmul.mubr.msk.f32.gmra.mxu0 %vm1076_vm2, %v6704_v18 }
0x1693   :  { %v9066_v33 = vpop.f32.mrf.mxu0 }
0x1694   :  { %v6908_v0 = vadd.f32 %v9066_v33, %v12393_v59 }
0x1695   :  { %v6828_v50 = vpop.f32.mrf.mxu0 }
0x1696   :  { %v12795_v15 = vadd.f32 %v12791_v61, %v6908_v0  ;;  %v6907_v32 = vadd.f32 %v6828_v50, %v12397_v35 }
0x1698   :  { %v12799_v22 = vadd.f32 %v12791_v61, %v6907_v32  ;;  %v6949_v12 = vsel %vm271_vm1, %v12795_v15, 0.0  ;;  %v7011_v16 = vmul.f32 %v12795_v15, %v12795_v15 }
0x1699   :  { %6950 = vadd.xlane.f32.xlu1 %v6949_v12 }
0x169a   :  { %v6946_v63 = vsel %vm271_vm1, %v12799_v22, 0.0  ;;  %v7029_v30 = vsel %vm271_vm1, %v7011_v16, 0.0  ;;  %v7010_v35 = vmul.f32 %v12799_v22, %v12799_v22 }
0x169b   :  { %6947 = vadd.xlane.f32.xlu0 %v6946_v63 }
0x169c   :  { %v7026_v8 = vsel %vm271_vm1, %v7010_v35, 0.0 }
0x169e   :  { %v9069_v59 = vpop.f32.mrf.mxu0 }
0x169f   :  { %v6910_v54 = vadd.f32 %v9069_v59, %v12410_v9  ;;  %7030 = vadd.xlane.f32.xlu0 %v7029_v30 }
0x16a0   :  { %v6838_v36 = vpop.f32.mrf.mxu0 }
0x16a1   :  { %v12812_v24 = vadd.f32 %v12791_v61, %v6910_v54  ;;  %v6909_v56 = vadd.f32 %v6838_v36, %v12419_v6 }
0x16a3   :  { %v12817_v40 = vadd.f32 %v12791_v61, %v6909_v56  ;;  %7027 = vadd.xlane.f32.xlu0 %v7026_v8  ;;  %v9072_v28 = vpop.f32.mrf.mxu0  ;;  %v6955_v3 = vsel %vm271_vm1, %v12812_v24, 0.0  ;;  %v7013_v9 = vmul.f32 %v12812_v24, %v12812_v24 }
0x16a4   :  { %v6912_v55 = vadd.f32 %v9072_v28, %v12423_v53  ;;  %6956 = vadd.xlane.f32.xlu1 %v6955_v3 }
0x16a5   :  { %v6848_v46 = vpop.f32.mrf.mxu0  ;;  %v6952_v6 = vsel %vm271_vm1, %v12817_v40, 0.0  ;;  %v7012_v62 = vmul.f32 %v12817_v40, %v12817_v40  ;;  %v7035_v38 = vsel %vm271_vm1, %v7013_v9, 0.0 }
0x16a6   :  { %v6911_v29 = vadd.f32 %v6848_v46, %v12436_v42  ;;  %v12830_v31 = vadd.f32 %v12791_v61, %v6912_v55 }
0x16a7   :  { %6953 = vadd.xlane.f32.xlu0 %v6952_v6  ;;  %v7032_v53 = vsel %vm271_vm1, %v7012_v62, 0.0 }
0x16a8   :  { %7036 = vadd.xlane.f32.xlu1 %v7035_v38  ;;  %v12834_v49 = vadd.f32 %v12791_v61, %v6911_v29  ;;  %v6961_v34 = vsel %vm271_vm1, %v12830_v31, 0.0  ;;  %v7015_v42 = vmul.f32 %v12830_v31, %v12830_v31 }
0x16aa   :  { %v6958_v23 = vsel %vm271_vm1, %v12834_v49, 0.0  ;;  %v7014_v48 = vmul.f32 %v12834_v49, %v12834_v49  ;;  %v7041_v11 = vsel %vm271_vm1, %v7015_v42, 0.0 }
0x16ab   :  { %7033 = vadd.xlane.f32.xlu0 %v7032_v53 }
0x16ac   :  { %6962 = vadd.xlane.f32.xlu1 %v6961_v34  ;;  %v7038_v25 = vsel %vm271_vm1, %v7014_v48, 0.0 }
0x16af   :  { %6959 = vadd.xlane.f32.xlu0 %v6958_v23 }
0x16b0   :  { %7042 = vadd.xlane.f32.xlu1 %v7041_v11 }
0x16b3   :  { %7039 = vadd.xlane.f32.xlu0 %v7038_v25 }
0x16cc   :  { %v9075_v20 = vpop.f32.mrf.mxu0 }
0x16cd   :  { %v6914_v57 = vadd.f32 %v9075_v20, %v12459_v44 }
0x16ce   :  { %v6858_v52 = vpop.f32.mrf.mxu0 }
0x16cf   :  { %v12861_v17 = vadd.f32 %v12791_v61, %v6914_v57  ;;  %v6913_v60 = vadd.f32 %v6858_v52, %v12463_v4 }
0x16d1   :  { %v12865_v7 = vadd.f32 %v12791_v61, %v6913_v60  ;;  %v6967_v27 = vsel %vm271_vm1, %v12861_v17, 0.0  ;;  %v7017_v21 = vmul.f32 %v12861_v17, %v12861_v17 }
0x16d2   :  { %6968 = vadd.xlane.f32.xlu1 %v6967_v27 }
0x16d3   :  { %v6964_v39 = vsel %vm271_vm1, %v12865_v7, 0.0  ;;  %v7016_v44 = vmul.f32 %v12865_v7, %v12865_v7  ;;  %v7047_v43 = vsel %vm271_vm1, %v7017_v21, 0.0 }
0x16d4   :  { %6965 = vadd.xlane.f32.xlu0 %v6964_v39 }
0x16d5   :  { %v7044_v4 = vsel %vm271_vm1, %v7016_v44, 0.0 }
0x16d6   :  { %7048 = vadd.xlane.f32.xlu1 %v7047_v43 }
0x16d8   :  { %7045 = vadd.xlane.f32.xlu0 %v7044_v4 }
0x16e3   :  { %v9078_v5 = vpop.f32.mrf.mxu0 }
0x16e4   :  { %v6916_v1 = vadd.f32 %v9078_v5, %v12477_v26 }
0x16e5   :  { %v6868_v18 = vpop.f32.mrf.mxu0 }
0x16e6   :  { %v12879_v33 = vadd.f32 %v12791_v61, %v6916_v1  ;;  %v6915_v0 = vadd.f32 %v6868_v18, %v12481_v41 }
0x16e8   :  { %v12883_v50 = vadd.f32 %v12791_v61, %v6915_v0  ;;  %v6973_v32 = vsel %vm271_vm1, %v12879_v33, 0.0  ;;  %v7019_v12 = vmul.f32 %v12879_v33, %v12879_v33 }
0x16e9   :  { %6974 = vadd.xlane.f32.xlu1 %v6973_v32 }
0x16ea   :  { %v6970_v63 = vsel %vm271_vm1, %v12883_v50, 0.0  ;;  %v7018_v16 = vmul.f32 %v12883_v50, %v12883_v50  ;;  %v7053_v59 = vsel %vm271_vm1, %v7019_v12, 0.0 }
0x16eb   :  { %v9081_v26 = vpop.f32.mrf.mxu0  ;;  %6971 = vadd.xlane.f32.xlu0 %v6970_v63 }
0x16ec   :  { %v6918_v41 = vadd.f32 %v9081_v26, %v12494_v14  ;;  %v7050_v36 = vsel %vm271_vm1, %v7018_v16, 0.0 }
0x16ed   :  { %v6878_v30 = vpop.f32.mrf.mxu0  ;;  %7054 = vadd.xlane.f32.xlu1 %v7053_v59 }
0x16ee   :  { %v12896_v35 = vadd.f32 %v12791_v61, %v6918_v41  ;;  %v6917_v54 = vadd.f32 %v6878_v30, %v12498_v2 }
0x16ef   :  { %7051 = vadd.xlane.f32.xlu0 %v7050_v36 }
0x16f0   :  { %v12901_v56 = vadd.f32 %v12791_v61, %v6917_v54  ;;  %v6979_v8 = vsel %vm271_vm1, %v12896_v35, 0.0  ;;  %v7021_v14 = vmul.f32 %v12896_v35, %v12896_v35 }
0x16f1   :  { %6980 = vadd.xlane.f32.xlu1 %v6979_v8 }
0x16f2   :  { %v6976_v28 = vsel %vm271_vm1, %v12901_v56, 0.0  ;;  %v7020_v2 = vmul.f32 %v12901_v56, %v12901_v56  ;;  %v7059_v55 = vsel %vm271_vm1, %v7021_v14, 0.0 }
0x16f3   :  { %v9084_v3 = vpop.f32.mrf.mxu0  ;;  %6977 = vadd.xlane.f32.xlu0 %v6976_v28 }
0x16f4   :  { %v6920_v9 = vadd.f32 %v9084_v3, %v12512_v58  ;;  %v7056_v62 = vsel %vm271_vm1, %v7020_v2, 0.0 }
0x16f5   :  { %v6888_v46 = vpop.f32.mrf.mxu0  ;;  %7060 = vadd.xlane.f32.xlu1 %v7059_v55 }
0x16f6   :  { %v12914_v6 = vadd.f32 %v12791_v61, %v6920_v9  ;;  %v6919_v29 = vadd.f32 %v6888_v46, %v12516_v10 }
0x16f7   :  { %7057 = vadd.xlane.f32.xlu0 %v7056_v62 }
0x16f8   :  { %v12919_v38 = vadd.f32 %v12791_v61, %v6919_v29  ;;  %v6985_v53 = vsel %vm271_vm1, %v12914_v6, 0.0  ;;  %v7023_v58 = vmul.f32 %v12914_v6, %v12914_v6 }
0x16f9   :  { %6986 = vadd.xlane.f32.xlu1 %v6985_v53 }
0x16fa   :  { %v6982_v34 = vsel %vm271_vm1, %v12919_v38, 0.0  ;;  %v7022_v10 = vmul.f32 %v12919_v38, %v12919_v38  ;;  %v7065_v48 = vsel %vm271_vm1, %v7023_v58, 0.0 }
0x16fb   :  { %v9087_v42 = vpop.f32.mrf.mxu0  ;;  %6983 = vadd.xlane.f32.xlu0 %v6982_v34 }
0x16fc   :  { %v6922_v23 = vadd.f32 %v9087_v42, %v12530_v13  ;;  %v7062_v51 = vsel %vm271_vm1, %v7022_v10, 0.0 }
0x16fd   :  { %v6898_v11 = vpop.f32.mrf.mxu0  ;;  %7066 = vadd.xlane.f32.xlu1 %v7065_v48 }
0x16fe   :  { %v12932_v25 = vadd.f32 %v12791_v61, %v6922_v23  ;;  %v6921_v37 = vadd.f32 %v6898_v11, %v12534_v45 }
0x16ff   :  { %7063 = vadd.xlane.f32.xlu0 %v7062_v51 }
0x1700   :  { %v12937_v19 = vadd.f32 %v12791_v61, %v6921_v37  ;;  %v6991_v47 = vsel %vm271_vm1, %v12932_v25, 0.0  ;;  %v7025_v13 = vmul.f32 %v12932_v25, %v12932_v25 }
0x1701   :  { %6992 = vadd.xlane.f32.xlu1 %v6991_v47 }
0x1702   :  { %v6988_v20 = vsel %vm271_vm1, %v12937_v19, 0.0  ;;  %v7024_v57 = vmul.f32 %v12937_v19, %v12937_v19  ;;  %v7071_v45 = vsel %vm271_vm1, %v7025_v13, 0.0 }
0x1703   :  { %6989 = vadd.xlane.f32.xlu0 %v6988_v20  ;;  %v12954_v20 = vld [vmem:[%s13109_s8] ss:$0 sm:$0xff] }
0x1704   :  { %v7068_v61 = vsel %vm271_vm1, %v7024_v57, 0.0 }
0x1705   :  { %7072 = vadd.xlane.f32.xlu1 %v7071_v45 }
0x1707   :  { %7069 = vadd.xlane.f32.xlu0 %v7068_v61 }
0x1722   :  { %v6951_v52 = vpop.xlane.xlu1 %6950 }
0x1723   :  { %v6995_v27 = vmul.f32 0.03125, %v6951_v52 }
0x1724   :  { %v6948_v60 = vpop.xlane.xlu0 %6947 }
0x1725   :  { %v7091_v39 = vmul.f32 %v6995_v27, %v6995_v27  ;;  %v6994_v44 = vmul.f32 0.03125, %v6948_v60  ;;  %v7123_v10 = vsub.f32 %v12795_v15, %v6995_v27  ;;  %v12960_v60 = vld [vmem:[%s13109_s8 + $0x1] ss:$0 sm:$0xff] }
0x1727   :  { %v7090_v1 = vmul.f32 %v6994_v44, %v6994_v44  ;;  %v7122_v13 = vsub.f32 %v12799_v22, %v6994_v44 }
0x1728   :  { %v7031_v21 = vpop.xlane.xlu0 %7030 }
0x1729   :  { %v7075_v43 = vmul.f32 0.03125, %v7031_v21 }
0x172b   :  { %v7107_v4 = vsub.f32 %v7075_v43, %v7091_v39 }
0x172c   :  { %v7028_v5 = vpop.xlane.xlu0 %7027 }
0x172d   :  { %v7139_v18 = vadd.f32 1e-05, %v7107_v4  ;;  %v7074_v0 = vmul.f32 0.03125, %v7028_v5  ;;  %v6957_v32 = vpop.xlane.xlu1 %6956 }
0x172e   :  { %v6997_v12 = vmul.f32 0.03125, %v6957_v32 }
0x172f   :  { %9638 = vrsqrt.f32 %v7139_v18  ;;  %v7106_v63 = vsub.f32 %v7074_v0, %v7090_v1 }
0x1730   :  { %v6954_v26 = vpop.xlane.xlu0 %6953  ;;  %v7093_v30 = vmul.f32 %v6997_v12, %v6997_v12  ;;  %v7125_v27 = vsub.f32 %v12812_v24, %v6997_v12 }
0x1731   :  { %v7138_v16 = vadd.f32 1e-05, %v7106_v63  ;;  %v6996_v41 = vmul.f32 0.03125, %v6954_v26  ;;  %v7037_v59 = vpop.xlane.xlu1 %7036 }
0x1732   :  { %v7077_v54 = vmul.f32 0.03125, %v7037_v59 }
0x1733   :  { %9640 = vrsqrt.f32 %v7138_v16  ;;  %v7092_v14 = vmul.f32 %v6996_v41, %v6996_v41  ;;  %v7124_v4 = vsub.f32 %v12817_v40, %v6996_v41 }
0x1734   :  { %v7109_v36 = vsub.f32 %v7077_v54, %v7093_v30  ;;  %v7034_v8 = vpop.xlane.xlu0 %7033 }
0x1735   :  { %v7076_v28 = vmul.f32 0.03125, %v7034_v8  ;;  %v6963_v3 = vpop.xlane.xlu1 %6962 }
0x1736   :  { %v7141_v2 = vadd.f32 1e-05, %v7109_v36  ;;  %v6999_v9 = vmul.f32 0.03125, %v6963_v3 }
0x1737   :  { %v7108_v55 = vsub.f32 %v7076_v28, %v7092_v14 }
0x1738   :  { %9642 = vrsqrt.f32 %v7141_v2  ;;  %v6960_v46 = vpop.xlane.xlu0 %6959  ;;  %v7095_v58 = vmul.f32 %v6999_v9, %v6999_v9  ;;  %v7127_v24 = vsub.f32 %v12830_v31, %v6999_v9 }
0x1739   :  { %v7140_v29 = vadd.f32 1e-05, %v7108_v55  ;;  %v6998_v62 = vmul.f32 0.03125, %v6960_v46  ;;  %v7043_v53 = vpop.xlane.xlu1 %7042 }
0x173a   :  { %v7079_v34 = vmul.f32 0.03125, %v7043_v53 }
0x173b   :  { %9644 = vrsqrt.f32 %v7140_v29  ;;  %v7094_v11 = vmul.f32 %v6998_v62, %v6998_v62  ;;  %v7126_v40 = vsub.f32 %v12834_v49, %v6998_v62 }
0x173c   :  { %v9639_v42 = vpop.eup %9638  ;;  %v7111_v23 = vsub.f32 %v7079_v34, %v7095_v58  ;;  %v7040_v48 = vpop.xlane.xlu0 %7039 }
0x173d   :  { %v7078_v37 = vmul.f32 0.03125, %v7040_v48  ;;  %v7171_v51 = vmul.f32 %v9639_v42, %v7123_v10 }
0x173e   :  { %v7143_v47 = vadd.f32 1e-05, %v7111_v23 }
0x173f   :  { %v7110_v57 = vsub.f32 %v7078_v37, %v7094_v11  ;;  %v7191_v15 = vmul.f32 %v12954_v20, %v7171_v51 }
0x1740   :  { %v9641_v45 = vpop.eup %9640  ;;  %9646 = vrsqrt.f32 %v7143_v47 }
0x1741   :  { %v7142_v61 = vadd.f32 1e-05, %v7110_v57  ;;  %v7170_v52 = vmul.f32 %v9641_v45, %v7122_v13  ;;  %v7211_v44 = vadd.f32 %v12960_v60, %v7191_v15 }
0x1743   :  { %9648 = vrsqrt.f32 %v7142_v61  ;;  %v7190_v22 = vmul.f32 %v12954_v20, %v7170_v52 }
0x1745   :  { %v9643_v21 = vpop.eup %9642  ;;  %v7210_v39 = vadd.f32 %v12960_v60, %v7190_v22 }
0x1746   :  { %v7173_v43 = vmul.f32 %v9643_v21, %v7125_v27 }
0x1747   :  { %9096 = vmatprep.mubr.msk.f32.mxu1 %vm271_vm1, %v7210_v39 }
0x1748   :  { %v9645_v5 = vpop.eup %9644  ;;  %9097 = vmatmul.mubr.msk.f32.vlgmr.msra.gmra.mxu1 %vm271_vm1, %v7211_v44  ;;  %v7193_v18 = vmul.f32 %v12954_v20, %v7173_v43 }
0x1749   :  { %v7172_v1 = vmul.f32 %v9645_v5, %v7124_v4 }
0x174a   :  { %v7213_v63 = vadd.f32 %v12960_v60, %v7193_v18 }
0x174b   :  { %v7192_v0 = vmul.f32 %v12954_v20, %v7172_v1 }
0x174d   :  { %v9647_v32 = vpop.eup %9646  ;;  %v7212_v12 = vadd.f32 %v12960_v60, %v7192_v0 }
0x174e   :  { %v7175_v26 = vmul.f32 %v9647_v32, %v7127_v24 }
0x174f   :  { %9099 = vmatprep.mubr.msk.f32.mxu1 %vm271_vm1, %v7212_v12 }
0x1750   :  { %v9649_v16 = vpop.eup %9648  ;;  %9100 = vmatmul.mubr.msk.f32.gmra.mxu1 %vm271_vm1, %v7213_v63  ;;  %v7195_v59 = vmul.f32 %v12954_v20, %v7175_v26 }
0x1751   :  { %v7174_v41 = vmul.f32 %v9649_v16, %v7126_v40 }
0x1752   :  { %v7215_v54 = vadd.f32 %v12960_v60, %v7195_v59 }
0x1753   :  { %v7194_v30 = vmul.f32 %v12954_v20, %v7174_v41 }
0x1755   :  { %v7214_v31 = vadd.f32 %v12960_v60, %v7194_v30 }
0x1757   :  { %9102 = vmatprep.mubr.msk.f32.mxu1 %vm271_vm1, %v7214_v31 }
0x1758   :  { %9103 = vmatmul.mubr.msk.f32.gmra.mxu1 %vm271_vm1, %v7215_v54 }
0x175b   :  { %v6969_v36 = vpop.xlane.xlu1 %6968 }
0x175c   :  { %v7001_v49 = vmul.f32 0.03125, %v6969_v36 }
0x175d   :  { %v6966_v8 = vpop.xlane.xlu0 %6965 }
0x175e   :  { %v7000_v14 = vmul.f32 0.03125, %v6966_v8  ;;  %v7097_v3 = vmul.f32 %v7001_v49, %v7001_v49  ;;  %v7129_v34 = vsub.f32 %v12861_v17, %v7001_v49 }
0x175f   :  { %v7049_v28 = vpop.xlane.xlu1 %7048 }
0x1760   :  { %v7081_v2 = vmul.f32 0.03125, %v7049_v28  ;;  %v7096_v55 = vmul.f32 %v7000_v14, %v7000_v14  ;;  %v7128_v23 = vsub.f32 %v12865_v7, %v7000_v14 }
0x1761   :  { %v7046_v9 = vpop.xlane.xlu0 %7045 }
0x1762   :  { %v7113_v46 = vsub.f32 %v7081_v2, %v7097_v3  ;;  %v7080_v29 = vmul.f32 0.03125, %v7046_v9 }
0x1764   :  { %v7145_v62 = vadd.f32 1e-05, %v7113_v46  ;;  %v7112_v53 = vsub.f32 %v7080_v29, %v7096_v55 }
0x1766   :  { %9650 = vrsqrt.f32 %v7145_v62  ;;  %v7144_v58 = vadd.f32 1e-05, %v7112_v53 }
0x1768   :  { %9652 = vrsqrt.f32 %v7144_v58 }
0x1772   :  { %v6975_v10 = vpop.xlane.xlu1 %6974 }
0x1773   :  { %v9651_v42 = vpop.eup %9650  ;;  %v7003_v48 = vmul.f32 0.03125, %v6975_v10 }
0x1774   :  { %v7177_v11 = vmul.f32 %v9651_v42, %v7129_v34  ;;  %v6972_v51 = vpop.xlane.xlu0 %6971 }
0x1775   :  { %v9653_v37 = vpop.eup %9652  ;;  %v7002_v47 = vmul.f32 0.03125, %v6972_v51  ;;  %v7099_v61 = vmul.f32 %v7003_v48, %v7003_v48  ;;  %v7131_v2 = vsub.f32 %v12879_v33, %v7003_v48 }
0x1776   :  { %v7176_v13 = vmul.f32 %v9653_v37, %v7128_v23  ;;  %v7055_v57 = vpop.xlane.xlu1 %7054  ;;  %v7197_v45 = vmul.f32 %v12954_v20, %v7177_v11 }
0x1777   :  { %v7083_v52 = vmul.f32 0.03125, %v7055_v57  ;;  %v7098_v27 = vmul.f32 %v7002_v47, %v7002_v47  ;;  %v7130_v23 = vsub.f32 %v12883_v50, %v7002_v47 }
0x1778   :  { %v7196_v15 = vmul.f32 %v12954_v20, %v7176_v13  ;;  %v7052_v22 = vpop.xlane.xlu0 %7051  ;;  %v7217_v44 = vadd.f32 %v12960_v60, %v7197_v45 }
0x1779   :  { %v7115_v17 = vsub.f32 %v7083_v52, %v7099_v61  ;;  %v7082_v21 = vmul.f32 0.03125, %v7052_v22 }
0x177a   :  { %v7216_v39 = vadd.f32 %v12960_v60, %v7196_v15  ;;  %v6981_v7 = vpop.xlane.xlu1 %6980 }
0x177b   :  { %v7147_v43 = vadd.f32 1e-05, %v7115_v17  ;;  %v7114_v4 = vsub.f32 %v7082_v21, %v7098_v27  ;;  %v12989_v5 = vmul.f32 0.03125, %v6981_v7 }
0x177c   :  { %9105 = vmatprep.mubr.msk.f32.mxu1 %vm271_vm1, %v7216_v39  ;;  %v6978_v1 = vpop.xlane.xlu0 %6977 }
0x177d   :  { %9106 = vmatmul.mubr.msk.f32.gmra.mxu1 %vm271_vm1, %v7217_v44  ;;  %9654 = vrsqrt.f32 %v7147_v43  ;;  %v7146_v18 = vadd.f32 1e-05, %v7114_v4  ;;  %v12993_v0 = vmul.f32 0.03125, %v6978_v1  ;;  %v7101_v32 = vmul.f32 %v12989_v5, %v12989_v5 }
0x177e   :  { %v7061_v24 = vpop.xlane.xlu1 %7060  ;;  %v7133_v15 = vsub.f32 %v12896_v35, %v12989_v5 }
0x177f   :  { %9656 = vrsqrt.f32 %v7146_v18  ;;  %v7085_v12 = vmul.f32 0.03125, %v7061_v24  ;;  %v7100_v26 = vmul.f32 %v12993_v0, %v12993_v0  ;;  %v7132_v17 = vsub.f32 %v12901_v56, %v12993_v0 }
0x1780   :  { %v7058_v63 = vpop.xlane.xlu0 %7057 }
0x1781   :  { %v7117_v40 = vsub.f32 %v7085_v12, %v7101_v32  ;;  %v7084_v16 = vmul.f32 0.03125, %v7058_v63 }
0x1782   :  { %v6987_v41 = vpop.xlane.xlu1 %6986 }
0x1783   :  { %v7149_v59 = vadd.f32 1e-05, %v7117_v40  ;;  %v7116_v30 = vsub.f32 %v7084_v16, %v7100_v26  ;;  %v7007_v31 = vmul.f32 0.03125, %v6987_v41 }
0x1784   :  { %v6984_v54 = vpop.xlane.xlu0 %6983 }
0x1785   :  { %9658 = vrsqrt.f32 %v7149_v59  ;;  %v7148_v36 = vadd.f32 1e-05, %v7116_v30  ;;  %v7006_v49 = vmul.f32 0.03125, %v6984_v54  ;;  %v7103_v14 = vmul.f32 %v7007_v31, %v7007_v31 }
0x1786   :  { %v7067_v8 = vpop.xlane.xlu1 %7066  ;;  %v7135_v18 = vsub.f32 %v12914_v6, %v7007_v31 }
0x1787   :  { %9660 = vrsqrt.f32 %v7148_v36  ;;  %v7087_v28 = vmul.f32 0.03125, %v7067_v8  ;;  %v7102_v9 = vmul.f32 %v7006_v49, %v7006_v49  ;;  %v7134_v12 = vsub.f32 %v12919_v38, %v7006_v49 }
0x1788   :  { %v7064_v3 = vpop.xlane.xlu0 %7063 }
0x1789   :  { %v7119_v55 = vsub.f32 %v7087_v28, %v7103_v14  ;;  %v7086_v46 = vmul.f32 0.03125, %v7064_v3 }
0x178a   :  { %v9655_v29 = vpop.eup %9654  ;;  %v6993_v62 = vpop.xlane.xlu1 %6992 }
0x178b   :  { %v7151_v53 = vadd.f32 1e-05, %v7119_v55  ;;  %v7118_v58 = vsub.f32 %v7086_v46, %v7102_v9  ;;  %v7009_v34 = vmul.f32 0.03125, %v6993_v62  ;;  %v7179_v42 = vmul.f32 %v9655_v29, %v7131_v2 }
0x178c   :  { %v9657_v10 = vpop.eup %9656  ;;  %v6990_v11 = vpop.xlane.xlu0 %6989 }
0x178d   :  { %9662 = vrsqrt.f32 %v7151_v53  ;;  %v7150_v37 = vadd.f32 1e-05, %v7118_v58  ;;  %v7008_v51 = vmul.f32 0.03125, %v6990_v11  ;;  %v7178_v57 = vmul.f32 %v9657_v10, %v7130_v23 }
0x178e   :  { %v7073_v13 = vpop.xlane.xlu1 %7072  ;;  %v7105_v33 = vmul.f32 %v7009_v34, %v7009_v34  ;;  %v7199_v45 = vmul.f32 %v12954_v20, %v7179_v42  ;;  %v7137_v6 = vsub.f32 %v12932_v25, %v7009_v34 }
0x178f   :  { %9664 = vrsqrt.f32 %v7150_v37  ;;  %v7089_v48 = vmul.f32 0.03125, %v7073_v13  ;;  %v7198_v52 = vmul.f32 %v12954_v20, %v7178_v57  ;;  %v7104_v22 = vmul.f32 %v7008_v51, %v7008_v51 }
0x1790   :  { %v7070_v61 = vpop.xlane.xlu0 %7069  ;;  %v7219_v44 = vadd.f32 %v12960_v60, %v7199_v45  ;;  %v7136_v38 = vsub.f32 %v12937_v19, %v7008_v51  ;;  %v7861_v19 = vld [vmem:[%s13109_s8 + $0x2] ss:$0 sm:$0xff] }
0x1791   :  { %v7121_v27 = vsub.f32 %v7089_v48, %v7105_v33  ;;  %v7088_v50 = vmul.f32 0.03125, %v7070_v61  ;;  %v7218_v21 = vadd.f32 %v12960_v60, %v7198_v52 }
0x1792   :  { %v9659_v47 = vpop.eup %9658 }
0x1793   :  { %v7153_v39 = vadd.f32 1e-05, %v7121_v27  ;;  %v7120_v7 = vsub.f32 %v7088_v50, %v7104_v22  ;;  %v7181_v43 = vmul.f32 %v9659_v47, %v7133_v15  ;;  %9108 = vmatprep.mubr.msk.f32.mxu1 %vm271_vm1, %v7218_v21 }
0x1794   :  { %v9661_v4 = vpop.eup %9660  ;;  %9109 = vmatmul.mubr.msk.f32.gmra.mxu1 %vm271_vm1, %v7219_v44 }
0x1795   :  { %9666 = vrsqrt.f32 %v7153_v39  ;;  %v7152_v1 = vadd.f32 1e-05, %v7120_v7  ;;  %v7180_v35 = vmul.f32 %v9661_v4, %v7132_v17  ;;  %v7201_v5 = vmul.f32 %v12954_v20, %v7181_v43 }
0x1797   :  { %9668 = vrsqrt.f32 %v7152_v1  ;;  %v7200_v56 = vmul.f32 %v12954_v20, %v7180_v35  ;;  %v7221_v32 = vadd.f32 %v12960_v60, %v7201_v5 }
0x1799   :  { %v7220_v0 = vadd.f32 %v12960_v60, %v7200_v56 }
0x179a   :  { %v9663_v24 = vpop.eup %9662 }
0x179b   :  { %9111 = vmatprep.mubr.msk.f32.mxu1 %vm271_vm1, %v7220_v0  ;;  %v7183_v63 = vmul.f32 %v9663_v24, %v7135_v18 }
0x179c   :  { %v9665_v26 = vpop.eup %9664  ;;  %9112 = vmatmul.mubr.msk.f32.gmra.mxu1 %vm271_vm1, %v7221_v32 }
0x179d   :  { %v7182_v40 = vmul.f32 %v9665_v26, %v7134_v12  ;;  %v7203_v16 = vmul.f32 %v12954_v20, %v7183_v63 }
0x179f   :  { %v7202_v41 = vmul.f32 %v12954_v20, %v7182_v40  ;;  %v7223_v31 = vadd.f32 %v12960_v60, %v7203_v16 }
0x17a1   :  { %v7222_v59 = vadd.f32 %v12960_v60, %v7202_v41 }
0x17a2   :  { %v9667_v30 = vpop.eup %9666 }
0x17a3   :  { %9114 = vmatprep.mubr.msk.f32.mxu1 %vm271_vm1, %v7222_v59  ;;  %v7185_v54 = vmul.f32 %v9667_v30, %v7137_v6 }
0x17a4   :  { %v9669_v36 = vpop.eup %9668  ;;  %9115 = vmatmul.mubr.msk.f32.gmra.mxu1 %vm271_vm1, %v7223_v31 }
0x17a5   :  { %v7184_v49 = vmul.f32 %v9669_v36, %v7136_v38  ;;  %v7205_v8 = vmul.f32 %v12954_v20, %v7185_v54 }
0x17a7   :  { %v7204_v14 = vmul.f32 %v12954_v20, %v7184_v49  ;;  %v7225_v28 = vadd.f32 %v12960_v60, %v7205_v8 }
0x17a9   :  { %v7224_v25 = vadd.f32 %v12960_v60, %v7204_v14 }
0x17ab   :  { %9117 = vmatprep.mubr.msk.f32.mxu1 %vm271_vm1, %v7224_v25 }
0x17ac   :  { %9118 = vmatmul.mubr.msk.f32.gmra.mxu1 %vm271_vm1, %v7225_v28 }
0x1808   :  { %v9098_v3 = vpop.f32.mrf.mxu1 }
0x1809   :  { %v7354_v2 = vadd.f32 %v9098_v3, %v7861_v19 }
0x180a   :  { %v7348_v9 = vpop.f32.mrf.mxu1 }
0x180b   :  { %7428 = vst.msk [vmem:[%s13110_s10 + $0x8] sm:$0xff] %vm69_vm0, %v7354_v2  ;;  %v7349_v20 = vadd.f32 %v7861_v19, %v7348_v9 }
0x180d   :  { %7427 = vst.msk [vmem:[%s13110_s10] sm:$0xff] %vm69_vm0, %v7349_v20 }
0x1810   :  { %v9101_v60 = vpop.f32.mrf.mxu1 }
0x1811   :  { %v7364_v55 = vadd.f32 %v9101_v60, %v7861_v19 }
0x1812   :  { %v7358_v46 = vpop.f32.mrf.mxu1 }
0x1813   :  { %7430 = vst.msk [vmem:[%s13110_s10 + $0x18] sm:$0xff] %vm69_vm0, %v7364_v55  ;;  %v7359_v29 = vadd.f32 %v7861_v19, %v7358_v46 }
0x1815   :  { %7429 = vst.msk [vmem:[%s13110_s10 + $0x10] sm:$0xff] %vm69_vm0, %v7359_v29 }
0x1818   :  { %v9104_v62 = vpop.f32.mrf.mxu1 }
0x1819   :  { %v7374_v53 = vadd.f32 %v9104_v62, %v7861_v19 }
0x181a   :  { %v7368_v58 = vpop.f32.mrf.mxu1 }
0x181b   :  { %7432 = vst.msk [vmem:[%s13110_s10 + $0x28] sm:$0xff] %vm69_vm0, %v7374_v53  ;;  %v7369_v34 = vadd.f32 %v7861_v19, %v7368_v58 }
0x181d   :  { %7431 = vst.msk [vmem:[%s13110_s10 + $0x20] sm:$0xff] %vm69_vm0, %v7369_v34 }
0x183d   :  { %v9107_v42 = vpop.f32.mrf.mxu1 }
0x183e   :  { %v7384_v10 = vadd.f32 %v9107_v42, %v7861_v19 }
0x183f   :  { %v7378_v23 = vpop.f32.mrf.mxu1 }
0x1840   :  { %7434 = vst.msk [vmem:[%s13110_s10 + $0x38] sm:$0xff] %vm69_vm0, %v7384_v10  ;;  %v7379_v11 = vadd.f32 %v7861_v19, %v7378_v23 }
0x1842   :  { %7433 = vst.msk [vmem:[%s13110_s10 + $0x30] sm:$0xff] %vm69_vm0, %v7379_v11 }
0x1854   :  { %v9110_v37 = vpop.f32.mrf.mxu1 }
0x1855   :  { %v7394_v51 = vadd.f32 %v9110_v37, %v7861_v19 }
0x1856   :  { %v7388_v13 = vpop.f32.mrf.mxu1 }
0x1857   :  { %7436 = vst.msk [vmem:[%s13110_s10 + $0x48] sm:$0xff] %vm69_vm0, %v7394_v51  ;;  %v7389_v57 = vadd.f32 %v7861_v19, %v7388_v13 }
0x1859   :  { %7435 = vst.msk [vmem:[%s13110_s10 + $0x40] sm:$0xff] %vm69_vm0, %v7389_v57 }
0x185c   :  { %v9113_v33 = vpop.f32.mrf.mxu1 }
0x185d   :  { %v7404_v48 = vadd.f32 %v9113_v33, %v7861_v19 }
0x185e   :  { %v7398_v45 = vpop.f32.mrf.mxu1 }
0x185f   :  { %7438 = vst.msk [vmem:[%s13110_s10 + $0x58] sm:$0xff] %vm69_vm0, %v7404_v48  ;;  %v7399_v61 = vadd.f32 %v7861_v19, %v7398_v45 }
0x1861   :  { %7437 = vst.msk [vmem:[%s13110_s10 + $0x50] sm:$0xff] %vm69_vm0, %v7399_v61 }
0x1864   :  { %v9116_v52 = vpop.f32.mrf.mxu1 }
0x1865   :  { %v7414_v15 = vadd.f32 %v9116_v52, %v7861_v19 }
0x1866   :  { %v7408_v22 = vpop.f32.mrf.mxu1 }
0x1867   :  { %7440 = vst.msk [vmem:[%s13110_s10 + $0x68] sm:$0xff] %vm69_vm0, %v7414_v15  ;;  %v7409_v27 = vadd.f32 %v7861_v19, %v7408_v22 }
0x1869   :  { %7439 = vst.msk [vmem:[%s13110_s10 + $0x60] sm:$0xff] %vm69_vm0, %v7409_v27 }
0x186c   :  { %v9119_v50 = vpop.f32.mrf.mxu1 }
0x186d   :  { %v7424_v47 = vadd.f32 %v9119_v50, %v7861_v19 }
0x186e   :  { %v7418_v17 = vpop.f32.mrf.mxu1 }
0x186f   :  { %7442 = vst.msk [vmem:[%s13110_s10 + $0x78] sm:$0xff] %vm69_vm0, %v7424_v47  ;;  %v7419_v21 = vadd.f32 %v7861_v19, %v7418_v17 }
0x1871   :  { %7441 = vst.msk [vmem:[%s13110_s10 + $0x70] sm:$0xff] %vm69_vm0, %v7419_v21 }

</bundles_post_ra>
